<compile_context>
chip_gen: v6e
topology: v6e:2x2x1
jax: 0.10.0
libtpu: 0.0.40
codegen_flags: <defaults>
</compile_context>

<pallas_src>
import jax
import jax.numpy as jnp
from jax.experimental import pallas as pl
from jax.experimental.pallas import tpu as pltpu


def _round_up(x, m):
    return ((x + m - 1) // m) * m


def _largest_divisor(n, cap, multiple_of=1):
    t = min(cap, n)
    while t > 1:
        if n % t == 0 and t % multiple_of == 0:
            return t
        t -= 1
    return 1


def _vmem_limit_bytes():
    # Generation-aware scoped-VMEM budget (v5e/v6e: 128 MiB physical, v7x: 64 MiB).
    try:
        cap = int(pltpu.get_tpu_info().vmem_capacity_bytes)
        return min(100 * 1024 * 1024, int(cap * 0.8))
    except Exception:
        return 48 * 1024 * 1024


_VMEM_LIMIT = _vmem_limit_bytes()


# ----------------------------------------------------------------------------
# Kernel 1: ConvTranspose2d(k=2, s=2) + bias, with the pixel shuffle fused into
# the output layout.  Output HBM array is (B, H, 2, W, 2*Cmidp); reshaping it
# to NHWC (B, 2H, 2W, Cmidp) outside the kernel is free (row-major identical).
# ----------------------------------------------------------------------------
def _conv_transpose_kernel(x_ref, w_ref, b_ref, o_ref):
    # x_ref: (1, tr, W, Cinp)    w_ref: (2, Cinp, 2*Cmidp)   b_ref: (1, 2*Cmidp)
    # o_ref: (1, tr, 2, W, 2*Cmidp)     (dims: row, i, col, (j, c))
    tr, W, Cinp = x_ref.shape[1], x_ref.shape[2], x_ref.shape[3]
    x2d = x_ref[0].reshape(tr * W, Cinp)
    for i in range(2):  # output sub-row 2h + i
        res = jnp.dot(x2d, w_ref[i], preferred_element_type=jnp.float32)
        res = res + b_ref[...]
        o_ref[0, :, i] = res.reshape(tr, W, res.shape[-1]).astype(o_ref.dtype)


def conv_transpose2x2_nhwc(x, w, b, *, row_cap=16):
    """ConvTranspose2d(kernel=2, stride=2) in NHWC.

    x: (B, H, W, Cin);  w: torch layout (Cin, Cmid, 2, 2);  b: (Cmid,)
    Returns (B, 2H, 2W, Cmidp) with Cmidp = round_up(Cmid, 128); padded output
    channels are exactly zero.
    """
    B, H, W, Cin = x.shape
    Cmid = w.shape[1]
    Cinp = _round_up(Cin, 128)
    Cmidp = _round_up(Cmid, 128)

    budget_rows = max(1, (4 << 20) // max(1, W * Cinp * 4))
    tr = _largest_divisor(H, min(row_cap, budget_rows))
    nR = H // tr

    xp = jnp.pad(x, ((0, 0), (0, 0), (0, 0), (0, Cinp - Cin)))
    # weight -> (i, c_in, j, c_out) -> (2, Cinp, 2*Cmidp); columns ordered (j, c_out)
    wt = jnp.transpose(w, (2, 0, 3, 1))
    wt = jnp.pad(wt, ((0, 0), (0, Cinp - Cin), (0, 0), (0, Cmidp - Cmid)))
    wt = wt.reshape(2, Cinp, 2 * Cmidp)
    bt = jnp.tile(jnp.pad(b, (0, Cmidp - Cmid)), 2).reshape(1, 2 * Cmidp)

    out = pl.pallas_call(
        _conv_transpose_kernel,
        out_shape=jax.ShapeDtypeStruct((B, H, 2, W, 2 * Cmidp), jnp.float32),
        grid=(B, nR),
        in_specs=[
            pl.BlockSpec((1, tr, W, Cinp), lambda bb, r: (bb, r, 0, 0)),
            # NOTE: weight/bias index_maps are constant; pipeline_mode=pl.Buffered(1)
            # would halve their VMEM (kept default-buffered for compile safety).
            pl.BlockSpec((2, Cinp, 2 * Cmidp), lambda bb, r: (0, 0, 0)),
            pl.BlockSpec((1, 2 * Cmidp), lambda bb, r: (0, 0)),
        ],
        out_specs=pl.BlockSpec((1, tr, 2, W, 2 * Cmidp),
                               lambda bb, r: (bb, r, 0, 0, 0)),
        compiler_params=pltpu.CompilerParams(
            dimension_semantics=("parallel", "parallel"),
            vmem_limit_bytes=_VMEM_LIMIT,
        ),
    )(xp, wt, bt)
    # Free (metadata-only) reshape to NHWC.
    return out.reshape(B, 2 * H, 2 * W, Cmidp)


# ----------------------------------------------------------------------------
# Kernel 2: 3x3 conv (padding=1) + bias + ReLU over the *virtual concat* of
# n NHWC inputs, row-tiled with a 2-row halo BlockSpec per input.
# im2col is built once per tile; the first dot initializes the accumulator.
# ----------------------------------------------------------------------------
def _make_conv3x3_kernel(n_in):
    def kernel(*args):
        xm = [args[2 * k] for k in range(n_in)]          # (1, th, Wp, Cp_k)
        xh = [args[2 * k + 1] for k in range(n_in)]      # (1, 2,  Wp, Cp_k)
        ws = [args[2 * n_in + k] for k in range(n_in)]   # (3, 3*Cp_k, Coutp)
        b_ref = args[3 * n_in]                           # (1, Coutp)
        o_ref = args[3 * n_in + 1]                       # (1, th, Wc, Coutp)
        acc_ref = args[3 * n_in + 2]                     # (th*Wc, Coutp) f32

        th, Wc, Coutp = o_ref.shape[1], o_ref.shape[2], o_ref.shape[3]
        first = True
        for k in range(n_in):
            Cp = xm[k].shape[3]
            rows = jnp.concatenate([xm[k][0], xh[k][0]], axis=0)   # (th+2, Wp, Cp)
            # im2col over dw, built ONCE per tile (hoisted out of the dh loop).
            imcol = jnp.concatenate(
                [rows[:, dw:dw + Wc, :] for dw in range(3)], axis=-1
            )                                                       # (th+2, Wc, 3*Cp)
            for dh in range(3):
                patch = imcol[dh:dh + th].reshape(th * Wc, 3 * Cp)
                contrib = jnp.dot(patch, ws[k][dh],
                                  preferred_element_type=jnp.float32)
                if first:
                    acc_ref[...] = contrib          # no zeros_like init
                    first = False
                else:
                    acc_ref[...] += contrib

        out = jnp.maximum(acc_ref[...] + b_ref[...], 0.0)
        o_ref[0] = out.reshape(th, Wc, Coutp).astype(o_ref.dtype)

    return kernel


def conv3x3_relu_nhwc(xs, ws, b, *, th_cap=16):
    """3x3 'same' conv + bias + ReLU over the channel-concat of `xs` (NHWC).

    xs: list of (B, Hc, Wc, Cx_k) arrays (channels may be zero-padded past the
        real count); ws: list of HWIO weights (3, 3, Cin_k, Cout) matching the
        real channel split; b: (Cout,).
    Returns (B, Hc, Wc, Coutp), Coutp = round_up(Cout, 128); padded output
    channels are exactly zero (zero weights + zero bias -> ReLU(0)=0).
    """
    n = len(xs)
    B, Hc, Wc, _ = xs[0].shape
    assert Hc % 2 == 0, "output height of UpSample is always even"
    Cout = ws[0].shape[3]
    Coutp = _round_up(Cout, 128)
    Wp = Wc + 2

    xps, wps, Cps = [], [], []
    for x, w in zip(xs, ws):
        assert x.shape[:3] == (B, Hc, Wc)
        Cx, Cin = x.shape[3], w.shape[2]
        assert Cx >= Cin
        Cp = _round_up(Cx, 128)
        # Fused pad: 1-row / 1-col spatial halo + channel pad to lane-dense 128.
        xps.append(jnp.pad(x, ((0, 0), (1, 1), (1, 1), (0, Cp - Cx))))
        wp = jnp.pad(w, ((0, 0), (0, 0), (0, Cp - Cin), (0, Coutp - Cout)))
        wps.append(wp.reshape(3, 3 * Cp, Coutp))    # per-dh (dw, c) im2col layout
        Cps.append(Cp)
    bp = jnp.pad(b, (0, Coutp - Cout)).reshape(1, Coutp)

    # Row tile: even divisor of Hc, capped by a VMEM budget for the input tiles.
    budget_rows = max(2, (4 << 20) // max(1, Wp * sum(Cps) * 4))
    th = _largest_divisor(Hc, min(th_cap, budget_rows), multiple_of=2)
    assert th % 2 == 0 and Hc % th == 0
    nH = Hc // th

    in_specs, call_args = [], []
    for xp, Cp in zip(xps, Cps):
        in_specs.append(pl.BlockSpec((1, th, Wp, Cp), lambda bb, i: (bb, i, 0, 0)))
        # 2-row halo just below the main rows (block size 2 along H).
        in_specs.append(pl.BlockSpec(
            (1, 2, Wp, Cp), lambda bb, i, _t=th: (bb, (i + 1) * (_t // 2), 0, 0)))
        call_args += [xp, xp]
    for wp, Cp in zip(wps, Cps):
        in_specs.append(pl.BlockSpec((3, 3 * Cp, Coutp), lambda bb, i: (0, 0, 0)))
        call_args.append(wp)
    in_specs.append(pl.BlockSpec((1, Coutp), lambda bb, i: (0, 0)))
    call_args.append(bp)

    out = pl.pallas_call(
        _make_conv3x3_kernel(n),
        out_shape=jax.ShapeDtypeStruct((B, Hc, Wc, Coutp), jnp.float32),
        grid=(B, nH),
        in_specs=in_specs,
        out_specs=pl.BlockSpec((1, th, Wc, Coutp), lambda bb, i: (bb, i, 0, 0)),
        scratch_shapes=[pltpu.VMEM((th * Wc, Coutp), jnp.float32)],
        compiler_params=pltpu.CompilerParams(
            dimension_semantics=("parallel", "parallel"),
            vmem_limit_bytes=_VMEM_LIMIT,
        ),
    )(*call_args)
    return out


# ----------------------------------------------------------------------------
# Params + forward
# ----------------------------------------------------------------------------
def init_upsample_params(key, in_channels, out_channels):
    cmid = in_channels // 2
    ks = jax.random.split(key, 6)
    scale = 0.1
    return {
        # ConvTranspose2d weight: (Cin, Cmid, 2, 2), bias: (Cmid,)
        "up_w": scale * jax.random.normal(ks[0], (in_channels, cmid, 2, 2), jnp.float32),
        "up_b": scale * jax.random.normal(ks[1], (cmid,), jnp.float32),
        # Conv2d #1: (Cout, Cin, 3, 3), bias (Cout,)
        "c1_w": scale * jax.random.normal(ks[2], (out_channels, in_channels, 3, 3), jnp.float32),
        "c1_b": scale * jax.random.normal(ks[3], (out_channels,), jnp.float32),
        # Conv2d #2: (Cout, Cout, 3, 3), bias (Cout,)
        "c2_w": scale * jax.random.normal(ks[4], (out_channels, out_channels, 3, 3), jnp.float32),
        "c2_b": scale * jax.random.normal(ks[5], (out_channels,), jnp.float32),
    }


@jax.jit
def upsample_forward(params, x1_nchw, x2_nchw):
    # x1_nchw: (B, Cin, H, W)    x2_nchw: (B, Cin//2, 2H, 2W)
    B, Cin, H, W = x1_nchw.shape
    Cmid = Cin // 2
    Cout = params["c1_w"].shape[0]

    x1 = jnp.transpose(x1_nchw, (0, 2, 3, 1))     # (B, H, W, Cin)
    x2 = jnp.transpose(x2_nchw, (0, 2, 3, 1))     # (B, 2H, 2W, Cmid)

    # ConvTranspose2d(k=2, s=2) with the pixel shuffle fused into the kernel's
    # output layout; `up` hits HBM exactly once, already NHWC & channel-padded.
    up = conv_transpose2x2_nhwc(x1, params["up_w"], params["up_b"])   # (B,2H,2W,Cmidp)

    # Fused concat + first conv: cat([up, x2], channel) is never materialized;
    # c1_w is split along input channels (up channels first, matching torch.cat).
    c1_w = jnp.transpose(params["c1_w"], (2, 3, 1, 0))                # (3,3,Cin,Cout)
    w1a = c1_w[:, :, :Cmid, :]
    w1b = c1_w[:, :, Cmid:, :]
    y = conv3x3_relu_nhwc([up, x2], [w1a, w1b], params["c1_b"])       # (B,2H,2W,Coutp)

    c2_w = jnp.transpose(params["c2_w"], (2, 3, 1, 0))                # (3,3,Cout,Cout)
    y = conv3x3_relu_nhwc([y], [c2_w], params["c2_b"])                # (B,2H,2W,Coutp)
    y = y[..., :Cout]

    return jnp.transpose(y, (0, 3, 1, 2))                             # NCHW


# ----------------------------------------------------------------------------
# Pure-jnp reference (correctness check)
# ----------------------------------------------------------------------------
def upsample_reference(params, x1_nchw, x2_nchw):
    B, Cin, H, W = x1_nchw.shape
    Cmid = Cin // 2
    x1 = jnp.transpose(x1_nchw, (0, 2, 3, 1))
    x2 = jnp.transpose(x2_nchw, (0, 2, 3, 1))

    # ConvTranspose2d(k=2, s=2):
    # out[b, 2h+i, 2w+j, o] = sum_c x1[b,h,w,c] * W[c,o,i,j] + bias[o]
    up = jnp.einsum("bhwc,coij->bhiwjo", x1, params["up_w"])
    up = up.reshape(B, 2 * H, 2 * W, Cmid) + params["up_b"]

    x = jnp.concatenate([up, x2], axis=-1)

    def conv3x3(x, w, b):
        xp = jnp.pad(x, ((0, 0), (1, 1), (1, 1), (0, 0)))
        Hh, Ww = x.shape[1], x.shape[2]
        out = 0.0
        for dh in range(3):
            for dw in range(3):
                out = out + jnp.einsum(
                    "bhwc,oc->bhwo",
                    xp[:, dh:dh + Hh, dw:dw + Ww, :], w[:, :, dh, dw])
        return jnp.maximum(out + b, 0.0)

    y = conv3x3(x, params["c1_w"], params["c1_b"])
    y = conv3x3(y, params["c2_w"], params["c2_b"])
    return jnp.transpose(y, (0, 3, 1, 2))


if __name__ == "__main__":
    key = jax.random.PRNGKey(0)
    k_p, k_x1, k_x2 = jax.random.split(key, 3)

    B, Cin, Cout = 2, 4, 4
    H = W = 8                      # x1 spatial; x2 is 2x that
    params = init_upsample_params(k_p, Cin, Cout)

    x1 = jax.random.normal(k_x1, (B, Cin, H, W), jnp.float32)
    x2 = jax.random.normal(k_x2, (B, Cin // 2, 2 * H, 2 * W), jnp.float32)

    out = jax.block_until_ready(upsample_forward(params, x1, x2))
    ref = upsample_reference(params, x1, x2)

    assert out.shape == (B, Cout, 2 * H, 2 * W), out.shape
    max_err = float(jnp.max(jnp.abs(out - ref)))
    assert jnp.allclose(out, ref, atol=2e-4, rtol=2e-4), max_err

    print("KERNEL_OK")
</pallas_src>

<mosaic_0001>
module attributes {stable_mosaic.version = 11 : i64} {
  func.func @_conv_transpose_kernel(%arg0: i32, %arg1: i32, %arg2: memref<1x8x8x128xf32, #tpu.memory_space<vmem>>, %arg3: memref<2x128x256xf32, #tpu.memory_space<vmem>>, %arg4: memref<1x256xf32, #tpu.memory_space<vmem>>, %arg5: memref<1x8x2x8x256xf32, #tpu.memory_space<vmem>>) attributes {dimension_semantics = [#tpu.dimension_semantics<parallel>, #tpu.dimension_semantics<parallel>], iteration_bounds = array<i64: 2, 1>, scalar_prefetch = 0 : i64, scratch_operands = 0 : i64, tpu.core_type = #tpu.core_type<tc>, window_params = [{transform_indices = @transform_0, window_bounds = array<i64: 1, 8, 8, 128>}, {pipeline_mode = #tpu.pipeline_mode<synchronous>, transform_indices = @transform_1, window_bounds = array<i64: 2, 128, 256>}, {pipeline_mode = #tpu.pipeline_mode<synchronous>, transform_indices = @transform_2, window_bounds = array<i64: 1, 256>}, {transform_indices = @transform_3, window_bounds = array<i64: 1, 8, 2, 8, 256>}]} {
    %c0 = arith.constant 0 : index
    %c0_0 = arith.constant 0 : index
    %c0_1 = arith.constant 0 : index
    %c0_2 = arith.constant 0 : index
    %0 = vector.load %arg2[%c0, %c0_0, %c0_1, %c0_2] : memref<1x8x8x128xf32, #tpu.memory_space<vmem>>, vector<1x8x8x128xf32>
    %1 = vector.shape_cast %0 : vector<1x8x8x128xf32> to vector<8x8x128xf32>
    %2 = vector.shape_cast %1 : vector<8x8x128xf32> to vector<64x128xf32>
    %c0_3 = arith.constant 0 : index
    %c0_4 = arith.constant 0 : index
    %c0_5 = arith.constant 0 : index
    %3 = vector.load %arg3[%c0_3, %c0_4, %c0_5] : memref<2x128x256xf32, #tpu.memory_space<vmem>>, vector<1x128x256xf32>
    %4 = vector.shape_cast %3 : vector<1x128x256xf32> to vector<128x256xf32>
    %cst = arith.constant dense<0.000000e+00> : vector<64x256xf32>
    %5 = tpu.matmul %2, %4, %cst {dimension_numbers = #tpu.dot_dimension_numbers<[1], [0], [0], [1], [0, 0, 1, 1], [], []>} : vector<64x128xf32>, vector<128x256xf32>, vector<64x256xf32> -> vector<64x256xf32>
    %c0_6 = arith.constant 0 : index
    %c0_7 = arith.constant 0 : index
    %6 = vector.load %arg4[%c0_6, %c0_7] : memref<1x256xf32, #tpu.memory_space<vmem>>, vector<1x256xf32>
    %7 = vector.broadcast %6 : vector<1x256xf32> to vector<64x256xf32>
    %8 = arith.addf %5, %7 : vector<64x256xf32>
    %9 = vector.shape_cast %8 : vector<64x256xf32> to vector<8x8x256xf32>
    %c0_8 = arith.constant 0 : index
    %c0_9 = arith.constant 0 : index
    %c0_10 = arith.constant 0 : index
    %c0_11 = arith.constant 0 : index
    %c0_12 = arith.constant 0 : index
    %10 = vector.load %arg5[%c0_8, %c0_9, %c0_10, %c0_11, %c0_12] : memref<1x8x2x8x256xf32, #tpu.memory_space<vmem>>, vector<1x8x1x8x256xf32>
    %11 = vector.shape_cast %10 : vector<1x8x1x8x256xf32> to vector<8x8x256xf32>
    %12 = vector.shape_cast %9 : vector<8x8x256xf32> to vector<1x8x1x8x256xf32>
    tpu.vector_store %arg5[%c0_8, %c0_9, %c0_10, %c0_11, %c0_12], %12 {strides = array<i32>} : memref<1x8x2x8x256xf32, #tpu.memory_space<vmem>>, vector<1x8x1x8x256xf32>,
    %c1 = arith.constant 1 : index
    %c0_13 = arith.constant 0 : index
    %c0_14 = arith.constant 0 : index
    %13 = vector.load %arg3[%c1, %c0_13, %c0_14] : memref<2x128x256xf32, #tpu.memory_space<vmem>>, vector<1x128x256xf32>
    %14 = vector.shape_cast %13 : vector<1x128x256xf32> to vector<128x256xf32>
    %cst_15 = arith.constant dense<0.000000e+00> : vector<64x256xf32>
    %15 = tpu.matmul %2, %14, %cst_15 {dimension_numbers = #tpu.dot_dimension_numbers<[1], [0], [0], [1], [0, 0, 1, 1], [], []>} : vector<64x128xf32>, vector<128x256xf32>, vector<64x256xf32> -> vector<64x256xf32>
    %c0_16 = arith.constant 0 : index
    %c0_17 = arith.constant 0 : index
    %16 = vector.load %arg4[%c0_16, %c0_17] : memref<1x256xf32, #tpu.memory_space<vmem>>, vector<1x256xf32>
    %17 = vector.broadcast %16 : vector<1x256xf32> to vector<64x256xf32>
    %18 = arith.addf %15, %17 : vector<64x256xf32>
    %19 = vector.shape_cast %18 : vector<64x256xf32> to vector<8x8x256xf32>
    %c0_18 = arith.constant 0 : index
    %c0_19 = arith.constant 0 : index
    %c1_20 = arith.constant 1 : index
    %c0_21 = arith.constant 0 : index
    %c0_22 = arith.constant 0 : index
    %20 = vector.load %arg5[%c0_18, %c0_19, %c1_20, %c0_21, %c0_22] : memref<1x8x2x8x256xf32, #tpu.memory_space<vmem>>, vector<1x8x1x8x256xf32>
    %21 = vector.shape_cast %20 : vector<1x8x1x8x256xf32> to vector<8x8x256xf32>
    %22 = vector.shape_cast %19 : vector<8x8x256xf32> to vector<1x8x1x8x256xf32>
    tpu.vector_store %arg5[%c0_18, %c0_19, %c1_20, %c0_21, %c0_22], %22 {strides = array<i32>} : memref<1x8x2x8x256xf32, #tpu.memory_space<vmem>>, vector<1x8x1x8x256xf32>,
    return
  }
  func.func @transform_0(%arg0: i32, %arg1: i32) -> (i32, i32, i32, i32) {
    %c0_i32 = arith.constant 0 : i32
    %c0_i32_0 = arith.constant 0 : i32
    %c0_i32_1 = arith.constant 0 : i32
    return %arg0, %arg1, %c0_i32, %c0_i32_0 : i32, i32, i32, i32
  }
  func.func @transform_1(%arg0: i32, %arg1: i32) -> (i32, i32, i32) {
    %c0_i32 = arith.constant 0 : i32
    %c0_i32_0 = arith.constant 0 : i32
    %c0_i32_1 = arith.constant 0 : i32
    %c0_i32_2 = arith.constant 0 : i32
    return %c0_i32, %c0_i32_0, %c0_i32_1 : i32, i32, i32
  }
  func.func @transform_2(%arg0: i32, %arg1: i32) -> (i32, i32) {
    %c0_i32 = arith.constant 0 : i32
    %c0_i32_0 = arith.constant 0 : i32
    %c0_i32_1 = arith.constant 0 : i32
    return %c0_i32, %c0_i32_0 : i32, i32
  }
  func.func @transform_3(%arg0: i32, %arg1: i32) -> (i32, i32, i32, i32, i32) {
    %c0_i32 = arith.constant 0 : i32
    %c0_i32_0 = arith.constant 0 : i32
    %c0_i32_1 = arith.constant 0 : i32
    %c0_i32_2 = arith.constant 0 : i32
    return %arg0, %arg1, %c0_i32, %c0_i32_0, %c0_i32_1 : i32, i32, i32, i32, i32
  }
}

module attributes {stable_mosaic.version = 11 : i64} {
  func.func @kernel(%arg0: i32, %arg1: i32, %arg2: memref<1x16x18x128xf32, #tpu.memory_space<vmem>>, %arg3: memref<1x2x18x128xf32, #tpu.memory_space<vmem>>, %arg4: memref<1x16x18x128xf32, #tpu.memory_space<vmem>>, %arg5: memref<1x2x18x128xf32, #tpu.memory_space<vmem>>, %arg6: memref<3x384x128xf32, #tpu.memory_space<vmem>>, %arg7: memref<3x384x128xf32, #tpu.memory_space<vmem>>, %arg8: memref<1x128xf32, #tpu.memory_space<vmem>>, %arg9: memref<1x16x16x128xf32, #tpu.memory_space<vmem>>, %arg10: memref<256x128xf32, #tpu.memory_space<vmem>>) attributes {dimension_semantics = [#tpu.dimension_semantics<parallel>, #tpu.dimension_semantics<parallel>], iteration_bounds = array<i64: 2, 1>, scalar_prefetch = 0 : i64, scratch_operands = 1 : i64, tpu.core_type = #tpu.core_type<tc>, window_params = [{transform_indices = @transform_0, window_bounds = array<i64: 1, 16, 18, 128>}, {transform_indices = @transform_1, window_bounds = array<i64: 1, 2, 18, 128>}, {transform_indices = @transform_2, window_bounds = array<i64: 1, 16, 18, 128>}, {transform_indices = @transform_3, window_bounds = array<i64: 1, 2, 18, 128>}, {pipeline_mode = #tpu.pipeline_mode<synchronous>, transform_indices = @transform_4, window_bounds = array<i64: 3, 384, 128>}, {pipeline_mode = #tpu.pipeline_mode<synchronous>, transform_indices = @transform_5, window_bounds = array<i64: 3, 384, 128>}, {pipeline_mode = #tpu.pipeline_mode<synchronous>, transform_indices = @transform_6, window_bounds = array<i64: 1, 128>}, {transform_indices = @transform_7, window_bounds = array<i64: 1, 16, 16, 128>}]} {
    %c0 = arith.constant 0 : index
    %c0_0 = arith.constant 0 : index
    %c0_1 = arith.constant 0 : index
    %c0_2 = arith.constant 0 : index
    %0 = vector.load %arg2[%c0, %c0_0, %c0_1, %c0_2] : memref<1x16x18x128xf32, #tpu.memory_space<vmem>>, vector<1x16x18x128xf32>
    %1 = vector.shape_cast %0 : vector<1x16x18x128xf32> to vector<16x18x128xf32>
    %c0_3 = arith.constant 0 : index
    %c0_4 = arith.constant 0 : index
    %c0_5 = arith.constant 0 : index
    %c0_6 = arith.constant 0 : index
    %2 = vector.load %arg3[%c0_3, %c0_4, %c0_5, %c0_6] : memref<1x2x18x128xf32, #tpu.memory_space<vmem>>, vector<1x2x18x128xf32>
    %3 = vector.shape_cast %2 : vector<1x2x18x128xf32> to vector<2x18x128xf32>
    %4 = tpu.concatenate %1, %3 in 0 : vector<16x18x128xf32>, vector<2x18x128xf32> -> vector<18x18x128xf32>
    %5 = vector.extract_strided_slice %4 {offsets = [0, 0, 0], sizes = [18, 16, 128], strides = [1, 1, 1]} : vector<18x18x128xf32> to vector<18x16x128xf32>
    %6 = vector.extract_strided_slice %4 {offsets = [0, 1, 0], sizes = [18, 16, 128], strides = [1, 1, 1]} : vector<18x18x128xf32> to vector<18x16x128xf32>
    %7 = vector.extract_strided_slice %4 {offsets = [0, 2, 0], sizes = [18, 16, 128], strides = [1, 1, 1]} : vector<18x18x128xf32> to vector<18x16x128xf32>
    %8 = tpu.concatenate %5, %6, %7 in 2 : vector<18x16x128xf32>, vector<18x16x128xf32>, vector<18x16x128xf32> -> vector<18x16x384xf32>
    %9 = vector.extract_strided_slice %8 {offsets = [0, 0, 0], sizes = [16, 16, 384], strides = [1, 1, 1]} : vector<18x16x384xf32> to vector<16x16x384xf32>
    %10 = vector.shape_cast %9 : vector<16x16x384xf32> to vector<256x384xf32>
    %c0_7 = arith.constant 0 : index
    %c0_8 = arith.constant 0 : index
    %c0_9 = arith.constant 0 : index
    %11 = vector.load %arg6[%c0_7, %c0_8, %c0_9] : memref<3x384x128xf32, #tpu.memory_space<vmem>>, vector<1x384x128xf32>
    %12 = vector.shape_cast %11 : vector<1x384x128xf32> to vector<384x128xf32>
    %cst = arith.constant dense<0.000000e+00> : vector<256x128xf32>
    %13 = tpu.matmul %10, %12, %cst {dimension_numbers = #tpu.dot_dimension_numbers<[1], [0], [0], [1], [0, 0, 1, 1], [], []>} : vector<256x384xf32>, vector<384x128xf32>, vector<256x128xf32> -> vector<256x128xf32>
    %c0_10 = arith.constant 0 : index
    %c0_11 = arith.constant 0 : index
    %14 = vector.load %arg10[%c0_10, %c0_11] : memref<256x128xf32, #tpu.memory_space<vmem>>, vector<256x128xf32>
    tpu.vector_store %arg10[%c0_10, %c0_11], %13 {strides = array<i32>} : memref<256x128xf32, #tpu.memory_space<vmem>>, vector<256x128xf32>,
    %15 = vector.extract_strided_slice %8 {offsets = [1, 0, 0], sizes = [16, 16, 384], strides = [1, 1, 1]} : vector<18x16x384xf32> to vector<16x16x384xf32>
    %16 = vector.shape_cast %15 : vector<16x16x384xf32> to vector<256x384xf32>
    %c1 = arith.constant 1 : index
    %c0_12 = arith.constant 0 : index
    %c0_13 = arith.constant 0 : index
    %17 = vector.load %arg6[%c1, %c0_12, %c0_13] : memref<3x384x128xf32, #tpu.memory_space<vmem>>, vector<1x384x128xf32>
    %18 = vector.shape_cast %17 : vector<1x384x128xf32> to vector<384x128xf32>
    %cst_14 = arith.constant dense<0.000000e+00> : vector<256x128xf32>
    %19 = tpu.matmul %16, %18, %cst_14 {dimension_numbers = #tpu.dot_dimension_numbers<[1], [0], [0], [1], [0, 0, 1, 1], [], []>} : vector<256x384xf32>, vector<384x128xf32>, vector<256x128xf32> -> vector<256x128xf32>
    %c0_15 = arith.constant 0 : index
    %c0_16 = arith.constant 0 : index
    %20 = vector.load %arg10[%c0_15, %c0_16] : memref<256x128xf32, #tpu.memory_space<vmem>>, vector<256x128xf32>
    %21 = arith.addf %20, %19 : vector<256x128xf32>
    %c0_17 = arith.constant 0 : index
    %c0_18 = arith.constant 0 : index
    %22 = vector.load %arg10[%c0_17, %c0_18] : memref<256x128xf32, #tpu.memory_space<vmem>>, vector<256x128xf32>
    tpu.vector_store %arg10[%c0_17, %c0_18], %21 {strides = array<i32>} : memref<256x128xf32, #tpu.memory_space<vmem>>, vector<256x128xf32>,
    %23 = vector.extract_strided_slice %8 {offsets = [2, 0, 0], sizes = [16, 16, 384], strides = [1, 1, 1]} : vector<18x16x384xf32> to vector<16x16x384xf32>
    %24 = vector.shape_cast %23 : vector<16x16x384xf32> to vector<256x384xf32>
    %c2 = arith.constant 2 : index
    %c0_19 = arith.constant 0 : index
    %c0_20 = arith.constant 0 : index
    %25 = vector.load %arg6[%c2, %c0_19, %c0_20] : memref<3x384x128xf32, #tpu.memory_space<vmem>>, vector<1x384x128xf32>
    %26 = vector.shape_cast %25 : vector<1x384x128xf32> to vector<384x128xf32>
    %cst_21 = arith.constant dense<0.000000e+00> : vector<256x128xf32>
    %27 = tpu.matmul %24, %26, %cst_21 {dimension_numbers = #tpu.dot_dimension_numbers<[1], [0], [0], [1], [0, 0, 1, 1], [], []>} : vector<256x384xf32>, vector<384x128xf32>, vector<256x128xf32> -> vector<256x128xf32>
    %c0_22 = arith.constant 0 : index
    %c0_23 = arith.constant 0 : index
    %28 = vector.load %arg10[%c0_22, %c0_23] : memref<256x128xf32, #tpu.memory_space<vmem>>, vector<256x128xf32>
    %29 = arith.addf %28, %27 : vector<256x128xf32>
    %c0_24 = arith.constant 0 : index
    %c0_25 = arith.constant 0 : index
    %30 = vector.load %arg10[%c0_24, %c0_25] : memref<256x128xf32, #tpu.memory_space<vmem>>, vector<256x128xf32>
    tpu.vector_store %arg10[%c0_24, %c0_25], %29 {strides = array<i32>} : memref<256x128xf32, #tpu.memory_space<vmem>>, vector<256x128xf32>,
    %c0_26 = arith.constant 0 : index
    %c0_27 = arith.constant 0 : index
    %c0_28 = arith.constant 0 : index
    %c0_29 = arith.constant 0 : index
    %31 = vector.load %arg4[%c0_26, %c0_27, %c0_28, %c0_29] : memref<1x16x18x128xf32, #tpu.memory_space<vmem>>, vector<1x16x18x128xf32>
    %32 = vector.shape_cast %31 : vector<1x16x18x128xf32> to vector<16x18x128xf32>
    %c0_30 = arith.constant 0 : index
    %c0_31 = arith.constant 0 : index
    %c0_32 = arith.constant 0 : index
    %c0_33 = arith.constant 0 : index
    %33 = vector.load %arg5[%c0_30, %c0_31, %c0_32, %c0_33] : memref<1x2x18x128xf32, #tpu.memory_space<vmem>>, vector<1x2x18x128xf32>
    %34 = vector.shape_cast %33 : vector<1x2x18x128xf32> to vector<2x18x128xf32>
    %35 = tpu.concatenate %32, %34 in 0 : vector<16x18x128xf32>, vector<2x18x128xf32> -> vector<18x18x128xf32>
    %36 = vector.extract_strided_slice %35 {offsets = [0, 0, 0], sizes = [18, 16, 128], strides = [1, 1, 1]} : vector<18x18x128xf32> to vector<18x16x128xf32>
    %37 = vector.extract_strided_slice %35 {offsets = [0, 1, 0], sizes = [18, 16, 128], strides = [1, 1, 1]} : vector<18x18x128xf32> to vector<18x16x128xf32>
    %38 = vector.extract_strided_slice %35 {offsets = [0, 2, 0], sizes = [18, 16, 128], strides = [1, 1, 1]} : vector<18x18x128xf32> to vector<18x16x128xf32>
    %39 = tpu.concatenate %36, %37, %38 in 2 : vector<18x16x128xf32>, vector<18x16x128xf32>, vector<18x16x128xf32> -> vector<18x16x384xf32>
    %40 = vector.extract_strided_slice %39 {offsets = [0, 0, 0], sizes = [16, 16, 384], strides = [1, 1, 1]} : vector<18x16x384xf32> to vector<16x16x384xf32>
    %41 = vector.shape_cast %40 : vector<16x16x384xf32> to vector<256x384xf32>
    %c0_34 = arith.constant 0 : index
    %c0_35 = arith.constant 0 : index
    %c0_36 = arith.constant 0 : index
    %42 = vector.load %arg7[%c0_34, %c0_35, %c0_36] : memref<3x384x128xf32, #tpu.memory_space<vmem>>, vector<1x384x128xf32>
    %43 = vector.shape_cast %42 : vector<1x384x128xf32> to vector<384x128xf32>
    %cst_37 = arith.constant dense<0.000000e+00> : vector<256x128xf32>
    %44 = tpu.matmul %41, %43, %cst_37 {dimension_numbers = #tpu.dot_dimension_numbers<[1], [0], [0], [1], [0, 0, 1, 1], [], []>} : vector<256x384xf32>, vector<384x128xf32>, vector<256x128xf32> -> vector<256x128xf32>
    %c0_38 = arith.constant 0 : index
    %c0_39 = arith.constant 0 : index
    %45 = vector.load %arg10[%c0_38, %c0_39] : memref<256x128xf32, #tpu.memory_space<vmem>>, vector<256x128xf32>
    %46 = arith.addf %45, %44 : vector<256x128xf32>
    %c0_40 = arith.constant 0 : index
    %c0_41 = arith.constant 0 : index
    %47 = vector.load %arg10[%c0_40, %c0_41] : memref<256x128xf32, #tpu.memory_space<vmem>>, vector<256x128xf32>
    tpu.vector_store %arg10[%c0_40, %c0_41], %46 {strides = array<i32>} : memref<256x128xf32, #tpu.memory_space<vmem>>, vector<256x128xf32>,
    %48 = vector.extract_strided_slice %39 {offsets = [1, 0, 0], sizes = [16, 16, 384], strides = [1, 1, 1]} : vector<18x16x384xf32> to vector<16x16x384xf32>
    %49 = vector.shape_cast %48 : vector<16x16x384xf32> to vector<256x384xf32>
    %c1_42 = arith.constant 1 : index
    %c0_43 = arith.constant 0 : index
    %c0_44 = arith.constant 0 : index
    %50 = vector.load %arg7[%c1_42, %c0_43, %c0_44] : memref<3x384x128xf32, #tpu.memory_space<vmem>>, vector<1x384x128xf32>
    %51 = vector.shape_cast %50 : vector<1x384x128xf32> to vector<384x128xf32>
    %cst_45 = arith.constant dense<0.000000e+00> : vector<256x128xf32>
    %52 = tpu.matmul %49, %51, %cst_45 {dimension_numbers = #tpu.dot_dimension_numbers<[1], [0], [0], [1], [0, 0, 1, 1], [], []>} : vector<256x384xf32>, vector<384x128xf32>, vector<256x128xf32> -> vector<256x128xf32>
    %c0_46 = arith.constant 0 : index
    %c0_47 = arith.constant 0 : index
    %53 = vector.load %arg10[%c0_46, %c0_47] : memref<256x128xf32, #tpu.memory_space<vmem>>, vector<256x128xf32>
    %54 = arith.addf %53, %52 : vector<256x128xf32>
    %c0_48 = arith.constant 0 : index
    %c0_49 = arith.constant 0 : index
    %55 = vector.load %arg10[%c0_48, %c0_49] : memref<256x128xf32, #tpu.memory_space<vmem>>, vector<256x128xf32>
    tpu.vector_store %arg10[%c0_48, %c0_49], %54 {strides = array<i32>} : memref<256x128xf32, #tpu.memory_space<vmem>>, vector<256x128xf32>,
    %56 = vector.extract_strided_slice %39 {offsets = [2, 0, 0], sizes = [16, 16, 384], strides = [1, 1, 1]} : vector<18x16x384xf32> to vector<16x16x384xf32>
    %57 = vector.shape_cast %56 : vector<16x16x384xf32> to vector<256x384xf32>
    %c2_50 = arith.constant 2 : index
    %c0_51 = arith.constant 0 : index
    %c0_52 = arith.constant 0 : index
    %58 = vector.load %arg7[%c2_50, %c0_51, %c0_52] : memref<3x384x128xf32, #tpu.memory_space<vmem>>, vector<1x384x128xf32>
    %59 = vector.shape_cast %58 : vector<1x384x128xf32> to vector<384x128xf32>
    %cst_53 = arith.constant dense<0.000000e+00> : vector<256x128xf32>
    %60 = tpu.matmul %57, %59, %cst_53 {dimension_numbers = #tpu.dot_dimension_numbers<[1], [0], [0], [1], [0, 0, 1, 1], [], []>} : vector<256x384xf32>, vector<384x128xf32>, vector<256x128xf32> -> vector<256x128xf32>
    %c0_54 = arith.constant 0 : index
    %c0_55 = arith.constant 0 : index
    %61 = vector.load %arg10[%c0_54, %c0_55] : memref<256x128xf32, #tpu.memory_space<vmem>>, vector<256x128xf32>
    %62 = arith.addf %61, %60 : vector<256x128xf32>
    %c0_56 = arith.constant 0 : index
    %c0_57 = arith.constant 0 : index
    %63 = vector.load %arg10[%c0_56, %c0_57] : memref<256x128xf32, #tpu.memory_space<vmem>>, vector<256x128xf32>
    tpu.vector_store %arg10[%c0_56, %c0_57], %62 {strides = array<i32>} : memref<256x128xf32, #tpu.memory_space<vmem>>, vector<256x128xf32>,
    %c0_58 = arith.constant 0 : index
    %c0_59 = arith.constant 0 : index
    %64 = vector.load %arg10[%c0_58, %c0_59] : memref<256x128xf32, #tpu.memory_space<vmem>>, vector<256x128xf32>
    %c0_60 = arith.constant 0 : index
    %c0_61 = arith.constant 0 : index
    %65 = vector.load %arg8[%c0_60, %c0_61] : memref<1x128xf32, #tpu.memory_space<vmem>>, vector<1x128xf32>
    %66 = vector.broadcast %65 : vector<1x128xf32> to vector<256x128xf32>
    %67 = arith.addf %64, %66 : vector<256x128xf32>
    %cst_62 = arith.constant 0.000000e+00 : f32
    %68 = vector.broadcast %cst_62 : f32 to vector<256x128xf32>
    %69 = arith.maximumf %67, %68 : vector<256x128xf32>
    %70 = vector.shape_cast %69 : vector<256x128xf32> to vector<16x16x128xf32>
    %c0_63 = arith.constant 0 : index
    %c0_64 = arith.constant 0 : index
    %c0_65 = arith.constant 0 : index
    %c0_66 = arith.constant 0 : index
    %71 = vector.load %arg9[%c0_63, %c0_64, %c0_65, %c0_66] : memref<1x16x16x128xf32, #tpu.memory_space<vmem>>, vector<1x16x16x128xf32>
    %72 = vector.shape_cast %71 : vector<1x16x16x128xf32> to vector<16x16x128xf32>
    %73 = vector.shape_cast %70 : vector<16x16x128xf32> to vector<1x16x16x128xf32>
    tpu.vector_store %arg9[%c0_63, %c0_64, %c0_65, %c0_66], %73 {strides = array<i32>} : memref<1x16x16x128xf32, #tpu.memory_space<vmem>>, vector<1x16x16x128xf32>,
    return
  }
  func.func @transform_0(%arg0: i32, %arg1: i32) -> (i32, i32, i32, i32) {
    %c0_i32 = arith.constant 0 : i32
    %c0_i32_0 = arith.constant 0 : i32
    %c0_i32_1 = arith.constant 0 : i32
    return %arg0, %arg1, %c0_i32, %c0_i32_0 : i32, i32, i32, i32
  }
  func.func @transform_1(%arg0: i32, %arg1: i32) -> (i32, i32, i32, i32) {
    %c1_i32 = arith.constant 1 : i32
    %0 = arith.addi %arg1, %c1_i32 : i32
    %c8_i32 = arith.constant 8 : i32
    %1 = arith.muli %0, %c8_i32 : i32
    %c0_i32 = arith.constant 0 : i32
    %c0_i32_0 = arith.constant 0 : i32
    %c0_i32_1 = arith.constant 0 : i32
    return %arg0, %1, %c0_i32, %c0_i32_0 : i32, i32, i32, i32
  }
  func.func @transform_2(%arg0: i32, %arg1: i32) -> (i32, i32, i32, i32) {
    %c0_i32 = arith.constant 0 : i32
    %c0_i32_0 = arith.constant 0 : i32
    %c0_i32_1 = arith.constant 0 : i32
    return %arg0, %arg1, %c0_i32, %c0_i32_0 : i32, i32, i32, i32
  }
  func.func @transform_3(%arg0: i32, %arg1: i32) -> (i32, i32, i32, i32) {
    %c1_i32 = arith.constant 1 : i32
    %0 = arith.addi %arg1, %c1_i32 : i32
    %c8_i32 = arith.constant 8 : i32
    %1 = arith.muli %0, %c8_i32 : i32
    %c0_i32 = arith.constant 0 : i32
    %c0_i32_0 = arith.constant 0 : i32
    %c0_i32_1 = arith.constant 0 : i32
    return %arg0, %1, %c0_i32, %c0_i32_0 : i32, i32, i32, i32
  }
  func.func @transform_4(%arg0: i32, %arg1: i32) -> (i32, i32, i32) {
    %c0_i32 = arith.constant 0 : i32
    %c0_i32_0 = arith.constant 0 : i32
    %c0_i32_1 = arith.constant 0 : i32
    %c0_i32_2 = arith.constant 0 : i32
    return %c0_i32, %c0_i32_0, %c0_i32_1 : i32, i32, i32
  }
  func.func @transform_5(%arg0: i32, %arg1: i32) -> (i32, i32, i32) {
    %c0_i32 = arith.constant 0 : i32
    %c0_i32_0 = arith.constant 0 : i32
    %c0_i32_1 = arith.constant 0 : i32
    %c0_i32_2 = arith.constant 0 : i32
    return %c0_i32, %c0_i32_0, %c0_i32_1 : i32, i32, i32
  }
  func.func @transform_6(%arg0: i32, %arg1: i32) -> (i32, i32) {
    %c0_i32 = arith.constant 0 : i32
    %c0_i32_0 = arith.constant 0 : i32
    %c0_i32_1 = arith.constant 0 : i32
    return %c0_i32, %c0_i32_0 : i32, i32
  }
  func.func @transform_7(%arg0: i32, %arg1: i32) -> (i32, i32, i32, i32) {
    %c0_i32 = arith.constant 0 : i32
    %c0_i32_0 = arith.constant 0 : i32
    %c0_i32_1 = arith.constant 0 : i32
    return %arg0, %arg1, %c0_i32, %c0_i32_0 : i32, i32, i32, i32
  }
}

module attributes {stable_mosaic.version = 11 : i64} {
  func.func @kernel(%arg0: i32, %arg1: i32, %arg2: memref<1x16x18x128xf32, #tpu.memory_space<vmem>>, %arg3: memref<1x2x18x128xf32, #tpu.memory_space<vmem>>, %arg4: memref<3x384x128xf32, #tpu.memory_space<vmem>>, %arg5: memref<1x128xf32, #tpu.memory_space<vmem>>, %arg6: memref<1x16x16x128xf32, #tpu.memory_space<vmem>>, %arg7: memref<256x128xf32, #tpu.memory_space<vmem>>) attributes {dimension_semantics = [#tpu.dimension_semantics<parallel>, #tpu.dimension_semantics<parallel>], iteration_bounds = array<i64: 2, 1>, scalar_prefetch = 0 : i64, scratch_operands = 1 : i64, tpu.core_type = #tpu.core_type<tc>, window_params = [{transform_indices = @transform_0, window_bounds = array<i64: 1, 16, 18, 128>}, {transform_indices = @transform_1, window_bounds = array<i64: 1, 2, 18, 128>}, {pipeline_mode = #tpu.pipeline_mode<synchronous>, transform_indices = @transform_2, window_bounds = array<i64: 3, 384, 128>}, {pipeline_mode = #tpu.pipeline_mode<synchronous>, transform_indices = @transform_3, window_bounds = array<i64: 1, 128>}, {transform_indices = @transform_4, window_bounds = array<i64: 1, 16, 16, 128>}]} {
    %c0 = arith.constant 0 : index
    %c0_0 = arith.constant 0 : index
    %c0_1 = arith.constant 0 : index
    %c0_2 = arith.constant 0 : index
    %0 = vector.load %arg2[%c0, %c0_0, %c0_1, %c0_2] : memref<1x16x18x128xf32, #tpu.memory_space<vmem>>, vector<1x16x18x128xf32>
    %1 = vector.shape_cast %0 : vector<1x16x18x128xf32> to vector<16x18x128xf32>
    %c0_3 = arith.constant 0 : index
    %c0_4 = arith.constant 0 : index
    %c0_5 = arith.constant 0 : index
    %c0_6 = arith.constant 0 : index
    %2 = vector.load %arg3[%c0_3, %c0_4, %c0_5, %c0_6] : memref<1x2x18x128xf32, #tpu.memory_space<vmem>>, vector<1x2x18x128xf32>
    %3 = vector.shape_cast %2 : vector<1x2x18x128xf32> to vector<2x18x128xf32>
    %4 = tpu.concatenate %1, %3 in 0 : vector<16x18x128xf32>, vector<2x18x128xf32> -> vector<18x18x128xf32>
    %5 = vector.extract_strided_slice %4 {offsets = [0, 0, 0], sizes = [18, 16, 128], strides = [1, 1, 1]} : vector<18x18x128xf32> to vector<18x16x128xf32>
    %6 = vector.extract_strided_slice %4 {offsets = [0, 1, 0], sizes = [18, 16, 128], strides = [1, 1, 1]} : vector<18x18x128xf32> to vector<18x16x128xf32>
    %7 = vector.extract_strided_slice %4 {offsets = [0, 2, 0], sizes = [18, 16, 128], strides = [1, 1, 1]} : vector<18x18x128xf32> to vector<18x16x128xf32>
    %8 = tpu.concatenate %5, %6, %7 in 2 : vector<18x16x128xf32>, vector<18x16x128xf32>, vector<18x16x128xf32> -> vector<18x16x384xf32>
    %9 = vector.extract_strided_slice %8 {offsets = [0, 0, 0], sizes = [16, 16, 384], strides = [1, 1, 1]} : vector<18x16x384xf32> to vector<16x16x384xf32>
    %10 = vector.shape_cast %9 : vector<16x16x384xf32> to vector<256x384xf32>
    %c0_7 = arith.constant 0 : index
    %c0_8 = arith.constant 0 : index
    %c0_9 = arith.constant 0 : index
    %11 = vector.load %arg4[%c0_7, %c0_8, %c0_9] : memref<3x384x128xf32, #tpu.memory_space<vmem>>, vector<1x384x128xf32>
    %12 = vector.shape_cast %11 : vector<1x384x128xf32> to vector<384x128xf32>
    %cst = arith.constant dense<0.000000e+00> : vector<256x128xf32>
    %13 = tpu.matmul %10, %12, %cst {dimension_numbers = #tpu.dot_dimension_numbers<[1], [0], [0], [1], [0, 0, 1, 1], [], []>} : vector<256x384xf32>, vector<384x128xf32>, vector<256x128xf32> -> vector<256x128xf32>
    %c0_10 = arith.constant 0 : index
    %c0_11 = arith.constant 0 : index
    %14 = vector.load %arg7[%c0_10, %c0_11] : memref<256x128xf32, #tpu.memory_space<vmem>>, vector<256x128xf32>
    tpu.vector_store %arg7[%c0_10, %c0_11], %13 {strides = array<i32>} : memref<256x128xf32, #tpu.memory_space<vmem>>, vector<256x128xf32>,
    %15 = vector.extract_strided_slice %8 {offsets = [1, 0, 0], sizes = [16, 16, 384], strides = [1, 1, 1]} : vector<18x16x384xf32> to vector<16x16x384xf32>
    %16 = vector.shape_cast %15 : vector<16x16x384xf32> to vector<256x384xf32>
    %c1 = arith.constant 1 : index
    %c0_12 = arith.constant 0 : index
    %c0_13 = arith.constant 0 : index
    %17 = vector.load %arg4[%c1, %c0_12, %c0_13] : memref<3x384x128xf32, #tpu.memory_space<vmem>>, vector<1x384x128xf32>
    %18 = vector.shape_cast %17 : vector<1x384x128xf32> to vector<384x128xf32>
    %cst_14 = arith.constant dense<0.000000e+00> : vector<256x128xf32>
    %19 = tpu.matmul %16, %18, %cst_14 {dimension_numbers = #tpu.dot_dimension_numbers<[1], [0], [0], [1], [0, 0, 1, 1], [], []>} : vector<256x384xf32>, vector<384x128xf32>, vector<256x128xf32> -> vector<256x128xf32>
    %c0_15 = arith.constant 0 : index
    %c0_16 = arith.constant 0 : index
    %20 = vector.load %arg7[%c0_15, %c0_16] : memref<256x128xf32, #tpu.memory_space<vmem>>, vector<256x128xf32>
    %21 = arith.addf %20, %19 : vector<256x128xf32>
    %c0_17 = arith.constant 0 : index
    %c0_18 = arith.constant 0 : index
    %22 = vector.load %arg7[%c0_17, %c0_18] : memref<256x128xf32, #tpu.memory_space<vmem>>, vector<256x128xf32>
    tpu.vector_store %arg7[%c0_17, %c0_18], %21 {strides = array<i32>} : memref<256x128xf32, #tpu.memory_space<vmem>>, vector<256x128xf32>,
    %23 = vector.extract_strided_slice %8 {offsets = [2, 0, 0], sizes = [16, 16, 384], strides = [1, 1, 1]} : vector<18x16x384xf32> to vector<16x16x384xf32>
    %24 = vector.shape_cast %23 : vector<16x16x384xf32> to vector<256x384xf32>
    %c2 = arith.constant 2 : index
    %c0_19 = arith.constant 0 : index
    %c0_20 = arith.constant 0 : index
    %25 = vector.load %arg4[%c2, %c0_19, %c0_20] : memref<3x384x128xf32, #tpu.memory_space<vmem>>, vector<1x384x128xf32>
    %26 = vector.shape_cast %25 : vector<1x384x128xf32> to vector<384x128xf32>
    %cst_21 = arith.constant dense<0.000000e+00> : vector<256x128xf32>
    %27 = tpu.matmul %24, %26, %cst_21 {dimension_numbers = #tpu.dot_dimension_numbers<[1], [0], [0], [1], [0, 0, 1, 1], [], []>} : vector<256x384xf32>, vector<384x128xf32>, vector<256x128xf32> -> vector<256x128xf32>
    %c0_22 = arith.constant 0 : index
    %c0_23 = arith.constant 0 : index
    %28 = vector.load %arg7[%c0_22, %c0_23] : memref<256x128xf32, #tpu.memory_space<vmem>>, vector<256x128xf32>
    %29 = arith.addf %28, %27 : vector<256x128xf32>
    %c0_24 = arith.constant 0 : index
    %c0_25 = arith.constant 0 : index
    %30 = vector.load %arg7[%c0_24, %c0_25] : memref<256x128xf32, #tpu.memory_space<vmem>>, vector<256x128xf32>
    tpu.vector_store %arg7[%c0_24, %c0_25], %29 {strides = array<i32>} : memref<256x128xf32, #tpu.memory_space<vmem>>, vector<256x128xf32>,
    %c0_26 = arith.constant 0 : index
    %c0_27 = arith.constant 0 : index
    %31 = vector.load %arg7[%c0_26, %c0_27] : memref<256x128xf32, #tpu.memory_space<vmem>>, vector<256x128xf32>
    %c0_28 = arith.constant 0 : index
    %c0_29 = arith.constant 0 : index
    %32 = vector.load %arg5[%c0_28, %c0_29] : memref<1x128xf32, #tpu.memory_space<vmem>>, vector<1x128xf32>
    %33 = vector.broadcast %32 : vector<1x128xf32> to vector<256x128xf32>
    %34 = arith.addf %31, %33 : vector<256x128xf32>
    %cst_30 = arith.constant 0.000000e+00 : f32
    %35 = vector.broadcast %cst_30 : f32 to vector<256x128xf32>
    %36 = arith.maximumf %34, %35 : vector<256x128xf32>
    %37 = vector.shape_cast %36 : vector<256x128xf32> to vector<16x16x128xf32>
    %c0_31 = arith.constant 0 : index
    %c0_32 = arith.constant 0 : index
    %c0_33 = arith.constant 0 : index
    %c0_34 = arith.constant 0 : index
    %38 = vector.load %arg6[%c0_31, %c0_32, %c0_33, %c0_34] : memref<1x16x16x128xf32, #tpu.memory_space<vmem>>, vector<1x16x16x128xf32>
    %39 = vector.shape_cast %38 : vector<1x16x16x128xf32> to vector<16x16x128xf32>
    %40 = vector.shape_cast %37 : vector<16x16x128xf32> to vector<1x16x16x128xf32>
    tpu.vector_store %arg6[%c0_31, %c0_32, %c0_33, %c0_34], %40 {strides = array<i32>} : memref<1x16x16x128xf32, #tpu.memory_space<vmem>>, vector<1x16x16x128xf32>,
    return
  }
  func.func @transform_0(%arg0: i32, %arg1: i32) -> (i32, i32, i32, i32) {
    %c0_i32 = arith.constant 0 : i32
    %c0_i32_0 = arith.constant 0 : i32
    %c0_i32_1 = arith.constant 0 : i32
    return %arg0, %arg1, %c0_i32, %c0_i32_0 : i32, i32, i32, i32
  }
  func.func @transform_1(%arg0: i32, %arg1: i32) -> (i32, i32, i32, i32) {
    %c1_i32 = arith.constant 1 : i32
    %0 = arith.addi %arg1, %c1_i32 : i32
    %c8_i32 = arith.constant 8 : i32
    %1 = arith.muli %0, %c8_i32 : i32
    %c0_i32 = arith.constant 0 : i32
    %c0_i32_0 = arith.constant 0 : i32
    %c0_i32_1 = arith.constant 0 : i32
    return %arg0, %1, %c0_i32, %c0_i32_0 : i32, i32, i32, i32
  }
  func.func @transform_2(%arg0: i32, %arg1: i32) -> (i32, i32, i32) {
    %c0_i32 = arith.constant 0 : i32
    %c0_i32_0 = arith.constant 0 : i32
    %c0_i32_1 = arith.constant 0 : i32
    %c0_i32_2 = arith.constant 0 : i32
    return %c0_i32, %c0_i32_0, %c0_i32_1 : i32, i32, i32
  }
  func.func @transform_3(%arg0: i32, %arg1: i32) -> (i32, i32) {
    %c0_i32 = arith.constant 0 : i32
    %c0_i32_0 = arith.constant 0 : i32
    %c0_i32_1 = arith.constant 0 : i32
    return %c0_i32, %c0_i32_0 : i32, i32
  }
  func.func @transform_4(%arg0: i32, %arg1: i32) -> (i32, i32, i32, i32) {
    %c0_i32 = arith.constant 0 : i32
    %c0_i32_0 = arith.constant 0 : i32
    %c0_i32_1 = arith.constant 0 : i32
    return %arg0, %arg1, %c0_i32, %c0_i32_0 : i32, i32, i32, i32
  }
}

</mosaic_0001>

<bundles_post_ra>
// kernel: tile.8
= control target key start
LH: loop header
LB: loop body
LE: loop exit
PB: predicated region body
PF: predicated region fallthrough
CT: control target
= control target key end

     0   :  { %s22_s0 = inlined_call_operand.vmem [shape: f32[128], index: 0, kind: input, shape index: {}]   ;;  %s23_s1 = inlined_call_operand.vmem [shape: f32[2,128], index: 1, kind: output, shape index: {}]  }
   0x1   :  { %v4_v0 = vld [vmem:[%s22_s0] ss:$0 sm:$0xff] }
   0x2   :  { %5 = vst [vmem:[%s23_s1] sm:$0x3] %v4_v0 }

// kernel: upsample_forward.3
= control target key start
LH: loop header
LB: loop body
LE: loop exit
PB: predicated region body
PF: predicated region fallthrough
CT: control target
= control target key end

     0   :  { %s792_s12 = smov 0   ;;  %s794_s13 = smov 0   ;;  %s1117_s0 = inlined_call_operand.vmem [shape: f32[2,8,8,128], index: 0, kind: input, shape index: {}]   ;;  %s1118_s1 = inlined_call_operand.vmem [shape: f32[2,128,256], index: 1, kind: input, shape index: {}]   ;;  %s1119_s2 = inlined_call_operand.vmem [shape: f32[1,256], index: 2, kind: input, shape index: {}]   ;;  %s1120_s3 = inlined_call_operand.vmem [shape: f32[2,8,2,8,256], index: 3, kind: output, shape index: {}]  }
   0x1   :  { %s796_s14 = smov 0  }
   0x2 LB: > { %s25_s15 = sadd.s32 1, %s765_s13  ;;  %p665_p0 = scmp.ge.s32.totalorder %s769_s14, 1  ;;  %s769_s14 = sphi %s796_s14, %s13_s14   ;;  %s765_s13 = sphi %s794_s13, %s1122_s13   ;;  %s761_s12 = sphi %s792_s12, %s1121_s12  }
   0x3   : > { %p27_p1 = scmp.ge.s32.totalorder %s25_s15, 2  ;;  %p158_p2 = scmp.lt.s32.totalorder %s769_s14, 3 }
   0x5   : > { %s1124_s15 = smov (%p27_p1, %s25_s15), 0  ;;  %p159_p3 = pnand %p665_p0, %p158_p2 }
   0x6   : > { %p192_p4 = scmp.lt.s32.totalorder (!%p159_p3), %s761_s12, 1 }
   0x7   : > { %162 = sbr.rel (%p159_p3) target bundleno = 273 (0x111), region = 32 }
   0xc   : > { %v251_v0 = vld [vmem:[%s1118_s1 + $0xf8] sm:$0xff]  ;;  %v250_v2 = vld [vmem:[%s1118_s1 + $0xf0] sm:$0xff]  ;;  %v249_v4 = vld [vmem:[%s1118_s1 + $0xe8] sm:$0xff]  ;;  %s1126_s12 = smov (!%p192_p4, %s761_s12), 1 }
   0xd   : > { %v701_v1 = vld [vmem:[%s1118_s1 + $0x1f8] sm:$0xff]  ;;  %264 = vmatprep.subr.mxu0 %v251_v0  ;;  %v700_v3 = vld [vmem:[%s1118_s1 + $0x1f0] sm:$0xff]  ;;  %v699_v5 = vld [vmem:[%s1118_s1 + $0x1e8] sm:$0xff]  ;;  %s720_s9 = sshll.u32 %s1126_s12, 6  ;;  %s721_s10 = sshll.u32 %s1126_s12, 8 }
   0xe   : > { %438 = vmatprep.subr.mxu1 %v701_v1  ;;  %265 = vmatpush1.msra.mxu0 %v250_v2  ;;  %v248_v6 = vld [vmem:[%s1118_s1 + $0xe0] sm:$0xff]  ;;  %v247_v8 = vld [vmem:[%s1118_s1 + $0xd8] sm:$0xff]  ;;  %v246_v10 = vld [vmem:[%s1118_s1 + $0xd0] sm:$0xff]  ;;  %s1008_s28 = scalar_lea.vmem %s1117_s0, %s720_s9  ;;  %v771_v1 = vmov 0.0   ;;  %s1042_s17 = scalar_lea.vmem %s1120_s3, %s721_s10 }
   0xf   : > { %439 = vmatpush1.msra.mxu1 %v700_v3  ;;  %v698_v7 = vld [vmem:[%s1118_s1 + $0x1e0] sm:$0xff]  ;;  %266 = vmatprep.subr.mxu0 %v249_v4  ;;  %v697_v9 = vld [vmem:[%s1118_s1 + $0x1d8] sm:$0xff]  ;;  %v696_v11 = vld [vmem:[%s1118_s1 + $0x1d0] sm:$0xff] }
  0x10   : > { %440 = vmatprep.subr.mxu1 %v699_v5  ;;  %267 = vmatpush1.msra.mxu0 %v248_v6  ;;  %v245_v12 = vld [vmem:[%s1118_s1 + $0xc8] sm:$0xff]  ;;  %v244_v14 = vld [vmem:[%s1118_s1 + $0xc0] sm:$0xff]  ;;  %v243_v16 = vld [vmem:[%s1118_s1 + $0xb8] sm:$0xff] }
  0x11   : > { %441 = vmatpush1.msra.mxu1 %v698_v7  ;;  %v695_v13 = vld [vmem:[%s1118_s1 + $0x1c8] sm:$0xff]  ;;  %268 = vmatprep.subr.mxu0 %v247_v8  ;;  %v694_v15 = vld [vmem:[%s1118_s1 + $0x1c0] sm:$0xff]  ;;  %v693_v17 = vld [vmem:[%s1118_s1 + $0x1b8] sm:$0xff] }
  0x12   : > { %442 = vmatprep.subr.mxu1 %v697_v9  ;;  %269 = vmatpush1.msra.mxu0 %v246_v10  ;;  %v242_v18 = vld [vmem:[%s1118_s1 + $0xb0] sm:$0xff]  ;;  %v241_v20 = vld [vmem:[%s1118_s1 + $0xa8] sm:$0xff]  ;;  %v240_v22 = vld [vmem:[%s1118_s1 + $0xa0] sm:$0xff]  ;;  %v254_v9 = vlaneseq }
  0x13   : > { %443 = vmatpush1.msra.mxu1 %v696_v11  ;;  %270 = vmatprep.subr.mxu0 %v245_v12  ;;  %v692_v19 = vld [vmem:[%s1118_s1 + $0x1b0] sm:$0xff]  ;;  %v691_v21 = vld [vmem:[%s1118_s1 + $0x1a8] sm:$0xff]  ;;  %v690_v23 = vld [vmem:[%s1118_s1 + $0x1a0] sm:$0xff] }
  0x14   : > { %444 = vmatprep.subr.mxu1 %v695_v13  ;;  %271 = vmatpush1.msra.mxu0 %v244_v14  ;;  %v239_v24 = vld [vmem:[%s1118_s1 + $0x98] sm:$0xff]  ;;  %v238_v26 = vld [vmem:[%s1118_s1 + $0x90] sm:$0xff]  ;;  %v237_v28 = vld [vmem:[%s1118_s1 + $0x88] sm:$0xff]  ;;  %v255_v10 = vshrl.u32 %v254_v9, 7 }
  0x15   : > { %445 = vmatpush1.msra.mxu1 %v694_v15  ;;  %272 = vmatprep.subr.mxu0 %v243_v16  ;;  %v689_v25 = vld [vmem:[%s1118_s1 + $0x198] sm:$0xff]  ;;  %v688_v27 = vld [vmem:[%s1118_s1 + $0x190] sm:$0xff]  ;;  %v687_v29 = vld [vmem:[%s1118_s1 + $0x188] sm:$0xff] }
  0x16   : > { %446 = vmatprep.subr.mxu1 %v693_v17  ;;  %273 = vmatpush1.msra.mxu0 %v242_v18  ;;  %v236_v30 = vld [vmem:[%s1118_s1 + $0x80] sm:$0xff]  ;;  %v235_v32 = vld [vmem:[%s1118_s1 + $0x78] sm:$0xff]  ;;  %v234_v34 = vld [vmem:[%s1118_s1 + $0x70] sm:$0xff]  ;;  %v256_v11 = vsub.s32 0, %v255_v10  ;;  %v260_v14 = vsub.s32 1, %v255_v10 }
  0x17   : > { %447 = vmatpush1.msra.mxu1 %v692_v19  ;;  %274 = vmatprep.subr.mxu0 %v241_v20  ;;  %v686_v31 = vld [vmem:[%s1118_s1 + $0x180] sm:$0xff]  ;;  %v685_v33 = vld [vmem:[%s1118_s1 + $0x178] sm:$0xff]  ;;  %v684_v35 = vld [vmem:[%s1118_s1 + $0x170] sm:$0xff] }
  0x18   : > { %448 = vmatprep.subr.mxu1 %v691_v21  ;;  %275 = vmatpush1.msra.mxu0 %v240_v22  ;;  %v233_v36 = vld [vmem:[%s1118_s1 + $0x68] sm:$0xff]  ;;  %v232_v38 = vld [vmem:[%s1118_s1 + $0x60] sm:$0xff]  ;;  %v231_v40 = vld [vmem:[%s1118_s1 + $0x58] sm:$0xff] }
  0x19   : > { %449 = vmatpush1.msra.mxu1 %v690_v23  ;;  %276 = vmatprep.subr.mxu0 %v239_v24  ;;  %v683_v37 = vld [vmem:[%s1118_s1 + $0x168] sm:$0xff]  ;;  %v682_v39 = vld [vmem:[%s1118_s1 + $0x160] sm:$0xff]  ;;  %v681_v41 = vld [vmem:[%s1118_s1 + $0x158] sm:$0xff] }
  0x1a   : > { %450 = vmatprep.subr.mxu1 %v689_v25  ;;  %277 = vmatpush1.msra.mxu0 %v238_v26  ;;  %v230_v42 = vld [vmem:[%s1118_s1 + $0x50] sm:$0xff]  ;;  %v229_v44 = vld [vmem:[%s1118_s1 + $0x48] sm:$0xff]  ;;  %v228_v46 = vld [vmem:[%s1118_s1 + $0x40] sm:$0xff] }
  0x1b   : > { %451 = vmatpush1.msra.mxu1 %v688_v27  ;;  %278 = vmatprep.subr.mxu0 %v237_v28  ;;  %v680_v43 = vld [vmem:[%s1118_s1 + $0x150] sm:$0xff]  ;;  %v679_v45 = vld [vmem:[%s1118_s1 + $0x148] sm:$0xff]  ;;  %v678_v47 = vld [vmem:[%s1118_s1 + $0x140] sm:$0xff] }
  0x1c   : > { %452 = vmatprep.subr.mxu1 %v687_v29  ;;  %279 = vmatpush1.msra.mxu0 %v236_v30  ;;  %v227_v48 = vld [vmem:[%s1118_s1 + $0x38] sm:$0xff]  ;;  %v226_v50 = vld [vmem:[%s1118_s1 + $0x30] sm:$0xff]  ;;  %v225_v52 = vld [vmem:[%s1118_s1 + $0x28] sm:$0xff] }
  0x1d   : > { %453 = vmatpush1.msra.mxu1 %v686_v31  ;;  %280 = vmatprep.subr.mxu0 %v235_v32  ;;  %v677_v49 = vld [vmem:[%s1118_s1 + $0x138] sm:$0xff]  ;;  %v676_v51 = vld [vmem:[%s1118_s1 + $0x130] sm:$0xff]  ;;  %v675_v53 = vld [vmem:[%s1118_s1 + $0x128] sm:$0xff] }
  0x1e   : > { %454 = vmatprep.subr.mxu1 %v685_v33  ;;  %281 = vmatpush1.msra.mxu0 %v234_v34  ;;  %v224_v54 = vld [vmem:[%s1118_s1 + $0x20] sm:$0xff]  ;;  %v223_v56 = vld [vmem:[%s1118_s1 + $0x18] sm:$0xff]  ;;  %v222_v58 = vld [vmem:[%s1118_s1 + $0x10] sm:$0xff] }
  0x1f   : > { %455 = vmatpush1.msra.mxu1 %v684_v35  ;;  %282 = vmatprep.subr.mxu0 %v233_v36  ;;  %v674_v55 = vld [vmem:[%s1118_s1 + $0x120] sm:$0xff]  ;;  %v673_v57 = vld [vmem:[%s1118_s1 + $0x118] sm:$0xff]  ;;  %v672_v59 = vld [vmem:[%s1118_s1 + $0x110] sm:$0xff] }
  0x20   : > { %456 = vmatprep.subr.mxu1 %v683_v37  ;;  %283 = vmatpush1.msra.mxu0 %v232_v38  ;;  %v221_v60 = vld [vmem:[%s1118_s1 + $0x8] sm:$0xff]  ;;  %v220_v62 = vld [vmem:[%s1118_s1] sm:$0xff]  ;;  %v214_v3 = vld [vmem:[%s1008_s28 + $0x10] sm:$0xff] }
  0x21   : > { %457 = vmatpush1.msra.mxu1 %v682_v39  ;;  %284 = vmatprep.subr.mxu0 %v231_v40  ;;  %v671_v61 = vld [vmem:[%s1118_s1 + $0x108] sm:$0xff]  ;;  %v670_v63 = vld [vmem:[%s1118_s1 + $0x100] sm:$0xff]  ;;  %v215_v4 = vld [vmem:[%s1008_s28 + $0x18] sm:$0xff] }
  0x22   : > { %458 = vmatprep.subr.mxu1 %v681_v41  ;;  %285 = vmatpush1.msra.mxu0 %v230_v42  ;;  %v212_v0 = vld [vmem:[%s1008_s28] sm:$0xff]  ;;  %v213_v2 = vld [vmem:[%s1008_s28 + $0x8] sm:$0xff]  ;;  %v218_v7 = vld [vmem:[%s1008_s28 + $0x30] sm:$0xff] }
  0x23   : > { %459 = vmatpush1.msra.mxu1 %v680_v43  ;;  %286 = vmatprep.subr.mxu0 %v229_v44  ;;  %v216_v5 = vld [vmem:[%s1008_s28 + $0x20] sm:$0xff]  ;;  %v217_v6 = vld [vmem:[%s1008_s28 + $0x28] sm:$0xff]  ;;  %v219_v8 = vld [vmem:[%s1008_s28 + $0x38] sm:$0xff] }
  0x24   : > { %460 = vmatprep.subr.mxu1 %v679_v45  ;;  %287 = vmatpush1.msra.mxu0 %v228_v46  ;;  %v252_v12 = vld [vmem:[%s1119_s2] sm:$0x3] }
  0x25   : > { %461 = vmatpush1.msra.mxu1 %v678_v47  ;;  %288 = vmatprep.subr.mxu0 %v227_v48  ;;  %v426_v13 = vld [vmem:[%s1119_s2] sm:$0x3]  ;;  %v1031_v15 = vrot.slane %v252_v12, %v256_v11  ;;  %v1035_v17 = vrot.slane %v252_v12, %v260_v14 }
  0x26   : > { %462 = vmatprep.subr.mxu1 %v677_v49  ;;  %289 = vmatpush1.msra.mxu0 %v226_v50  ;;  %v1033_v16 = vrot.slane %v426_v13, %v256_v11  ;;  %v1037_v18 = vrot.slane %v426_v13, %v260_v14 }
  0x27   : > { %463 = vmatpush1.msra.mxu1 %v676_v51  ;;  %290 = vmatprep.subr.mxu0 %v225_v52 }
  0x28   : > { %464 = vmatprep.subr.mxu1 %v675_v53  ;;  %291 = vmatpush1.msra.mxu0 %v224_v54 }
  0x29   : > { %465 = vmatpush1.msra.mxu1 %v674_v55  ;;  %292 = vmatprep.subr.mxu0 %v223_v56 }
  0x2a   : > { %466 = vmatprep.subr.mxu1 %v673_v57  ;;  %293 = vmatpush1.msra.mxu0 %v222_v58 }
  0x2b   : > { %467 = vmatpush1.msra.mxu1 %v672_v59  ;;  %294 = vmatprep.subr.mxu0 %v221_v60 }
  0x2c   : > { %468 = vmatprep.subr.mxu1 %v671_v61  ;;  %295 = vmatpush1.msra.mxu0 %v220_v62 }
  0x2d   : > { %328 = vmatprep.mubr.f32.mxu0 %v771_v1  ;;  %469 = vmatpush1.msra.mxu1 %v670_v63 }
  0x2e   : > { %502 = vmatprep.mubr.f32.mxu1 %v771_v1  ;;  %329 = vmatmul.mubr.f32.vlgmr.msra.gmra.mxu0 %v212_v0 }
  0x2f   : > { %503 = vmatmul.mubr.f32.vlgmr.msra.gmra.mxu1 %v212_v0  ;;  %334 = vmatprep.mubr.f32.mxu0 %v771_v1 }
  0x30   : > { %508 = vmatprep.mubr.f32.mxu1 %v771_v1 }
  0x32   : > { %335 = vmatmul.mubr.f32.gmra.mxu0 %v213_v2 }
  0x33   : > { %509 = vmatmul.mubr.f32.gmra.mxu1 %v213_v2  ;;  %340 = vmatprep.mubr.f32.mxu0 %v771_v1 }
  0x34   : > { %514 = vmatprep.mubr.f32.mxu1 %v771_v1 }
  0x36   : > { %341 = vmatmul.mubr.f32.gmra.mxu0 %v214_v3 }
  0x37   : > { %515 = vmatmul.mubr.f32.gmra.mxu1 %v214_v3  ;;  %346 = vmatprep.mubr.f32.mxu0 %v771_v1 }
  0x38   : > { %520 = vmatprep.mubr.f32.mxu1 %v771_v1 }
  0x3a   : > { %347 = vmatmul.mubr.f32.gmra.mxu0 %v215_v4 }
  0x3b   : > { %521 = vmatmul.mubr.f32.gmra.mxu1 %v215_v4  ;;  %352 = vmatprep.mubr.f32.mxu0 %v771_v1 }
  0x3c   : > { %526 = vmatprep.mubr.f32.mxu1 %v771_v1 }
  0x3e   : > { %353 = vmatmul.mubr.f32.gmra.mxu0 %v216_v5 }
  0x3f   : > { %527 = vmatmul.mubr.f32.gmra.mxu1 %v216_v5  ;;  %358 = vmatprep.mubr.f32.mxu0 %v771_v1 }
  0x40   : > { %532 = vmatprep.mubr.f32.mxu1 %v771_v1 }
  0x42   : > { %359 = vmatmul.mubr.f32.gmra.mxu0 %v217_v6 }
  0x43   : > { %533 = vmatmul.mubr.f32.gmra.mxu1 %v217_v6  ;;  %364 = vmatprep.mubr.f32.mxu0 %v771_v1 }
  0x44   : > { %538 = vmatprep.mubr.f32.mxu1 %v771_v1 }
  0x46   : > { %365 = vmatmul.mubr.f32.gmra.mxu0 %v218_v7 }
  0x47   : > { %539 = vmatmul.mubr.f32.gmra.mxu1 %v218_v7  ;;  %370 = vmatprep.mubr.f32.mxu0 %v771_v1 }
  0x48   : > { %544 = vmatprep.mubr.f32.mxu1 %v771_v1 }
  0x4a   : > { %371 = vmatmul.mubr.f32.gmra.mxu0 %v219_v8 }
  0x4b   : > { %545 = vmatmul.mubr.f32.gmra.mxu1 %v219_v8 }
  0xee   : > { %v330_v19 = vpop.f32.mrf.mxu0 }
  0xef   : > { %v504_v20 = vpop.f32.mrf.mxu1  ;;  %v331_v21 = vadd.f32 %v330_v19, %v1031_v15 }
  0xf0   : > { %v505_v22 = vadd.f32 %v504_v20, %v1033_v16  ;;  %v332_v23 = vpop.f32.mrf.mxu0 }
  0xf1   : > { %v506_v24 = vpop.f32.mrf.mxu1  ;;  %377 = vst [vmem:[%s1042_s17] sm:$0xff] %v331_v21  ;;  %v333_v25 = vadd.f32 %v332_v23, %v1035_v17 }
  0xf2   : > { %702 = vst [vmem:[%s1042_s17 + $0x10] sm:$0xff] %v505_v22  ;;  %v507_v26 = vadd.f32 %v506_v24, %v1037_v18  ;;  %v336_v27 = vpop.f32.mrf.mxu0 }
  0xf3   : > { %v510_v28 = vpop.f32.mrf.mxu1  ;;  %378 = vst [vmem:[%s1042_s17 + $0x8] sm:$0xff] %v333_v25  ;;  %v337_v29 = vadd.f32 %v336_v27, %v1031_v15 }
  0xf4   : > { %703 = vst [vmem:[%s1042_s17 + $0x18] sm:$0xff] %v507_v26  ;;  %v511_v30 = vadd.f32 %v510_v28, %v1033_v16  ;;  %v338_v31 = vpop.f32.mrf.mxu0 }
  0xf5   : > { %v512_v32 = vpop.f32.mrf.mxu1  ;;  %379 = vst [vmem:[%s1042_s17 + $0x20] sm:$0xff] %v337_v29  ;;  %v339_v33 = vadd.f32 %v338_v31, %v1035_v17 }
  0xf6   : > { %704 = vst [vmem:[%s1042_s17 + $0x30] sm:$0xff] %v511_v30  ;;  %v513_v34 = vadd.f32 %v512_v32, %v1037_v18  ;;  %v342_v35 = vpop.f32.mrf.mxu0 }
  0xf7   : > { %v516_v36 = vpop.f32.mrf.mxu1  ;;  %380 = vst [vmem:[%s1042_s17 + $0x28] sm:$0xff] %v339_v33  ;;  %v343_v37 = vadd.f32 %v342_v35, %v1031_v15 }
  0xf8   : > { %705 = vst [vmem:[%s1042_s17 + $0x38] sm:$0xff] %v513_v34  ;;  %v517_v38 = vadd.f32 %v516_v36, %v1033_v16  ;;  %v344_v39 = vpop.f32.mrf.mxu0 }
  0xf9   : > { %v518_v40 = vpop.f32.mrf.mxu1  ;;  %381 = vst [vmem:[%s1042_s17 + $0x40] sm:$0xff] %v343_v37  ;;  %v345_v41 = vadd.f32 %v344_v39, %v1035_v17 }
  0xfa   : > { %706 = vst [vmem:[%s1042_s17 + $0x50] sm:$0xff] %v517_v38  ;;  %v519_v42 = vadd.f32 %v518_v40, %v1037_v18  ;;  %v348_v43 = vpop.f32.mrf.mxu0 }
  0xfb   : > { %v522_v44 = vpop.f32.mrf.mxu1  ;;  %382 = vst [vmem:[%s1042_s17 + $0x48] sm:$0xff] %v345_v41  ;;  %v349_v45 = vadd.f32 %v348_v43, %v1031_v15 }
  0xfc   : > { %707 = vst [vmem:[%s1042_s17 + $0x58] sm:$0xff] %v519_v42  ;;  %v523_v46 = vadd.f32 %v522_v44, %v1033_v16  ;;  %v350_v47 = vpop.f32.mrf.mxu0 }
  0xfd   : > { %v524_v48 = vpop.f32.mrf.mxu1  ;;  %383 = vst [vmem:[%s1042_s17 + $0x60] sm:$0xff] %v349_v45  ;;  %v351_v49 = vadd.f32 %v350_v47, %v1035_v17 }
  0xfe   : > { %708 = vst [vmem:[%s1042_s17 + $0x70] sm:$0xff] %v523_v46  ;;  %v525_v50 = vadd.f32 %v524_v48, %v1037_v18  ;;  %v354_v51 = vpop.f32.mrf.mxu0 }
  0xff   : > { %v528_v52 = vpop.f32.mrf.mxu1  ;;  %384 = vst [vmem:[%s1042_s17 + $0x68] sm:$0xff] %v351_v49  ;;  %v355_v53 = vadd.f32 %v354_v51, %v1031_v15 }
 0x100   : > { %709 = vst [vmem:[%s1042_s17 + $0x78] sm:$0xff] %v525_v50  ;;  %v529_v54 = vadd.f32 %v528_v52, %v1033_v16  ;;  %v356_v55 = vpop.f32.mrf.mxu0 }
 0x101   : > { %v530_v56 = vpop.f32.mrf.mxu1  ;;  %385 = vst [vmem:[%s1042_s17 + $0x80] sm:$0xff] %v355_v53  ;;  %v357_v57 = vadd.f32 %v356_v55, %v1035_v17 }
 0x102   : > { %710 = vst [vmem:[%s1042_s17 + $0x90] sm:$0xff] %v529_v54  ;;  %v531_v58 = vadd.f32 %v530_v56, %v1037_v18  ;;  %v360_v59 = vpop.f32.mrf.mxu0 }
 0x103   : > { %v534_v60 = vpop.f32.mrf.mxu1  ;;  %386 = vst [vmem:[%s1042_s17 + $0x88] sm:$0xff] %v357_v57  ;;  %v361_v61 = vadd.f32 %v360_v59, %v1031_v15 }
 0x104   : > { %711 = vst [vmem:[%s1042_s17 + $0x98] sm:$0xff] %v531_v58  ;;  %v535_v62 = vadd.f32 %v534_v60, %v1033_v16  ;;  %v362_v63 = vpop.f32.mrf.mxu0 }
 0x105   : > { %v536_v0 = vpop.f32.mrf.mxu1  ;;  %387 = vst [vmem:[%s1042_s17 + $0xa0] sm:$0xff] %v361_v61  ;;  %v363_v1 = vadd.f32 %v362_v63, %v1035_v17 }
 0x106   : > { %712 = vst [vmem:[%s1042_s17 + $0xb0] sm:$0xff] %v535_v62  ;;  %v537_v2 = vadd.f32 %v536_v0, %v1037_v18  ;;  %v366_v3 = vpop.f32.mrf.mxu0 }
 0x107   : > { %v540_v4 = vpop.f32.mrf.mxu1  ;;  %388 = vst [vmem:[%s1042_s17 + $0xa8] sm:$0xff] %v363_v1  ;;  %v367_v5 = vadd.f32 %v366_v3, %v1031_v15 }
 0x108   : > { %713 = vst [vmem:[%s1042_s17 + $0xb8] sm:$0xff] %v537_v2  ;;  %v541_v6 = vadd.f32 %v540_v4, %v1033_v16  ;;  %v368_v7 = vpop.f32.mrf.mxu0 }
 0x109   : > { %v542_v8 = vpop.f32.mrf.mxu1  ;;  %389 = vst [vmem:[%s1042_s17 + $0xc0] sm:$0xff] %v367_v5  ;;  %v369_v9 = vadd.f32 %v368_v7, %v1035_v17 }
 0x10a   : > { %714 = vst [vmem:[%s1042_s17 + $0xd0] sm:$0xff] %v541_v6  ;;  %v543_v10 = vadd.f32 %v542_v8, %v1037_v18  ;;  %v372_v11 = vpop.f32.mrf.mxu0 }
 0x10b   : > { %v546_v12 = vpop.f32.mrf.mxu1  ;;  %390 = vst [vmem:[%s1042_s17 + $0xc8] sm:$0xff] %v369_v9  ;;  %v373_v13 = vadd.f32 %v372_v11, %v1031_v15 }
 0x10c   : > { %715 = vst [vmem:[%s1042_s17 + $0xd8] sm:$0xff] %v543_v10  ;;  %v547_v14 = vadd.f32 %v546_v12, %v1033_v16  ;;  %v374_v19 = vpop.f32.mrf.mxu0 }
 0x10d   : > { %v548_v20 = vpop.f32.mrf.mxu1  ;;  %391 = vst [vmem:[%s1042_s17 + $0xe0] sm:$0xff] %v373_v13  ;;  %v375_v21 = vadd.f32 %v374_v19, %v1035_v17 }
 0x10e   : > { %716 = vst [vmem:[%s1042_s17 + $0xf0] sm:$0xff] %v547_v14  ;;  %v549_v22 = vadd.f32 %v548_v20, %v1037_v18 }
 0x10f   : > { %392 = vst [vmem:[%s1042_s17 + $0xe8] sm:$0xff] %v375_v21 }
 0x110   : > { %717 = vst [vmem:[%s1042_s17 + $0xf8] sm:$0xff] %v549_v22 }
 0x111 PF: > { %s13_s14 = sadd.s32 1, %s769_s14   ;;  %s1121_s12 = smov %s765_s13 }
 0x112   : > { %p10_p5 = scmp.ge.s32.totalorder %s13_s14, 4   ;;  %s1122_s13 = smov %s1124_s15 }
 0x114   :  { %12 = sbr.rel (!%p10_p5) target bundleno = 2 (0x2), region = 64 }

// kernel: upsample_forward.5
= control target key start
LH: loop header
LB: loop body
LE: loop exit
PB: predicated region body
PF: predicated region fallthrough
CT: control target
= control target key end

     0   :  { %s3255_s15 = smov 0   ;;  %s3257_s16 = smov 0   ;;  %s5074_s0 = inlined_call_operand.vmem [shape: f32[2,18,18,128], index: 0, kind: input, shape index: {}, may-alias: {0,1}]   ;;  %s5075_s1 = inlined_call_operand.vmem [shape: f32[2,18,18,128], index: 1, kind: input, shape index: {}, may-alias: {0,1}]   ;;  %s5076_s2 = inlined_call_operand.vmem [shape: f32[3,384,128], index: 2, kind: input, shape index: {}]   ;;  %s5077_s3 = inlined_call_operand.vmem [shape: f32[1,128], index: 3, kind: input, shape index: {}]   ;;  %s5078_s4 = inlined_call_operand.vmem [shape: f32[2,16,16,128], index: 4, kind: output, shape index: {}]  }
   0x1   :  { %s3259_s17 = smov 0  }
   0x2 LB: > { %s26_s18 = sadd.s32 1, %s3223_s16  ;;  %p2658_p0 = scmp.ge.s32.totalorder %s3227_s17, 1  ;;  %s3227_s17 = sphi %s3259_s17, %s14_s17   ;;  %s3223_s16 = sphi %s3257_s16, %s5307_s16   ;;  %s3219_s15 = sphi %s3255_s15, %s5306_s15  }
   0x3   : > { %p28_p1 = scmp.ge.s32.totalorder %s26_s18, 2  ;;  %p220_p2 = scmp.lt.s32.totalorder %s3227_s17, 3 }
   0x5   : > { %s5309_s18 = smov (%p28_p1, %s26_s18), 0  ;;  %p221_p3 = pnand %p2658_p0, %p220_p2 }
   0x7   : > { %224 = sbr.rel (%p221_p3) target bundleno = 573 (0x23d), region = 36 }
   0xc   : > { %v729_v0 = vld [vmem:[%s5076_s2 + $0x178] sm:$0xff]  ;;  %v728_v2 = vld [vmem:[%s5076_s2 + $0x170] sm:$0xff]  ;;  %p279_p4 = scmp.lt.s32.totalorder %s3219_s15, 1  ;;  %v5081_v3 = vmov 0.0   ;;  %v727_v5 = vld [vmem:[%s5076_s2 + $0x168] sm:$0xff]  ;;  %vm555_vm0 = vcmask 1045504  }
   0xd   : > { %v697_v1 = vld [vmem:[%s5076_s2 + $0x78] sm:$0xff]  ;;  %730 = vmatprep.subr.mxu0 %v5081_v3  ;;  %2909 = vmatprep.subr.mxu1 %v729_v0  ;;  %v696_v4 = vld [vmem:[%s5076_s2 + $0x70] sm:$0xff]  ;;  %v695_v6 = vld [vmem:[%s5076_s2 + $0x68] sm:$0xff]  ;;  %vm428_vm1 = vcmask 1046528  }
   0xe   : > { %731 = vmatpush1.msra.mxu0 %v697_v1  ;;  %2910 = vmatpush3.msra.mxu1 %v729_v0  ;;  %s5311_s15 = smov (!%p279_p4, %s3219_s15), 1  ;;  %v726_v7 = vld [vmem:[%s5076_s2 + $0x160] sm:$0xff]  ;;  %v725_v9 = vld [vmem:[%s5076_s2 + $0x158] sm:$0xff]  ;;  %v724_v11 = vld [vmem:[%s5076_s2 + $0x150] sm:$0xff] }
   0xf   : > { %732 = vmatprep.subr.mxu0 %v5081_v3  ;;  %2911 = vmatprep.subr.mxu1 %v728_v2  ;;  %v694_v8 = vld [vmem:[%s5076_s2 + $0x60] sm:$0xff]  ;;  %v693_v10 = vld [vmem:[%s5076_s2 + $0x58] sm:$0xff]  ;;  %v692_v12 = vld [vmem:[%s5076_s2 + $0x50] sm:$0xff]  ;;  %s3149_s9 = smul.u32 432, %s5311_s15  ;;  %s2764_s30 = sshll.u32 %s5311_s15, 8 }
  0x10   : > { %733 = vmatpush1.msra.mxu0 %v696_v4  ;;  %2912 = vmatpush3.msra.mxu1 %v728_v2  ;;  %v723_v13 = vld [vmem:[%s5076_s2 + $0x148] sm:$0xff]  ;;  %v722_v15 = vld [vmem:[%s5076_s2 + $0x140] sm:$0xff]  ;;  %v721_v17 = vld [vmem:[%s5076_s2 + $0x138] sm:$0xff]  ;;  %s4943_s6 = scalar_lea.vmem %s5078_s4, %s2764_s30 }
  0x11   : > { %734 = vmatprep.subr.mxu0 %v5081_v3  ;;  %2913 = vmatprep.subr.mxu1 %v727_v5  ;;  %v691_v14 = vld [vmem:[%s5076_s2 + $0x48] sm:$0xff]  ;;  %v690_v16 = vld [vmem:[%s5076_s2 + $0x40] sm:$0xff]  ;;  %v689_v18 = vld [vmem:[%s5076_s2 + $0x38] sm:$0xff]  ;;  %s3360_s24 = scalar_lea.vmem %s5074_s0, %s3149_s9  ;;  %s2763_s5 = sadd.s32 384, %s3149_s9 }
  0x12   : > { %735 = vmatpush1.msra.mxu0 %v695_v6  ;;  %2914 = vmatpush3.msra.mxu1 %v727_v5  ;;  %v720_v19 = vld [vmem:[%s5076_s2 + $0x130] sm:$0xff]  ;;  %v719_v21 = vld [vmem:[%s5076_s2 + $0x128] sm:$0xff]  ;;  %v718_v23 = vld [vmem:[%s5076_s2 + $0x120] sm:$0xff]  ;;  %s4344_s11 = scalar_lea.vmem %s5075_s1, %s2763_s5 }
  0x13   : > { %736 = vmatprep.subr.mxu0 %v5081_v3  ;;  %2915 = vmatprep.subr.mxu1 %v726_v7  ;;  %v688_v20 = vld [vmem:[%s5076_s2 + $0x30] sm:$0xff]  ;;  %v687_v22 = vld [vmem:[%s5076_s2 + $0x28] sm:$0xff]  ;;  %v686_v24 = vld [vmem:[%s5076_s2 + $0x20] sm:$0xff] }
  0x14   : > { %737 = vmatpush1.msra.mxu0 %v694_v8  ;;  %2916 = vmatpush3.msra.mxu1 %v726_v7  ;;  %v717_v25 = vld [vmem:[%s5076_s2 + $0x118] sm:$0xff]  ;;  %v3374_v27 = vld [vmem:[%s3360_s24] sm:$0xff]  ;;  %v3377_v28 = vld [vmem:[%s3360_s24 + $0x8] sm:$0xff] }
  0x15   : > { %738 = vmatprep.subr.mxu0 %v5081_v3  ;;  %2917 = vmatprep.subr.mxu1 %v725_v9  ;;  %v685_v26 = vld [vmem:[%s5076_s2 + $0x18] sm:$0xff]  ;;  %v716_v29 = vld [vmem:[%s5076_s2 + $0x110] sm:$0xff]  ;;  %v715_v32 = vld [vmem:[%s5076_s2 + $0x108] sm:$0xff]  ;;  %v556_v33 = vrot.slane %v3374_v27, 2  ;;  %v557_v34 = vrot.slane %v3377_v28, 2 }
  0x16   : > { %739 = vmatpush1.msra.mxu0 %v693_v10  ;;  %2918 = vmatpush3.msra.mxu1 %v725_v9  ;;  %v3383_v30 = vld [vmem:[%s3360_s24 + $0x10] sm:$0x3]  ;;  %v683_v35 = vld [vmem:[%s5076_s2 + $0x8] sm:$0xff]  ;;  %v3400_v37 = vld [vmem:[%s3360_s24 + $0x18] sm:$0xff] }
  0x17   : > { %740 = vmatprep.subr.mxu0 %v5081_v3  ;;  %2919 = vmatprep.subr.mxu1 %v724_v11  ;;  %v684_v31 = vld [vmem:[%s5076_s2 + $0x10] sm:$0xff]  ;;  %v559_v36 = vrot.slane %v3383_v30, 2  ;;  %v3403_v38 = vld [vmem:[%s3360_s24 + $0x20] sm:$0xff]  ;;  %v3413_v41 = vld [vmem:[%s3360_s24 + $0x28] sm:$0x3]  ;;  %v558_v42 = vsel %vm555_vm0, %v556_v33, %v557_v34  ;;  %v561_v43 = vrot.slane %v3400_v37, 2 }
  0x18   : > { %741 = vmatpush1.msra.mxu0 %v692_v12  ;;  %2920 = vmatpush3.msra.mxu1 %v724_v11  ;;  %v714_v39 = vld [vmem:[%s5076_s2 + $0x100] sm:$0xff]  ;;  %v562_v44 = vrot.slane %v3403_v38, 2  ;;  %v713_v46 = vld [vmem:[%s5076_s2 + $0xf8] sm:$0xff]  ;;  %v564_v48 = vrot.slane %v3413_v41, 2  ;;  %v3428_v49 = vld [vmem:[%s3360_s24 + $0x30] sm:$0xff] }
  0x19   : > { %742 = vmatprep.subr.mxu0 %v5081_v3  ;;  %2921 = vmatprep.subr.mxu1 %v723_v13  ;;  %v682_v40 = vld [vmem:[%s5076_s2] sm:$0xff]  ;;  %v560_v45 = vsel %vm555_vm0, %v557_v34, %v559_v36  ;;  %v2678_v47 = vld [vmem:[%s5076_s2 + $0x1f8] sm:$0xff]  ;;  %v712_v51 = vld [vmem:[%s5076_s2 + $0xf0] sm:$0xff]  ;;  %v566_v55 = vrot.slane %v3428_v49, 2 }
  0x1a   : > { %743 = vmatpush1.msra.mxu0 %v691_v14  ;;  %2922 = vmatpush3.msra.mxu1 %v723_v13  ;;  %v3431_v50 = vld [vmem:[%s3360_s24 + $0x38] sm:$0xff]  ;;  %v3439_v52 = vsel %vm555_vm0, %v561_v43, %v562_v44  ;;  %v3442_v53 = vld [vmem:[%s3360_s24 + $0x40] sm:$0x3]  ;;  %v2677_v54 = vld [vmem:[%s5076_s2 + $0x1f0] sm:$0xff]  ;;  %v3452_v57 = vsel %vm555_vm0, %v562_v44, %v564_v48 }
  0x1b   : > { %744 = vmatprep.subr.mxu0 %v5081_v3  ;;  %2923 = vmatprep.subr.mxu1 %v722_v15  ;;  %v567_v56 = vrot.slane %v3431_v50, 2  ;;  %5143 = vst [vmem:[#allocation3_spill] sm:$0xff] %v3452_v57  ;;  %v711_v58 = vld [vmem:[%s5076_s2 + $0xe8] sm:$0xff]  ;;  %v569_v60 = vrot.slane %v3442_v53, 2  ;;  %v3466_v62 = vld [vmem:[%s3360_s24 + $0x50] sm:$0xff]  ;;  %v710_v63 = vld [vmem:[%s5076_s2 + $0xe0] sm:$0xff] }
  0x1c   : > { %745 = vmatpush1.msra.mxu0 %v690_v16  ;;  %2924 = vmatpush3.msra.mxu1 %v722_v15  ;;  %v2676_v59 = vld [vmem:[%s5076_s2 + $0x1e8] sm:$0xff]  ;;  %v3478_v1 = vld [vmem:[%s3360_s24 + $0x58] sm:$0x3]  ;;  %v2675_v2 = vld [vmem:[%s5076_s2 + $0x1e0] sm:$0xff]  ;;  %v572_v5 = vrot.slane %v3466_v62, 2 }
  0x1d   : > { %746 = vmatprep.subr.mxu0 %v5081_v3  ;;  %2925 = vmatprep.subr.mxu1 %v721_v17  ;;  %v3463_v61 = vld [vmem:[%s3360_s24 + $0x48] sm:$0xff]  ;;  %v3475_v0 = vsel %vm555_vm0, %v566_v55, %v567_v56  ;;  %v3488_v6 = vsel %vm555_vm0, %v567_v56, %v569_v60  ;;  %v709_v7 = vld [vmem:[%s5076_s2 + $0xd8] sm:$0xff]  ;;  %v574_v9 = vrot.slane %v3478_v1, 2  ;;  %v3499_v10 = vld [vmem:[%s3360_s24 + $0x60] sm:$0xff] }
  0x1e   : > { %747 = vmatpush1.msra.mxu0 %v689_v18  ;;  %2926 = vmatpush3.msra.mxu1 %v721_v17  ;;  %5144 = vst [vmem:[#allocation4_spill] sm:$0xff] %v3475_v0  ;;  %v571_v4 = vrot.slane %v3463_v61, 2  ;;  %5145 = vst [vmem:[#allocation5_spill] sm:$0xff] %v3488_v6  ;;  %v2674_v8 = vld [vmem:[%s5076_s2 + $0x1d8] sm:$0xff]  ;;  %v3502_v11 = vld [vmem:[%s3360_s24 + $0x68] sm:$0xff]  ;;  %v576_v16 = vrot.slane %v3499_v10, 2 }
  0x1f   : > { %748 = vmatprep.subr.mxu0 %v5081_v3  ;;  %2927 = vmatprep.subr.mxu1 %v720_v19  ;;  %v708_v12 = vld [vmem:[%s5076_s2 + $0xd0] sm:$0xff]  ;;  %v577_v17 = vrot.slane %v3502_v11, 2  ;;  %v3524_v18 = vsel %vm555_vm0, %v572_v5, %v574_v9  ;;  %v705_v34 = vld [vmem:[%s5076_s2 + $0xb8] sm:$0xff]  ;;  %v3586_v44 = vld [vmem:[%s3360_s24 + $0xa0] sm:$0x3] }
  0x20   : > { %749 = vmatpush1.msra.mxu0 %v688_v20  ;;  %2928 = vmatpush3.msra.mxu1 %v720_v19  ;;  %v3511_v13 = vsel %vm555_vm0, %v571_v4, %v572_v5  ;;  %v3514_v14 = vld [vmem:[%s3360_s24 + $0x70] sm:$0x3]  ;;  %5147 = vst [vmem:[#allocation7_spill] sm:$0xff] %v3524_v18  ;;  %v707_v19 = vld [vmem:[%s5076_s2 + $0xc8] sm:$0xff]  ;;  %v589_v55 = vrot.slane %v3586_v44, 2  ;;  %v2666_v9 = vld [vmem:[%s5076_s2 + $0x198] sm:$0xff] }
  0x21   : > { %750 = vmatprep.subr.mxu0 %v5081_v3  ;;  %2929 = vmatprep.subr.mxu1 %v719_v21  ;;  %5146 = vst [vmem:[#allocation6_spill] sm:$0xff] %v3511_v13  ;;  %v2673_v15 = vld [vmem:[%s5076_s2 + $0x1d0] sm:$0xff]  ;;  %v2672_v20 = vld [vmem:[%s5076_s2 + $0x1c8] sm:$0xff] }
  0x22   : > { %751 = vmatpush1.msra.mxu0 %v687_v22  ;;  %2930 = vmatpush3.msra.mxu1 %v719_v21  ;;  %v579_v21 = vrot.slane %v3514_v14, 2  ;;  %v3535_v22 = vld [vmem:[%s3360_s24 + $0x78] sm:$0xff]  ;;  %v3607_v56 = vld [vmem:[%s3360_s24 + $0xa8] sm:$0xff] }
  0x23   : > { %752 = vmatprep.subr.mxu0 %v5081_v3  ;;  %2931 = vmatprep.subr.mxu1 %v718_v23  ;;  %v591_v4 = vrot.slane %v3607_v56, 2 }
  0x24   : > { %753 = vmatpush1.msra.mxu0 %v686_v24  ;;  %2932 = vmatpush3.msra.mxu1 %v718_v23  ;;  %v3538_v23 = vld [vmem:[%s3360_s24 + $0x80] sm:$0xff]  ;;  %v3560_v33 = vsel %vm555_vm0, %v577_v17, %v579_v21  ;;  %v2665_v21 = vld [vmem:[%s5076_s2 + $0x190] sm:$0xff] }
  0x25   : > { %754 = vmatprep.subr.mxu0 %v5081_v3  ;;  %2933 = vmatprep.subr.mxu1 %v717_v25  ;;  %v706_v24 = vld [vmem:[%s5076_s2 + $0xc0] sm:$0xff]  ;;  %5149 = vst [vmem:[#allocation9_spill] sm:$0xff] %v3560_v33 }
  0x26   : > { %755 = vmatpush1.msra.mxu0 %v685_v26  ;;  %2934 = vmatpush3.msra.mxu1 %v717_v25  ;;  %v3547_v25 = vsel %vm555_vm0, %v576_v16, %v577_v17  ;;  %v3550_v26 = vld [vmem:[%s3360_s24 + $0x88] sm:$0x3]  ;;  %v700_v17 = vld [vmem:[%s5076_s2 + $0x90] sm:$0xff] }
  0x27   : > { %756 = vmatprep.subr.mxu0 %v5081_v3  ;;  %2935 = vmatprep.subr.mxu1 %v716_v29  ;;  %5148 = vst [vmem:[#allocation8_spill] sm:$0xff] %v3547_v25  ;;  %v584_v36 = vrot.slane %v3550_v26, 2  ;;  %v3647_v16 = vld [vmem:[%s3360_s24 + $0xc8] sm:$0xff] }
  0x28   : > { %757 = vmatpush1.msra.mxu0 %v684_v31  ;;  %2936 = vmatpush3.msra.mxu1 %v716_v29  ;;  %v2671_v29 = vld [vmem:[%s5076_s2 + $0x1c0] sm:$0xff]  ;;  %v581_v31 = vrot.slane %v3535_v22, 2 }
  0x29   : > { %758 = vmatprep.subr.mxu0 %v5081_v3  ;;  %2937 = vmatprep.subr.mxu1 %v715_v32 }
  0x2a   : > { %759 = vmatpush1.msra.mxu0 %v683_v35  ;;  %2938 = vmatpush3.msra.mxu1 %v715_v32  ;;  %v582_v32 = vrot.slane %v3538_v23, 2  ;;  %v2670_v35 = vld [vmem:[%s5076_s2 + $0x1b8] sm:$0xff] }
  0x2b   : > { %760 = vmatprep.subr.mxu0 %v5081_v3  ;;  %2939 = vmatprep.subr.mxu1 %v714_v39 }
  0x2c   : > { %761 = vmatpush1.msra.mxu0 %v682_v40  ;;  %2940 = vmatpush3.msra.mxu1 %v714_v39  ;;  %v3571_v39 = vld [vmem:[%s3360_s24 + $0x90] sm:$0xff]  ;;  %v3574_v40 = vld [vmem:[%s3360_s24 + $0x98] sm:$0xff]  ;;  %v3583_v43 = vsel %vm555_vm0, %v581_v31, %v582_v32  ;;  %v3596_v48 = vsel %vm555_vm0, %v582_v32, %v584_v36  ;;  %v3676_v36 = vld [vmem:[%s3360_s24 + $0xe0] sm:$0xff] }
  0x2d   : > { %2941 = vmatprep.mubr.f32.mxu1 %v558_v42  ;;  %762 = vmatprep.subr.mxu0 %v5081_v3  ;;  %v704_v42 = vld [vmem:[%s5076_s2 + $0xb0] sm:$0xff]  ;;  %5150 = vst [vmem:[#allocation10_spill] sm:$0xff] %v3583_v43  ;;  %5151 = vst [vmem:[#allocation11_spill] sm:$0xff] %v3596_v48 }
  0x2e   : > { %2942 = vmatmul.mubr.f32.vlgmr.msra.gmra.mxu1 %v560_v45  ;;  %1261 = vmatprep.subr.mxu1 %v5081_v3  ;;  %v2669_v45 = vld [vmem:[%s5076_s2 + $0x1b0] sm:$0xff] }
  0x2f   : > { %763 = vmatpush2.msra.mxu0 %v713_v46  ;;  %1262 = vmatpush1.msra.mxu1 %v2678_v47  ;;  %v586_v46 = vrot.slane %v3571_v39, 2  ;;  %v587_v47 = vrot.slane %v3574_v40, 2 }
  0x30   : > { %764 = vmatprep.subr.mxu0 %v5081_v3  ;;  %1263 = vmatprep.subr.mxu1 %v5081_v3 }
  0x31   : > { %765 = vmatpush2.msra.mxu0 %v712_v51  ;;  %2944 = vmatprep.mubr.f32.mxu1 %v3439_v52  ;;  %v703_v51 = vld [vmem:[%s5076_s2 + $0xa8] sm:$0xff]  ;;  %v3619_v60 = vsel %vm555_vm0, %v586_v46, %v587_v47 }
  0x32   : > { %1264 = vmatpush1.msra.mxu1 %v2677_v54  ;;  %766 = vmatprep.subr.mxu0 %v5081_v3  ;;  %v2668_v54 = vld [vmem:[%s5076_s2 + $0x1a8] sm:$0xff]  ;;  %5152 = vst [vmem:[#allocation12_spill] sm:$0xff] %v3619_v60 }
  0x33   : > { %2945 = vmatmul.mubr.f32.gmra.mxu1 %v3452_v57  ;;  %1265 = vmatprep.subr.mxu1 %v5081_v3  ;;  %v450_v57 = vrot.slane %v3502_v11, 1 }
  0x34   : > { %767 = vmatpush2.msra.mxu0 %v711_v58  ;;  %1266 = vmatpush1.msra.mxu1 %v2676_v59  ;;  %v3610_v58 = vld [vmem:[%s3360_s24 + $0xb0] sm:$0xff]  ;;  %v702_v59 = vld [vmem:[%s5076_s2 + $0xa0] sm:$0xff] }
  0x35   : > { %768 = vmatprep.subr.mxu0 %v5081_v3  ;;  %1267 = vmatprep.subr.mxu1 %v5081_v3  ;;  %v592_v5 = vrot.slane %v3610_v58, 2 }
  0x36   : > { %769 = vmatpush2.msra.mxu0 %v710_v63  ;;  %2947 = vmatprep.mubr.f32.mxu1 %v3475_v0  ;;  %v3622_v63 = vld [vmem:[%s3360_s24 + $0xb8] sm:$0x3] }
  0x37   : > { %1268 = vmatpush1.msra.mxu1 %v2675_v2  ;;  %770 = vmatprep.subr.mxu0 %v5081_v3  ;;  %v2667_v2 = vld [vmem:[%s5076_s2 + $0x1a0] sm:$0xff]  ;;  %v3902_v0 = vld [vmem:[%s3360_s24 + $0x178] sm:$0x3] }
  0x38   : > { %2948 = vmatmul.mubr.f32.gmra.mxu1 %v3488_v6  ;;  %1269 = vmatprep.subr.mxu1 %v5081_v3 }
  0x39   : > { %771 = vmatpush2.msra.mxu0 %v709_v7  ;;  %1270 = vmatpush1.msra.mxu1 %v2674_v8  ;;  %v3632_v7 = vsel %vm555_vm0, %v587_v47, %v589_v55  ;;  %v701_v8 = vld [vmem:[%s5076_s2 + $0x98] sm:$0xff]  ;;  %v432_v47 = vrot.slane %v3383_v30, 1 }
  0x3a   : > { %772 = vmatprep.subr.mxu0 %v5081_v3  ;;  %1271 = vmatprep.subr.mxu1 %v5081_v3  ;;  %5153 = vst [vmem:[#allocation13_spill] sm:$0xff] %v3632_v7 }
  0x3b   : > { %773 = vmatpush2.msra.mxu0 %v708_v12  ;;  %2950 = vmatprep.mubr.f32.mxu1 %v3511_v13  ;;  %v594_v12 = vrot.slane %v3622_v63, 2 }
  0x3c   : > { %1272 = vmatpush1.msra.mxu1 %v2673_v15  ;;  %774 = vmatprep.subr.mxu0 %v5081_v3  ;;  %v3644_v15 = vld [vmem:[%s3360_s24 + $0xc0] sm:$0xff] }
  0x3d   : > { %2951 = vmatmul.mubr.f32.gmra.mxu1 %v3524_v18  ;;  %1273 = vmatprep.subr.mxu1 %v5081_v3  ;;  %v3668_v31 = vsel %vm555_vm0, %v592_v5, %v594_v12  ;;  %v596_v32 = vrot.slane %v3644_v15, 2 }
  0x3e   : > { %775 = vmatpush2.msra.mxu0 %v707_v19  ;;  %1274 = vmatpush1.msra.mxu1 %v2672_v20  ;;  %v3655_v19 = vsel %vm555_vm0, %v591_v4, %v592_v5  ;;  %v3658_v20 = vld [vmem:[%s3360_s24 + $0xd0] sm:$0x3]  ;;  %5155 = vst [vmem:[#allocation15_spill] sm:$0xff] %v3668_v31  ;;  %v2663_v4 = vld [vmem:[%s5076_s2 + $0x180] sm:$0xff] }
  0x3f   : > { %776 = vmatprep.subr.mxu0 %v5081_v3  ;;  %1275 = vmatprep.subr.mxu1 %v5081_v3  ;;  %5154 = vst [vmem:[#allocation14_spill] sm:$0xff] %v3655_v19  ;;  %v599_v46 = vrot.slane %v3658_v20, 2 }
  0x40   : > { %777 = vmatpush2.msra.mxu0 %v706_v24  ;;  %2953 = vmatprep.mubr.f32.mxu1 %v3547_v25  ;;  %v429_v24 = vrot.slane %v3374_v27, 1 }
  0x41   : > { %1276 = vmatpush1.msra.mxu1 %v2671_v29  ;;  %778 = vmatprep.subr.mxu0 %v5081_v3  ;;  %v430_v29 = vrot.slane %v3377_v28, 1 }
  0x42   : > { %2954 = vmatmul.mubr.f32.gmra.mxu1 %v3560_v33  ;;  %1277 = vmatprep.subr.mxu1 %v5081_v3 }
  0x43   : > { %779 = vmatpush2.msra.mxu0 %v705_v34  ;;  %1278 = vmatpush1.msra.mxu1 %v2670_v35  ;;  %v597_v34 = vrot.slane %v3647_v16, 2  ;;  %v3673_v35 = vld [vmem:[%s3360_s24 + $0xd8] sm:$0xff]  ;;  %v433_v12 = vsel %vm428_vm1, %v430_v29, %v432_v47  ;;  %v2693_v47 = vld [vmem:[%s5076_s2 + $0x270] sm:$0xff] }
  0x44   : > { %780 = vmatprep.subr.mxu0 %v5081_v3  ;;  %1279 = vmatprep.subr.mxu1 %v5081_v3  ;;  %v601_v55 = vrot.slane %v3673_v35, 2 }
  0x45   : > { %781 = vmatpush2.msra.mxu0 %v704_v42  ;;  %2956 = vmatprep.mubr.f32.mxu1 %v3583_v43  ;;  %v699_v42 = vld [vmem:[%s5076_s2 + $0x88] sm:$0xff]  ;;  %v3700_v30 = vsel %vm555_vm0, %v596_v32, %v597_v34  ;;  %v3708_v5 = vsel %vm555_vm0, %v597_v34, %v599_v46  ;;  %v434_v32 = vrot.slane %v3400_v37, 1  ;;  %v435_v34 = vrot.slane %v3403_v38, 1  ;;  %v3737_v46 = vld [vmem:[%s5076_s2 + $0x2f8] sm:$0xff] }
  0x46   : > { %1280 = vmatpush1.msra.mxu1 %v2669_v45  ;;  %782 = vmatprep.subr.mxu0 %v5081_v3  ;;  %v2664_v45 = vld [vmem:[%s5076_s2 + $0x188] sm:$0xff]  ;;  %5156 = vst [vmem:[#allocation16_spill] sm:$0xff] %v3700_v30  ;;  %5157 = vst [vmem:[#allocation17_spill] sm:$0xff] %v3708_v5 }
  0x47   : > { %2957 = vmatmul.mubr.f32.gmra.mxu1 %v3596_v48  ;;  %1281 = vmatprep.subr.mxu1 %v5081_v3  ;;  %v3833_v48 = vld [vmem:[%s3360_s24 + $0x148] sm:$0x3] }
  0x48   : > { %783 = vmatpush2.msra.mxu0 %v703_v51  ;;  %1282 = vmatpush1.msra.mxu1 %v2668_v54  ;;  %v698_v51 = vld [vmem:[%s5076_s2 + $0x80] sm:$0xff]  ;;  %v431_v54 = vsel %vm428_vm1, %v429_v24, %v430_v29  ;;  %v624_v43 = vrot.slane %v3833_v48, 2 }
  0x49   : > { %784 = vmatprep.subr.mxu0 %v5081_v3  ;;  %1283 = vmatprep.subr.mxu1 %v5081_v3 }
  0x4a   : > { %785 = vmatpush2.msra.mxu0 %v702_v59  ;;  %2959 = vmatprep.mubr.f32.mxu1 %v3619_v60  ;;  %v602_v59 = vrot.slane %v3676_v36, 2 }
  0x4b   : > { %1284 = vmatpush1.msra.mxu1 %v2667_v2  ;;  %786 = vmatprep.subr.mxu0 %v5081_v3  ;;  %v3697_v2 = vld [vmem:[%s3360_s24 + $0xe8] sm:$0x3] }
  0x4c   : > { %2960 = vmatmul.mubr.f32.gmra.mxu1 %v3632_v7  ;;  %1285 = vmatprep.subr.mxu1 %v5081_v3  ;;  %v3723_v24 = vsel %vm555_vm0, %v601_v55, %v602_v59 }
  0x4d   : > { %787 = vmatpush2.msra.mxu0 %v701_v8  ;;  %1286 = vmatpush1.msra.mxu1 %v2666_v9  ;;  %v3711_v8 = vld [vmem:[%s3360_s24 + $0xf0] sm:$0xff]  ;;  %v3714_v9 = vld [vmem:[%s3360_s24 + $0xf8] sm:$0xff]  ;;  %5158 = vst [vmem:[#allocation18_spill] sm:$0xff] %v3723_v24 }
  0x4e   : > { %788 = vmatprep.subr.mxu0 %v5081_v3  ;;  %1287 = vmatprep.subr.mxu1 %v5081_v3  ;;  %v606_v29 = vrot.slane %v3711_v8, 2 }
  0x4f   : > { %789 = vmatpush2.msra.mxu0 %v700_v17  ;;  %2962 = vmatprep.mubr.f32.mxu1 %v3655_v19  ;;  %v604_v17 = vrot.slane %v3697_v2, 2 }
  0x50   : > { %1288 = vmatpush1.msra.mxu1 %v2665_v21  ;;  %790 = vmatprep.subr.mxu0 %v5081_v3  ;;  %v2694_v21 = vld [vmem:[%s5076_s2 + $0x278] sm:$0xff] }
  0x51   : > { %2963 = vmatmul.mubr.f32.gmra.mxu1 %v3668_v31  ;;  %1289 = vmatprep.subr.mxu1 %v5081_v3 }
  0x52   : > { %791 = vmatpush2.msra.mxu0 %v699_v42  ;;  %1290 = vmatpush1.msra.mxu1 %v2664_v45  ;;  %v3728_v42 = vld [vmem:[%s3360_s24 + $0x100] sm:$0x3]  ;;  %v607_v45 = vrot.slane %v3714_v9, 2 }
  0x53   : > { %792 = vmatprep.subr.mxu0 %v5081_v3  ;;  %1291 = vmatprep.subr.mxu1 %v5081_v3  ;;  %v609_v55 = vrot.slane %v3728_v42, 2 }
  0x54   : > { %793 = vmatpush2.msra.mxu0 %v698_v51  ;;  %794 = vmatprep.mubr.f32.mxu0 %v431_v54  ;;  %v3747_v51 = vld [vmem:[%s3360_s24 + $0x110] sm:$0xff]  ;;  %v3751_v54 = vsel %vm555_vm0, %v602_v59, %v604_v17  ;;  %v3768_v59 = vsel %vm555_vm0, %v606_v29, %v607_v45 }
  0x55   : > { %2965 = vmatprep.mubr.f32.mxu1 %v3700_v30  ;;  %1292 = vmatpush1.msra.mxu1 %v2663_v4  ;;  %5159 = vst [vmem:[#allocation19_spill] sm:$0xff] %v3751_v54  ;;  %v2692_v4 = vld [vmem:[%s5076_s2 + $0x268] sm:$0xff]  ;;  %5160 = vst [vmem:[#allocation20_spill] sm:$0xff] %v3768_v59 }
  0x56   : > { %795 = vmatmul.mubr.f32.vlgmr.msra.gmra.mxu0 %v3374_v27  ;;  %2966 = vmatmul.mubr.f32.gmra.mxu1 %v3708_v5  ;;  %v3744_v27 = vld [vmem:[%s3360_s24 + $0x108] sm:$0xff]  ;;  %v3763_v5 = vld [vmem:[%s3360_s24 + $0x118] sm:$0x3] }
  0x57   : > { %1293 = vmatprep.subr.mxu1 %v5081_v3  ;;  %799 = vmatprep.mubr.f32.mxu0 %v433_v12  ;;  %v3759_v12 = vsel %vm428_vm1, %v434_v32, %v435_v34  ;;  %v611_v17 = vrot.slane %v3744_v27, 2  ;;  %v5161_v32 = vmov 0.0   ;;  %v614_v29 = vrot.slane %v3763_v5, 2 }
  0x58   : > { %1294 = vmatpush2.msra.mxu1 %v2694_v21  ;;  %2968 = vmatprep.mubr.f32.mxu1 %v3723_v24  ;;  %v437_v21 = vrot.slane %v3413_v41, 1  ;;  %v2691_v41 = vld [vmem:[%s5076_s2 + $0x260] sm:$0xff] }
  0x59   : > { %1295 = vmatprep.subr.mxu1 %v5081_v3  ;;  %2989 = vmatprep.subr.mxu0 %v3737_v46  ;;  %v612_v3 = vrot.slane %v3747_v51, 2  ;;  %v3778_v24 = vld [vmem:[%s3360_s24 + $0x120] sm:$0xff] }
  0x5a   : > { %1296 = vmatpush2.msra.mxu1 %v2693_v47  ;;  %800 = vmatmul.mubr.f32.gmra.mxu0 %v3377_v28  ;;  %v3781_v47 = vld [vmem:[%s3360_s24 + $0x128] sm:$0xff]  ;;  %v3785_v28 = vsel %vm555_vm0, %v607_v45, %v609_v55  ;;  %v3794_v30 = vsel %vm428_vm1, %v435_v34, %v437_v21  ;;  %v440_v45 = vrot.slane %v3431_v50, 1  ;;  %v3799_v55 = vld [vmem:[%s3360_s24 + $0x130] sm:$0x3]  ;;  %v3813_v21 = vld [vmem:[%s3360_s24 + $0x138] sm:$0xff] }
  0x5b   : > { %2969 = vmatmul.mubr.f32.gmra.mxu1 %v3751_v54  ;;  %1297 = vmatprep.subr.mxu1 %v5161_v32  ;;  %5162 = vst [vmem:[#allocation21_spill] sm:$0xff] %v3785_v28  ;;  %v2690_v54 = vld [vmem:[%s5076_s2 + $0x258] sm:$0xff]  ;;  %v3803_v31 = vsel %vm555_vm0, %v611_v17, %v612_v3  ;;  %v617_v19 = vrot.slane %v3781_v47, 2  ;;  %v2689_v34 = vld [vmem:[%s5076_s2 + $0x250] sm:$0xff]  ;;  %v3820_v17 = vsel %vm555_vm0, %v612_v3, %v614_v29  ;;  %v619_v7 = vrot.slane %v3799_v55, 2 }
  0x5c   : > { %1298 = vmatpush2.msra.mxu1 %v2692_v4  ;;  %804 = vmatprep.mubr.f32.mxu0 %v3759_v12  ;;  %v439_v4 = vrot.slane %v3428_v49, 1  ;;  %5163 = vst [vmem:[#allocation22_spill] sm:$0xff] %v3803_v31  ;;  %5164 = vst [vmem:[#allocation23_spill] sm:$0xff] %v3820_v17  ;;  %v621_v29 = vrot.slane %v3813_v21, 2 }
  0x5d   : > { %1299 = vmatprep.subr.mxu1 %v5161_v32  ;;  %2971 = vmatprep.mubr.f32.mxu1 %v3768_v59  ;;  %v616_v59 = vrot.slane %v3778_v24, 2 }
  0x5e   : > { %1300 = vmatpush2.msra.mxu1 %v2691_v41  ;;  %805 = vmatmul.mubr.f32.gmra.mxu0 %v3400_v37  ;;  %v3816_v41 = vld [vmem:[%s3360_s24 + $0x140] sm:$0xff]  ;;  %v3829_v60 = vsel %vm428_vm1, %v439_v4, %v440_v45  ;;  %v3847_v4 = vld [vmem:[%s3360_s24 + $0x150] sm:$0xff] }
  0x5f   : > { %2972 = vmatmul.mubr.f32.gmra.mxu1 %v3785_v28  ;;  %1301 = vmatprep.subr.mxu1 %v5161_v32  ;;  %v2688_v28 = vld [vmem:[%s5076_s2 + $0x248] sm:$0xff]  ;;  %v3837_v3 = vsel %vm555_vm0, %v616_v59, %v617_v19  ;;  %v3854_v59 = vsel %vm555_vm0, %v617_v19, %v619_v7  ;;  %v445_v7 = vrot.slane %v3466_v62, 1  ;;  %v3868_v19 = vld [vmem:[%s3360_s24 + $0x160] sm:$0x3] }
  0x60   : > { %1302 = vmatpush2.msra.mxu1 %v2690_v54  ;;  %809 = vmatprep.mubr.f32.mxu0 %v3794_v30  ;;  %v442_v54 = vrot.slane %v3442_v53, 1  ;;  %5165 = vst [vmem:[#allocation24_spill] sm:$0xff] %v3837_v3  ;;  %v2687_v53 = vld [vmem:[%s5076_s2 + $0x240] sm:$0xff]  ;;  %5166 = vst [vmem:[#allocation25_spill] sm:$0xff] %v3854_v59  ;;  %v629_v13 = vrot.slane %v3868_v19, 2 }
  0x61   : > { %1303 = vmatprep.subr.mxu1 %v5161_v32  ;;  %2974 = vmatprep.mubr.f32.mxu1 %v3803_v31  ;;  %v622_v31 = vrot.slane %v3816_v41, 2 }
  0x62   : > { %1304 = vmatpush2.msra.mxu1 %v2689_v34  ;;  %810 = vmatmul.mubr.f32.gmra.mxu0 %v3403_v38  ;;  %v3850_v34 = vld [vmem:[%s3360_s24 + $0x158] sm:$0xff]  ;;  %v3863_v33 = vsel %vm428_vm1, %v440_v45, %v442_v54  ;;  %v2685_v45 = vld [vmem:[%s5076_s2 + $0x230] sm:$0xff]  ;;  %v3882_v54 = vld [vmem:[%s3360_s24 + $0x168] sm:$0xff] }
  0x63   : > { %2975 = vmatmul.mubr.f32.gmra.mxu1 %v3820_v17  ;;  %1305 = vmatprep.subr.mxu1 %v5161_v32  ;;  %v2686_v17 = vld [vmem:[%s5076_s2 + $0x238] sm:$0xff]  ;;  %v3872_v25 = vsel %vm555_vm0, %v621_v29, %v622_v31  ;;  %v627_v18 = vrot.slane %v3850_v34, 2  ;;  %v3889_v29 = vsel %vm555_vm0, %v622_v31, %v624_v43  ;;  %v631_v31 = vrot.slane %v3882_v54, 2 }
  0x64   : > { %1306 = vmatpush2.msra.mxu1 %v2688_v28  ;;  %814 = vmatprep.mubr.f32.mxu0 %v3829_v60  ;;  %v444_v28 = vrot.slane %v3463_v61, 1  ;;  %5167 = vst [vmem:[#allocation26_spill] sm:$0xff] %v3872_v25  ;;  %5168 = vst [vmem:[#allocation27_spill] sm:$0xff] %v3889_v29 }
  0x65   : > { %1307 = vmatprep.subr.mxu1 %v5161_v32  ;;  %2977 = vmatprep.mubr.f32.mxu1 %v3837_v3  ;;  %v626_v3 = vrot.slane %v3847_v4, 2 }
  0x66   : > { %1308 = vmatpush2.msra.mxu1 %v2687_v53  ;;  %815 = vmatmul.mubr.f32.gmra.mxu0 %v3428_v49  ;;  %v3885_v53 = vld [vmem:[%s3360_s24 + $0x170] sm:$0xff]  ;;  %v3898_v6 = vsel %vm428_vm1, %v444_v28, %v445_v7  ;;  %v3917_v28 = vsel %vm555_vm0, %v627_v18, %v629_v13 }
  0x67   : > { %2978 = vmatmul.mubr.f32.gmra.mxu1 %v3854_v59  ;;  %1309 = vmatprep.subr.mxu1 %v5161_v32  ;;  %v2684_v59 = vld [vmem:[%s5076_s2 + $0x228] sm:$0xff]  ;;  %v3906_v43 = vsel %vm555_vm0, %v626_v3, %v627_v18  ;;  %v634_v3 = vrot.slane %v3902_v0, 2  ;;  %v2681_v18 = vld [vmem:[%s5076_s2 + $0x210] sm:$0xff] }
  0x68   : > { %1310 = vmatpush2.msra.mxu1 %v2686_v17  ;;  %819 = vmatprep.mubr.f32.mxu0 %v3863_v33  ;;  %v447_v17 = vrot.slane %v3478_v1, 1  ;;  %v2683_v1 = vld [vmem:[%s5076_s2 + $0x220] sm:$0xff] }
  0x69   : > { %1311 = vmatprep.subr.mxu1 %v5161_v32  ;;  %2980 = vmatprep.mubr.f32.mxu1 %v3872_v25  ;;  %v632_v25 = vrot.slane %v3885_v53, 2 }
  0x6a   : > { %1312 = vmatpush2.msra.mxu1 %v2685_v45  ;;  %820 = vmatmul.mubr.f32.gmra.mxu0 %v3431_v50  ;;  %v2682_v45 = vld [vmem:[%s5076_s2 + $0x218] sm:$0xff] }
  0x6b   : > { %2981 = vmatmul.mubr.f32.gmra.mxu1 %v3889_v29  ;;  %1313 = vmatprep.subr.mxu1 %v5161_v32  ;;  %v3926_v29 = vsel %vm428_vm1, %v445_v7, %v447_v17  ;;  %v3932_v13 = vsel %vm555_vm0, %v631_v31, %v632_v25  ;;  %v3941_v7 = vsel %vm555_vm0, %v632_v25, %v634_v3  ;;  %v2680_v17 = vld [vmem:[%s5076_s2 + $0x208] sm:$0xff]  ;;  %v2679_v25 = vld [vmem:[%s5076_s2 + $0x200] sm:$0xff]  ;;  %v454_v3 = vrot.slane %v3535_v22, 1 }
  0x6c   : > { %1314 = vmatpush2.msra.mxu1 %v2684_v59  ;;  %824 = vmatprep.mubr.f32.mxu0 %v3898_v6  ;;  %v449_v59 = vrot.slane %v3499_v10, 1 }
  0x6d   : > { %1315 = vmatprep.subr.mxu1 %v5161_v32  ;;  %2983 = vmatprep.mubr.f32.mxu1 %v3906_v43 }
  0x6e   : > { %1316 = vmatpush2.msra.mxu1 %v2683_v1  ;;  %825 = vmatmul.mubr.f32.gmra.mxu0 %v3463_v61  ;;  %v3949_v31 = vsel %vm428_vm1, %v449_v59, %v450_v57  ;;  %v452_v1 = vrot.slane %v3514_v14, 1  ;;  %v2726_v59 = vld [vmem:[%s5076_s2 + $0x378] sm:$0xff] }
  0x6f   : > { %2984 = vmatmul.mubr.f32.gmra.mxu1 %v3917_v28  ;;  %1317 = vmatprep.subr.mxu1 %v5161_v32 }
  0x70   : > { %1318 = vmatpush2.msra.mxu1 %v2682_v45  ;;  %829 = vmatprep.mubr.f32.mxu0 %v3926_v29  ;;  %v3962_v14 = vsel %vm428_vm1, %v450_v57, %v452_v1  ;;  %v455_v45 = vrot.slane %v3538_v23, 1  ;;  %v2709_v57 = vld [vmem:[%s5076_s2 + $0x2f0] sm:$0xff]  ;;  %v2723_v1 = vld [vmem:[%s5076_s2 + $0x360] sm:$0xff] }
  0x71   : > { %1319 = vmatprep.subr.mxu1 %v5161_v32  ;;  %2986 = vmatprep.mubr.f32.mxu1 %v3932_v13 }
  0x72   : > { %1320 = vmatpush2.msra.mxu1 %v2681_v18  ;;  %830 = vmatmul.mubr.f32.gmra.mxu0 %v3466_v62 }
  0x73   : > { %2987 = vmatmul.mubr.f32.gmra.mxu1 %v3941_v7  ;;  %1321 = vmatprep.subr.mxu1 %v5161_v32 }
  0x74   : > { %1322 = vmatpush2.msra.mxu1 %v2680_v17  ;;  %834 = vmatprep.mubr.f32.mxu0 %v3949_v31  ;;  %v459_v17 = vrot.slane %v3571_v39, 1 }
  0x75   : > { %1323 = vmatprep.subr.mxu1 %v5161_v32  ;;  %1325 = vmatprep.mubr.f32.mxu1 %v3759_v12  ;;  %v3982_v12 = vsel %vm428_vm1, %v454_v3, %v455_v45  ;;  %v462_v3 = vrot.slane %v3586_v44, 1 }
  0x76   : > { %1324 = vmatpush2.msra.mxu1 %v2679_v25  ;;  %2990 = vmatpush3.msra.mxu0 %v3737_v46  ;;  %v2725_v46 = vld [vmem:[%s5076_s2 + $0x370] sm:$0xff] }
  0x77   : > { %835 = vmatmul.mubr.f32.gmra.mxu0 %v3499_v10  ;;  %1326 = vmatmul.mubr.f32.vlgmr.msra.gmra.mxu1 %v3400_v37  ;;  %v457_v37 = vrot.slane %v3550_v26, 1  ;;  %v2724_v26 = vld [vmem:[%s5076_s2 + $0x368] sm:$0xff] }
  0x78   : > { %1856 = vmatprep.subr.mxu1 %v5161_v32  ;;  %839 = vmatprep.mubr.f32.mxu0 %v3962_v14 }
  0x79   : > { %1857 = vmatpush1.msra.mxu1 %v2726_v59  ;;  %1330 = vmatprep.mubr.f32.mxu1 %v3794_v30  ;;  %v2708_v30 = vld [vmem:[%s5076_s2 + $0x2e8] sm:$0xff]  ;;  %v3997_v18 = vsel %vm428_vm1, %v455_v45, %v457_v37  ;;  %v2722_v45 = vld [vmem:[%s5076_s2 + $0x358] sm:$0xff]  ;;  %v464_v59 = vrot.slane %v3607_v56, 1 }
  0x7a   : > { %1858 = vmatprep.subr.mxu1 %v5161_v32  ;;  %2991 = vmatprep.subr.mxu0 %v2709_v57 }
  0x7b   : > { %840 = vmatmul.mubr.f32.gmra.mxu0 %v3502_v11  ;;  %1331 = vmatmul.mubr.f32.gmra.mxu1 %v3403_v38  ;;  %v460_v38 = vrot.slane %v3574_v40, 1 }
  0x7c   : > { %1859 = vmatpush1.msra.mxu1 %v2725_v46  ;;  %844 = vmatprep.mubr.f32.mxu0 %v3982_v12  ;;  %v2721_v46 = vld [vmem:[%s5076_s2 + $0x350] sm:$0xff] }
  0x7d   : > { %1335 = vmatprep.mubr.f32.mxu1 %v3829_v60  ;;  %2992 = vmatpush3.msra.mxu0 %v2709_v57  ;;  %v4011_v25 = vsel %vm428_vm1, %v459_v17, %v460_v38  ;;  %v4026_v44 = vsel %vm428_vm1, %v460_v38, %v462_v3  ;;  %v465_v57 = vrot.slane %v3610_v58, 1  ;;  %v469_v17 = vrot.slane %v3644_v15, 1 }
  0x7e   : > { %1860 = vmatprep.subr.mxu1 %v5161_v32  ;;  %2993 = vmatprep.subr.mxu0 %v2708_v30  ;;  %v470_v38 = vrot.slane %v3647_v16, 1 }
  0x7f   : > { %845 = vmatmul.mubr.f32.gmra.mxu0 %v3535_v22  ;;  %1336 = vmatmul.mubr.f32.gmra.mxu1 %v3428_v49  ;;  %v2707_v49 = vld [vmem:[%s5076_s2 + $0x2e0] sm:$0xff]  ;;  %v4042_v37 = vsel %vm428_vm1, %v464_v59, %v465_v57  ;;  %v474_v59 = vrot.slane %v3673_v35, 1 }
  0x80   : > { %1861 = vmatpush1.msra.mxu1 %v2724_v26  ;;  %849 = vmatprep.mubr.f32.mxu0 %v3997_v18  ;;  %v2720_v26 = vld [vmem:[%s5076_s2 + $0x348] sm:$0xff]  ;;  %v4073_v3 = vsel %vm428_vm1, %v469_v17, %v470_v38  ;;  %v480_v17 = vrot.slane %v3714_v9, 1 }
  0x81   : > { %1340 = vmatprep.mubr.f32.mxu1 %v3863_v33  ;;  %1862 = vmatprep.subr.mxu1 %v5161_v32 }
  0x82   : > { %1863 = vmatpush1.msra.mxu1 %v2723_v1  ;;  %2994 = vmatpush3.msra.mxu0 %v2708_v30  ;;  %v467_v30 = vrot.slane %v3622_v63, 1  ;;  %v2719_v1 = vld [vmem:[%s5076_s2 + $0x340] sm:$0xff] }
  0x83   : > { %850 = vmatmul.mubr.f32.gmra.mxu0 %v3538_v23  ;;  %1341 = vmatmul.mubr.f32.gmra.mxu1 %v3431_v50  ;;  %v2706_v50 = vld [vmem:[%s5076_s2 + $0x2d8] sm:$0xff] }
  0x84   : > { %854 = vmatprep.mubr.f32.mxu0 %v4011_v25  ;;  %1345 = vmatprep.mubr.f32.mxu1 %v3898_v6  ;;  %v4057_v63 = vsel %vm428_vm1, %v465_v57, %v467_v30  ;;  %v475_v57 = vrot.slane %v3676_v36, 1  ;;  %v477_v30 = vrot.slane %v3697_v2, 1 }
  0x85   : > { %1864 = vmatprep.subr.mxu1 %v5161_v32  ;;  %2995 = vmatprep.subr.mxu0 %v2707_v49 }
  0x86   : > { %1865 = vmatpush1.msra.mxu1 %v2722_v45  ;;  %2996 = vmatpush3.msra.mxu0 %v2707_v49  ;;  %v472_v49 = vrot.slane %v3658_v20, 1  ;;  %v2718_v45 = vld [vmem:[%s5076_s2 + $0x338] sm:$0xff]  ;;  %v4119_v2 = vsel %vm428_vm1, %v475_v57, %v477_v30  ;;  %v489_v30 = vrot.slane %v3778_v24, 1 }
  0x87   : > { %855 = vmatmul.mubr.f32.gmra.mxu0 %v3571_v39  ;;  %1346 = vmatmul.mubr.f32.gmra.mxu1 %v3463_v61  ;;  %v2705_v61 = vld [vmem:[%s5076_s2 + $0x2d0] sm:$0xff] }
  0x88   : > { %859 = vmatprep.mubr.f32.mxu0 %v4026_v44  ;;  %1350 = vmatprep.mubr.f32.mxu1 %v3926_v29  ;;  %v4088_v20 = vsel %vm428_vm1, %v470_v38, %v472_v49  ;;  %v2715_v38 = vld [vmem:[%s5076_s2 + $0x320] sm:$0xff]  ;;  %v2714_v49 = vld [vmem:[%s5076_s2 + $0x318] sm:$0xff] }
  0x89   : > { %1866 = vmatprep.subr.mxu1 %v5161_v32  ;;  %2997 = vmatprep.subr.mxu0 %v2706_v50 }
  0x8a   : > { %1867 = vmatpush1.msra.mxu1 %v2721_v46  ;;  %2998 = vmatpush3.msra.mxu0 %v2706_v50  ;;  %v2717_v50 = vld [vmem:[%s5076_s2 + $0x330] sm:$0xff]  ;;  %v4104_v46 = vsel %vm428_vm1, %v474_v59, %v475_v57 }
  0x8b   : > { %860 = vmatmul.mubr.f32.gmra.mxu0 %v3574_v40  ;;  %1351 = vmatmul.mubr.f32.gmra.mxu1 %v3466_v62  ;;  %v2704_v62 = vld [vmem:[%s5076_s2 + $0x2c8] sm:$0xff]  ;;  %v2713_v59 = vld [vmem:[%s5076_s2 + $0x310] sm:$0xff] }
  0x8c   : > { %864 = vmatprep.mubr.f32.mxu0 %v4042_v37  ;;  %1355 = vmatprep.mubr.f32.mxu1 %v3949_v31 }
  0x8d   : > { %1868 = vmatprep.subr.mxu1 %v5161_v32  ;;  %2999 = vmatprep.subr.mxu0 %v2705_v61 }
  0x8e   : > { %1869 = vmatpush1.msra.mxu1 %v2720_v26  ;;  %3000 = vmatpush3.msra.mxu0 %v2705_v61  ;;  %v2716_v61 = vld [vmem:[%s5076_s2 + $0x328] sm:$0xff]  ;;  %v479_v26 = vrot.slane %v3711_v8, 1 }
  0x8f   : > { %865 = vmatmul.mubr.f32.gmra.mxu0 %v3607_v56  ;;  %1356 = vmatmul.mubr.f32.gmra.mxu1 %v3499_v10  ;;  %v2703_v10 = vld [vmem:[%s5076_s2 + $0x2c0] sm:$0xff] }
  0x90   : > { %869 = vmatprep.mubr.f32.mxu0 %v4057_v63  ;;  %1360 = vmatprep.mubr.f32.mxu1 %v3962_v14 }
  0x91   : > { %1870 = vmatprep.subr.mxu1 %v5161_v32  ;;  %3001 = vmatprep.subr.mxu0 %v2704_v62 }
  0x92   : > { %1871 = vmatpush1.msra.mxu1 %v2719_v1  ;;  %3002 = vmatpush3.msra.mxu0 %v2704_v62  ;;  %v4135_v62 = vsel %vm428_vm1, %v479_v26, %v480_v17  ;;  %v482_v1 = vrot.slane %v3728_v42, 1 }
  0x93   : > { %870 = vmatmul.mubr.f32.gmra.mxu0 %v3610_v58  ;;  %1361 = vmatmul.mubr.f32.gmra.mxu1 %v3502_v11  ;;  %v2702_v11 = vld [vmem:[%s5076_s2 + $0x2b8] sm:$0xff] }
  0x94   : > { %874 = vmatprep.mubr.f32.mxu0 %v4073_v3  ;;  %1365 = vmatprep.mubr.f32.mxu1 %v3982_v12  ;;  %v4150_v42 = vsel %vm428_vm1, %v480_v17, %v482_v1  ;;  %v492_v17 = vrot.slane %v3799_v55, 1  ;;  %v495_v1 = vrot.slane %v3816_v41, 1 }
  0x95   : > { %1872 = vmatprep.subr.mxu1 %v5161_v32  ;;  %3003 = vmatprep.subr.mxu0 %v2703_v10 }
  0x96   : > { %1873 = vmatpush1.msra.mxu1 %v2718_v45  ;;  %3004 = vmatpush3.msra.mxu0 %v2703_v10  ;;  %v484_v10 = vrot.slane %v3744_v27, 1  ;;  %v485_v45 = vrot.slane %v3747_v51, 1 }
  0x97   : > { %875 = vmatmul.mubr.f32.gmra.mxu0 %v3644_v15  ;;  %1366 = vmatmul.mubr.f32.gmra.mxu1 %v3535_v22  ;;  %v2701_v22 = vld [vmem:[%s5076_s2 + $0x2b0] sm:$0xff] }
  0x98   : > { %879 = vmatprep.mubr.f32.mxu0 %v4088_v20  ;;  %1370 = vmatprep.mubr.f32.mxu1 %v3997_v18  ;;  %v4166_v57 = vsel %vm428_vm1, %v484_v10, %v485_v45  ;;  %v497_v10 = vrot.slane %v3833_v48, 1  ;;  %v499_v48 = vrot.slane %v3847_v4, 1 }
  0x99   : > { %1874 = vmatprep.subr.mxu1 %v5161_v32  ;;  %3005 = vmatprep.subr.mxu0 %v2702_v11 }
  0x9a   : > { %1875 = vmatpush1.msra.mxu1 %v2717_v50  ;;  %3006 = vmatpush3.msra.mxu0 %v2702_v11  ;;  %v487_v11 = vrot.slane %v3763_v5, 1  ;;  %v2712_v50 = vld [vmem:[%s5076_s2 + $0x308] sm:$0xff] }
  0x9b   : > { %880 = vmatmul.mubr.f32.gmra.mxu0 %v3647_v16  ;;  %1371 = vmatmul.mubr.f32.gmra.mxu1 %v3538_v23  ;;  %v2700_v23 = vld [vmem:[%s5076_s2 + $0x2a8] sm:$0xff] }
  0x9c   : > { %884 = vmatprep.mubr.f32.mxu0 %v4104_v46  ;;  %1375 = vmatprep.mubr.f32.mxu1 %v4011_v25  ;;  %v4181_v5 = vsel %vm428_vm1, %v485_v45, %v487_v11  ;;  %v4243_v45 = vsel %vm428_vm1, %v495_v1, %v497_v10  ;;  %v502_v11 = vrot.slane %v3868_v19, 1  ;;  %v504_v19 = vrot.slane %v3882_v54, 1  ;;  %v5185_v10 = vld [vmem:[#allocation9_spill] sm:$0xff] }
  0x9d   : > { %1876 = vmatprep.subr.mxu1 %v5161_v32  ;;  %3007 = vmatprep.subr.mxu0 %v2701_v22  ;;  %5172 = vst [vmem:[#allocation31_spill] sm:$0xff] %v4243_v45 }
  0x9e   : > { %1877 = vmatpush1.msra.mxu1 %v2716_v61  ;;  %3008 = vmatpush3.msra.mxu0 %v2701_v22  ;;  %v490_v22 = vrot.slane %v3781_v47, 1  ;;  %v2711_v61 = vld [vmem:[%s5076_s2 + $0x300] sm:$0xff] }
  0x9f   : > { %885 = vmatmul.mubr.f32.gmra.mxu0 %v3673_v35  ;;  %1376 = vmatmul.mubr.f32.gmra.mxu1 %v3571_v39  ;;  %v2699_v39 = vld [vmem:[%s5076_s2 + $0x2a0] sm:$0xff] }
  0xa0   : > { %889 = vmatprep.mubr.f32.mxu0 %v4119_v2  ;;  %1380 = vmatprep.mubr.f32.mxu1 %v4026_v44  ;;  %v4197_v26 = vsel %vm428_vm1, %v489_v30, %v490_v22  ;;  %v4212_v55 = vsel %vm428_vm1, %v490_v22, %v492_v17  ;;  %v507_v22 = vrot.slane %v3902_v0, 1  ;;  %v2735_v0 = vld [vmem:[%s5076_s2 + $0x3c0] sm:$0xff]  ;;  %v5178_v17 = vld [vmem:[#allocation4_spill] sm:$0xff] }
  0xa1   : > { %1878 = vmatprep.subr.mxu1 %v5161_v32  ;;  %3009 = vmatprep.subr.mxu0 %v2700_v23  ;;  %5169 = vst [vmem:[#allocation28_spill] sm:$0xff] %v4197_v26  ;;  %5170 = vst [vmem:[#allocation29_spill] sm:$0xff] %v4212_v55 }
  0xa2   : > { %1879 = vmatpush1.msra.mxu1 %v2715_v38  ;;  %3010 = vmatpush3.msra.mxu0 %v2700_v23  ;;  %v2742_v23 = vld [vmem:[%s5076_s2 + $0x3f8] sm:$0xff]  ;;  %v494_v38 = vrot.slane %v3813_v21, 1 }
  0xa3   : > { %890 = vmatmul.mubr.f32.gmra.mxu0 %v3676_v36  ;;  %1381 = vmatmul.mubr.f32.gmra.mxu1 %v3574_v40  ;;  %v2698_v40 = vld [vmem:[%s5076_s2 + $0x298] sm:$0xff] }
  0xa4   : > { %894 = vmatprep.mubr.f32.mxu0 %v4135_v62  ;;  %1385 = vmatprep.mubr.f32.mxu1 %v4042_v37 }
  0xa5   : > { %1880 = vmatprep.subr.mxu1 %v5161_v32  ;;  %3011 = vmatprep.subr.mxu0 %v2699_v39 }
  0xa6   : > { %1881 = vmatpush1.msra.mxu1 %v2714_v49  ;;  %3012 = vmatpush3.msra.mxu0 %v2699_v39  ;;  %v2741_v39 = vld [vmem:[%s5076_s2 + $0x3f0] sm:$0xff]  ;;  %v4230_v49 = vsel %vm428_vm1, %v494_v38, %v495_v1  ;;  %v2731_v38 = vld [vmem:[%s5076_s2 + $0x3a0] sm:$0xff] }
  0xa7   : > { %895 = vmatmul.mubr.f32.gmra.mxu0 %v3711_v8  ;;  %1386 = vmatmul.mubr.f32.gmra.mxu1 %v3607_v56  ;;  %v2697_v56 = vld [vmem:[%s5076_s2 + $0x290] sm:$0xff]  ;;  %5171 = vst [vmem:[#allocation30_spill] sm:$0xff] %v4230_v49  ;;  %v2755_v1 = vld [vmem:[%s5076_s2 + $0x460] sm:$0xff] }
  0xa8   : > { %899 = vmatprep.mubr.f32.mxu0 %v4150_v42  ;;  %1390 = vmatprep.mubr.f32.mxu1 %v4057_v63 }
  0xa9   : > { %1882 = vmatprep.subr.mxu1 %v5161_v32  ;;  %3013 = vmatprep.subr.mxu0 %v2698_v40 }
  0xaa   : > { %1883 = vmatpush1.msra.mxu1 %v2713_v59  ;;  %3014 = vmatpush3.msra.mxu0 %v2698_v40  ;;  %v500_v40 = vrot.slane %v3850_v34, 1 }
  0xab   : > { %900 = vmatmul.mubr.f32.gmra.mxu0 %v3714_v9  ;;  %1391 = vmatmul.mubr.f32.gmra.mxu1 %v3610_v58  ;;  %v2696_v58 = vld [vmem:[%s5076_s2 + $0x288] sm:$0xff] }
  0xac   : > { %904 = vmatprep.mubr.f32.mxu0 %v4166_v57  ;;  %1395 = vmatprep.mubr.f32.mxu1 %v4073_v3  ;;  %v4256_v59 = vsel %vm428_vm1, %v499_v48, %v500_v40  ;;  %v2754_v48 = vld [vmem:[%s5076_s2 + $0x458] sm:$0xff] }
  0xad   : > { %1884 = vmatprep.subr.mxu1 %v5161_v32  ;;  %3015 = vmatprep.subr.mxu0 %v2697_v56  ;;  %5173 = vst [vmem:[#allocation32_spill] sm:$0xff] %v4256_v59 }
  0xae   : > { %1885 = vmatpush1.msra.mxu1 %v2712_v50  ;;  %3016 = vmatpush3.msra.mxu0 %v2697_v56  ;;  %v4268_v56 = vsel %vm428_vm1, %v500_v40, %v502_v11  ;;  %v505_v50 = vrot.slane %v3885_v53, 1  ;;  %v5186_v40 = vld [vmem:[#allocation10_spill] sm:$0xff]  ;;  %v4372_v11 = vld [vmem:[%s4344_s11 + $0x10] sm:$0x3] }
  0xaf   : > { %905 = vmatmul.mubr.f32.gmra.mxu0 %v3744_v27  ;;  %1396 = vmatmul.mubr.f32.gmra.mxu1 %v3644_v15  ;;  %v2695_v15 = vld [vmem:[%s5076_s2 + $0x280] sm:$0xff]  ;;  %5174 = vst [vmem:[#allocation33_spill] sm:$0xff] %v4268_v56 }
  0xb0   : > { %909 = vmatprep.mubr.f32.mxu0 %v4181_v5  ;;  %1400 = vmatprep.mubr.f32.mxu1 %v4088_v20  ;;  %v4281_v30 = vsel %vm428_vm1, %v504_v19, %v505_v50  ;;  %v2729_v19 = vld [vmem:[%s5076_s2 + $0x390] sm:$0xff] }
  0xb1   : > { %1886 = vmatprep.subr.mxu1 %v5161_v32  ;;  %3017 = vmatprep.subr.mxu0 %v2696_v58  ;;  %5175 = vst [vmem:[#allocation34_spill] sm:$0xff] %v4281_v30 }
  0xb2   : > { %1887 = vmatpush1.msra.mxu1 %v2711_v61  ;;  %3018 = vmatpush3.msra.mxu0 %v2696_v58  ;;  %v4293_v58 = vsel %vm428_vm1, %v505_v50, %v507_v22  ;;  %v2757_v61 = vld [vmem:[%s5076_s2 + $0x470] sm:$0xff] }
  0xb3   : > { %910 = vmatmul.mubr.f32.gmra.mxu0 %v3747_v51  ;;  %1401 = vmatmul.mubr.f32.gmra.mxu1 %v3647_v16  ;;  %v4219_v16 = vld [vmem:[%s5076_s2 + $0x478] sm:$0xff]  ;;  %5176 = vst [vmem:[#allocation35_spill] sm:$0xff] %v4293_v58  ;;  %v2753_v50 = vld [vmem:[%s5076_s2 + $0x450] sm:$0xff] }
  0xb4   : > { %914 = vmatprep.mubr.f32.mxu0 %v4197_v26  ;;  %1405 = vmatprep.mubr.f32.mxu1 %v4104_v46 }
  0xb5   : > { %1888 = vmatprep.subr.mxu1 %v5161_v32  ;;  %3019 = vmatprep.subr.mxu0 %v2695_v15 }
  0xb6   : > { %1889 = vmatpush2.msra.mxu1 %v2742_v23  ;;  %3020 = vmatpush3.msra.mxu0 %v2695_v15  ;;  %v2756_v15 = vld [vmem:[%s5076_s2 + $0x468] sm:$0xff]  ;;  %v5180_v23 = vld [vmem:[#allocation6_spill] sm:$0xff] }
  0xb7   : > { %915 = vmatmul.mubr.f32.gmra.mxu0 %v3778_v24  ;;  %1406 = vmatmul.mubr.f32.gmra.mxu1 %v3673_v35  ;;  %v2740_v35 = vld [vmem:[%s5076_s2 + $0x3e8] sm:$0xff] }
  0xb8   : > { %919 = vmatprep.mubr.f32.mxu0 %v4212_v55  ;;  %1410 = vmatprep.mubr.f32.mxu1 %v4119_v2 }
  0xb9   : > { %1890 = vmatprep.subr.mxu1 %v5161_v32  ;;  %3069 = vmatprep.subr.mxu0 %v4219_v16 }
  0xba   : > { %1891 = vmatpush2.msra.mxu1 %v2741_v39  ;;  %v4356_v39 = vld [vmem:[%s4344_s11 + $0x8] sm:$0xff] }
  0xbb   : > { %920 = vmatmul.mubr.f32.gmra.mxu0 %v3781_v47  ;;  %1411 = vmatmul.mubr.f32.gmra.mxu1 %v3676_v36  ;;  %v2739_v36 = vld [vmem:[%s5076_s2 + $0x3e0] sm:$0xff]  ;;  %5184 = vst [vmem:[#allocation4_spill] sm:$0xff] %v4356_v39 }
  0xbc   : > { %924 = vmatprep.mubr.f32.mxu0 %v4230_v49  ;;  %1415 = vmatprep.mubr.f32.mxu1 %v4135_v62 }
  0xbd   : > { %1892 = vmatprep.subr.mxu1 %v5161_v32 }
  0xbe   : > { %1893 = vmatpush2.msra.mxu1 %v2740_v35  ;;  %v2730_v35 = vld [vmem:[%s5076_s2 + $0x398] sm:$0xff] }
  0xbf   : > { %925 = vmatmul.mubr.f32.gmra.mxu0 %v3813_v21  ;;  %1416 = vmatmul.mubr.f32.gmra.mxu1 %v3711_v8  ;;  %v2738_v8 = vld [vmem:[%s5076_s2 + $0x3d8] sm:$0xff] }
  0xc0   : > { %929 = vmatprep.mubr.f32.mxu0 %v4243_v45  ;;  %1420 = vmatprep.mubr.f32.mxu1 %v4150_v42 }
  0xc1   : > { %1894 = vmatprep.subr.mxu1 %v5161_v32 }
  0xc2   : > { %1895 = vmatpush2.msra.mxu1 %v2739_v36 }
  0xc3   : > { %930 = vmatmul.mubr.f32.gmra.mxu0 %v3816_v41  ;;  %1421 = vmatmul.mubr.f32.gmra.mxu1 %v3714_v9  ;;  %v2737_v9 = vld [vmem:[%s5076_s2 + $0x3d0] sm:$0xff] }
  0xc4   : > { %934 = vmatprep.mubr.f32.mxu0 %v4256_v59  ;;  %1425 = vmatprep.mubr.f32.mxu1 %v4166_v57 }
  0xc5   : > { %1896 = vmatprep.subr.mxu1 %v5161_v32 }
  0xc6   : > { %1897 = vmatpush2.msra.mxu1 %v2738_v8  ;;  %v5187_v8 = vld [vmem:[#allocation11_spill] sm:$0xff] }
  0xc7   : > { %935 = vmatmul.mubr.f32.gmra.mxu0 %v3847_v4  ;;  %1426 = vmatmul.mubr.f32.gmra.mxu1 %v3744_v27  ;;  %v2736_v27 = vld [vmem:[%s5076_s2 + $0x3c8] sm:$0xff] }
  0xc8   : > { %939 = vmatprep.mubr.f32.mxu0 %v4268_v56  ;;  %1430 = vmatprep.mubr.f32.mxu1 %v4181_v5 }
  0xc9   : > { %1898 = vmatprep.subr.mxu1 %v5161_v32 }
  0xca   : > { %1899 = vmatpush2.msra.mxu1 %v2737_v9  ;;  %v5188_v9 = vld [vmem:[#allocation12_spill] sm:$0xff] }
  0xcb   : > { %940 = vmatmul.mubr.f32.gmra.mxu0 %v3850_v34  ;;  %1431 = vmatmul.mubr.f32.gmra.mxu1 %v3747_v51  ;;  %v2734_v51 = vld [vmem:[%s5076_s2 + $0x3b8] sm:$0xff] }
  0xcc   : > { %944 = vmatprep.mubr.f32.mxu0 %v4281_v30  ;;  %1435 = vmatprep.mubr.f32.mxu1 %v4197_v26  ;;  %v2744_v26 = vld [vmem:[%s5076_s2 + $0x408] sm:$0xff] }
  0xcd   : > { %1900 = vmatprep.subr.mxu1 %v5161_v32 }
  0xce   : > { %1901 = vmatpush2.msra.mxu1 %v2736_v27  ;;  %v5190_v27 = vld [vmem:[#allocation13_spill] sm:$0xff] }
  0xcf   : > { %945 = vmatmul.mubr.f32.gmra.mxu0 %v3882_v54  ;;  %1436 = vmatmul.mubr.f32.gmra.mxu1 %v3778_v24  ;;  %v5177_v24 = vld [vmem:[#allocation3_spill] sm:$0xff] }
  0xd0   : > { %949 = vmatprep.mubr.f32.mxu0 %v4293_v58  ;;  %1440 = vmatprep.mubr.f32.mxu1 %v4212_v55  ;;  %v637_v55 = vrot.slane %v4356_v39, 2 }
  0xd1   : > { %1902 = vmatprep.subr.mxu1 %v5161_v32 }
  0xd2   : > { %1903 = vmatpush2.msra.mxu1 %v2735_v0  ;;  %v2728_v0 = vld [vmem:[%s5076_s2 + $0x388] sm:$0xff] }
  0xd3   : > { %950 = vmatmul.mubr.f32.gmra.mxu0 %v3885_v53  ;;  %1441 = vmatmul.mubr.f32.gmra.mxu1 %v3781_v47  ;;  %v2733_v47 = vld [vmem:[%s5076_s2 + $0x3b0] sm:$0xff] }
  0xd4   : > { %1445 = vmatprep.mubr.f32.mxu1 %v4230_v49  ;;  %3021 = vmatprep.mubr.f32.mxu0 %v3439_v52  ;;  %v5179_v52 = vld [vmem:[#allocation5_spill] sm:$0xff] }
  0xd5   : > { %1904 = vmatprep.subr.mxu1 %v5161_v32 }
  0xd6   : > { %1905 = vmatpush2.msra.mxu1 %v2734_v51  ;;  %v2752_v51 = vld [vmem:[%s5076_s2 + $0x448] sm:$0xff] }
  0xd7   : > { %1446 = vmatmul.mubr.f32.gmra.mxu1 %v3813_v21  ;;  %3022 = vmatmul.mubr.f32.vlgmr.msra.gmra.mxu0 %v5177_v24  ;;  %v2732_v21 = vld [vmem:[%s5076_s2 + $0x3a8] sm:$0xff]  ;;  %v5191_v24 = vld [vmem:[#allocation14_spill] sm:$0xff] }
  0xd8   : > { %1450 = vmatprep.mubr.f32.mxu1 %v4243_v45  ;;  %3024 = vmatprep.mubr.f32.mxu0 %v5178_v17 }
  0xd9   : > { %1906 = vmatprep.subr.mxu1 %v5161_v32  ;;  %3070 = vmatpush3.msra.mxu0 %v4219_v16  ;;  %v4353_v16 = vld [vmem:[%s4344_s11] sm:$0xff] }
  0xda   : > { %1907 = vmatpush2.msra.mxu1 %v2733_v47  ;;  %3071 = vmatprep.subr.mxu0 %v2757_v61  ;;  %5183 = vst [vmem:[#allocation3_spill] sm:$0xff] %v4353_v16  ;;  %v509_v36 = vrot.slane %v4353_v16, 1 }
  0xdb   : > { %1451 = vmatmul.mubr.f32.gmra.mxu1 %v3816_v41  ;;  %3025 = vmatmul.mubr.f32.gmra.mxu0 %v5179_v52  ;;  %v5181_v41 = vld [vmem:[#allocation7_spill] sm:$0xff] }
  0xdc   : > { %1455 = vmatprep.mubr.f32.mxu1 %v4256_v59  ;;  %3027 = vmatprep.mubr.f32.mxu0 %v5180_v23  ;;  %v5204_v59 = vld [vmem:[#allocation26_spill] sm:$0xff] }
  0xdd   : > { %1908 = vmatprep.subr.mxu1 %v5161_v32  ;;  %3072 = vmatpush3.msra.mxu0 %v2757_v61  ;;  %v5193_v61 = vld [vmem:[#allocation15_spill] sm:$0xff] }
  0xde   : > { %1909 = vmatpush2.msra.mxu1 %v2732_v21  ;;  %3073 = vmatprep.subr.mxu0 %v2756_v15  ;;  %v2727_v21 = vld [vmem:[%s5076_s2 + $0x380] sm:$0xff] }
  0xdf   : > { %1456 = vmatmul.mubr.f32.gmra.mxu1 %v3847_v4  ;;  %3028 = vmatmul.mubr.f32.gmra.mxu0 %v5181_v41  ;;  %v5182_v4 = vld [vmem:[#allocation8_spill] sm:$0xff] }
  0xe0   : > { %1460 = vmatprep.mubr.f32.mxu1 %v4268_v56  ;;  %3030 = vmatprep.mubr.f32.mxu0 %v5182_v4  ;;  %v3180_v56 = vld [vmem:[%s3360_s24 + $0x50] sm:$0xff] }
  0xe1   : > { %1910 = vmatprep.subr.mxu1 %v5161_v32  ;;  %3074 = vmatpush3.msra.mxu0 %v2756_v15  ;;  %v2751_v15 = vld [vmem:[%s5076_s2 + $0x440] sm:$0xff] }
  0xe2   : > { %1911 = vmatpush2.msra.mxu1 %v2731_v38  ;;  %3075 = vmatprep.subr.mxu0 %v2755_v1  ;;  %v5194_v38 = vld [vmem:[#allocation16_spill] sm:$0xff] }
  0xe3   : > { %1461 = vmatmul.mubr.f32.gmra.mxu1 %v3850_v34  ;;  %3031 = vmatmul.mubr.f32.gmra.mxu0 %v5185_v10  ;;  %v510_v34 = vrot.slane %v4356_v39, 1 }
  0xe4   : > { %1465 = vmatprep.mubr.f32.mxu1 %v4281_v30  ;;  %3033 = vmatprep.mubr.f32.mxu0 %v5186_v40  ;;  %v5202_v30 = vld [vmem:[#allocation24_spill] sm:$0xff] }
  0xe5   : > { %1912 = vmatprep.subr.mxu1 %v5161_v32  ;;  %3076 = vmatpush3.msra.mxu0 %v2755_v1  ;;  %v4386_v22 = vsel %vm428_vm1, %v509_v36, %v510_v34  ;;  %v2750_v36 = vld [vmem:[%s5076_s2 + $0x438] sm:$0xff] }
  0xe6   : > { %1913 = vmatpush2.msra.mxu1 %v2730_v35  ;;  %3077 = vmatprep.subr.mxu0 %v2754_v48  ;;  %5189 = vst [vmem:[#allocation5_spill] sm:$0xff] %v4386_v22  ;;  %v5195_v35 = vld [vmem:[#allocation17_spill] sm:$0xff] }
  0xe7   : > { %1466 = vmatmul.mubr.f32.gmra.mxu1 %v3882_v54  ;;  %3034 = vmatmul.mubr.f32.gmra.mxu0 %v5187_v8  ;;  %v512_v54 = vrot.slane %v4372_v11, 1 }
  0xe8   : > { %1470 = vmatprep.mubr.f32.mxu1 %v4293_v58  ;;  %3036 = vmatprep.mubr.f32.mxu0 %v5188_v9 }
  0xe9   : > { %1914 = vmatprep.subr.mxu1 %v5161_v32  ;;  %3078 = vmatpush3.msra.mxu0 %v2754_v48  ;;  %v4401_v47 = vsel %vm428_vm1, %v510_v34, %v512_v54  ;;  %v5196_v34 = vld [vmem:[#allocation18_spill] sm:$0xff]  ;;  %v2749_v54 = vld [vmem:[%s5076_s2 + $0x430] sm:$0xff] }
  0xea   : > { %1915 = vmatpush2.msra.mxu1 %v2729_v19  ;;  %3079 = vmatprep.subr.mxu0 %v2753_v50  ;;  %5192 = vst [vmem:[#allocation6_spill] sm:$0xff] %v4401_v47 }
  0xeb   : > { %1471 = vmatmul.mubr.f32.gmra.mxu1 %v3885_v53  ;;  %3037 = vmatmul.mubr.f32.gmra.mxu0 %v5190_v27 }
  0xec   : > { %1475 = vmatprep.mubr.f32.mxu1 %v4386_v22  ;;  %3039 = vmatprep.mubr.f32.mxu0 %v5191_v24  ;;  %v3179_v22 = vld [vmem:[%s3360_s24 + $0x48] sm:$0xff] }
  0xed   : > { %1916 = vmatprep.subr.mxu1 %v5161_v32  ;;  %3080 = vmatpush3.msra.mxu0 %v2753_v50  ;;  %v3177_v50 = vld [vmem:[%s3360_s24 + $0x30] sm:$0xff] }
  0xee   : > { %1917 = vmatpush2.msra.mxu1 %v2728_v0  ;;  %v4403_v53 = vpop.f32.mrf.mxu1  ;;  %3081 = vmatprep.subr.mxu0 %v2752_v51  ;;  %v5198_v0 = vld [vmem:[#allocation20_spill] sm:$0xff] }
  0xef   : > { %1476 = vmatmul.mubr.f32.gmra.mxu1 %v4353_v16  ;;  %3040 = vmatmul.mubr.f32.gmra.mxu0 %v5193_v61 }
  0xf0   : > { %1480 = vmatprep.mubr.f32.mxu1 %v4401_v47  ;;  %3042 = vmatprep.mubr.f32.mxu0 %v5194_v38  ;;  %v4415_v1 = vpop.f32.mrf.mxu1  ;;  %v5200_v47 = vld [vmem:[#allocation22_spill] sm:$0xff] }
  0xf1   : > { %1918 = vmatprep.subr.mxu1 %v5161_v32  ;;  %3082 = vmatpush3.msra.mxu0 %v2752_v51  ;;  %v5197_v32 = vld [vmem:[#allocation19_spill] sm:$0xff] }
  0xf2   : > { %1919 = vmatpush2.msra.mxu1 %v2727_v21  ;;  %3083 = vmatprep.subr.mxu0 %v2751_v15  ;;  %v5199_v21 = vld [vmem:[#allocation21_spill] sm:$0xff] }
  0xf3   : > { %1481 = vmatmul.mubr.f32.gmra.mxu1 %v4356_v39  ;;  %3043 = vmatmul.mubr.f32.gmra.mxu0 %v5195_v35  ;;  %v4420_v48 = vpop.f32.mrf.mxu1 }
  0xf4   : > { %3045 = vmatprep.mubr.f32.mxu0 %v5196_v34  ;;  %1920 = vmatprep.mubr.f32.mxu1 %v3829_v60 }
  0xf5   : > { %v4427_v19 = vpop.f32.mrf.mxu1  ;;  %3084 = vmatpush3.msra.mxu0 %v2751_v15  ;;  %v3178_v15 = vld [vmem:[%s3360_s24 + $0x38] sm:$0xff] }
  0xf6   : > { %3085 = vmatprep.subr.mxu0 %v2750_v36 }
  0xf7   : > { %3046 = vmatmul.mubr.f32.gmra.mxu0 %v5197_v32  ;;  %1921 = vmatmul.mubr.f32.vlgmr.msra.gmra.mxu1 %v3177_v50  ;;  %v2748_v50 = vld [vmem:[%s5076_s2 + $0x428] sm:$0xff] }
  0xf8   : > { %3048 = vmatprep.mubr.f32.mxu0 %v5198_v0  ;;  %1925 = vmatprep.mubr.f32.mxu1 %v3863_v33  ;;  %v4436_v51 = vpop.f32.mrf.mxu1 }
  0xf9   : > { %3086 = vmatpush3.msra.mxu0 %v2750_v36  ;;  %v5201_v36 = vld [vmem:[#allocation23_spill] sm:$0xff] }
  0xfa   : > { %v4438_v60 = vpop.f32.mrf.mxu1  ;;  %3087 = vmatprep.subr.mxu0 %v2749_v54 }
  0xfb   : > { %3049 = vmatmul.mubr.f32.gmra.mxu0 %v5199_v21  ;;  %1926 = vmatmul.mubr.f32.gmra.mxu1 %v3178_v15  ;;  %v2747_v15 = vld [vmem:[%s5076_s2 + $0x420] sm:$0xff] }
  0xfc   : > { %3051 = vmatprep.mubr.f32.mxu0 %v5200_v47  ;;  %1930 = vmatprep.mubr.f32.mxu1 %v3898_v6 }
  0xfd   : > { %v4447_v33 = vpop.f32.mrf.mxu1  ;;  %3088 = vmatpush3.msra.mxu0 %v2749_v54  ;;  %v5203_v54 = vld [vmem:[#allocation25_spill] sm:$0xff] }
  0xfe   : > { %3089 = vmatprep.subr.mxu0 %v2748_v50 }
  0xff   : > { %3052 = vmatmul.mubr.f32.gmra.mxu0 %v5201_v36  ;;  %1931 = vmatmul.mubr.f32.gmra.mxu1 %v3179_v22  ;;  %v4451_v58 = vpop.f32.mrf.mxu1  ;;  %v2746_v22 = vld [vmem:[%s5076_s2 + $0x418] sm:$0xff] }
 0x100   : > { %3054 = vmatprep.mubr.f32.mxu0 %v5202_v30  ;;  %1935 = vmatprep.mubr.f32.mxu1 %v3926_v29  ;;  %v5205_v29 = vld [vmem:[#allocation27_spill] sm:$0xff] }
 0x101   : > { %3090 = vmatpush3.msra.mxu0 %v2748_v50  ;;  %v3181_v50 = vld [vmem:[%s3360_s24 + $0x60] sm:$0xff] }
 0x102   : > { %v4458_v6 = vpop.f32.mrf.mxu1  ;;  %3091 = vmatprep.subr.mxu0 %v2747_v15 }
 0x103   : > { %3055 = vmatmul.mubr.f32.gmra.mxu0 %v5203_v54  ;;  %1936 = vmatmul.mubr.f32.gmra.mxu1 %v3180_v56  ;;  %v2745_v56 = vld [vmem:[%s5076_s2 + $0x410] sm:$0xff] }
 0x104   : > { %3057 = vmatprep.mubr.f32.mxu0 %v5204_v59  ;;  %1940 = vmatprep.mubr.f32.mxu1 %v3949_v31  ;;  %v4467_v45 = vpop.f32.mrf.mxu1 }
 0x105   : > { %3092 = vmatpush3.msra.mxu0 %v2747_v15  ;;  %v636_v15 = vrot.slane %v4353_v16, 2 }
 0x106   : > { %3093 = vmatprep.subr.mxu0 %v2746_v22 }
 0x107   : > { %3058 = vmatmul.mubr.f32.gmra.mxu0 %v5205_v29  ;;  %1941 = vmatmul.mubr.f32.gmra.mxu1 %v3181_v50  ;;  %v4471_v49 = vpop.f32.mrf.mxu1  ;;  %v3182_v50 = vld [vmem:[%s3360_s24 + $0x68] sm:$0xff]  ;;  %v4493_v39 = vsel %vm555_vm0, %v636_v15, %v637_v55  ;;  %v3184_v15 = vld [vmem:[%s3360_s24 + $0x80] sm:$0xff] }
 0x108   : > { %3060 = vmatprep.mubr.f32.mxu0 %v3906_v43  ;;  %1945 = vmatprep.mubr.f32.mxu1 %v3962_v14  ;;  %5206 = vst [vmem:[#allocation7_spill] sm:$0xff] %v4493_v39 }
 0x109   : > { %v4478_v31 = vpop.f32.mrf.mxu1  ;;  %3094 = vmatpush3.msra.mxu0 %v2746_v22  ;;  %v639_v22 = vrot.slane %v4372_v11, 2 }
 0x10a   : > { %3095 = vmatprep.subr.mxu0 %v2745_v56 }
 0x10b   : > { %3061 = vmatmul.mubr.f32.gmra.mxu0 %v3917_v28  ;;  %1946 = vmatmul.mubr.f32.gmra.mxu1 %v3182_v50  ;;  %v3183_v50 = vld [vmem:[%s3360_s24 + $0x78] sm:$0xff]  ;;  %v4505_v11 = vsel %vm555_vm0, %v637_v55, %v639_v22 }
 0x10c   : > { %3063 = vmatprep.mubr.f32.mxu0 %v3932_v13  ;;  %1950 = vmatprep.mubr.f32.mxu1 %v3982_v12  ;;  %v4489_v14 = vpop.f32.mrf.mxu1  ;;  %v2743_v12 = vld [vmem:[%s5076_s2 + $0x400] sm:$0xff] }
 0x10d   : > { %3096 = vmatpush3.msra.mxu0 %v2745_v56 }
 0x10e   : > { %v4495_v16 = vpop.f32.mrf.mxu1  ;;  %3097 = vmatprep.subr.mxu0 %v2744_v26 }
 0x10f   : > { %3064 = vmatmul.mubr.f32.gmra.mxu0 %v3941_v7  ;;  %1951 = vmatmul.mubr.f32.gmra.mxu1 %v3183_v50 }
 0x110   : > { %3066 = vmatprep.mubr.f32.mxu0 %v4493_v39  ;;  %1955 = vmatprep.mubr.f32.mxu1 %v3997_v18 }
 0x111   : > { %v4507_v56 = vpop.f32.mrf.mxu1  ;;  %3098 = vmatpush3.msra.mxu0 %v2744_v26  ;;  %v3185_v26 = vld [vmem:[%s3360_s24 + $0x90] sm:$0xff] }
 0x112   : > { %3099 = vmatprep.subr.mxu0 %v2743_v12 }
 0x113   : > { %3067 = vmatmul.mubr.f32.gmra.mxu0 %v4505_v11  ;;  %1956 = vmatmul.mubr.f32.gmra.mxu1 %v3184_v15  ;;  %v4511_v50 = vpop.f32.mrf.mxu1 }
 0x114   : > { %1960 = vmatprep.mubr.f32.mxu1 %v4011_v25  ;;  %3100 = vmatpush3.msra.mxu0 %v2743_v12 }
 0x115   : > { %3101 = vmatprep.mubr.f32.mxu0 %v5178_v17 }
 0x116   : > { %v796_v18 = vpop.f32.mrf.mxu0  ;;  %v4515_v39 = vpop.f32.mrf.mxu1 }
 0x117   : > { %v4518_v55 = vadd.f32 %v4415_v1, %v796_v18  ;;  %1961 = vmatmul.mubr.f32.gmra.mxu1 %v3185_v26  ;;  %3102 = vmatmul.mubr.f32.vlgmr.msra.gmra.mxu0 %v5179_v52  ;;  %v3186_v1 = vld [vmem:[%s3360_s24 + $0x98] sm:$0xff]  ;;  %v3187_v26 = vld [vmem:[%s3360_s24 + $0xa8] sm:$0xff] }
 0x118   : > { %v798_v22 = vpop.f32.mrf.mxu0  ;;  %v4522_v15 = vpop.f32.mrf.mxu1  ;;  %1965 = vmatprep.mubr.f32.mxu1 %v4026_v44  ;;  %3104 = vmatprep.mubr.f32.mxu0 %v5180_v23 }
 0x119   : > { %5207 = vst [vmem:[#allocation8_spill] sm:$0xff] %v4518_v55 }
 0x11a   : > { %v801_v25 = vpop.f32.mrf.mxu0 }
 0x11b   : > { %v4527_v17 = vadd.f32 %v4403_v53, %v801_v25  ;;  %v4529_v12 = vpop.f32.mrf.mxu1  ;;  %1966 = vmatmul.mubr.f32.gmra.mxu1 %v3186_v1  ;;  %3105 = vmatmul.mubr.f32.gmra.mxu0 %v5181_v41  ;;  %v3188_v25 = vld [vmem:[%s3360_s24 + $0xb0] sm:$0xff] }
 0x11c   : > { %v803_v18 = vpop.f32.mrf.mxu0  ;;  %1970 = vmatprep.mubr.f32.mxu1 %v4042_v37  ;;  %3107 = vmatprep.mubr.f32.mxu0 %v5182_v4 }
 0x11d   : > { %5208 = vst [vmem:[#allocation9_spill] sm:$0xff] %v4527_v17  ;;  %v4535_v52 = vpop.f32.mrf.mxu1  ;;  %v3189_v18 = vld [vmem:[%s3360_s24 + $0xc0] sm:$0xff] }
 0x11e   : > { %v806_v44 = vpop.f32.mrf.mxu0 }
 0x11f   : > { %v4538_v23 = vadd.f32 %v4427_v19, %v806_v44  ;;  %v4540_v53 = vpop.f32.mrf.mxu1  ;;  %1971 = vmatmul.mubr.f32.gmra.mxu1 %v3187_v26  ;;  %3108 = vmatmul.mubr.f32.gmra.mxu0 %v5185_v10  ;;  %v3190_v26 = vld [vmem:[%s3360_s24 + $0xc8] sm:$0xff] }
 0x120   : > { %v808_v22 = vpop.f32.mrf.mxu0  ;;  %1975 = vmatprep.mubr.f32.mxu1 %v4057_v63  ;;  %3110 = vmatprep.mubr.f32.mxu0 %v5186_v40 }
 0x121   : > { %5209 = vst [vmem:[#allocation10_spill] sm:$0xff] %v4538_v23  ;;  %v4546_v37 = vpop.f32.mrf.mxu1 }
 0x122   : > { %v811_v41 = vpop.f32.mrf.mxu0 }
 0x123   : > { %v4549_v4 = vadd.f32 %v4420_v48, %v811_v41  ;;  %v4551_v19 = vpop.f32.mrf.mxu1  ;;  %1976 = vmatmul.mubr.f32.gmra.mxu1 %v3188_v25  ;;  %3111 = vmatmul.mubr.f32.gmra.mxu0 %v5187_v8  ;;  %v3191_v41 = vld [vmem:[%s3360_s24 + $0xd8] sm:$0xff] }
 0x124   : > { %v813_v1 = vpop.f32.mrf.mxu0  ;;  %1980 = vmatprep.mubr.f32.mxu1 %v4073_v3  ;;  %3113 = vmatprep.mubr.f32.mxu0 %v5188_v9 }
 0x125   : > { %5210 = vst [vmem:[#allocation11_spill] sm:$0xff] %v4549_v4  ;;  %v4557_v63 = vpop.f32.mrf.mxu1  ;;  %v3192_v1 = vld [vmem:[%s3360_s24 + $0xe0] sm:$0xff] }
 0x126   : > { %v816_v10 = vpop.f32.mrf.mxu0 }
 0x127   : > { %v4560_v40 = vadd.f32 %v4438_v60, %v816_v10  ;;  %v4562_v48 = vpop.f32.mrf.mxu1  ;;  %1981 = vmatmul.mubr.f32.gmra.mxu1 %v3189_v18  ;;  %3114 = vmatmul.mubr.f32.gmra.mxu0 %v5190_v27  ;;  %v3193_v18 = vld [vmem:[%s3360_s24 + $0xf0] sm:$0xff] }
 0x128   : > { %v818_v44 = vpop.f32.mrf.mxu0  ;;  %1985 = vmatprep.mubr.f32.mxu1 %v4088_v20  ;;  %3116 = vmatprep.mubr.f32.mxu0 %v5191_v24 }
 0x129   : > { %5211 = vst [vmem:[#allocation12_spill] sm:$0xff] %v4560_v40  ;;  %v4568_v3 = vpop.f32.mrf.mxu1 }
 0x12a   : > { %v821_v8 = vpop.f32.mrf.mxu0 }
 0x12b   : > { %v4571_v9 = vadd.f32 %v4436_v51, %v821_v8  ;;  %v4573_v60 = vpop.f32.mrf.mxu1  ;;  %1986 = vmatmul.mubr.f32.gmra.mxu1 %v3190_v26  ;;  %3117 = vmatmul.mubr.f32.gmra.mxu0 %v5193_v61  ;;  %v3194_v8 = vld [vmem:[%s3360_s24 + $0xf8] sm:$0xff] }
 0x12c   : > { %v823_v22 = vpop.f32.mrf.mxu0  ;;  %1990 = vmatprep.mubr.f32.mxu1 %v4104_v46  ;;  %3119 = vmatprep.mubr.f32.mxu0 %v5194_v38 }
 0x12d   : > { %5212 = vst [vmem:[#allocation13_spill] sm:$0xff] %v4571_v9  ;;  %v4579_v20 = vpop.f32.mrf.mxu1  ;;  %v3195_v22 = vld [vmem:[%s3360_s24 + $0x108] sm:$0xff] }
 0x12e   : > { %v826_v27 = vpop.f32.mrf.mxu0 }
 0x12f   : > { %v4582_v24 = vadd.f32 %v4451_v58, %v826_v27  ;;  %v4584_v51 = vpop.f32.mrf.mxu1  ;;  %1991 = vmatmul.mubr.f32.gmra.mxu1 %v3191_v41  ;;  %3120 = vmatmul.mubr.f32.gmra.mxu0 %v5195_v35  ;;  %v3196_v41 = vld [vmem:[%s3360_s24 + $0x110] sm:$0xff] }
 0x130   : > { %v828_v25 = vpop.f32.mrf.mxu0  ;;  %1995 = vmatprep.mubr.f32.mxu1 %v4119_v2  ;;  %3122 = vmatprep.mubr.f32.mxu0 %v5196_v34 }
 0x131   : > { %5213 = vst [vmem:[#allocation14_spill] sm:$0xff] %v4582_v24  ;;  %v4590_v46 = vpop.f32.mrf.mxu1  ;;  %v4640_v25 = vld [vmem:[%s4344_s11 + $0x18] sm:$0xff] }
 0x132   : > { %v831_v61 = vpop.f32.mrf.mxu0 }
 0x133   : > { %v4593_v38 = vadd.f32 %v4447_v33, %v831_v61  ;;  %v4595_v58 = vpop.f32.mrf.mxu1  ;;  %1996 = vmatmul.mubr.f32.gmra.mxu1 %v3192_v1  ;;  %3123 = vmatmul.mubr.f32.gmra.mxu0 %v5197_v32  ;;  %v4643_v61 = vld [vmem:[%s4344_s11 + $0x20] sm:$0xff] }
 0x134   : > { %v833_v10 = vpop.f32.mrf.mxu0  ;;  %2000 = vmatprep.mubr.f32.mxu1 %v4135_v62  ;;  %3125 = vmatprep.mubr.f32.mxu0 %v5198_v0 }
 0x135   : > { %5214 = vst [vmem:[#allocation15_spill] sm:$0xff] %v4593_v38  ;;  %v4601_v2 = vpop.f32.mrf.mxu1 }
 0x137   : > { %v836_v35 = vpop.f32.mrf.mxu0  ;;  %v4603_v34 = vpop.f32.mrf.mxu1  ;;  %2001 = vmatmul.mubr.f32.gmra.mxu1 %v3193_v18  ;;  %3126 = vmatmul.mubr.f32.gmra.mxu0 %v5199_v21 }
 0x138   : > { %v4608_v33 = vadd.f32 %v4467_v45, %v836_v35  ;;  %2005 = vmatprep.mubr.f32.mxu1 %v4150_v42  ;;  %3128 = vmatprep.mubr.f32.mxu0 %v5200_v47  ;;  %v3197_v35 = vld [vmem:[%s3360_s24 + $0x120] sm:$0xff] }
 0x139   : > { %v838_v62 = vpop.f32.mrf.mxu0  ;;  %v1329_v32 = vpop.f32.mrf.mxu1 }
 0x13a   : > { %5215 = vst [vmem:[#allocation16_spill] sm:$0xff] %v4608_v33  ;;  %v641_v62 = vrot.slane %v4640_v25, 2  ;;  %v642_v32 = vrot.slane %v4643_v61, 2 }
 0x13b   : > { %v841_v0 = vpop.f32.mrf.mxu0  ;;  %v4612_v44 = vpop.f32.mrf.mxu1  ;;  %2006 = vmatmul.mubr.f32.gmra.mxu1 %v3194_v8  ;;  %3129 = vmatmul.mubr.f32.gmra.mxu0 %v5201_v36 }
 0x13c   : > { %v4617_v26 = vadd.f32 %v4458_v6, %v841_v0  ;;  %2010 = vmatprep.mubr.f32.mxu1 %v4166_v57  ;;  %3131 = vmatprep.mubr.f32.mxu0 %v5202_v30  ;;  %v4657_v0 = vld [vmem:[%s4344_s11 + $0x28] sm:$0x3] }
 0x13d   : > { %v843_v42 = vpop.f32.mrf.mxu0  ;;  %v1334_v45 = vpop.f32.mrf.mxu1 }
 0x13e   : > { %5216 = vst [vmem:[#allocation17_spill] sm:$0xff] %v4617_v26  ;;  %v5228_v45 = vld [vmem:[#allocation7_spill] sm:$0xff] }
 0x13f   : > { %v846_v47 = vpop.f32.mrf.mxu0  ;;  %v4621_v21 = vpop.f32.mrf.mxu1  ;;  %2011 = vmatmul.mubr.f32.gmra.mxu1 %v3195_v22  ;;  %3132 = vmatmul.mubr.f32.gmra.mxu0 %v5203_v54 }
 0x140   : > { %5217 = vst [vmem:[#allocation18_spill] sm:$0xff] %v4621_v21  ;;  %v4626_v36 = vadd.f32 %v4478_v31, %v846_v47  ;;  %2015 = vmatprep.mubr.f32.mxu1 %v4181_v5  ;;  %3134 = vmatprep.mubr.f32.mxu0 %v5204_v59  ;;  %v5221_v31 = vld [vmem:[#allocation28_spill] sm:$0xff]  ;;  %v644_v47 = vrot.slane %v4657_v0, 2 }
 0x141   : > { %v848_v57 = vpop.f32.mrf.mxu0  ;;  %v1339_v30 = vpop.f32.mrf.mxu1 }
 0x142   : > { %5218 = vst [vmem:[#allocation19_spill] sm:$0xff] %v4626_v36  ;;  %v643_v30 = vsel %vm555_vm0, %v641_v62, %v642_v32 }
 0x143   : > { %v851_v6 = vpop.f32.mrf.mxu0  ;;  %v4630_v27 = vpop.f32.mrf.mxu1  ;;  %2016 = vmatmul.mubr.f32.gmra.mxu1 %v3196_v41  ;;  %3135 = vmatmul.mubr.f32.gmra.mxu0 %v5205_v29  ;;  %v5224_v29 = vld [vmem:[#allocation29_spill] sm:$0xff] }
 0x144   : > { %5219 = vst [vmem:[#allocation20_spill] sm:$0xff] %v4630_v27  ;;  %v4635_v54 = vadd.f32 %v4471_v49, %v851_v6  ;;  %2020 = vmatprep.mubr.f32.mxu1 %v5221_v31  ;;  %3137 = vmatprep.mubr.f32.mxu0 %v3906_v43  ;;  %v3199_v31 = vld [vmem:[%s3360_s24 + $0x138] sm:$0xff] }
 0x145   : > { %v853_v5 = vpop.f32.mrf.mxu0  ;;  %v1344_v59 = vpop.f32.mrf.mxu1 }
 0x146   : > { %5220 = vst [vmem:[#allocation21_spill] sm:$0xff] %v4635_v54  ;;  %v645_v5 = vsel %vm555_vm0, %v642_v32, %v644_v47 }
 0x147   : > { %v856_v1 = vpop.f32.mrf.mxu0  ;;  %v4645_v10 = vpop.f32.mrf.mxu1  ;;  %2021 = vmatmul.mubr.f32.gmra.mxu1 %v3197_v35  ;;  %3138 = vmatmul.mubr.f32.gmra.mxu0 %v3917_v28  ;;  %v3198_v28 = vld [vmem:[%s3360_s24 + $0x128] sm:$0xff] }
 0x148   : > { %5222 = vst [vmem:[#allocation22_spill] sm:$0xff] %v4645_v10  ;;  %v4650_v49 = vadd.f32 %v4495_v16, %v856_v1  ;;  %2025 = vmatprep.mubr.f32.mxu1 %v5224_v29  ;;  %3140 = vmatprep.mubr.f32.mxu0 %v3932_v13  ;;  %v5227_v13 = vld [vmem:[#allocation30_spill] sm:$0xff] }
 0x149   : > { %v858_v43 = vpop.f32.mrf.mxu0  ;;  %v1349_v18 = vpop.f32.mrf.mxu1 }
 0x14a   : > { %5223 = vst [vmem:[#allocation23_spill] sm:$0xff] %v4650_v49  ;;  %v3200_v43 = vld [vmem:[%s3360_s24 + $0x140] sm:$0xff] }
 0x14b   : > { %v861_v8 = vpop.f32.mrf.mxu0  ;;  %v4659_v42 = vpop.f32.mrf.mxu1  ;;  %2026 = vmatmul.mubr.f32.gmra.mxu1 %v3198_v28  ;;  %3141 = vmatmul.mubr.f32.gmra.mxu0 %v3941_v7  ;;  %v3201_v28 = vld [vmem:[%s3360_s24 + $0x150] sm:$0xff] }
 0x14c   : > { %5225 = vst [vmem:[#allocation24_spill] sm:$0xff] %v4659_v42  ;;  %v4664_v16 = vadd.f32 %v4489_v14, %v861_v8  ;;  %2030 = vmatprep.mubr.f32.mxu1 %v5227_v13  ;;  %3143 = vmatprep.mubr.f32.mxu0 %v5228_v45  ;;  %v5231_v14 = vld [vmem:[#allocation31_spill] sm:$0xff]  ;;  %v5236_v13 = vld [vmem:[#allocation33_spill] sm:$0xff] }
 0x14d   : > { %v863_v22 = vpop.f32.mrf.mxu0  ;;  %v1354_v57 = vpop.f32.mrf.mxu1 }
 0x14e   : > { %5226 = vst [vmem:[#allocation25_spill] sm:$0xff] %v4664_v16 }
 0x14f   : > { %v866_v6 = vpop.f32.mrf.mxu0  ;;  %v4670_v41 = vpop.f32.mrf.mxu1  ;;  %2031 = vmatmul.mubr.f32.gmra.mxu1 %v3199_v31  ;;  %3144 = vmatmul.mubr.f32.gmra.mxu0 %v4505_v11  ;;  %v5233_v11 = vld [vmem:[#allocation32_spill] sm:$0xff] }
 0x150   : > { %5229 = vst [vmem:[#allocation26_spill] sm:$0xff] %v4670_v41  ;;  %v4675_v7 = vadd.f32 %v4511_v50, %v866_v6  ;;  %2035 = vmatprep.mubr.f32.mxu1 %v5231_v14  ;;  %3146 = vmatprep.mubr.f32.mxu0 %v643_v30  ;;  %v3202_v30 = vld [vmem:[%s3360_s24 + $0x158] sm:$0xff] }
 0x151   : > { %v868_v59 = vpop.f32.mrf.mxu0  ;;  %v1359_v1 = vpop.f32.mrf.mxu1  ;;  %v5238_v6 = vld [vmem:[#allocation34_spill] sm:$0xff] }
 0x152   : > { %5230 = vst [vmem:[#allocation27_spill] sm:$0xff] %v4675_v7  ;;  %v5240_v1 = vld [vmem:[#allocation35_spill] sm:$0xff] }
 0x153   : > { %v4679_v35 = vpop.f32.mrf.mxu0  ;;  %v4681_v29 = vpop.f32.mrf.mxu1  ;;  %2036 = vmatmul.mubr.f32.gmra.mxu1 %v3200_v43  ;;  %3147 = vmatmul.mubr.f32.gmra.mxu0 %v645_v5 }
 0x154   : > { %5232 = vst [vmem:[#allocation28_spill] sm:$0xff] %v4681_v29  ;;  %2040 = vmatprep.mubr.f32.mxu1 %v5233_v11 }
 0x155   : > { %v873_v50 = vpop.f32.mrf.mxu0  ;;  %v1364_v18 = vpop.f32.mrf.mxu1 }
 0x157   : > { %v876_v62 = vpop.f32.mrf.mxu0  ;;  %v4685_v8 = vpop.f32.mrf.mxu1  ;;  %2041 = vmatmul.mubr.f32.gmra.mxu1 %v3201_v28  ;;  %v5242_v28 = vld [vmem:[#allocation5_spill] sm:$0xff] }
 0x158   : > { %5234 = vst [vmem:[#allocation29_spill] sm:$0xff] %v4685_v8  ;;  %v4689_v32 = vadd.f32 %v4522_v15, %v876_v62  ;;  %2045 = vmatprep.mubr.f32.mxu1 %v5236_v13  ;;  %v3203_v15 = vld [vmem:[%s3360_s24 + $0x168] sm:$0xff]  ;;  %v3204_v62 = vld [vmem:[%s3360_s24 + $0x170] sm:$0xff] }
 0x159   : > { %v878_v45 = vpop.f32.mrf.mxu0  ;;  %v1369_v47 = vpop.f32.mrf.mxu1 }
 0x15a   : > { %5235 = vst [vmem:[#allocation30_spill] sm:$0xff] %v4689_v32  ;;  %v514_v47 = vrot.slane %v4640_v25, 1 }
 0x15b   : > { %v4692_v22 = vpop.f32.mrf.mxu0  ;;  %v4694_v57 = vpop.f32.mrf.mxu1  ;;  %2046 = vmatmul.mubr.f32.gmra.mxu1 %v3202_v30  ;;  %v515_v30 = vrot.slane %v4643_v61, 1 }
 0x15c   : > { %5237 = vst [vmem:[#allocation7_spill] sm:$0xff] %v4694_v57  ;;  %2050 = vmatprep.mubr.f32.mxu1 %v5238_v6 }
 0x15d   : > { %v883_v31 = vpop.f32.mrf.mxu0  ;;  %v1374_v14 = vpop.f32.mrf.mxu1 }
 0x15e   : > { %v5244_v14 = vld [vmem:[#allocation3_spill] sm:$0xff] }
 0x15f   : > { %v4698_v5 = vpop.f32.mrf.mxu0  ;;  %v4700_v59 = vpop.f32.mrf.mxu1  ;;  %2051 = vmatmul.mubr.f32.gmra.mxu1 %v3203_v15  ;;  %v5245_v15 = vld [vmem:[#allocation6_spill] sm:$0xff] }
 0x160   : > { %5239 = vst [vmem:[#allocation31_spill] sm:$0xff] %v4700_v59  ;;  %2055 = vmatprep.mubr.f32.mxu1 %v5240_v1 }
 0x161   : > { %v888_v43 = vpop.f32.mrf.mxu0  ;;  %v1379_v11 = vpop.f32.mrf.mxu1 }
 0x162   : > { %v516_v11 = vsel %vm428_vm1, %v514_v47, %v515_v30 }
 0x163   : > { %v4704_v50 = vpop.f32.mrf.mxu0  ;;  %v4706_v18 = vpop.f32.mrf.mxu1  ;;  %2056 = vmatmul.mubr.f32.gmra.mxu1 %v3204_v62  ;;  %v517_v62 = vrot.slane %v4657_v0, 1 }
 0x164   : > { %5241 = vst [vmem:[#allocation32_spill] sm:$0xff] %v4706_v18  ;;  %2060 = vmatprep.mubr.f32.mxu1 %v5242_v28 }
 0x165   : > { %v893_v13 = vpop.f32.mrf.mxu0  ;;  %v1384_v45 = vpop.f32.mrf.mxu1  ;;  %v518_v49 = vsel %vm428_vm1, %v515_v30, %v517_v62 }
 0x166   : > { %v5247_v45 = vld [vmem:[#allocation4_spill] sm:$0xff] }
 0x167   : > { %v4712_v6 = vpop.f32.mrf.mxu0  ;;  %v4714_v31 = vpop.f32.mrf.mxu1  ;;  %2061 = vmatmul.mubr.f32.gmra.mxu1 %v5244_v14 }
 0x168   : > { %5243 = vst [vmem:[#allocation33_spill] sm:$0xff] %v4714_v31  ;;  %2065 = vmatprep.mubr.f32.mxu1 %v5245_v15 }
 0x169   : > { %v898_v1 = vpop.f32.mrf.mxu0  ;;  %v1389_v43 = vpop.f32.mrf.mxu1 }
 0x16b   : > { %v4720_v28 = vpop.f32.mrf.mxu0  ;;  %v4722_v13 = vpop.f32.mrf.mxu1  ;;  %2066 = vmatmul.mubr.f32.gmra.mxu1 %v5247_v45 }
 0x16c   : > { %5246 = vst [vmem:[#allocation34_spill] sm:$0xff] %v4722_v13  ;;  %2070 = vmatprep.mubr.f32.mxu1 %v516_v11 }
 0x16d   : > { %v903_v32 = vpop.f32.mrf.mxu0  ;;  %v1394_v7 = vpop.f32.mrf.mxu1 }
 0x16f   : > { %v4726_v14 = vpop.f32.mrf.mxu0  ;;  %v4728_v15 = vpop.f32.mrf.mxu1  ;;  %2071 = vmatmul.mubr.f32.gmra.mxu1 %v4640_v25 }
 0x170   : > { %5248 = vst [vmem:[#allocation35_spill] sm:$0xff] %v4728_v15  ;;  %2075 = vmatprep.mubr.f32.mxu1 %v518_v49 }
 0x171   : > { %v908_v47 = vpop.f32.mrf.mxu0  ;;  %v1399_v0 = vpop.f32.mrf.mxu1 }
 0x173   : > { %v4731_v1 = vpop.f32.mrf.mxu0  ;;  %v4733_v43 = vpop.f32.mrf.mxu1  ;;  %2076 = vmatmul.mubr.f32.gmra.mxu1 %v4643_v61 }
 0x175   : > { %v913_v11 = vpop.f32.mrf.mxu0  ;;  %v1404_v32 = vpop.f32.mrf.mxu1 }
 0x177   : > { %v4736_v7 = vpop.f32.mrf.mxu0  ;;  %v4738_v30 = vpop.f32.mrf.mxu1 }
 0x178   : > { %5249 = vst [vmem:[#allocation5_spill] sm:$0xff] %v4738_v30 }
 0x179   : > { %v918_v62 = vpop.f32.mrf.mxu0  ;;  %v1409_v45 = vpop.f32.mrf.mxu1 }
 0x17b   : > { %v4740_v15 = vpop.f32.mrf.mxu0  ;;  %v4742_v25 = vpop.f32.mrf.mxu1 }
 0x17d   : > { %v923_v49 = vpop.f32.mrf.mxu0  ;;  %v1414_v47 = vpop.f32.mrf.mxu1 }
 0x17f   : > { %v4744_v0 = vpop.f32.mrf.mxu0  ;;  %v4746_v16 = vpop.f32.mrf.mxu1 }
 0x181   : > { %v928_v31 = vpop.f32.mrf.mxu0  ;;  %v1419_v61 = vpop.f32.mrf.mxu1 }
 0x183   : > { %v4748_v11 = vpop.f32.mrf.mxu0  ;;  %v4750_v32 = vpop.f32.mrf.mxu1 }
 0x185   : > { %v933_v36 = vpop.f32.mrf.mxu0  ;;  %v1424_v30 = vpop.f32.mrf.mxu1 }
 0x187   : > { %v4752_v62 = vpop.f32.mrf.mxu0  ;;  %v4754_v45 = vpop.f32.mrf.mxu1 }
 0x189   : > { %v938_v13 = vpop.f32.mrf.mxu0  ;;  %v1429_v54 = vpop.f32.mrf.mxu1 }
 0x18b   : > { %v4756_v49 = vpop.f32.mrf.mxu0  ;;  %v4758_v47 = vpop.f32.mrf.mxu1 }
 0x18d   : > { %v943_v59 = vpop.f32.mrf.mxu0  ;;  %v1434_v33 = vpop.f32.mrf.mxu1 }
 0x18f   : > { %v4760_v31 = vpop.f32.mrf.mxu0  ;;  %v4762_v61 = vpop.f32.mrf.mxu1 }
 0x191   : > { %v948_v18 = vpop.f32.mrf.mxu0  ;;  %v1439_v26 = vpop.f32.mrf.mxu1 }
 0x193   : > { %v4764_v36 = vpop.f32.mrf.mxu0  ;;  %v4766_v30 = vpop.f32.mrf.mxu1 }
 0x195   : > { %v953_v8 = vpop.f32.mrf.mxu0  ;;  %v1444_v24 = vpop.f32.mrf.mxu1 }
 0x197   : > { %v4768_v13 = vpop.f32.mrf.mxu1  ;;  %v4770_v54 = vpop.f32.mrf.mxu0 }
 0x199   : > { %v1449_v57 = vpop.f32.mrf.mxu1  ;;  %v4772_v38 = vpop.f32.mrf.mxu0 }
 0x19b   : > { %v4774_v33 = vpop.f32.mrf.mxu1  ;;  %v4776_v59 = vpop.f32.mrf.mxu0 }
 0x19c   : > { %5250 = vst [vmem:[#allocation3_spill] sm:$0xff] %v4776_v59 }
 0x19d   : > { %v1454_v41 = vpop.f32.mrf.mxu1  ;;  %v4778_v18 = vpop.f32.mrf.mxu0 }
 0x19e   : > { %5251 = vst [vmem:[#allocation6_spill] sm:$0xff] %v4778_v18 }
 0x19f   : > { %v4780_v26 = vpop.f32.mrf.mxu1  ;;  %v4782_v40 = vpop.f32.mrf.mxu0 }
 0x1a0   : > { %5252 = vst [vmem:[#allocation4_spill] sm:$0xff] %v4782_v40 }
 0x1a1   : > { %v1459_v8 = vpop.f32.mrf.mxu1  ;;  %v4784_v24 = vpop.f32.mrf.mxu0 }
 0x1a2   : > { %5253 = vst [vmem:[#allocation36_spill] sm:$0xff] %v4784_v24 }
 0x1a3   : > { %v4786_v29 = vpop.f32.mrf.mxu1  ;;  %v4788_v9 = vpop.f32.mrf.mxu0 }
 0x1a4   : > { %5254 = vst [vmem:[#allocation37_spill] sm:$0xff] %v4788_v9 }
 0x1a5   : > { %v1464_v57 = vpop.f32.mrf.mxu1  ;;  %v4790_v10 = vpop.f32.mrf.mxu0 }
 0x1a6   : > { %5255 = vst [vmem:[#allocation38_spill] sm:$0xff] %v4790_v10 }
 0x1a7   : > { %v4792_v23 = vpop.f32.mrf.mxu1  ;;  %v4794_v4 = vpop.f32.mrf.mxu0 }
 0x1a8   : > { %5256 = vst [vmem:[#allocation39_spill] sm:$0xff] %v4794_v4 }
 0x1a9   : > { %v1469_v41 = vpop.f32.mrf.mxu1  ;;  %v4796_v42 = vpop.f32.mrf.mxu0 }
 0x1aa   : > { %5257 = vst [vmem:[#allocation40_spill] sm:$0xff] %v4796_v42  ;;  %v1097_v41 = vadd.f32 %v4507_v56, %v4679_v35 }
 0x1ab   : > { %v4798_v55 = vpop.f32.mrf.mxu1  ;;  %v4800_v40 = vpop.f32.mrf.mxu0 }
 0x1ac   : > { %5258 = vst [vmem:[#allocation41_spill] sm:$0xff] %v4800_v40 }
 0x1ad   : > { %v1474_v8 = vpop.f32.mrf.mxu1  ;;  %v4802_v24 = vpop.f32.mrf.mxu0 }
 0x1ae   : > { %5259 = vst [vmem:[#allocation42_spill] sm:$0xff] %v4802_v24 }
 0x1af   : > { %v4804_v18 = vpop.f32.mrf.mxu1  ;;  %v4806_v9 = vpop.f32.mrf.mxu0 }
 0x1b0   : > { %5260 = vst [vmem:[#allocation43_spill] sm:$0xff] %v4804_v18  ;;  %5261 = vst [vmem:[#allocation44_spill] sm:$0xff] %v4806_v9 }
 0x1b1   : > { %v1479_v57 = vpop.f32.mrf.mxu1  ;;  %v4808_v10 = vpop.f32.mrf.mxu0 }
 0x1b2   : > { %5262 = vst [vmem:[#allocation45_spill] sm:$0xff] %v4808_v10  ;;  %v1107_v57 = vadd.f32 %v4515_v39, %v4692_v22  ;;  %v1112_v39 = vadd.f32 %v4535_v52, %v4698_v5 }
 0x1b3   : > { %v4810_v21 = vpop.f32.mrf.mxu1  ;;  %v3044_v4 = vpop.f32.mrf.mxu0 }
 0x1b4   : > { %v1628_v42 = vadd.f32 %v3044_v4, %v4733_v43 }
 0x1b5   : > { %v1484_v59 = vpop.f32.mrf.mxu1  ;;  %v4815_v40 = vpop.f32.mrf.mxu0 }
 0x1b6   : > { %v4817_v8 = vadd.f32 %v1628_v42, %v1097_v41  ;;  %v1117_v42 = vadd.f32 %v4529_v12, %v4704_v50 }
 0x1b7   : > { %v3047_v24 = vpop.f32.mrf.mxu0  ;;  %v4819_v27 = vpop.f32.mrf.mxu1 }
 0x1b8   : > { %v1638_v10 = vadd.f32 %v3047_v24, %v4742_v25  ;;  %v1127_v24 = vadd.f32 %v4540_v53, %v4720_v28 }
 0x1b9   : > { %v4824_v9 = vpop.f32.mrf.mxu0  ;;  %v1924_v17 = vpop.f32.mrf.mxu1 }
 0x1ba   : > { %v4826_v18 = vadd.f32 %v1638_v10, %v1107_v57  ;;  %v1122_v57 = vadd.f32 %v4546_v37, %v4712_v6 }
 0x1bb   : > { %v3050_v56 = vpop.f32.mrf.mxu0  ;;  %v4828_v4 = vpop.f32.mrf.mxu1 }
 0x1bc   : > { %v1648_v35 = vadd.f32 %v3050_v56, %v4750_v32 }
 0x1bd   : > { %v1642_v43 = vpop.f32.mrf.mxu0  ;;  %v1929_v59 = vpop.f32.mrf.mxu1 }
 0x1be   : > { %v4835_v22 = vadd.f32 %v1648_v35, %v1117_v42  ;;  %v1643_v25 = vadd.f32 %v1642_v43, %v4746_v16  ;;  %v1137_v42 = vadd.f32 %v4551_v19, %v4731_v1  ;;  %v1132_v43 = vadd.f32 %v4557_v63, %v4726_v14 }
 0x1bf   : > { %v3053_v17 = vpop.f32.mrf.mxu0  ;;  %v4838_v10 = vpop.f32.mrf.mxu1 }
 0x1c0   : > { %v4842_v41 = vadd.f32 %v1643_v25, %v1112_v39  ;;  %v1658_v12 = vadd.f32 %v3053_v17, %v4758_v47  ;;  %v1147_v39 = vadd.f32 %v4562_v48, %v4740_v15  ;;  %v1142_v17 = vadd.f32 %v4568_v3, %v4736_v7 }
 0x1c1   : > { %v1652_v50 = vpop.f32.mrf.mxu0  ;;  %v1934_v32 = vpop.f32.mrf.mxu1 }
 0x1c2   : > { %v4847_v52 = vadd.f32 %v1658_v12, %v1127_v24  ;;  %v1653_v5 = vadd.f32 %v1652_v50, %v4754_v45  ;;  %v1157_v12 = vadd.f32 %v4573_v60, %v4748_v11  ;;  %v1152_v32 = vadd.f32 %v4579_v20, %v4744_v0 }
 0x1c3   : > { %v3056_v16 = vpop.f32.mrf.mxu0  ;;  %v4850_v56 = vpop.f32.mrf.mxu1 }
 0x1c4   : > { %v4854_v53 = vadd.f32 %v1653_v5, %v1122_v57  ;;  %v1668_v28 = vadd.f32 %v3056_v16, %v4766_v30  ;;  %v1167_v5 = vadd.f32 %v4584_v51, %v4756_v49  ;;  %v1558_v51 = vadd.f32 %v4770_v54, %v4612_v44  ;;  %v5264_v54 = vld [vmem:[#allocation9_spill] sm:$0xff] }
 0x1c5   : > { %v1662_v47 = vpop.f32.mrf.mxu0  ;;  %v1939_v35 = vpop.f32.mrf.mxu1 }
 0x1c6   : > { %v4859_v37 = vadd.f32 %v1668_v28, %v1137_v42  ;;  %v1663_v6 = vadd.f32 %v1662_v47, %v4762_v61  ;;  %v1162_v42 = vadd.f32 %v4590_v46, %v4752_v62  ;;  %v1177_v47 = vadd.f32 %v4595_v58, %v4764_v36 }
 0x1c7   : > { %v3059_v45 = vpop.f32.mrf.mxu0  ;;  %v4862_v59 = vpop.f32.mrf.mxu1  ;;  %v1172_v46 = vadd.f32 %v4601_v2, %v4760_v31  ;;  %v5267_v2 = vld [vmem:[#allocation18_spill] sm:$0xff] }
 0x1c8   : > { %v4866_v19 = vadd.f32 %v1663_v6, %v1132_v43  ;;  %v1678_v1 = vadd.f32 %v3059_v45, %v4774_v33  ;;  %v5263_v6 = vld [vmem:[#allocation43_spill] sm:$0xff]  ;;  %v1744_v45 = vadd.f32 %v1558_v51, %v5264_v54  ;;  %v5268_v31 = vld [vmem:[#allocation6_spill] sm:$0xff]  ;;  %v5275_v51 = vld [vmem:[#allocation36_spill] sm:$0xff] }
 0x1c9   : > { %v1672_v30 = vpop.f32.mrf.mxu0  ;;  %v1944_v25 = vpop.f32.mrf.mxu1  ;;  %v5278_v54 = vld [vmem:[#allocation37_spill] sm:$0xff] }
 0x1ca   : > { %v4871_v63 = vadd.f32 %v1678_v1, %v1147_v39  ;;  %v1673_v14 = vadd.f32 %v1672_v30, %v4768_v13  ;;  %v5265_v39 = vld [vmem:[#allocation20_spill] sm:$0xff] }
 0x1cb   : > { %v3062_v61 = vpop.f32.mrf.mxu0  ;;  %v4874_v24 = vpop.f32.mrf.mxu1 }
 0x1cc   : > { %v4878_v48 = vadd.f32 %v1673_v14, %v1142_v17  ;;  %v1688_v15 = vadd.f32 %v3062_v61, %v4786_v29  ;;  %v1563_v17 = vadd.f32 %v5268_v31, %v5267_v2  ;;  %v5269_v61 = vld [vmem:[#allocation8_spill] sm:$0xff] }
 0x1cd   : > { %v1682_v33 = vpop.f32.mrf.mxu0  ;;  %v1949_v50 = vpop.f32.mrf.mxu1 }
 0x1ce   : > { %v4883_v3 = vadd.f32 %v1688_v15, %v1157_v12  ;;  %v1683_v7 = vadd.f32 %v1682_v33, %v4780_v26  ;;  %v5270_v50 = vld [vmem:[#allocation24_spill] sm:$0xff] }
 0x1cf   : > { %v3065_v13 = vpop.f32.mrf.mxu0  ;;  %v4886_v57 = vpop.f32.mrf.mxu1 }
 0x1d0   : > { %v4890_v60 = vadd.f32 %v1683_v7, %v1152_v32  ;;  %v1698_v11 = vadd.f32 %v3065_v13, %v4798_v55  ;;  %v5271_v32 = vld [vmem:[#allocation4_spill] sm:$0xff] }
 0x1d1   : > { %v1692_v29 = vpop.f32.mrf.mxu0  ;;  %v1954_v16 = vpop.f32.mrf.mxu1  ;;  %v1578_v7 = vadd.f32 %v5271_v32, %v5270_v50 }
 0x1d2   : > { %v4895_v20 = vadd.f32 %v1698_v11, %v1167_v5  ;;  %v1693_v0 = vadd.f32 %v1692_v29, %v4792_v23  ;;  %v1553_v23 = vadd.f32 %v4772_v38, %v4603_v34  ;;  %v4927_v38 = vld [vmem:[%s5077_s3] ss:$0 sm:$0xff] }
 0x1d3   : > { %v3068_v26 = vpop.f32.mrf.mxu0  ;;  %v4898_v28 = vpop.f32.mrf.mxu1  ;;  %v5272_v5 = vld [vmem:[#allocation11_spill] sm:$0xff] }
 0x1d4   : > { %v4904_v49 = vadd.f32 %v1693_v0, %v1162_v42  ;;  %v1708_v55 = vadd.f32 %v3068_v26, %v4810_v21  ;;  %v5266_v21 = vld [vmem:[#allocation3_spill] sm:$0xff]  ;;  %v1743_v12 = vadd.f32 %v1553_v23, %v5269_v61  ;;  %v5273_v0 = vld [vmem:[#allocation10_spill] sm:$0xff] }
 0x1d5   : > { %v1702_v35 = vpop.f32.mrf.mxu0  ;;  %v1959_v43 = vpop.f32.mrf.mxu1  ;;  %v1568_v1 = vadd.f32 %v5266_v21, %v5265_v39  ;;  %v1745_v26 = vadd.f32 %v1563_v17, %v5273_v0  ;;  %v5279_v17 = vld [vmem:[#allocation12_spill] sm:$0xff] }
 0x1d6   : > { %v4911_v62 = vadd.f32 %v1708_v55, %v1177_v47  ;;  %v1703_v58 = vadd.f32 %v1702_v35, %v5263_v6  ;;  %v5274_v47 = vld [vmem:[#allocation22_spill] sm:$0xff]  ;;  %v5276_v6 = vld [vmem:[#allocation13_spill] sm:$0xff] }
 0x1d7   : > { %v4914_v36 = vpop.f32.mrf.mxu1  ;;  %v3103_v44 = vpop.f32.mrf.mxu0  ;;  %v1746_v11 = vadd.f32 %v1568_v1, %v5272_v5  ;;  %v1573_v55 = vadd.f32 %v5275_v51, %v5274_v47 }
 0x1d8   : > { %v4919_v30 = vadd.f32 %v1703_v58, %v1172_v46  ;;  %v2153_v25 = vadd.f32 %v3103_v44, %v4828_v4  ;;  %v1748_v58 = vadd.f32 %v1578_v7, %v5276_v6  ;;  %v5277_v44 = vld [vmem:[#allocation28_spill] sm:$0xff] }
 0x1d9   : > { %v1964_v34 = vpop.f32.mrf.mxu1  ;;  %v2147_v14 = vpop.f32.mrf.mxu0 }
 0x1da   : > { %v2339_v15 = vadd.f32 %v2153_v25, %v1744_v45  ;;  %v2148_v33 = vadd.f32 %v2147_v14, %v4819_v27  ;;  %v1588_v45 = vadd.f32 %v5278_v54, %v5277_v44  ;;  %v1747_v34 = vadd.f32 %v1573_v55, %v5279_v17  ;;  %v5280_v14 = vld [vmem:[#allocation26_spill] sm:$0xff]  ;;  %v5288_v54 = vld [vmem:[#allocation17_spill] sm:$0xff] }
 0x1db   : > { %v1967_v4 = vpop.f32.mrf.mxu1  ;;  %v3106_v13 = vpop.f32.mrf.mxu0  ;;  %v5285_v55 = vld [vmem:[#allocation14_spill] sm:$0xff] }
 0x1dc   : > { %v2442_v29 = vadd.f32 %v4927_v38, %v2339_v15  ;;  %v2338_v16 = vadd.f32 %v2148_v33, %v1743_v12  ;;  %v2163_v42 = vadd.f32 %v3106_v13, %v4850_v56  ;;  %v5282_v13 = vld [vmem:[#allocation15_spill] sm:$0xff] }
 0x1dd   : > { %v1969_v27 = vpop.f32.mrf.mxu1  ;;  %v2157_v35 = vpop.f32.mrf.mxu0  ;;  %v1750_v5 = vadd.f32 %v1588_v45, %v5282_v13 }
 0x1de   : > { %v2474_v43 = vmax.f32 %v2442_v29, 0.0  ;;  %v2441_v46 = vadd.f32 %v4927_v38, %v2338_v16  ;;  %v2341_v23 = vadd.f32 %v2163_v42, %v1746_v11  ;;  %v2158_v56 = vadd.f32 %v2157_v35, %v4838_v10  ;;  %v5281_v10 = vld [vmem:[#allocation38_spill] sm:$0xff]  ;;  %v5283_v11 = vld [vmem:[#allocation7_spill] sm:$0xff]  ;;  %v5286_v35 = vld [vmem:[#allocation29_spill] sm:$0xff] }
 0x1df   : > { %v4950_v39 = vpop.f32.mrf.mxu1  ;;  %v3109_v21 = vpop.f32.mrf.mxu0  ;;  %v1583_v61 = vadd.f32 %v5281_v10, %v5280_v14  ;;  %v5284_v29 = vld [vmem:[#allocation39_spill] sm:$0xff]  ;;  %v5291_v10 = vld [vmem:[#allocation16_spill] sm:$0xff] }
 0x1e0   : > { %2506 = vst [vmem:[%s4943_s6 + $0x8] sm:$0xff] %v2474_v43  ;;  %v2473_v1 = vmax.f32 %v2441_v46, 0.0  ;;  %v2444_v25 = vadd.f32 %v4927_v38, %v2341_v23  ;;  %v2340_v2 = vadd.f32 %v2158_v56, %v1745_v26  ;;  %v2173_v31 = vadd.f32 %v3109_v21, %v4874_v24  ;;  %v5287_v43 = vld [vmem:[#allocation40_spill] sm:$0xff] }
 0x1e1   : > { %v1974_v12 = vpop.f32.mrf.mxu1  ;;  %v2167_v15 = vpop.f32.mrf.mxu0  ;;  %v1598_v24 = vadd.f32 %v5284_v29, %v5283_v11  ;;  %v1749_v27 = vadd.f32 %v1583_v61, %v5285_v55  ;;  %v5289_v21 = vld [vmem:[#allocation32_spill] sm:$0xff]  ;;  %v5294_v11 = vld [vmem:[#allocation21_spill] sm:$0xff] }
 0x1e2   : > { %2505 = vst [vmem:[%s4943_s6] sm:$0xff] %v2473_v1  ;;  %v2476_v33 = vmax.f32 %v2444_v25, 0.0  ;;  %v2443_v50 = vadd.f32 %v4927_v38, %v2340_v2  ;;  %v2343_v32 = vadd.f32 %v2173_v31, %v1748_v58  ;;  %v2168_v7 = vadd.f32 %v2167_v15, %v4862_v59  ;;  %v5290_v1 = vld [vmem:[#allocation41_spill] sm:$0xff]  ;;  %v5292_v12 = vld [vmem:[#allocation31_spill] sm:$0xff]  ;;  %v5293_v15 = vld [vmem:[#allocation42_spill] sm:$0xff] }
 0x1e3   : > { %v1977_v16 = vpop.f32.mrf.mxu1  ;;  %v3112_v42 = vpop.f32.mrf.mxu0  ;;  %v1593_v59 = vadd.f32 %v5287_v43, %v5286_v35  ;;  %v1752_v45 = vadd.f32 %v1598_v24, %v5288_v54  ;;  %v5295_v24 = vld [vmem:[#allocation34_spill] sm:$0xff]  ;;  %v5297_v35 = vld [vmem:[#allocation19_spill] sm:$0xff] }
 0x1e4   : > { %2508 = vst [vmem:[%s4943_s6 + $0x18] sm:$0xff] %v2476_v33  ;;  %v2475_v0 = vmax.f32 %v2443_v50, 0.0  ;;  %v2446_v26 = vadd.f32 %v4927_v38, %v2343_v32  ;;  %v2342_v47 = vadd.f32 %v2168_v7, %v1747_v34  ;;  %v2183_v51 = vadd.f32 %v3112_v42, %v4898_v28  ;;  %v5296_v42 = vld [vmem:[#allocation44_spill] sm:$0xff] }
 0x1e5   : > { %v1979_v46 = vpop.f32.mrf.mxu1  ;;  %v2177_v23 = vpop.f32.mrf.mxu0  ;;  %v1608_v28 = vadd.f32 %v5290_v1, %v5289_v21  ;;  %v1751_v61 = vadd.f32 %v1593_v59, %v5291_v10  ;;  %v1603_v33 = vadd.f32 %v5293_v15, %v5292_v12  ;;  %v5298_v59 = vld [vmem:[#allocation33_spill] sm:$0xff]  ;;  %v5302_v10 = vld [vmem:[#allocation35_spill] sm:$0xff] }
 0x1e6   : > { %2507 = vst [vmem:[%s4943_s6 + $0x10] sm:$0xff] %v2475_v0  ;;  %v2478_v56 = vmax.f32 %v2446_v26, 0.0  ;;  %v2445_v6 = vadd.f32 %v4927_v38, %v2342_v47  ;;  %v2345_v58 = vadd.f32 %v2183_v51, %v1750_v5  ;;  %v2178_v44 = vadd.f32 %v2177_v23, %v4886_v57  ;;  %v5299_v46 = vld [vmem:[#allocation45_spill] sm:$0xff] }
 0x1e7   : > { %v1982_v25 = vpop.f32.mrf.mxu1  ;;  %v3115_v2 = vpop.f32.mrf.mxu0  ;;  %v1754_v29 = vadd.f32 %v1608_v28, %v5294_v11  ;;  %v1753_v43 = vadd.f32 %v1603_v33, %v5297_v35  ;;  %v1613_v23 = vadd.f32 %v5299_v46, %v5298_v59 }
 0x1e8   : > { %2510 = vst [vmem:[%s4943_s6 + $0x28] sm:$0xff] %v2478_v56  ;;  %v2477_v31 = vmax.f32 %v2445_v6, 0.0  ;;  %v2448_v17 = vadd.f32 %v4927_v38, %v2345_v58  ;;  %v2344_v34 = vadd.f32 %v2178_v44, %v1749_v27  ;;  %v2193_v14 = vadd.f32 %v3115_v2, %v1967_v4 }
 0x1e9   : > { %v1984_v57 = vpop.f32.mrf.mxu1  ;;  %v2187_v50 = vpop.f32.mrf.mxu0  ;;  %v1618_v4 = vadd.f32 %v5296_v42, %v5295_v24  ;;  %v5303_v24 = vld [vmem:[#allocation27_spill] sm:$0xff]  ;;  %v5304_v42 = vld [vmem:[#allocation5_spill] sm:$0xff] }
 0x1ea   : > { %2509 = vst [vmem:[%s4943_s6 + $0x20] sm:$0xff] %v2477_v31  ;;  %v2480_v32 = vmax.f32 %v2448_v17, 0.0  ;;  %v2447_v7 = vadd.f32 %v4927_v38, %v2344_v34  ;;  %v2347_v13 = vadd.f32 %v2193_v14, %v1752_v45  ;;  %v2188_v5 = vadd.f32 %v2187_v50, %v4914_v36  ;;  %v5300_v45 = vld [vmem:[#allocation25_spill] sm:$0xff]  ;;  %v5301_v34 = vld [vmem:[#allocation23_spill] sm:$0xff] }
 0x1eb   : > { %v1987_v0 = vpop.f32.mrf.mxu1  ;;  %v3118_v26 = vpop.f32.mrf.mxu0  ;;  %v1756_v21 = vadd.f32 %v1618_v4, %v5300_v45  ;;  %v1755_v14 = vadd.f32 %v1613_v23, %v5301_v34  ;;  %v1633_v4 = vadd.f32 %v4824_v9, %v5304_v42 }
 0x1ec   : > { %2512 = vst [vmem:[%s4943_s6 + $0x38] sm:$0xff] %v2480_v32  ;;  %v2479_v47 = vmax.f32 %v2447_v7, 0.0  ;;  %v2450_v51 = vadd.f32 %v4927_v38, %v2347_v13  ;;  %v2346_v55 = vadd.f32 %v2188_v5, %v1751_v61  ;;  %v2203_v27 = vadd.f32 %v3118_v26, %v1977_v16 }
 0x1ed   : > { %v1989_v36 = vpop.f32.mrf.mxu1  ;;  %v2197_v56 = vpop.f32.mrf.mxu0  ;;  %v1623_v61 = vadd.f32 %v4815_v40, %v5302_v10 }
 0x1ee   : > { %2511 = vst [vmem:[%s4943_s6 + $0x30] sm:$0xff] %v2479_v47  ;;  %v2482_v6 = vmax.f32 %v2450_v51, 0.0  ;;  %v2449_v58 = vadd.f32 %v4927_v38, %v2346_v55  ;;  %v2349_v44 = vadd.f32 %v2203_v27, %v1754_v29  ;;  %v2198_v54 = vadd.f32 %v2197_v56, %v4950_v39  ;;  %v5305_v36 = vld [vmem:[#allocation30_spill] sm:$0xff] }
 0x1ef   : > { %v1992_v1 = vpop.f32.mrf.mxu1  ;;  %v3121_v28 = vpop.f32.mrf.mxu0  ;;  %v1757_v40 = vadd.f32 %v1623_v61, %v5303_v24  ;;  %v1759_v56 = vadd.f32 %v1633_v4, %v5305_v36 }
 0x1f0   : > { %2514 = vst [vmem:[%s4943_s6 + $0x48] sm:$0xff] %v2482_v6  ;;  %v2481_v16 = vmax.f32 %v2449_v58, 0.0  ;;  %v2452_v2 = vadd.f32 %v4927_v38, %v2349_v44  ;;  %v2348_v31 = vadd.f32 %v2198_v54, %v1753_v43  ;;  %v2213_v17 = vadd.f32 %v3121_v28, %v1987_v0 }
 0x1f1   : > { %v1994_v12 = vpop.f32.mrf.mxu1  ;;  %v2207_v15 = vpop.f32.mrf.mxu0 }
 0x1f2   : > { %2513 = vst [vmem:[%s4943_s6 + $0x40] sm:$0xff] %v2481_v16  ;;  %v2484_v39 = vmax.f32 %v2452_v2, 0.0  ;;  %v2451_v33 = vadd.f32 %v4927_v38, %v2348_v31  ;;  %v2351_v57 = vadd.f32 %v2213_v17, %v1756_v21  ;;  %v2208_v50 = vadd.f32 %v2207_v15, %v1982_v25 }
 0x1f3   : > { %v1997_v32 = vpop.f32.mrf.mxu1  ;;  %v3124_v7 = vpop.f32.mrf.mxu0 }
 0x1f4   : > { %2516 = vst [vmem:[%s4943_s6 + $0x58] sm:$0xff] %v2484_v39  ;;  %v2483_v13 = vmax.f32 %v2451_v33, 0.0  ;;  %v2454_v5 = vadd.f32 %v4927_v38, %v2351_v57  ;;  %v2350_v11 = vadd.f32 %v2208_v50, %v1755_v14  ;;  %v2223_v29 = vadd.f32 %v3124_v7, %v1997_v32 }
 0x1f5   : > { %v1999_v0 = vpop.f32.mrf.mxu1  ;;  %v2217_v26 = vpop.f32.mrf.mxu0 }
 0x1f6   : > { %2515 = vst [vmem:[%s4943_s6 + $0x50] sm:$0xff] %v2483_v13  ;;  %v2486_v47 = vmax.f32 %v2454_v5, 0.0  ;;  %v2453_v25 = vadd.f32 %v4927_v38, %v2350_v11  ;;  %v2353_v51 = vadd.f32 %v2223_v29, %v4817_v8  ;;  %v2218_v55 = vadd.f32 %v2217_v26, %v1992_v1 }
 0x1f7   : > { %v2002_v27 = vpop.f32.mrf.mxu1  ;;  %v3127_v35 = vpop.f32.mrf.mxu0 }
 0x1f8   : > { %2518 = vst [vmem:[%s4943_s6 + $0x68] sm:$0xff] %v2486_v47  ;;  %v2485_v43 = vmax.f32 %v2453_v25, 0.0  ;;  %v2456_v59 = vadd.f32 %v4927_v38, %v2353_v51  ;;  %v2352_v46 = vadd.f32 %v2218_v55, %v1757_v40 }
 0x1f9   : > { %v2004_v9 = vpop.f32.mrf.mxu1  ;;  %v2227_v23 = vpop.f32.mrf.mxu0 }
 0x1fa   : > { %2517 = vst [vmem:[%s4943_s6 + $0x60] sm:$0xff] %v2485_v43  ;;  %v2488_v6 = vmax.f32 %v2456_v59, 0.0  ;;  %v2455_v58 = vadd.f32 %v4927_v38, %v2352_v46  ;;  %v2228_v44 = vadd.f32 %v2227_v23, %v2002_v27 }
 0x1fb   : > { %v2007_v8 = vpop.f32.mrf.mxu1  ;;  %v3130_v54 = vpop.f32.mrf.mxu0 }
 0x1fc   : > { %2520 = vst [vmem:[%s4943_s6 + $0x78] sm:$0xff] %v2488_v6  ;;  %v2487_v45 = vmax.f32 %v2455_v58, 0.0  ;;  %v2354_v21 = vadd.f32 %v2228_v44, %v1759_v56  ;;  %v2233_v1 = vadd.f32 %v3127_v35, %v2007_v8 }
 0x1fd   : > { %v2009_v28 = vpop.f32.mrf.mxu1  ;;  %v2237_v16 = vpop.f32.mrf.mxu0 }
 0x1fe   : > { %2519 = vst [vmem:[%s4943_s6 + $0x70] sm:$0xff] %v2487_v45  ;;  %v2457_v2 = vadd.f32 %v4927_v38, %v2354_v21  ;;  %v2355_v31 = vadd.f32 %v2233_v1, %v4826_v18 }
 0x1ff   : > { %v2012_v17 = vpop.f32.mrf.mxu1  ;;  %v3133_v12 = vpop.f32.mrf.mxu0 }
 0x200   : > { %v2489_v34 = vmax.f32 %v2457_v2, 0.0  ;;  %v2458_v14 = vadd.f32 %v4927_v38, %v2355_v31  ;;  %v2238_v10 = vadd.f32 %v2237_v16, %v2012_v17 }
 0x201   : > { %v2014_v61 = vpop.f32.mrf.mxu1  ;;  %v2247_v18 = vpop.f32.mrf.mxu0 }
 0x202   : > { %2521 = vst [vmem:[%s4943_s6 + $0x80] sm:$0xff] %v2489_v34  ;;  %v2490_v15 = vmax.f32 %v2458_v14, 0.0  ;;  %v2356_v39 = vadd.f32 %v2238_v10, %v4842_v41 }
 0x203   : > { %v2017_v33 = vpop.f32.mrf.mxu1  ;;  %v3136_v40 = vpop.f32.mrf.mxu0 }
 0x204   : > { %2522 = vst [vmem:[%s4943_s6 + $0x88] sm:$0xff] %v2490_v15  ;;  %v2459_v57 = vadd.f32 %v4927_v38, %v2356_v39  ;;  %v2243_v50 = vadd.f32 %v3130_v54, %v2017_v33 }
 0x205   : > { %v2019_v32 = vpop.f32.mrf.mxu1  ;;  %v2257_v25 = vpop.f32.mrf.mxu0 }
 0x206   : > { %v2491_v7 = vmax.f32 %v2459_v57, 0.0  ;;  %v2357_v13 = vadd.f32 %v2243_v50, %v4835_v22 }
 0x207   : > { %v2022_v5 = vpop.f32.mrf.mxu1  ;;  %v3139_v59 = vpop.f32.mrf.mxu0 }
 0x208   : > { %2523 = vst [vmem:[%s4943_s6 + $0x90] sm:$0xff] %v2491_v7  ;;  %v2460_v11 = vadd.f32 %v4927_v38, %v2357_v13  ;;  %v2248_v29 = vadd.f32 %v2247_v18, %v2022_v5 }
 0x209   : > { %v2024_v24 = vpop.f32.mrf.mxu1  ;;  %v2267_v6 = vpop.f32.mrf.mxu0 }
 0x20a   : > { %v2492_v41 = vmax.f32 %v2460_v11, 0.0  ;;  %v2358_v42 = vadd.f32 %v2248_v29, %v4854_v53 }
 0x20b   : > { %v2027_v4 = vpop.f32.mrf.mxu1  ;;  %v3142_v21 = vpop.f32.mrf.mxu0 }
 0x20c   : > { %2524 = vst [vmem:[%s4943_s6 + $0x98] sm:$0xff] %v2492_v41  ;;  %v2461_v0 = vadd.f32 %v4927_v38, %v2358_v42  ;;  %v2253_v26 = vadd.f32 %v3133_v12, %v2027_v4 }
 0x20d   : > { %v2029_v47 = vpop.f32.mrf.mxu1  ;;  %v2277_v17 = vpop.f32.mrf.mxu0 }
 0x20e   : > { %v2493_v22 = vmax.f32 %v2461_v0, 0.0  ;;  %v2359_v51 = vadd.f32 %v2253_v26, %v4847_v52 }
 0x20f   : > { %v2032_v55 = vpop.f32.mrf.mxu1  ;;  %v3145_v15 = vpop.f32.mrf.mxu0 }
 0x210   : > { %2525 = vst [vmem:[%s4943_s6 + $0xa0] sm:$0xff] %v2493_v22  ;;  %v2462_v27 = vadd.f32 %v4927_v38, %v2359_v51  ;;  %v2258_v35 = vadd.f32 %v2257_v25, %v2032_v55 }
 0x211   : > { %v2034_v43 = vpop.f32.mrf.mxu1  ;;  %v2287_v18 = vpop.f32.mrf.mxu0 }
 0x212   : > { %v2494_v53 = vmax.f32 %v2462_v27, 0.0  ;;  %v2360_v46 = vadd.f32 %v2258_v35, %v4866_v19 }
 0x213   : > { %v2037_v9 = vpop.f32.mrf.mxu1  ;;  %v3148_v24 = vpop.f32.mrf.mxu0 }
 0x214   : > { %2526 = vst [vmem:[%s4943_s6 + $0xa8] sm:$0xff] %v2494_v53  ;;  %v2463_v23 = vadd.f32 %v4927_v38, %v2360_v46  ;;  %v2263_v36 = vadd.f32 %v3136_v40, %v2037_v9 }
 0x215   : > { %v2039_v56 = vpop.f32.mrf.mxu1  ;;  %v2297_v26 = vpop.f32.mrf.mxu0 }
 0x216   : > { %v2495_v52 = vmax.f32 %v2463_v23, 0.0  ;;  %v2361_v58 = vadd.f32 %v2263_v36, %v4859_v37 }
 0x217   : > { %v2042_v44 = vpop.f32.mrf.mxu1 }
 0x218   : > { %2527 = vst [vmem:[%s4943_s6 + $0xb0] sm:$0xff] %v2495_v52  ;;  %v2464_v8 = vadd.f32 %v4927_v38, %v2361_v58  ;;  %v2268_v54 = vadd.f32 %v2267_v6, %v2042_v44 }
 0x219   : > { %v2044_v45 = vpop.f32.mrf.mxu1 }
 0x21a   : > { %v2496_v19 = vmax.f32 %v2464_v8, 0.0  ;;  %v2362_v1 = vadd.f32 %v2268_v54, %v4878_v48 }
 0x21b   : > { %v2047_v28 = vpop.f32.mrf.mxu1 }
 0x21c   : > { %2528 = vst [vmem:[%s4943_s6 + $0xb8] sm:$0xff] %v2496_v19  ;;  %v2465_v16 = vadd.f32 %v4927_v38, %v2362_v1  ;;  %v2273_v2 = vadd.f32 %v3139_v59, %v2047_v28 }
 0x21d   : > { %v2049_v31 = vpop.f32.mrf.mxu1 }
 0x21e   : > { %v2497_v37 = vmax.f32 %v2465_v16, 0.0  ;;  %v2363_v34 = vadd.f32 %v2273_v2, %v4871_v63 }
 0x21f   : > { %v2052_v14 = vpop.f32.mrf.mxu1 }
 0x220   : > { %2529 = vst [vmem:[%s4943_s6 + $0xc0] sm:$0xff] %v2497_v37  ;;  %v2466_v10 = vadd.f32 %v4927_v38, %v2363_v34  ;;  %v2278_v61 = vadd.f32 %v2277_v17, %v2052_v14 }
 0x221   : > { %v2054_v12 = vpop.f32.mrf.mxu1 }
 0x222   : > { %v2498_v48 = vmax.f32 %v2466_v10, 0.0  ;;  %v2364_v39 = vadd.f32 %v2278_v61, %v4890_v60 }
 0x223   : > { %v2057_v33 = vpop.f32.mrf.mxu1 }
 0x224   : > { %2530 = vst [vmem:[%s4943_s6 + $0xc8] sm:$0xff] %v2498_v48  ;;  %v2467_v57 = vadd.f32 %v4927_v38, %v2364_v39  ;;  %v2283_v50 = vadd.f32 %v3142_v21, %v2057_v33 }
 0x225   : > { %v2059_v32 = vpop.f32.mrf.mxu1 }
 0x226   : > { %v2499_v63 = vmax.f32 %v2467_v57, 0.0  ;;  %v2365_v7 = vadd.f32 %v2283_v50, %v4883_v3 }
 0x227   : > { %v2062_v13 = vpop.f32.mrf.mxu1 }
 0x228   : > { %2531 = vst [vmem:[%s4943_s6 + $0xd0] sm:$0xff] %v2499_v63  ;;  %v2468_v5 = vadd.f32 %v4927_v38, %v2365_v7  ;;  %v2288_v11 = vadd.f32 %v2287_v18, %v2062_v13 }
 0x229   : > { %v2064_v29 = vpop.f32.mrf.mxu1 }
 0x22a   : > { %v2500_v60 = vmax.f32 %v2468_v5, 0.0  ;;  %v2366_v40 = vadd.f32 %v2288_v11, %v4904_v49 }
 0x22b   : > { %v2067_v41 = vpop.f32.mrf.mxu1 }
 0x22c   : > { %2532 = vst [vmem:[%s4943_s6 + $0xd8] sm:$0xff] %v2500_v60  ;;  %v2469_v42 = vadd.f32 %v4927_v38, %v2366_v40  ;;  %v2293_v4 = vadd.f32 %v3145_v15, %v2067_v41 }
 0x22d   : > { %v2069_v0 = vpop.f32.mrf.mxu1 }
 0x22e   : > { %v2501_v3 = vmax.f32 %v2469_v42, 0.0  ;;  %v2367_v47 = vadd.f32 %v2293_v4, %v4895_v20 }
 0x22f   : > { %v2072_v25 = vpop.f32.mrf.mxu1 }
 0x230   : > { %2533 = vst [vmem:[%s4943_s6 + $0xe0] sm:$0xff] %v2501_v3  ;;  %v2470_v22 = vadd.f32 %v4927_v38, %v2367_v47  ;;  %v2298_v51 = vadd.f32 %v2297_v26, %v2072_v25 }
 0x231   : > { %v2074_v55 = vpop.f32.mrf.mxu1 }
 0x232   : > { %v2502_v49 = vmax.f32 %v2470_v22, 0.0  ;;  %v2368_v27 = vadd.f32 %v2298_v51, %v4919_v30 }
 0x233   : > { %v2077_v35 = vpop.f32.mrf.mxu1 }
 0x234   : > { %2534 = vst [vmem:[%s4943_s6 + $0xe8] sm:$0xff] %v2502_v49  ;;  %v2471_v43 = vadd.f32 %v4927_v38, %v2368_v27  ;;  %v2303_v59 = vadd.f32 %v3148_v24, %v2077_v35 }
 0x235   : > { %v2079_v53 = vpop.f32.mrf.mxu1 }
 0x236   : > { %v2503_v46 = vmax.f32 %v2471_v43, 0.0  ;;  %v2369_v9 = vadd.f32 %v2303_v59, %v4911_v62 }
 0x238   : > { %2535 = vst [vmem:[%s4943_s6 + $0xf0] sm:$0xff] %v2503_v46  ;;  %v2472_v20 = vadd.f32 %v4927_v38, %v2369_v9 }
 0x23a   : > { %v2504_v23 = vmax.f32 %v2472_v20, 0.0 }
 0x23c   : > { %2536 = vst [vmem:[%s4943_s6 + $0xf8] sm:$0xff] %v2504_v23 }
 0x23d PF: > { %s14_s17 = sadd.s32 1, %s3227_s17   ;;  %s5306_s15 = smov %s3223_s16 }
 0x23e   : > { %p11_p5 = scmp.ge.s32.totalorder %s14_s17, 4   ;;  %s5307_s16 = smov %s5309_s18 }
 0x240   :  { %13 = sbr.rel (!%p11_p5) target bundleno = 2 (0x2), region = 71 }

// kernel: upsample_forward.4
= control target key start
LH: loop header
LB: loop body
LE: loop exit
PB: predicated region body
PF: predicated region fallthrough
CT: control target
= control target key end

     0   :  { %s6168_s24 = smov 0   ;;  %s6170_s25 = smov 0   ;;  %s9716_s0 = inlined_call_operand.vmem [shape: f32[2,18,18,128], index: 0, kind: input, shape index: {}, may-alias: {0,1}]   ;;  %s9717_s1 = inlined_call_operand.vmem [shape: f32[2,18,18,128], index: 1, kind: input, shape index: {}, may-alias: {0,1}]   ;;  %s9718_s2 = inlined_call_operand.vmem [shape: f32[2,18,18,128], index: 2, kind: input, shape index: {}, may-alias: {2,3}]   ;;  %s9719_s3 = inlined_call_operand.vmem [shape: f32[2,18,18,128], index: 3, kind: input, shape index: {}, may-alias: {2,3}]   ;;  %s9720_s4 = inlined_call_operand.vmem [shape: f32[3,384,128], index: 4, kind: input, shape index: {}]   ;;  %s9721_s5 = inlined_call_operand.vmem [shape: f32[3,384,128], index: 5, kind: input, shape index: {}]   ;;  %s9722_s6 = inlined_call_operand.vmem [shape: f32[1,128], index: 6, kind: input, shape index: {}]   ;;  %s9723_s7 = inlined_call_operand.vmem [shape: f32[2,16,16,128], index: 7, kind: output, shape index: {}]  }
   0x1   :  { %s6172_s26 = smov 0  }
   0x2 LB: > { %s29_s27 = sadd.s32 1, %s6121_s25  ;;  %p5042_p0 = scmp.ge.s32.totalorder %s6125_s26, 1  ;;  %s6125_s26 = sphi %s6172_s26, %s17_s26   ;;  %s6121_s25 = sphi %s6170_s25, %s10298_s25   ;;  %s6117_s24 = sphi %s6168_s24, %s10297_s24  }
   0x3   : > { %p31_p1 = scmp.ge.s32.totalorder %s29_s27, 2  ;;  %p349_p2 = scmp.lt.s32.totalorder %s6125_s26, 3 }
   0x5   : > { %s10300_s27 = smov (%p31_p1, %s29_s27), 0  ;;  %p350_p3 = pnand %p5042_p0, %p349_p2 }
   0x7   : > { %353 = sbr.rel (%p350_p3) target bundleno = 869 (0x365), region = 48 }
   0xc   : > { %v927_v0 = vld [vmem:[%s9720_s4 + $0x178] sm:$0xff]  ;;  %v926_v2 = vld [vmem:[%s9720_s4 + $0x170] sm:$0xff]  ;;  %p441_p4 = scmp.lt.s32.totalorder %s6117_s24, 1  ;;  %v9726_v3 = vmov 0.0   ;;  %v925_v5 = vld [vmem:[%s9720_s4 + $0x168] sm:$0xff]  ;;  %vm753_vm0 = vcmask 1045504  }
   0xd   : > { %v895_v1 = vld [vmem:[%s9720_s4 + $0x78] sm:$0xff]  ;;  %928 = vmatprep.subr.mxu0 %v9726_v3  ;;  %5537 = vmatprep.subr.mxu1 %v927_v0  ;;  %v894_v4 = vld [vmem:[%s9720_s4 + $0x70] sm:$0xff]  ;;  %v893_v6 = vld [vmem:[%s9720_s4 + $0x68] sm:$0xff]  ;;  %vm626_vm1 = vcmask 1046528  }
   0xe   : > { %929 = vmatpush1.msra.mxu0 %v895_v1  ;;  %5538 = vmatpush3.msra.mxu1 %v927_v0  ;;  %s10302_s24 = smov (!%p441_p4, %s6117_s24), 1  ;;  %v924_v7 = vld [vmem:[%s9720_s4 + $0x160] sm:$0xff]  ;;  %v923_v9 = vld [vmem:[%s9720_s4 + $0x158] sm:$0xff]  ;;  %v922_v11 = vld [vmem:[%s9720_s4 + $0x150] sm:$0xff] }
   0xf   : > { %930 = vmatprep.subr.mxu0 %v9726_v3  ;;  %5539 = vmatprep.subr.mxu1 %v926_v2  ;;  %v892_v8 = vld [vmem:[%s9720_s4 + $0x60] sm:$0xff]  ;;  %v891_v10 = vld [vmem:[%s9720_s4 + $0x58] sm:$0xff]  ;;  %v890_v12 = vld [vmem:[%s9720_s4 + $0x50] sm:$0xff]  ;;  %s6254_s28 = smul.u32 432, %s10302_s24  ;;  %s5248_s20 = sshll.u32 %s10302_s24, 8 }
  0x10   : > { %931 = vmatpush1.msra.mxu0 %v894_v4  ;;  %5540 = vmatpush3.msra.mxu1 %v926_v2  ;;  %v921_v13 = vld [vmem:[%s9720_s4 + $0x148] sm:$0xff]  ;;  %v920_v15 = vld [vmem:[%s9720_s4 + $0x140] sm:$0xff]  ;;  %v919_v17 = vld [vmem:[%s9720_s4 + $0x138] sm:$0xff]  ;;  %s9612_s23 = scalar_lea.vmem %s9723_s7, %s5248_s20 }
  0x11   : > { %932 = vmatprep.subr.mxu0 %v9726_v3  ;;  %5541 = vmatprep.subr.mxu1 %v925_v5  ;;  %v889_v14 = vld [vmem:[%s9720_s4 + $0x48] sm:$0xff]  ;;  %v888_v16 = vld [vmem:[%s9720_s4 + $0x40] sm:$0xff]  ;;  %v887_v18 = vld [vmem:[%s9720_s4 + $0x38] sm:$0xff]  ;;  %s6274_s16 = scalar_lea.vmem %s9716_s0, %s6254_s28  ;;  %s5245_s13 = sadd.s32 384, %s6254_s28 }
  0x12   : > { %933 = vmatpush1.msra.mxu0 %v893_v6  ;;  %5542 = vmatpush3.msra.mxu1 %v925_v5  ;;  %v918_v19 = vld [vmem:[%s9720_s4 + $0x130] sm:$0xff]  ;;  %v917_v21 = vld [vmem:[%s9720_s4 + $0x128] sm:$0xff]  ;;  %v916_v23 = vld [vmem:[%s9720_s4 + $0x120] sm:$0xff]  ;;  %s7281_s19 = scalar_lea.vmem %s9717_s1, %s5245_s13  ;;  %s7712_s8 = scalar_lea.vmem %s9718_s2, %s6254_s28 }
  0x13   : > { %934 = vmatprep.subr.mxu0 %v9726_v3  ;;  %5543 = vmatprep.subr.mxu1 %v924_v7  ;;  %v886_v20 = vld [vmem:[%s9720_s4 + $0x30] sm:$0xff]  ;;  %v885_v22 = vld [vmem:[%s9720_s4 + $0x28] sm:$0xff]  ;;  %v884_v24 = vld [vmem:[%s9720_s4 + $0x20] sm:$0xff] }
  0x14   : > { %935 = vmatpush1.msra.mxu0 %v892_v8  ;;  %5544 = vmatpush3.msra.mxu1 %v924_v7  ;;  %v915_v25 = vld [vmem:[%s9720_s4 + $0x118] sm:$0xff]  ;;  %v6288_v27 = vld [vmem:[%s6274_s16] sm:$0xff]  ;;  %v6291_v28 = vld [vmem:[%s6274_s16 + $0x8] sm:$0xff] }
  0x15   : > { %936 = vmatprep.subr.mxu0 %v9726_v3  ;;  %5545 = vmatprep.subr.mxu1 %v923_v9  ;;  %v883_v26 = vld [vmem:[%s9720_s4 + $0x18] sm:$0xff]  ;;  %v914_v29 = vld [vmem:[%s9720_s4 + $0x110] sm:$0xff]  ;;  %v913_v32 = vld [vmem:[%s9720_s4 + $0x108] sm:$0xff]  ;;  %v754_v33 = vrot.slane %v6288_v27, 2  ;;  %v755_v34 = vrot.slane %v6291_v28, 2 }
  0x16   : > { %937 = vmatpush1.msra.mxu0 %v891_v10  ;;  %5546 = vmatpush3.msra.mxu1 %v923_v9  ;;  %v6297_v30 = vld [vmem:[%s6274_s16 + $0x10] sm:$0x3]  ;;  %v881_v35 = vld [vmem:[%s9720_s4 + $0x8] sm:$0xff]  ;;  %v6314_v37 = vld [vmem:[%s6274_s16 + $0x18] sm:$0xff] }
  0x17   : > { %938 = vmatprep.subr.mxu0 %v9726_v3  ;;  %5547 = vmatprep.subr.mxu1 %v922_v11  ;;  %v882_v31 = vld [vmem:[%s9720_s4 + $0x10] sm:$0xff]  ;;  %v757_v36 = vrot.slane %v6297_v30, 2  ;;  %v6317_v38 = vld [vmem:[%s6274_s16 + $0x20] sm:$0xff]  ;;  %v6327_v41 = vld [vmem:[%s6274_s16 + $0x28] sm:$0x3]  ;;  %v756_v42 = vsel %vm753_vm0, %v754_v33, %v755_v34  ;;  %v759_v43 = vrot.slane %v6314_v37, 2 }
  0x18   : > { %939 = vmatpush1.msra.mxu0 %v890_v12  ;;  %5548 = vmatpush3.msra.mxu1 %v922_v11  ;;  %v912_v39 = vld [vmem:[%s9720_s4 + $0x100] sm:$0xff]  ;;  %v760_v44 = vrot.slane %v6317_v38, 2  ;;  %v911_v46 = vld [vmem:[%s9720_s4 + $0xf8] sm:$0xff]  ;;  %v762_v48 = vrot.slane %v6327_v41, 2  ;;  %v6342_v49 = vld [vmem:[%s6274_s16 + $0x30] sm:$0xff] }
  0x19   : > { %940 = vmatprep.subr.mxu0 %v9726_v3  ;;  %5549 = vmatprep.subr.mxu1 %v921_v13  ;;  %v880_v40 = vld [vmem:[%s9720_s4] sm:$0xff]  ;;  %v758_v45 = vsel %vm753_vm0, %v755_v34, %v757_v36  ;;  %v5064_v47 = vld [vmem:[%s9720_s4 + $0x1f8] sm:$0xff]  ;;  %v910_v51 = vld [vmem:[%s9720_s4 + $0xf0] sm:$0xff]  ;;  %v764_v55 = vrot.slane %v6342_v49, 2 }
  0x1a   : > { %941 = vmatpush1.msra.mxu0 %v889_v14  ;;  %5550 = vmatpush3.msra.mxu1 %v921_v13  ;;  %v6345_v50 = vld [vmem:[%s6274_s16 + $0x38] sm:$0xff]  ;;  %v6353_v52 = vsel %vm753_vm0, %v759_v43, %v760_v44  ;;  %v6356_v53 = vld [vmem:[%s6274_s16 + $0x40] sm:$0x3]  ;;  %v5063_v54 = vld [vmem:[%s9720_s4 + $0x1f0] sm:$0xff]  ;;  %v6366_v57 = vsel %vm753_vm0, %v760_v44, %v762_v48 }
  0x1b   : > { %942 = vmatprep.subr.mxu0 %v9726_v3  ;;  %5551 = vmatprep.subr.mxu1 %v920_v15  ;;  %v765_v56 = vrot.slane %v6345_v50, 2  ;;  %9912 = vst [vmem:[#allocation3_spill] sm:$0xff] %v6366_v57  ;;  %v909_v58 = vld [vmem:[%s9720_s4 + $0xe8] sm:$0xff]  ;;  %v767_v60 = vrot.slane %v6356_v53, 2  ;;  %v6380_v62 = vld [vmem:[%s6274_s16 + $0x50] sm:$0xff]  ;;  %v908_v63 = vld [vmem:[%s9720_s4 + $0xe0] sm:$0xff] }
  0x1c   : > { %943 = vmatpush1.msra.mxu0 %v888_v16  ;;  %5552 = vmatpush3.msra.mxu1 %v920_v15  ;;  %v5062_v59 = vld [vmem:[%s9720_s4 + $0x1e8] sm:$0xff]  ;;  %v6392_v1 = vld [vmem:[%s6274_s16 + $0x58] sm:$0x3]  ;;  %v5061_v2 = vld [vmem:[%s9720_s4 + $0x1e0] sm:$0xff]  ;;  %v770_v5 = vrot.slane %v6380_v62, 2 }
  0x1d   : > { %944 = vmatprep.subr.mxu0 %v9726_v3  ;;  %5553 = vmatprep.subr.mxu1 %v919_v17  ;;  %v6377_v61 = vld [vmem:[%s6274_s16 + $0x48] sm:$0xff]  ;;  %v6389_v0 = vsel %vm753_vm0, %v764_v55, %v765_v56  ;;  %v6402_v6 = vsel %vm753_vm0, %v765_v56, %v767_v60  ;;  %v907_v7 = vld [vmem:[%s9720_s4 + $0xd8] sm:$0xff]  ;;  %v772_v9 = vrot.slane %v6392_v1, 2  ;;  %v6413_v10 = vld [vmem:[%s6274_s16 + $0x60] sm:$0xff] }
  0x1e   : > { %945 = vmatpush1.msra.mxu0 %v887_v18  ;;  %5554 = vmatpush3.msra.mxu1 %v919_v17  ;;  %9913 = vst [vmem:[#allocation4_spill] sm:$0xff] %v6389_v0  ;;  %v769_v4 = vrot.slane %v6377_v61, 2  ;;  %9914 = vst [vmem:[#allocation5_spill] sm:$0xff] %v6402_v6  ;;  %v5060_v8 = vld [vmem:[%s9720_s4 + $0x1d8] sm:$0xff]  ;;  %v6416_v11 = vld [vmem:[%s6274_s16 + $0x68] sm:$0xff]  ;;  %v774_v16 = vrot.slane %v6413_v10, 2 }
  0x1f   : > { %946 = vmatprep.subr.mxu0 %v9726_v3  ;;  %5555 = vmatprep.subr.mxu1 %v918_v19  ;;  %v906_v12 = vld [vmem:[%s9720_s4 + $0xd0] sm:$0xff]  ;;  %v775_v17 = vrot.slane %v6416_v11, 2  ;;  %v6438_v18 = vsel %vm753_vm0, %v770_v5, %v772_v9  ;;  %v903_v34 = vld [vmem:[%s9720_s4 + $0xb8] sm:$0xff]  ;;  %v6500_v44 = vld [vmem:[%s6274_s16 + $0xa0] sm:$0x3] }
  0x20   : > { %947 = vmatpush1.msra.mxu0 %v886_v20  ;;  %5556 = vmatpush3.msra.mxu1 %v918_v19  ;;  %v6425_v13 = vsel %vm753_vm0, %v769_v4, %v770_v5  ;;  %v6428_v14 = vld [vmem:[%s6274_s16 + $0x70] sm:$0x3]  ;;  %9916 = vst [vmem:[#allocation7_spill] sm:$0xff] %v6438_v18  ;;  %v905_v19 = vld [vmem:[%s9720_s4 + $0xc8] sm:$0xff]  ;;  %v787_v55 = vrot.slane %v6500_v44, 2  ;;  %v5052_v9 = vld [vmem:[%s9720_s4 + $0x198] sm:$0xff] }
  0x21   : > { %948 = vmatprep.subr.mxu0 %v9726_v3  ;;  %5557 = vmatprep.subr.mxu1 %v917_v21  ;;  %9915 = vst [vmem:[#allocation6_spill] sm:$0xff] %v6425_v13  ;;  %v5059_v15 = vld [vmem:[%s9720_s4 + $0x1d0] sm:$0xff]  ;;  %v5058_v20 = vld [vmem:[%s9720_s4 + $0x1c8] sm:$0xff] }
  0x22   : > { %949 = vmatpush1.msra.mxu0 %v885_v22  ;;  %5558 = vmatpush3.msra.mxu1 %v917_v21  ;;  %v777_v21 = vrot.slane %v6428_v14, 2  ;;  %v6449_v22 = vld [vmem:[%s6274_s16 + $0x78] sm:$0xff]  ;;  %v6521_v56 = vld [vmem:[%s6274_s16 + $0xa8] sm:$0xff] }
  0x23   : > { %950 = vmatprep.subr.mxu0 %v9726_v3  ;;  %5559 = vmatprep.subr.mxu1 %v916_v23  ;;  %v789_v4 = vrot.slane %v6521_v56, 2 }
  0x24   : > { %951 = vmatpush1.msra.mxu0 %v884_v24  ;;  %5560 = vmatpush3.msra.mxu1 %v916_v23  ;;  %v6452_v23 = vld [vmem:[%s6274_s16 + $0x80] sm:$0xff]  ;;  %v6474_v33 = vsel %vm753_vm0, %v775_v17, %v777_v21  ;;  %v5051_v21 = vld [vmem:[%s9720_s4 + $0x190] sm:$0xff] }
  0x25   : > { %952 = vmatprep.subr.mxu0 %v9726_v3  ;;  %5561 = vmatprep.subr.mxu1 %v915_v25  ;;  %v904_v24 = vld [vmem:[%s9720_s4 + $0xc0] sm:$0xff]  ;;  %9918 = vst [vmem:[#allocation9_spill] sm:$0xff] %v6474_v33 }
  0x26   : > { %953 = vmatpush1.msra.mxu0 %v883_v26  ;;  %5562 = vmatpush3.msra.mxu1 %v915_v25  ;;  %v6461_v25 = vsel %vm753_vm0, %v774_v16, %v775_v17  ;;  %v6464_v26 = vld [vmem:[%s6274_s16 + $0x88] sm:$0x3]  ;;  %v898_v17 = vld [vmem:[%s9720_s4 + $0x90] sm:$0xff] }
  0x27   : > { %954 = vmatprep.subr.mxu0 %v9726_v3  ;;  %5563 = vmatprep.subr.mxu1 %v914_v29  ;;  %9917 = vst [vmem:[#allocation8_spill] sm:$0xff] %v6461_v25  ;;  %v782_v36 = vrot.slane %v6464_v26, 2  ;;  %v6561_v16 = vld [vmem:[%s6274_s16 + $0xc8] sm:$0xff] }
  0x28   : > { %955 = vmatpush1.msra.mxu0 %v882_v31  ;;  %5564 = vmatpush3.msra.mxu1 %v914_v29  ;;  %v5057_v29 = vld [vmem:[%s9720_s4 + $0x1c0] sm:$0xff]  ;;  %v779_v31 = vrot.slane %v6449_v22, 2 }
  0x29   : > { %956 = vmatprep.subr.mxu0 %v9726_v3  ;;  %5565 = vmatprep.subr.mxu1 %v913_v32 }
  0x2a   : > { %957 = vmatpush1.msra.mxu0 %v881_v35  ;;  %5566 = vmatpush3.msra.mxu1 %v913_v32  ;;  %v780_v32 = vrot.slane %v6452_v23, 2  ;;  %v5056_v35 = vld [vmem:[%s9720_s4 + $0x1b8] sm:$0xff] }
  0x2b   : > { %958 = vmatprep.subr.mxu0 %v9726_v3  ;;  %5567 = vmatprep.subr.mxu1 %v912_v39 }
  0x2c   : > { %959 = vmatpush1.msra.mxu0 %v880_v40  ;;  %5568 = vmatpush3.msra.mxu1 %v912_v39  ;;  %v6485_v39 = vld [vmem:[%s6274_s16 + $0x90] sm:$0xff]  ;;  %v6488_v40 = vld [vmem:[%s6274_s16 + $0x98] sm:$0xff]  ;;  %v6497_v43 = vsel %vm753_vm0, %v779_v31, %v780_v32  ;;  %v6510_v48 = vsel %vm753_vm0, %v780_v32, %v782_v36  ;;  %v5050_v36 = vld [vmem:[%s9720_s4 + $0x188] sm:$0xff] }
  0x2d   : > { %5569 = vmatprep.mubr.f32.mxu1 %v756_v42  ;;  %960 = vmatprep.subr.mxu0 %v9726_v3  ;;  %v902_v42 = vld [vmem:[%s9720_s4 + $0xb0] sm:$0xff]  ;;  %9919 = vst [vmem:[#allocation10_spill] sm:$0xff] %v6497_v43  ;;  %9920 = vst [vmem:[#allocation11_spill] sm:$0xff] %v6510_v48 }
  0x2e   : > { %5570 = vmatmul.mubr.f32.vlgmr.msra.gmra.mxu1 %v758_v45  ;;  %1459 = vmatprep.subr.mxu1 %v9726_v3  ;;  %v5055_v45 = vld [vmem:[%s9720_s4 + $0x1b0] sm:$0xff] }
  0x2f   : > { %961 = vmatpush2.msra.mxu0 %v911_v46  ;;  %1460 = vmatpush1.msra.mxu1 %v5064_v47  ;;  %v784_v46 = vrot.slane %v6485_v39, 2  ;;  %v785_v47 = vrot.slane %v6488_v40, 2 }
  0x30   : > { %962 = vmatprep.subr.mxu0 %v9726_v3  ;;  %1461 = vmatprep.subr.mxu1 %v9726_v3 }
  0x31   : > { %963 = vmatpush2.msra.mxu0 %v910_v51  ;;  %5572 = vmatprep.mubr.f32.mxu1 %v6353_v52  ;;  %v901_v51 = vld [vmem:[%s9720_s4 + $0xa8] sm:$0xff]  ;;  %v6533_v60 = vsel %vm753_vm0, %v784_v46, %v785_v47  ;;  %v6599_v46 = vld [vmem:[%s6274_s16 + $0xe0] sm:$0xff] }
  0x32   : > { %1462 = vmatpush1.msra.mxu1 %v5063_v54  ;;  %964 = vmatprep.subr.mxu0 %v9726_v3  ;;  %v5054_v54 = vld [vmem:[%s9720_s4 + $0x1a8] sm:$0xff]  ;;  %9921 = vst [vmem:[#allocation12_spill] sm:$0xff] %v6533_v60 }
  0x33   : > { %5573 = vmatmul.mubr.f32.gmra.mxu1 %v6366_v57  ;;  %1463 = vmatprep.subr.mxu1 %v9726_v3  ;;  %v648_v57 = vrot.slane %v6416_v11, 1 }
  0x34   : > { %965 = vmatpush2.msra.mxu0 %v909_v58  ;;  %1464 = vmatpush1.msra.mxu1 %v5062_v59  ;;  %v6524_v58 = vld [vmem:[%s6274_s16 + $0xb0] sm:$0xff]  ;;  %v900_v59 = vld [vmem:[%s9720_s4 + $0xa0] sm:$0xff] }
  0x35   : > { %966 = vmatprep.subr.mxu0 %v9726_v3  ;;  %1465 = vmatprep.subr.mxu1 %v9726_v3  ;;  %v790_v5 = vrot.slane %v6524_v58, 2 }
  0x36   : > { %967 = vmatpush2.msra.mxu0 %v908_v63  ;;  %5575 = vmatprep.mubr.f32.mxu1 %v6389_v0  ;;  %v6536_v63 = vld [vmem:[%s6274_s16 + $0xb8] sm:$0x3]  ;;  %v647_v0 = vrot.slane %v6413_v10, 1 }
  0x37   : > { %1466 = vmatpush1.msra.mxu1 %v5061_v2  ;;  %968 = vmatprep.subr.mxu0 %v9726_v3  ;;  %v5053_v2 = vld [vmem:[%s9720_s4 + $0x1a0] sm:$0xff] }
  0x38   : > { %5576 = vmatmul.mubr.f32.gmra.mxu1 %v6402_v6  ;;  %1467 = vmatprep.subr.mxu1 %v9726_v3  ;;  %v5068_v6 = vld [vmem:[%s9720_s4 + $0x218] sm:$0xff] }
  0x39   : > { %969 = vmatpush2.msra.mxu0 %v907_v7  ;;  %1468 = vmatpush1.msra.mxu1 %v5060_v8  ;;  %v6546_v7 = vsel %vm753_vm0, %v785_v47, %v787_v55  ;;  %v899_v8 = vld [vmem:[%s9720_s4 + $0x98] sm:$0xff]  ;;  %v896_v47 = vld [vmem:[%s9720_s4 + $0x80] sm:$0xff] }
  0x3a   : > { %970 = vmatprep.subr.mxu0 %v9726_v3  ;;  %1469 = vmatprep.subr.mxu1 %v9726_v3  ;;  %9922 = vst [vmem:[#allocation13_spill] sm:$0xff] %v6546_v7 }
  0x3b   : > { %971 = vmatpush2.msra.mxu0 %v906_v12  ;;  %5578 = vmatprep.mubr.f32.mxu1 %v6425_v13  ;;  %v792_v12 = vrot.slane %v6536_v63, 2  ;;  %v6811_v13 = vld [vmem:[%s6274_s16 + $0x170] sm:$0xff] }
  0x3c   : > { %1470 = vmatpush1.msra.mxu1 %v5059_v15  ;;  %972 = vmatprep.subr.mxu0 %v9726_v3  ;;  %v6558_v15 = vld [vmem:[%s6274_s16 + $0xc0] sm:$0xff] }
  0x3d   : > { %5579 = vmatmul.mubr.f32.gmra.mxu1 %v6438_v18  ;;  %1471 = vmatprep.subr.mxu1 %v9726_v3  ;;  %v6582_v31 = vsel %vm753_vm0, %v790_v5, %v792_v12  ;;  %v794_v32 = vrot.slane %v6558_v15, 2  ;;  %v6628_v12 = vld [vmem:[%s6274_s16 + $0xf8] sm:$0xff] }
  0x3e   : > { %973 = vmatpush2.msra.mxu0 %v905_v19  ;;  %1472 = vmatpush1.msra.mxu1 %v5058_v20  ;;  %v6569_v19 = vsel %vm753_vm0, %v789_v4, %v790_v5  ;;  %v6572_v20 = vld [vmem:[%s6274_s16 + $0xd0] sm:$0x3]  ;;  %9924 = vst [vmem:[#allocation15_spill] sm:$0xff] %v6582_v31 }
  0x3f   : > { %974 = vmatprep.subr.mxu0 %v9726_v3  ;;  %1473 = vmatprep.subr.mxu1 %v9726_v3  ;;  %9923 = vst [vmem:[#allocation14_spill] sm:$0xff] %v6569_v19 }
  0x40   : > { %975 = vmatpush2.msra.mxu0 %v904_v24  ;;  %5581 = vmatprep.mubr.f32.mxu1 %v6461_v25  ;;  %v627_v24 = vrot.slane %v6288_v27, 1  ;;  %v643_v25 = vrot.slane %v6380_v62, 1 }
  0x41   : > { %1474 = vmatpush1.msra.mxu1 %v5057_v29  ;;  %976 = vmatprep.subr.mxu0 %v9726_v3  ;;  %v628_v29 = vrot.slane %v6291_v28, 1 }
  0x42   : > { %5582 = vmatmul.mubr.f32.gmra.mxu1 %v6474_v33  ;;  %1475 = vmatprep.subr.mxu1 %v9726_v3  ;;  %v642_v33 = vrot.slane %v6377_v61, 1 }
  0x43   : > { %977 = vmatpush2.msra.mxu0 %v903_v34  ;;  %1476 = vmatpush1.msra.mxu1 %v5056_v35  ;;  %v795_v34 = vrot.slane %v6561_v16, 2  ;;  %v897_v35 = vld [vmem:[%s9720_s4 + $0x88] sm:$0xff] }
  0x44   : > { %978 = vmatprep.subr.mxu0 %v9726_v3  ;;  %1477 = vmatprep.subr.mxu1 %v9726_v3 }
  0x45   : > { %979 = vmatpush2.msra.mxu0 %v902_v42  ;;  %5584 = vmatprep.mubr.f32.mxu1 %v6497_v43  ;;  %v797_v42 = vrot.slane %v6572_v20, 2  ;;  %v6611_v55 = vsel %vm753_vm0, %v794_v32, %v795_v34  ;;  %v633_v32 = vrot.slane %v6317_v38, 1  ;;  %v5072_v43 = vld [vmem:[%s9720_s4 + $0x238] sm:$0xff] }
  0x46   : > { %1478 = vmatpush1.msra.mxu1 %v5055_v45  ;;  %980 = vmatprep.subr.mxu0 %v9726_v3  ;;  %v6596_v45 = vld [vmem:[%s6274_s16 + $0xd8] sm:$0xff]  ;;  %9925 = vst [vmem:[#allocation16_spill] sm:$0xff] %v6611_v55 }
  0x47   : > { %5585 = vmatmul.mubr.f32.gmra.mxu1 %v6510_v48  ;;  %1479 = vmatprep.subr.mxu1 %v9726_v3  ;;  %v6620_v4 = vsel %vm753_vm0, %v795_v34, %v797_v42  ;;  %v799_v5 = vrot.slane %v6596_v45, 2  ;;  %v6646_v42 = vld [vmem:[%s6274_s16 + $0x100] sm:$0x3] }
  0x48   : > { %981 = vmatpush2.msra.mxu0 %v901_v51  ;;  %1480 = vmatpush1.msra.mxu1 %v5054_v54  ;;  %v629_v51 = vsel %vm626_vm1, %v627_v24, %v628_v29  ;;  %v6608_v54 = vld [vmem:[%s6274_s16 + $0xe8] sm:$0x3]  ;;  %9926 = vst [vmem:[#allocation17_spill] sm:$0xff] %v6620_v4  ;;  %v632_v24 = vrot.slane %v6314_v37, 1 }
  0x49   : > { %982 = vmatprep.subr.mxu0 %v9726_v3  ;;  %1481 = vmatprep.subr.mxu1 %v9726_v3 }
  0x4a   : > { %983 = vmatpush2.msra.mxu0 %v900_v59  ;;  %5587 = vmatprep.mubr.f32.mxu1 %v6533_v60  ;;  %v5049_v59 = vld [vmem:[%s9720_s4 + $0x180] sm:$0xff]  ;;  %v6765_v60 = vld [vmem:[%s6274_s16 + $0x150] sm:$0xff] }
  0x4b   : > { %1482 = vmatpush1.msra.mxu1 %v5053_v2  ;;  %984 = vmatprep.subr.mxu0 %v9726_v3  ;;  %v630_v2 = vrot.slane %v6297_v30, 1  ;;  %v5096_v30 = vld [vmem:[%s9720_s4 + $0x2f8] sm:$0xff] }
  0x4c   : > { %5588 = vmatmul.mubr.f32.gmra.mxu1 %v6546_v7  ;;  %1483 = vmatprep.subr.mxu1 %v9726_v3  ;;  %v6739_v7 = vld [vmem:[%s6274_s16 + $0x140] sm:$0xff] }
  0x4d   : > { %985 = vmatpush2.msra.mxu0 %v899_v8  ;;  %1484 = vmatpush1.msra.mxu1 %v5052_v9  ;;  %v800_v8 = vrot.slane %v6599_v46, 2  ;;  %v6625_v9 = vld [vmem:[%s6274_s16 + $0xf0] sm:$0xff]  ;;  %v631_v34 = vsel %vm626_vm1, %v628_v29, %v630_v2  ;;  %v6664_v2 = vld [vmem:[%s6274_s16 + $0x108] sm:$0xff] }
  0x4e   : > { %986 = vmatprep.subr.mxu0 %v9726_v3  ;;  %1485 = vmatprep.subr.mxu1 %v9726_v3 }
  0x4f   : > { %987 = vmatpush2.msra.mxu0 %v898_v17  ;;  %5590 = vmatprep.mubr.f32.mxu1 %v6569_v19  ;;  %v802_v17 = vrot.slane %v6608_v54, 2 }
  0x50   : > { %1486 = vmatpush1.msra.mxu1 %v5051_v21  ;;  %988 = vmatprep.subr.mxu0 %v9726_v3  ;;  %v5080_v21 = vld [vmem:[%s9720_s4 + $0x278] sm:$0xff] }
  0x51   : > { %5591 = vmatmul.mubr.f32.gmra.mxu1 %v6582_v31  ;;  %1487 = vmatprep.subr.mxu1 %v9726_v3  ;;  %v6656_v29 = vsel %vm753_vm0, %v800_v8, %v802_v17  ;;  %v6677_v17 = vld [vmem:[%s6274_s16 + $0x118] sm:$0x3]  ;;  %v638_v31 = vrot.slane %v6345_v50, 1 }
  0x52   : > { %989 = vmatpush2.msra.mxu0 %v897_v35  ;;  %1488 = vmatpush1.msra.mxu1 %v5050_v36  ;;  %v804_v35 = vrot.slane %v6625_v9, 2  ;;  %v805_v36 = vrot.slane %v6628_v12, 2  ;;  %9928 = vst [vmem:[#allocation19_spill] sm:$0xff] %v6656_v29 }
  0x53   : > { %990 = vmatprep.subr.mxu0 %v9726_v3  ;;  %1489 = vmatprep.subr.mxu1 %v9726_v3 }
  0x54   : > { %991 = vmatpush2.msra.mxu0 %v896_v47  ;;  %992 = vmatprep.mubr.f32.mxu0 %v629_v51  ;;  %v6650_v47 = vsel %vm753_vm0, %v799_v5, %v800_v8  ;;  %v6660_v51 = vsel %vm626_vm1, %v632_v24, %v633_v32  ;;  %v6667_v5 = vld [vmem:[%s6274_s16 + $0x110] sm:$0xff]  ;;  %v5078_v8 = vld [vmem:[%s9720_s4 + $0x268] sm:$0xff]  ;;  %v635_v24 = vrot.slane %v6327_v41, 1 }
  0x55   : > { %5593 = vmatprep.mubr.f32.mxu1 %v6611_v55  ;;  %1490 = vmatpush1.msra.mxu1 %v5049_v59  ;;  %9927 = vst [vmem:[#allocation18_spill] sm:$0xff] %v6650_v47  ;;  %v807_v59 = vrot.slane %v6646_v42, 2  ;;  %v637_v55 = vrot.slane %v6342_v49, 1 }
  0x56   : > { %993 = vmatmul.mubr.f32.vlgmr.msra.gmra.mxu0 %v6288_v27  ;;  %5594 = vmatmul.mubr.f32.gmra.mxu1 %v6620_v4  ;;  %v5079_v27 = vld [vmem:[%s9720_s4 + $0x270] sm:$0xff]  ;;  %v5076_v4 = vld [vmem:[%s9720_s4 + $0x258] sm:$0xff] }
  0x57   : > { %1491 = vmatprep.subr.mxu1 %v9726_v3  ;;  %5617 = vmatprep.subr.mxu0 %v5096_v30  ;;  %v6700_v41 = vsel %vm753_vm0, %v805_v36, %v807_v59 }
  0x58   : > { %1492 = vmatpush2.msra.mxu1 %v5080_v21  ;;  %5618 = vmatpush3.msra.mxu0 %v5096_v30  ;;  %v6674_v30 = vsel %vm753_vm0, %v804_v35, %v805_v36  ;;  %v5095_v21 = vld [vmem:[%s9720_s4 + $0x2f0] sm:$0xff]  ;;  %v809_v35 = vrot.slane %v6664_v2, 2  ;;  %9930 = vst [vmem:[#allocation21_spill] sm:$0xff] %v6700_v41  ;;  %v6711_v36 = vsel %vm626_vm1, %v633_v32, %v635_v24 }
  0x59   : > { %1493 = vmatprep.subr.mxu1 %v9726_v3  ;;  %997 = vmatprep.mubr.f32.mxu0 %v631_v34  ;;  %9929 = vst [vmem:[#allocation20_spill] sm:$0xff] %v6674_v30  ;;  %v5077_v34 = vld [vmem:[%s9720_s4 + $0x260] sm:$0xff]  ;;  %v5075_v32 = vld [vmem:[%s9720_s4 + $0x250] sm:$0xff] }
  0x5a   : > { %5596 = vmatprep.mubr.f32.mxu1 %v6650_v47  ;;  %1494 = vmatpush2.msra.mxu1 %v5079_v27  ;;  %v6693_v27 = vld [vmem:[%s6274_s16 + $0x120] sm:$0xff]  ;;  %v9931_v47 = vmov 0.0  }
  0x5b   : > { %998 = vmatmul.mubr.f32.gmra.mxu0 %v6291_v28  ;;  %5597 = vmatmul.mubr.f32.gmra.mxu1 %v6656_v29  ;;  %v810_v28 = vrot.slane %v6667_v5, 2  ;;  %v6696_v29 = vld [vmem:[%s6274_s16 + $0x128] sm:$0xff]  ;;  %v814_v59 = vrot.slane %v6693_v27, 2 }
  0x5c   : > { %1495 = vmatprep.subr.mxu1 %v9726_v3  ;;  %1002 = vmatprep.mubr.f32.mxu0 %v6660_v51  ;;  %v812_v3 = vrot.slane %v6677_v17, 2 }
  0x5d   : > { %1496 = vmatpush2.msra.mxu1 %v5078_v8  ;;  %5599 = vmatprep.mubr.f32.mxu1 %v6674_v30  ;;  %v815_v8 = vrot.slane %v6696_v29, 2  ;;  %v6716_v30 = vld [vmem:[%s6274_s16 + $0x130] sm:$0x3] }
  0x5e   : > { %1497 = vmatprep.subr.mxu1 %v9931_v47  ;;  %5619 = vmatprep.subr.mxu0 %v5095_v21  ;;  %v6727_v24 = vsel %vm753_vm0, %v810_v28, %v812_v3  ;;  %v817_v19 = vrot.slane %v6716_v30, 2  ;;  %v5074_v3 = vld [vmem:[%s9720_s4 + $0x248] sm:$0xff] }
  0x5f   : > { %1498 = vmatpush2.msra.mxu1 %v5077_v34  ;;  %1003 = vmatmul.mubr.f32.gmra.mxu0 %v6314_v37  ;;  %v6721_v34 = vsel %vm753_vm0, %v809_v35, %v810_v28  ;;  %9933 = vst [vmem:[#allocation23_spill] sm:$0xff] %v6727_v24  ;;  %v6736_v35 = vld [vmem:[%s6274_s16 + $0x138] sm:$0xff]  ;;  %v640_v28 = vrot.slane %v6356_v53, 1 }
  0x60   : > { %5600 = vmatmul.mubr.f32.gmra.mxu1 %v6700_v41  ;;  %1499 = vmatprep.subr.mxu1 %v9931_v47  ;;  %9932 = vst [vmem:[#allocation22_spill] sm:$0xff] %v6721_v34  ;;  %v6732_v41 = vsel %vm626_vm1, %v637_v55, %v638_v31  ;;  %v6749_v55 = vld [vmem:[%s6274_s16 + $0x148] sm:$0x3]  ;;  %v6772_v53 = vsel %vm753_vm0, %v815_v8, %v817_v19 }
  0x61   : > { %1500 = vmatpush2.msra.mxu1 %v5076_v4  ;;  %5620 = vmatpush3.msra.mxu0 %v5095_v21  ;;  %v6746_v4 = vsel %vm753_vm0, %v814_v59, %v815_v8  ;;  %v5094_v21 = vld [vmem:[%s9720_s4 + $0x2e8] sm:$0xff]  ;;  %v5073_v59 = vld [vmem:[%s9720_s4 + $0x240] sm:$0xff]  ;;  %9935 = vst [vmem:[#allocation25_spill] sm:$0xff] %v6772_v53  ;;  %v822_v48 = vrot.slane %v6749_v55, 2  ;;  %v6783_v19 = vsel %vm626_vm1, %v638_v31, %v640_v28  ;;  %v824_v8 = vrot.slane %v6765_v60, 2  ;;  %v5071_v31 = vld [vmem:[%s9720_s4 + $0x230] sm:$0xff] }
  0x62   : > { %1501 = vmatprep.subr.mxu1 %v9931_v47  ;;  %1007 = vmatprep.mubr.f32.mxu0 %v6711_v36  ;;  %9934 = vst [vmem:[#allocation24_spill] sm:$0xff] %v6746_v4 }
  0x63   : > { %5602 = vmatprep.mubr.f32.mxu1 %v6721_v34  ;;  %1502 = vmatpush2.msra.mxu1 %v5075_v32  ;;  %v819_v32 = vrot.slane %v6736_v35, 2  ;;  %v820_v34 = vrot.slane %v6739_v7, 2 }
  0x64   : > { %1008 = vmatmul.mubr.f32.gmra.mxu0 %v6317_v38  ;;  %5603 = vmatmul.mubr.f32.gmra.mxu1 %v6727_v24  ;;  %v6768_v24 = vld [vmem:[%s6274_s16 + $0x158] sm:$0xff] }
  0x65   : > { %1503 = vmatprep.subr.mxu1 %v9931_v47  ;;  %1012 = vmatprep.mubr.f32.mxu0 %v6732_v41  ;;  %v6799_v28 = vsel %vm753_vm0, %v820_v34, %v822_v48 }
  0x66   : > { %1504 = vmatpush2.msra.mxu1 %v5074_v3  ;;  %5605 = vmatprep.mubr.f32.mxu1 %v6746_v4  ;;  %v825_v3 = vrot.slane %v6768_v24, 2  ;;  %v6788_v4 = vld [vmem:[%s6274_s16 + $0x160] sm:$0x3]  ;;  %9937 = vst [vmem:[#allocation27_spill] sm:$0xff] %v6799_v28 }
  0x67   : > { %1505 = vmatprep.subr.mxu1 %v9931_v47  ;;  %5621 = vmatprep.subr.mxu0 %v5094_v21  ;;  %v827_v18 = vrot.slane %v6788_v4, 2 }
  0x68   : > { %1506 = vmatpush2.msra.mxu1 %v5073_v59  ;;  %1013 = vmatmul.mubr.f32.gmra.mxu0 %v6342_v49  ;;  %v6793_v59 = vsel %vm753_vm0, %v819_v32, %v820_v34  ;;  %v6808_v32 = vld [vmem:[%s6274_s16 + $0x168] sm:$0xff]  ;;  %v6818_v48 = vsel %vm753_vm0, %v824_v8, %v825_v3  ;;  %v6821_v34 = vld [vmem:[%s6274_s16 + $0x178] sm:$0x3]  ;;  %v5069_v8 = vld [vmem:[%s9720_s4 + $0x220] sm:$0xff] }
  0x69   : > { %5606 = vmatmul.mubr.f32.gmra.mxu1 %v6772_v53  ;;  %1507 = vmatprep.subr.mxu1 %v9931_v47  ;;  %9936 = vst [vmem:[#allocation26_spill] sm:$0xff] %v6793_v59  ;;  %v6804_v53 = vsel %vm626_vm1, %v642_v33, %v643_v25  ;;  %9938 = vst [vmem:[#allocation28_spill] sm:$0xff] %v6818_v48  ;;  %v5093_v33 = vld [vmem:[%s9720_s4 + $0x2e0] sm:$0xff] }
  0x6a   : > { %1508 = vmatpush2.msra.mxu1 %v5072_v43  ;;  %5622 = vmatpush3.msra.mxu0 %v5094_v21  ;;  %v5070_v43 = vld [vmem:[%s9720_s4 + $0x228] sm:$0xff]  ;;  %v645_v21 = vrot.slane %v6392_v1, 1  ;;  %v832_v1 = vrot.slane %v6821_v34, 2 }
  0x6b   : > { %1509 = vmatprep.subr.mxu1 %v9931_v47  ;;  %1017 = vmatprep.mubr.f32.mxu0 %v6783_v19 }
  0x6c   : > { %5608 = vmatprep.mubr.f32.mxu1 %v6793_v59  ;;  %1510 = vmatpush2.msra.mxu1 %v5071_v31  ;;  %v829_v31 = vrot.slane %v6808_v32, 2  ;;  %v830_v59 = vrot.slane %v6811_v13, 2 }
  0x6d   : > { %1018 = vmatmul.mubr.f32.gmra.mxu0 %v6345_v50  ;;  %5609 = vmatmul.mubr.f32.gmra.mxu1 %v6799_v28  ;;  %v6838_v28 = vsel %vm753_vm0, %v825_v3, %v827_v18  ;;  %v5067_v3 = vld [vmem:[%s9720_s4 + $0x210] sm:$0xff] }
  0x6e   : > { %1511 = vmatprep.subr.mxu1 %v9931_v47  ;;  %1022 = vmatprep.mubr.f32.mxu0 %v6804_v53  ;;  %v6854_v18 = vsel %vm753_vm0, %v829_v31, %v830_v59 }
  0x6f   : > { %1512 = vmatpush2.msra.mxu1 %v5070_v43  ;;  %5611 = vmatprep.mubr.f32.mxu1 %v6818_v48  ;;  %v6849_v43 = vsel %vm626_vm1, %v643_v25, %v645_v21  ;;  %v6865_v25 = vsel %vm626_vm1, %v647_v0, %v648_v57  ;;  %v5066_v21 = vld [vmem:[%s9720_s4 + $0x208] sm:$0xff]  ;;  %v5065_v0 = vld [vmem:[%s9720_s4 + $0x200] sm:$0xff] }
  0x70   : > { %1513 = vmatprep.subr.mxu1 %v9931_v47  ;;  %5623 = vmatprep.subr.mxu0 %v5093_v33 }
  0x71   : > { %1514 = vmatpush2.msra.mxu1 %v5069_v8  ;;  %1023 = vmatmul.mubr.f32.gmra.mxu0 %v6377_v61  ;;  %v6860_v8 = vsel %vm753_vm0, %v830_v59, %v832_v1  ;;  %v5092_v59 = vld [vmem:[%s9720_s4 + $0x2d8] sm:$0xff]  ;;  %v5091_v1 = vld [vmem:[%s9720_s4 + $0x2d0] sm:$0xff] }
  0x72   : > { %5612 = vmatmul.mubr.f32.gmra.mxu1 %v6838_v28  ;;  %1515 = vmatprep.subr.mxu1 %v9931_v47 }
  0x73   : > { %1516 = vmatpush2.msra.mxu1 %v5068_v6  ;;  %5624 = vmatpush3.msra.mxu0 %v5093_v33  ;;  %v650_v6 = vrot.slane %v6428_v14, 1  ;;  %v652_v14 = vrot.slane %v6449_v22, 1  ;;  %v653_v33 = vrot.slane %v6452_v23, 1 }
  0x74   : > { %1517 = vmatprep.subr.mxu1 %v9931_v47  ;;  %1027 = vmatprep.mubr.f32.mxu0 %v6849_v43 }
  0x75   : > { %5614 = vmatprep.mubr.f32.mxu1 %v6854_v18  ;;  %1518 = vmatpush2.msra.mxu1 %v5067_v3  ;;  %v6887_v31 = vsel %vm626_vm1, %v648_v57, %v650_v6  ;;  %v6900_v57 = vsel %vm626_vm1, %v652_v14, %v653_v33  ;;  %v655_v3 = vrot.slane %v6464_v26, 1  ;;  %v658_v6 = vrot.slane %v6488_v40, 1 }
  0x76   : > { %1028 = vmatmul.mubr.f32.gmra.mxu0 %v6380_v62  ;;  %5615 = vmatmul.mubr.f32.gmra.mxu1 %v6860_v8  ;;  %v660_v14 = vrot.slane %v6500_v44, 1 }
  0x77   : > { %1519 = vmatprep.subr.mxu1 %v9931_v47  ;;  %1032 = vmatprep.mubr.f32.mxu0 %v6865_v25  ;;  %v6915_v26 = vsel %vm626_vm1, %v653_v33, %v655_v3  ;;  %v5109_v33 = vld [vmem:[%s9720_s4 + $0x360] sm:$0xff]  ;;  %v5108_v3 = vld [vmem:[%s9720_s4 + $0x358] sm:$0xff] }
  0x78   : > { %1520 = vmatpush2.msra.mxu1 %v5066_v21  ;;  %1523 = vmatprep.mubr.f32.mxu1 %v6660_v51  ;;  %v5112_v51 = vld [vmem:[%s9720_s4 + $0x378] sm:$0xff]  ;;  %v657_v21 = vrot.slane %v6485_v39, 1  ;;  %v6946_v44 = vsel %vm626_vm1, %v658_v6, %v660_v14 }
  0x79   : > { %1521 = vmatprep.subr.mxu1 %v9931_v47  ;;  %5625 = vmatprep.subr.mxu0 %v5092_v59 }
  0x7a   : > { %1522 = vmatpush2.msra.mxu1 %v5065_v0  ;;  %1033 = vmatmul.mubr.f32.gmra.mxu0 %v6413_v10  ;;  %v6931_v0 = vsel %vm626_vm1, %v657_v21, %v658_v6  ;;  %v5107_v21 = vld [vmem:[%s9720_s4 + $0x350] sm:$0xff]  ;;  %v667_v6 = vrot.slane %v6558_v15, 1 }
  0x7b   : > { %1524 = vmatmul.mubr.f32.vlgmr.msra.gmra.mxu1 %v6314_v37  ;;  %5626 = vmatpush3.msra.mxu0 %v5092_v59  ;;  %v5090_v37 = vld [vmem:[%s9720_s4 + $0x2c8] sm:$0xff] }
  0x7c   : > { %1037 = vmatprep.mubr.f32.mxu0 %v6887_v31  ;;  %1528 = vmatprep.mubr.f32.mxu1 %v6711_v36  ;;  %v5111_v36 = vld [vmem:[%s9720_s4 + $0x370] sm:$0xff]  ;;  %v5110_v59 = vld [vmem:[%s9720_s4 + $0x368] sm:$0xff] }
  0x7d   : > { %5627 = vmatprep.subr.mxu0 %v5091_v1  ;;  %2054 = vmatprep.subr.mxu1 %v9931_v47 }
  0x7e   : > { %1038 = vmatmul.mubr.f32.gmra.mxu0 %v6416_v11  ;;  %2055 = vmatpush1.msra.mxu1 %v5112_v51  ;;  %v663_v51 = vrot.slane %v6524_v58, 1 }
  0x7f   : > { %1529 = vmatmul.mubr.f32.gmra.mxu1 %v6317_v38  ;;  %1042 = vmatprep.mubr.f32.mxu0 %v6900_v57  ;;  %v5089_v38 = vld [vmem:[%s9720_s4 + $0x2c0] sm:$0xff] }
  0x80   : > { %1533 = vmatprep.mubr.f32.mxu1 %v6732_v41  ;;  %5628 = vmatpush3.msra.mxu0 %v5091_v1  ;;  %v662_v1 = vrot.slane %v6521_v56, 1 }
  0x81   : > { %5629 = vmatprep.subr.mxu0 %v5090_v37  ;;  %2056 = vmatprep.subr.mxu1 %v9931_v47 }
  0x82   : > { %1043 = vmatmul.mubr.f32.gmra.mxu0 %v6449_v22  ;;  %2057 = vmatpush1.msra.mxu1 %v5111_v36  ;;  %v665_v36 = vrot.slane %v6536_v63, 1 }
  0x83   : > { %1534 = vmatmul.mubr.f32.gmra.mxu1 %v6342_v49  ;;  %1047 = vmatprep.mubr.f32.mxu0 %v6915_v26  ;;  %v5088_v49 = vld [vmem:[%s9720_s4 + $0x2b8] sm:$0xff] }
  0x84   : > { %1538 = vmatprep.mubr.f32.mxu1 %v6783_v19  ;;  %5630 = vmatpush3.msra.mxu0 %v5090_v37  ;;  %v6962_v37 = vsel %vm626_vm1, %v662_v1, %v663_v51  ;;  %v6977_v63 = vsel %vm626_vm1, %v663_v51, %v665_v36  ;;  %v672_v1 = vrot.slane %v6596_v45, 1  ;;  %v673_v51 = vrot.slane %v6599_v46, 1  ;;  %v5103_v36 = vld [vmem:[%s9720_s4 + $0x330] sm:$0xff] }
  0x85   : > { %5631 = vmatprep.subr.mxu0 %v5089_v38  ;;  %2058 = vmatprep.subr.mxu1 %v9931_v47 }
  0x86   : > { %1048 = vmatmul.mubr.f32.gmra.mxu0 %v6452_v23  ;;  %2059 = vmatpush1.msra.mxu1 %v5110_v59  ;;  %v5106_v59 = vld [vmem:[%s9720_s4 + $0x348] sm:$0xff] }
  0x87   : > { %1539 = vmatmul.mubr.f32.gmra.mxu1 %v6345_v50  ;;  %1052 = vmatprep.mubr.f32.mxu0 %v6931_v0  ;;  %v5087_v50 = vld [vmem:[%s9720_s4 + $0x2b0] sm:$0xff] }
  0x88   : > { %1543 = vmatprep.mubr.f32.mxu1 %v6804_v53  ;;  %5632 = vmatpush3.msra.mxu0 %v5089_v38  ;;  %v668_v38 = vrot.slane %v6561_v16, 1 }
  0x89   : > { %5633 = vmatprep.subr.mxu0 %v5088_v49  ;;  %2060 = vmatprep.subr.mxu1 %v9931_v47 }
  0x8a   : > { %1053 = vmatmul.mubr.f32.gmra.mxu0 %v6485_v39  ;;  %2061 = vmatpush1.msra.mxu1 %v5109_v33  ;;  %v6993_v14 = vsel %vm626_vm1, %v667_v6, %v668_v38  ;;  %v5105_v33 = vld [vmem:[%s9720_s4 + $0x340] sm:$0xff]  ;;  %v678_v6 = vrot.slane %v6628_v12, 1 }
  0x8b   : > { %1544 = vmatmul.mubr.f32.gmra.mxu1 %v6377_v61  ;;  %1057 = vmatprep.mubr.f32.mxu0 %v6946_v44  ;;  %v5086_v61 = vld [vmem:[%s9720_s4 + $0x2a8] sm:$0xff] }
  0x8c   : > { %1548 = vmatprep.mubr.f32.mxu1 %v6849_v43  ;;  %5634 = vmatpush3.msra.mxu0 %v5088_v49  ;;  %v670_v49 = vrot.slane %v6572_v20, 1 }
  0x8d   : > { %5635 = vmatprep.subr.mxu0 %v5087_v50  ;;  %2062 = vmatprep.subr.mxu1 %v9931_v47 }
  0x8e   : > { %1058 = vmatmul.mubr.f32.gmra.mxu0 %v6488_v40  ;;  %2063 = vmatpush1.msra.mxu1 %v5108_v3  ;;  %v7008_v20 = vsel %vm626_vm1, %v668_v38, %v670_v49  ;;  %v675_v3 = vrot.slane %v6608_v54, 1  ;;  %v5102_v54 = vld [vmem:[%s9720_s4 + $0x328] sm:$0xff]  ;;  %v5101_v38 = vld [vmem:[%s9720_s4 + $0x320] sm:$0xff] }
  0x8f   : > { %1549 = vmatmul.mubr.f32.gmra.mxu1 %v6380_v62  ;;  %1062 = vmatprep.mubr.f32.mxu0 %v6962_v37  ;;  %v5085_v62 = vld [vmem:[%s9720_s4 + $0x2a0] sm:$0xff] }
  0x90   : > { %1553 = vmatprep.mubr.f32.mxu1 %v6865_v25  ;;  %5636 = vmatpush3.msra.mxu0 %v5087_v50  ;;  %v7021_v50 = vsel %vm626_vm1, %v672_v1, %v673_v51  ;;  %v5098_v1 = vld [vmem:[%s9720_s4 + $0x308] sm:$0xff] }
  0x91   : > { %5637 = vmatprep.subr.mxu0 %v5086_v61  ;;  %2064 = vmatprep.subr.mxu1 %v9931_v47 }
  0x92   : > { %1063 = vmatmul.mubr.f32.gmra.mxu0 %v6521_v56  ;;  %2065 = vmatpush1.msra.mxu1 %v5107_v21  ;;  %v677_v21 = vrot.slane %v6625_v9, 1 }
  0x93   : > { %1554 = vmatmul.mubr.f32.gmra.mxu1 %v6413_v10  ;;  %1067 = vmatprep.mubr.f32.mxu0 %v6977_v63  ;;  %v5084_v10 = vld [vmem:[%s9720_s4 + $0x298] sm:$0xff] }
  0x94   : > { %1558 = vmatprep.mubr.f32.mxu1 %v6887_v31  ;;  %5638 = vmatpush3.msra.mxu0 %v5086_v61  ;;  %v7040_v61 = vsel %vm626_vm1, %v673_v51, %v675_v3 }
  0x95   : > { %2066 = vmatprep.subr.mxu1 %v9931_v47  ;;  %5639 = vmatprep.subr.mxu0 %v5085_v62 }
  0x96   : > { %1068 = vmatmul.mubr.f32.gmra.mxu0 %v6524_v58  ;;  %2067 = vmatpush1.msra.mxu1 %v5106_v59  ;;  %v680_v59 = vrot.slane %v6646_v42, 1  ;;  %v682_v42 = vrot.slane %v6664_v2, 1 }
  0x97   : > { %1559 = vmatmul.mubr.f32.gmra.mxu1 %v6416_v11  ;;  %1072 = vmatprep.mubr.f32.mxu0 %v6993_v14  ;;  %v5104_v11 = vld [vmem:[%s9720_s4 + $0x338] sm:$0xff] }
  0x98   : > { %1563 = vmatprep.mubr.f32.mxu1 %v6900_v57  ;;  %5640 = vmatpush3.msra.mxu0 %v5085_v62  ;;  %v7056_v62 = vsel %vm626_vm1, %v677_v21, %v678_v6  ;;  %v7068_v49 = vsel %vm626_vm1, %v678_v6, %v680_v59  ;;  %v690_v21 = vrot.slane %v6716_v30, 1  ;;  %v5127_v6 = vld [vmem:[%s9720_s4 + $0x3f0] sm:$0xff] }
  0x99   : > { %2068 = vmatprep.subr.mxu1 %v9931_v47  ;;  %5641 = vmatprep.subr.mxu0 %v5084_v10 }
  0x9a   : > { %1073 = vmatmul.mubr.f32.gmra.mxu0 %v6558_v15  ;;  %2069 = vmatpush1.msra.mxu1 %v5105_v33  ;;  %v5099_v33 = vld [vmem:[%s9720_s4 + $0x310] sm:$0xff] }
  0x9b   : > { %1564 = vmatmul.mubr.f32.gmra.mxu1 %v6449_v22  ;;  %1077 = vmatprep.mubr.f32.mxu0 %v7008_v20  ;;  %v5083_v22 = vld [vmem:[%s9720_s4 + $0x290] sm:$0xff] }
  0x9c   : > { %1568 = vmatprep.mubr.f32.mxu1 %v6915_v26  ;;  %2070 = vmatprep.subr.mxu1 %v9931_v47 }
  0x9d   : > { %2071 = vmatpush1.msra.mxu1 %v5104_v11  ;;  %5642 = vmatpush3.msra.mxu0 %v5084_v10  ;;  %v683_v10 = vrot.slane %v6667_v5, 1  ;;  %v685_v11 = vrot.slane %v6677_v17, 1  ;;  %v5097_v17 = vld [vmem:[%s9720_s4 + $0x300] sm:$0xff] }
  0x9e   : > { %1078 = vmatmul.mubr.f32.gmra.mxu0 %v6561_v16  ;;  %2072 = vmatprep.subr.mxu1 %v9931_v47 }
  0x9f   : > { %1569 = vmatmul.mubr.f32.gmra.mxu1 %v6452_v23  ;;  %1082 = vmatprep.mubr.f32.mxu0 %v7021_v50  ;;  %v5082_v23 = vld [vmem:[%s9720_s4 + $0x288] sm:$0xff]  ;;  %v7088_v51 = vsel %vm626_vm1, %v682_v42, %v683_v10  ;;  %v7105_v3 = vsel %vm626_vm1, %v683_v10, %v685_v11  ;;  %v5124_v42 = vld [vmem:[%s9720_s4 + $0x3d8] sm:$0xff]  ;;  %v697_v10 = vrot.slane %v6765_v60, 1  ;;  %v5121_v11 = vld [vmem:[%s9720_s4 + $0x3c0] sm:$0xff] }
  0xa0   : > { %1573 = vmatprep.mubr.f32.mxu1 %v6931_v0  ;;  %2073 = vmatpush1.msra.mxu1 %v5103_v36  ;;  %9939 = vst [vmem:[#allocation29_spill] sm:$0xff] %v7105_v3  ;;  %v687_v36 = vrot.slane %v6693_v27, 1 }
  0xa1   : > { %2074 = vmatprep.subr.mxu1 %v9931_v47  ;;  %5643 = vmatprep.subr.mxu0 %v5083_v22 }
  0xa2   : > { %1083 = vmatmul.mubr.f32.gmra.mxu0 %v6596_v45  ;;  %2075 = vmatpush1.msra.mxu1 %v5102_v54 }
  0xa3   : > { %1574 = vmatmul.mubr.f32.gmra.mxu1 %v6485_v39  ;;  %1087 = vmatprep.mubr.f32.mxu0 %v7040_v61  ;;  %v5100_v39 = vld [vmem:[%s9720_s4 + $0x318] sm:$0xff] }
  0xa4   : > { %1578 = vmatprep.mubr.f32.mxu1 %v6946_v44  ;;  %5644 = vmatpush3.msra.mxu0 %v5083_v22  ;;  %v688_v22 = vrot.slane %v6696_v29, 1 }
  0xa5   : > { %2076 = vmatprep.subr.mxu1 %v9931_v47  ;;  %5645 = vmatprep.subr.mxu0 %v5082_v23 }
  0xa6   : > { %1088 = vmatmul.mubr.f32.gmra.mxu0 %v6599_v46  ;;  %2077 = vmatpush1.msra.mxu1 %v5101_v38  ;;  %v7119_v54 = vsel %vm626_vm1, %v687_v36, %v688_v22  ;;  %v7135_v30 = vsel %vm626_vm1, %v688_v22, %v690_v21  ;;  %v693_v38 = vrot.slane %v6739_v7, 1  ;;  %v703_v36 = vrot.slane %v6811_v13, 1  ;;  %v5118_v21 = vld [vmem:[%s9720_s4 + $0x3a8] sm:$0xff] }
  0xa7   : > { %1579 = vmatmul.mubr.f32.gmra.mxu1 %v6488_v40  ;;  %1092 = vmatprep.mubr.f32.mxu0 %v7056_v62  ;;  %v5081_v40 = vld [vmem:[%s9720_s4 + $0x280] sm:$0xff]  ;;  %9940 = vst [vmem:[#allocation30_spill] sm:$0xff] %v7119_v54  ;;  %9941 = vst [vmem:[#allocation31_spill] sm:$0xff] %v7135_v30 }
  0xa8   : > { %1583 = vmatprep.mubr.f32.mxu1 %v6962_v37  ;;  %2078 = vmatprep.subr.mxu1 %v9931_v47 }
  0xa9   : > { %2079 = vmatpush1.msra.mxu1 %v5100_v39  ;;  %5646 = vmatpush3.msra.mxu0 %v5082_v23  ;;  %v692_v23 = vrot.slane %v6736_v35, 1  ;;  %v695_v39 = vrot.slane %v6749_v55, 1 }
  0xaa   : > { %1093 = vmatmul.mubr.f32.gmra.mxu0 %v6625_v9  ;;  %2080 = vmatprep.subr.mxu1 %v9931_v47 }
  0xab   : > { %1584 = vmatmul.mubr.f32.gmra.mxu1 %v6521_v56  ;;  %1097 = vmatprep.mubr.f32.mxu0 %v7068_v49  ;;  %v7096_v56 = vld [vmem:[%s9720_s4 + $0x478] sm:$0xff]  ;;  %v7148_v59 = vsel %vm626_vm1, %v692_v23, %v693_v38  ;;  %v7164_v55 = vsel %vm626_vm1, %v693_v38, %v695_v39  ;;  %v5143_v23 = vld [vmem:[%s9720_s4 + $0x470] sm:$0xff]  ;;  %v9952_v39 = vld [vmem:[#allocation7_spill] sm:$0xff] }
  0xac   : > { %1588 = vmatprep.mubr.f32.mxu1 %v6977_v63  ;;  %2081 = vmatpush1.msra.mxu1 %v5099_v33  ;;  %9942 = vst [vmem:[#allocation32_spill] sm:$0xff] %v7148_v59  ;;  %9943 = vst [vmem:[#allocation33_spill] sm:$0xff] %v7164_v55  ;;  %v698_v33 = vrot.slane %v6768_v24, 1  ;;  %v9950_v38 = vld [vmem:[#allocation5_spill] sm:$0xff] }
  0xad   : > { %2082 = vmatprep.subr.mxu1 %v9931_v47  ;;  %5647 = vmatprep.subr.mxu0 %v5081_v40 }
  0xae   : > { %1098 = vmatmul.mubr.f32.gmra.mxu0 %v6628_v12  ;;  %2083 = vmatpush1.msra.mxu1 %v5098_v1  ;;  %v700_v1 = vrot.slane %v6788_v4, 1 }
  0xaf   : > { %1589 = vmatmul.mubr.f32.gmra.mxu1 %v6524_v58  ;;  %1102 = vmatprep.mubr.f32.mxu0 %v7088_v51  ;;  %v5128_v58 = vld [vmem:[%s9720_s4 + $0x3f8] sm:$0xff] }
  0xb0   : > { %1593 = vmatprep.mubr.f32.mxu1 %v6993_v14  ;;  %5648 = vmatpush3.msra.mxu0 %v5081_v40  ;;  %v7177_v40 = vsel %vm626_vm1, %v697_v10, %v698_v33  ;;  %v7193_v4 = vsel %vm626_vm1, %v698_v33, %v700_v1  ;;  %v7290_v10 = vld [vmem:[%s7281_s19] sm:$0xff]  ;;  %v7293_v33 = vld [vmem:[%s7281_s19 + $0x8] sm:$0xff] }
  0xb1   : > { %2084 = vmatprep.subr.mxu1 %v9931_v47  ;;  %5697 = vmatprep.subr.mxu0 %v7096_v56  ;;  %9944 = vst [vmem:[#allocation34_spill] sm:$0xff] %v7177_v40  ;;  %9945 = vst [vmem:[#allocation35_spill] sm:$0xff] %v7193_v4  ;;  %v707_v1 = vrot.slane %v7290_v10, 1 }
  0xb2   : > { %1103 = vmatmul.mubr.f32.gmra.mxu0 %v6664_v2  ;;  %2085 = vmatpush1.msra.mxu1 %v5097_v17  ;;  %v702_v17 = vrot.slane %v6808_v32, 1 }
  0xb3   : > { %1594 = vmatmul.mubr.f32.gmra.mxu1 %v6558_v15  ;;  %1107 = vmatprep.mubr.f32.mxu0 %v7105_v3  ;;  %v5126_v15 = vld [vmem:[%s9720_s4 + $0x3e8] sm:$0xff] }
  0xb4   : > { %1598 = vmatprep.mubr.f32.mxu1 %v7008_v20  ;;  %2086 = vmatprep.subr.mxu1 %v9931_v47  ;;  %v7206_v22 = vsel %vm626_vm1, %v702_v17, %v703_v36  ;;  %v5139_v17 = vld [vmem:[%s9720_s4 + $0x450] sm:$0xff] }
  0xb5   : > { %2087 = vmatpush2.msra.mxu1 %v5128_v58  ;;  %9946 = vst [vmem:[#allocation36_spill] sm:$0xff] %v7206_v22  ;;  %v705_v58 = vrot.slane %v6821_v34, 1 }
  0xb6   : > { %1108 = vmatmul.mubr.f32.gmra.mxu0 %v6667_v5  ;;  %2088 = vmatprep.subr.mxu1 %v9931_v47 }
  0xb7   : > { %1599 = vmatmul.mubr.f32.gmra.mxu1 %v6561_v16  ;;  %1112 = vmatprep.mubr.f32.mxu0 %v7119_v54  ;;  %v5125_v16 = vld [vmem:[%s9720_s4 + $0x3e0] sm:$0xff]  ;;  %v7222_v34 = vsel %vm626_vm1, %v703_v36, %v705_v58  ;;  %v7305_v36 = vld [vmem:[%s7281_s19 + $0x10] sm:$0x3] }
  0xb8   : > { %1603 = vmatprep.mubr.f32.mxu1 %v7021_v50  ;;  %2089 = vmatpush2.msra.mxu1 %v5127_v6  ;;  %9947 = vst [vmem:[#allocation37_spill] sm:$0xff] %v7222_v34  ;;  %v5115_v6 = vld [vmem:[%s9720_s4 + $0x390] sm:$0xff]  ;;  %v710_v58 = vrot.slane %v7305_v36, 1 }
  0xb9   : > { %2090 = vmatprep.subr.mxu1 %v9931_v47 }
  0xba   : > { %1113 = vmatmul.mubr.f32.gmra.mxu0 %v6693_v27  ;;  %2091 = vmatpush2.msra.mxu1 %v5126_v15  ;;  %v9948_v15 = vld [vmem:[#allocation3_spill] sm:$0xff] }
  0xbb   : > { %1604 = vmatmul.mubr.f32.gmra.mxu1 %v6596_v45  ;;  %1117 = vmatprep.mubr.f32.mxu0 %v7135_v30  ;;  %v5123_v45 = vld [vmem:[%s9720_s4 + $0x3d0] sm:$0xff]  ;;  %9955 = vst [vmem:[#allocation3_spill] sm:$0xff] %v7293_v33 }
  0xbc   : > { %1608 = vmatprep.mubr.f32.mxu1 %v7040_v61  ;;  %2092 = vmatprep.subr.mxu1 %v9931_v47 }
  0xbd   : > { %2093 = vmatpush2.msra.mxu1 %v5125_v16  ;;  %v9951_v16 = vld [vmem:[#allocation6_spill] sm:$0xff] }
  0xbe   : > { %1118 = vmatmul.mubr.f32.gmra.mxu0 %v6696_v29  ;;  %2094 = vmatprep.subr.mxu1 %v9931_v47 }
  0xbf   : > { %1609 = vmatmul.mubr.f32.gmra.mxu1 %v6599_v46  ;;  %1122 = vmatprep.mubr.f32.mxu0 %v7148_v59  ;;  %v5122_v46 = vld [vmem:[%s9720_s4 + $0x3c8] sm:$0xff] }
  0xc0   : > { %1613 = vmatprep.mubr.f32.mxu1 %v7056_v62  ;;  %2095 = vmatpush2.msra.mxu1 %v5124_v42  ;;  %v5141_v42 = vld [vmem:[%s9720_s4 + $0x460] sm:$0xff] }
  0xc1   : > { %2096 = vmatprep.subr.mxu1 %v9931_v47 }
  0xc2   : > { %1123 = vmatmul.mubr.f32.gmra.mxu0 %v6736_v35  ;;  %2097 = vmatpush2.msra.mxu1 %v5123_v45  ;;  %v9954_v45 = vld [vmem:[#allocation9_spill] sm:$0xff] }
  0xc3   : > { %1614 = vmatmul.mubr.f32.gmra.mxu1 %v6625_v9  ;;  %1127 = vmatprep.mubr.f32.mxu0 %v7164_v55  ;;  %v5120_v9 = vld [vmem:[%s9720_s4 + $0x3b8] sm:$0xff] }
  0xc4   : > { %1618 = vmatprep.mubr.f32.mxu1 %v7068_v49  ;;  %2098 = vmatprep.subr.mxu1 %v9931_v47 }
  0xc5   : > { %2099 = vmatpush2.msra.mxu1 %v5122_v46  ;;  %v9956_v46 = vld [vmem:[#allocation10_spill] sm:$0xff] }
  0xc6   : > { %1128 = vmatmul.mubr.f32.gmra.mxu0 %v6739_v7  ;;  %2100 = vmatprep.subr.mxu1 %v9931_v47 }
  0xc7   : > { %1619 = vmatmul.mubr.f32.gmra.mxu1 %v6628_v12  ;;  %1132 = vmatprep.mubr.f32.mxu0 %v7177_v40  ;;  %v5119_v12 = vld [vmem:[%s9720_s4 + $0x3b0] sm:$0xff] }
  0xc8   : > { %1623 = vmatprep.mubr.f32.mxu1 %v7088_v51  ;;  %2101 = vmatpush2.msra.mxu1 %v5121_v11  ;;  %v708_v11 = vrot.slane %v7293_v33, 1 }
  0xc9   : > { %2102 = vmatprep.subr.mxu1 %v9931_v47 }
  0xca   : > { %1133 = vmatmul.mubr.f32.gmra.mxu0 %v6765_v60  ;;  %2103 = vmatpush2.msra.mxu1 %v5120_v9  ;;  %v9957_v9 = vld [vmem:[#allocation11_spill] sm:$0xff] }
  0xcb   : > { %1624 = vmatmul.mubr.f32.gmra.mxu1 %v6664_v2  ;;  %1137 = vmatprep.mubr.f32.mxu0 %v7193_v4  ;;  %v5117_v2 = vld [vmem:[%s9720_s4 + $0x3a0] sm:$0xff] }
  0xcc   : > { %1628 = vmatprep.mubr.f32.mxu1 %v7105_v3  ;;  %2104 = vmatprep.subr.mxu1 %v9931_v47  ;;  %v9976_v3 = vld [vmem:[#allocation27_spill] sm:$0xff] }
  0xcd   : > { %2105 = vmatpush2.msra.mxu1 %v5119_v12  ;;  %v7311_v12 = vsel %vm626_vm1, %v707_v1, %v708_v11  ;;  %v9966_v1 = vld [vmem:[#allocation18_spill] sm:$0xff] }
  0xce   : > { %1138 = vmatmul.mubr.f32.gmra.mxu0 %v6768_v24  ;;  %2106 = vmatprep.subr.mxu1 %v9931_v47 }
  0xcf   : > { %1629 = vmatmul.mubr.f32.gmra.mxu1 %v6667_v5  ;;  %1142 = vmatprep.mubr.f32.mxu0 %v7206_v22  ;;  %v5116_v5 = vld [vmem:[%s9720_s4 + $0x398] sm:$0xff] }
  0xd0   : > { %1633 = vmatprep.mubr.f32.mxu1 %v7119_v54  ;;  %2107 = vmatpush2.msra.mxu1 %v5118_v21  ;;  %v9960_v21 = vld [vmem:[#allocation13_spill] sm:$0xff]  ;;  %v9975_v54 = vld [vmem:[#allocation26_spill] sm:$0xff] }
  0xd1   : > { %2108 = vmatprep.subr.mxu1 %v9931_v47 }
  0xd2   : > { %1143 = vmatmul.mubr.f32.gmra.mxu0 %v6808_v32  ;;  %2109 = vmatpush2.msra.mxu1 %v5117_v2  ;;  %v5138_v2 = vld [vmem:[%s9720_s4 + $0x448] sm:$0xff] }
  0xd3   : > { %1634 = vmatmul.mubr.f32.gmra.mxu1 %v6693_v27  ;;  %1147 = vmatprep.mubr.f32.mxu0 %v7222_v34  ;;  %v5114_v27 = vld [vmem:[%s9720_s4 + $0x388] sm:$0xff] }
  0xd4   : > { %1638 = vmatprep.mubr.f32.mxu1 %v7135_v30  ;;  %2110 = vmatprep.subr.mxu1 %v9931_v47 }
  0xd5   : > { %2111 = vmatpush2.msra.mxu1 %v5116_v5 }
  0xd6   : > { %1148 = vmatmul.mubr.f32.gmra.mxu0 %v6811_v13  ;;  %2112 = vmatprep.subr.mxu1 %v9931_v47 }
  0xd7   : > { %1639 = vmatmul.mubr.f32.gmra.mxu1 %v6696_v29  ;;  %5649 = vmatprep.mubr.f32.mxu0 %v6353_v52  ;;  %v5113_v52 = vld [vmem:[%s9720_s4 + $0x380] sm:$0xff]  ;;  %v9949_v29 = vld [vmem:[#allocation4_spill] sm:$0xff] }
  0xd8   : > { %1643 = vmatprep.mubr.f32.mxu1 %v7148_v59  ;;  %2113 = vmatpush2.msra.mxu1 %v5115_v6  ;;  %9959 = vst [vmem:[#allocation4_spill] sm:$0xff] %v7311_v12  ;;  %v9973_v59 = vld [vmem:[#allocation25_spill] sm:$0xff] }
  0xd9   : > { %2114 = vmatprep.subr.mxu1 %v9931_v47 }
  0xda   : > { %5650 = vmatmul.mubr.f32.vlgmr.msra.gmra.mxu0 %v9948_v15  ;;  %2115 = vmatpush2.msra.mxu1 %v5114_v27  ;;  %v7326_v27 = vsel %vm626_vm1, %v708_v11, %v710_v58  ;;  %v9963_v15 = vld [vmem:[#allocation15_spill] sm:$0xff]  ;;  %v5135_v58 = vld [vmem:[%s9720_s4 + $0x430] sm:$0xff] }
  0xdb   : > { %1644 = vmatmul.mubr.f32.gmra.mxu1 %v6736_v35  ;;  %5698 = vmatpush3.msra.mxu0 %v7096_v56  ;;  %v5142_v35 = vld [vmem:[%s9720_s4 + $0x468] sm:$0xff]  ;;  %v7264_v56 = vld [vmem:[%s9721_s5 + $0x178] sm:$0xff]  ;;  %9962 = vst [vmem:[#allocation5_spill] sm:$0xff] %v7326_v27 }
  0xdc   : > { %1648 = vmatprep.mubr.f32.mxu1 %v7164_v55  ;;  %5652 = vmatprep.mubr.f32.mxu0 %v9949_v29  ;;  %v3004_v55 = vld [vmem:[%s9721_s5 + $0x160] sm:$0xff] }
  0xdd   : > { %5699 = vmatprep.subr.mxu0 %v5143_v23  ;;  %2116 = vmatprep.subr.mxu1 %v9931_v47 }
  0xde   : > { %5653 = vmatmul.mubr.f32.gmra.mxu0 %v9950_v38  ;;  %2117 = vmatpush2.msra.mxu1 %v5113_v52  ;;  %v9964_v52 = vld [vmem:[#allocation16_spill] sm:$0xff] }
  0xdf   : > { %1649 = vmatmul.mubr.f32.gmra.mxu1 %v6739_v7  ;;  %5700 = vmatpush3.msra.mxu0 %v5143_v23  ;;  %v9953_v7 = vld [vmem:[#allocation8_spill] sm:$0xff]  ;;  %v5137_v23 = vld [vmem:[%s9720_s4 + $0x440] sm:$0xff] }
  0xe0   : > { %1653 = vmatprep.mubr.f32.mxu1 %v7177_v40  ;;  %5655 = vmatprep.mubr.f32.mxu0 %v9951_v16  ;;  %v6047_v40 = vld [vmem:[%s6274_s16 + $0x48] sm:$0xff] }
  0xe1   : > { %5701 = vmatprep.subr.mxu0 %v5142_v35  ;;  %5777 = vmatprep.subr.mxu1 %v7264_v56 }
  0xe2   : > { %5656 = vmatmul.mubr.f32.gmra.mxu0 %v9952_v39 }
  0xe3   : > { %1654 = vmatmul.mubr.f32.gmra.mxu1 %v6765_v60  ;;  %5702 = vmatpush3.msra.mxu0 %v5142_v35  ;;  %v5140_v60 = vld [vmem:[%s9720_s4 + $0x458] sm:$0xff] }
  0xe4   : > { %1658 = vmatprep.mubr.f32.mxu1 %v7193_v4  ;;  %5658 = vmatprep.mubr.f32.mxu0 %v9953_v7  ;;  %v9970_v4 = vld [vmem:[#allocation22_spill] sm:$0xff] }
  0xe5   : > { %5703 = vmatprep.subr.mxu0 %v5141_v42 }
  0xe6   : > { %5659 = vmatmul.mubr.f32.gmra.mxu0 %v9954_v45 }
  0xe7   : > { %1659 = vmatmul.mubr.f32.gmra.mxu1 %v6768_v24  ;;  %5704 = vmatpush3.msra.mxu0 %v5141_v42  ;;  %v9958_v24 = vld [vmem:[#allocation12_spill] sm:$0xff]  ;;  %v9965_v42 = vld [vmem:[#allocation17_spill] sm:$0xff] }
  0xe8   : > { %1663 = vmatprep.mubr.f32.mxu1 %v7206_v22  ;;  %5661 = vmatprep.mubr.f32.mxu0 %v9956_v46 }
  0xe9   : > { %5705 = vmatprep.subr.mxu0 %v5140_v60 }
  0xea   : > { %5662 = vmatmul.mubr.f32.gmra.mxu0 %v9957_v9 }
  0xeb   : > { %1664 = vmatmul.mubr.f32.gmra.mxu1 %v6808_v32  ;;  %5706 = vmatpush3.msra.mxu0 %v5140_v60  ;;  %v9961_v32 = vld [vmem:[#allocation14_spill] sm:$0xff] }
  0xec   : > { %1668 = vmatprep.mubr.f32.mxu1 %v7222_v34  ;;  %5664 = vmatprep.mubr.f32.mxu0 %v9958_v24  ;;  %v5136_v60 = vld [vmem:[%s9720_s4 + $0x438] sm:$0xff]  ;;  %v9969_v34 = vld [vmem:[#allocation21_spill] sm:$0xff] }
  0xed   : > { %5707 = vmatprep.subr.mxu0 %v5139_v17 }
  0xee   : > { %5665 = vmatmul.mubr.f32.gmra.mxu0 %v9960_v21  ;;  %v7318_v5 = vpop.f32.mrf.mxu1 }
  0xef   : > { %1669 = vmatmul.mubr.f32.gmra.mxu1 %v6811_v13  ;;  %5708 = vmatpush3.msra.mxu0 %v5139_v17  ;;  %v9967_v17 = vld [vmem:[#allocation19_spill] sm:$0xff] }
  0xf0   : > { %1673 = vmatprep.mubr.f32.mxu1 %v7311_v12  ;;  %5667 = vmatprep.mubr.f32.mxu0 %v9961_v32  ;;  %v7323_v6 = vpop.f32.mrf.mxu1 }
  0xf1   : > { %5709 = vmatprep.subr.mxu0 %v5138_v2 }
  0xf2   : > { %5668 = vmatmul.mubr.f32.gmra.mxu0 %v9963_v15 }
  0xf3   : > { %1674 = vmatmul.mubr.f32.gmra.mxu1 %v7290_v10  ;;  %5710 = vmatpush3.msra.mxu0 %v5138_v2  ;;  %v7333_v13 = vpop.f32.mrf.mxu1 }
  0xf4   : > { %1678 = vmatprep.mubr.f32.mxu1 %v7326_v27  ;;  %5670 = vmatprep.mubr.f32.mxu0 %v9964_v52  ;;  %v6045_v27 = vld [vmem:[%s6274_s16 + $0x30] sm:$0xff] }
  0xf5   : > { %5711 = vmatprep.subr.mxu0 %v5137_v23  ;;  %v7337_v35 = vpop.f32.mrf.mxu1 }
  0xf6   : > { %5671 = vmatmul.mubr.f32.gmra.mxu0 %v9965_v42 }
  0xf7   : > { %1679 = vmatmul.mubr.f32.gmra.mxu1 %v7293_v33  ;;  %5712 = vmatpush3.msra.mxu0 %v5137_v23  ;;  %v3006_v23 = vld [vmem:[%s9721_s5 + $0x170] sm:$0xff] }
  0xf8   : > { %5673 = vmatprep.mubr.f32.mxu0 %v9966_v1  ;;  %2118 = vmatprep.mubr.f32.mxu1 %v6732_v41  ;;  %v7346_v11 = vpop.f32.mrf.mxu1  ;;  %v9968_v41 = vld [vmem:[#allocation20_spill] sm:$0xff] }
  0xf9   : > { %5713 = vmatprep.subr.mxu0 %v5136_v60 }
  0xfa   : > { %5674 = vmatmul.mubr.f32.gmra.mxu0 %v9967_v17  ;;  %v7352_v2 = vpop.f32.mrf.mxu1 }
  0xfb   : > { %2119 = vmatmul.mubr.f32.vlgmr.msra.gmra.mxu1 %v6045_v27  ;;  %5714 = vmatpush3.msra.mxu0 %v5136_v60  ;;  %v5134_v27 = vld [vmem:[%s9720_s4 + $0x428] sm:$0xff]  ;;  %v6046_v60 = vld [vmem:[%s6274_s16 + $0x38] sm:$0xff] }
  0xfc   : > { %5676 = vmatprep.mubr.f32.mxu0 %v9968_v41  ;;  %2123 = vmatprep.mubr.f32.mxu1 %v6783_v19  ;;  %v3005_v19 = vld [vmem:[%s9721_s5 + $0x168] sm:$0xff] }
  0xfd   : > { %5715 = vmatprep.subr.mxu0 %v5135_v58  ;;  %v7360_v12 = vpop.f32.mrf.mxu1  ;;  %5778 = vmatpush3.msra.mxu1 %v7264_v56  ;;  %v9971_v56 = vld [vmem:[#allocation23_spill] sm:$0xff] }
  0xfe   : > { %5677 = vmatmul.mubr.f32.gmra.mxu0 %v9969_v34  ;;  %5779 = vmatprep.subr.mxu1 %v3006_v23 }
  0xff   : > { %2124 = vmatmul.mubr.f32.gmra.mxu1 %v6046_v60  ;;  %5716 = vmatpush3.msra.mxu0 %v5135_v58  ;;  %v7368_v22 = vpop.f32.mrf.mxu1  ;;  %v5133_v60 = vld [vmem:[%s9720_s4 + $0x420] sm:$0xff] }
 0x100   : > { %5679 = vmatprep.mubr.f32.mxu0 %v9970_v4  ;;  %2128 = vmatprep.mubr.f32.mxu1 %v6804_v53  ;;  %v9972_v53 = vld [vmem:[#allocation24_spill] sm:$0xff] }
 0x101   : > { %5717 = vmatprep.subr.mxu0 %v5134_v27  ;;  %5780 = vmatpush3.msra.mxu1 %v3006_v23 }
 0x102   : > { %5680 = vmatmul.mubr.f32.gmra.mxu0 %v9971_v56  ;;  %v7379_v58 = vpop.f32.mrf.mxu1  ;;  %5781 = vmatprep.subr.mxu1 %v3005_v19 }
 0x103   : > { %2129 = vmatmul.mubr.f32.gmra.mxu1 %v6047_v40  ;;  %5718 = vmatpush3.msra.mxu0 %v5134_v27  ;;  %v5132_v40 = vld [vmem:[%s9720_s4 + $0x418] sm:$0xff]  ;;  %v6048_v27 = vld [vmem:[%s6274_s16 + $0x50] sm:$0xff] }
 0x104   : > { %5682 = vmatprep.mubr.f32.mxu0 %v9972_v53  ;;  %2133 = vmatprep.mubr.f32.mxu1 %v6849_v43  ;;  %v7387_v23 = vpop.f32.mrf.mxu1  ;;  %v3003_v43 = vld [vmem:[%s9721_s5 + $0x158] sm:$0xff] }
 0x105   : > { %5719 = vmatprep.subr.mxu0 %v5133_v60  ;;  %5782 = vmatpush3.msra.mxu1 %v3005_v19 }
 0x106   : > { %5683 = vmatmul.mubr.f32.gmra.mxu0 %v9973_v59  ;;  %5783 = vmatprep.subr.mxu1 %v3004_v55 }
 0x107   : > { %2134 = vmatmul.mubr.f32.gmra.mxu1 %v6048_v27  ;;  %5720 = vmatpush3.msra.mxu0 %v5133_v60  ;;  %v7394_v30 = vpop.f32.mrf.mxu1  ;;  %v5131_v60 = vld [vmem:[%s9720_s4 + $0x410] sm:$0xff]  ;;  %v6049_v27 = vld [vmem:[%s6274_s16 + $0x60] sm:$0xff] }
 0x108   : > { %9974 = vst [vmem:[#allocation6_spill] sm:$0xff] %v7394_v30  ;;  %5685 = vmatprep.mubr.f32.mxu0 %v9975_v54  ;;  %2138 = vmatprep.mubr.f32.mxu1 %v6865_v25  ;;  %v3002_v30 = vld [vmem:[%s9721_s5 + $0x150] sm:$0xff] }
 0x109   : > { %5721 = vmatprep.subr.mxu0 %v5132_v40  ;;  %v7401_v19 = vpop.f32.mrf.mxu1  ;;  %5784 = vmatpush3.msra.mxu1 %v3004_v55  ;;  %v834_v55 = vrot.slane %v7290_v10, 2 }
 0x10a   : > { %5686 = vmatmul.mubr.f32.gmra.mxu0 %v9976_v3  ;;  %5785 = vmatprep.subr.mxu1 %v3003_v43  ;;  %v835_v3 = vrot.slane %v7293_v33, 2 }
 0x10b   : > { %2139 = vmatmul.mubr.f32.gmra.mxu1 %v6049_v27  ;;  %5722 = vmatpush3.msra.mxu0 %v5132_v40  ;;  %v5130_v40 = vld [vmem:[%s9720_s4 + $0x408] sm:$0xff] }
 0x10c   : > { %5688 = vmatprep.mubr.f32.mxu0 %v6818_v48  ;;  %2143 = vmatprep.mubr.f32.mxu1 %v6887_v31  ;;  %v7413_v25 = vpop.f32.mrf.mxu1  ;;  %v6050_v48 = vld [vmem:[%s6274_s16 + $0x68] sm:$0xff]  ;;  %v837_v31 = vrot.slane %v7305_v36, 2  ;;  %v6051_v36 = vld [vmem:[%s6274_s16 + $0x78] sm:$0xff] }
 0x10d   : > { %9977 = vst [vmem:[#allocation7_spill] sm:$0xff] %v7413_v25  ;;  %5723 = vmatprep.subr.mxu0 %v5131_v60  ;;  %5786 = vmatpush3.msra.mxu1 %v3003_v43  ;;  %v3001_v25 = vld [vmem:[%s9721_s5 + $0x148] sm:$0xff]  ;;  %v7431_v43 = vsel %vm753_vm0, %v834_v55, %v835_v3 }
 0x10e   : > { %5689 = vmatmul.mubr.f32.gmra.mxu0 %v6838_v28  ;;  %v7421_v27 = vpop.f32.mrf.mxu1  ;;  %5787 = vmatprep.subr.mxu1 %v3002_v30 }
 0x10f   : > { %2144 = vmatmul.mubr.f32.gmra.mxu1 %v6050_v48  ;;  %5724 = vmatpush3.msra.mxu0 %v5131_v60  ;;  %v5129_v48 = vld [vmem:[%s9720_s4 + $0x400] sm:$0xff] }
 0x110   : > { %5691 = vmatprep.mubr.f32.mxu0 %v6854_v18  ;;  %2148 = vmatprep.mubr.f32.mxu1 %v6900_v57  ;;  %v7441_v57 = vsel %vm753_vm0, %v835_v3, %v837_v31  ;;  %v6052_v3 = vld [vmem:[%s6274_s16 + $0x80] sm:$0xff]  ;;  %v7460_v31 = vld [vmem:[%s9721_s5 + $0x138] sm:$0xff] }
 0x111   : > { %5725 = vmatprep.subr.mxu0 %v5130_v40  ;;  %v7433_v33 = vpop.f32.mrf.mxu1  ;;  %5788 = vmatpush3.msra.mxu1 %v3002_v30  ;;  %v3000_v30 = vld [vmem:[%s9721_s5 + $0x140] sm:$0xff] }
 0x112   : > { %5692 = vmatmul.mubr.f32.gmra.mxu0 %v6860_v8  ;;  %5789 = vmatprep.subr.mxu1 %v3001_v25 }
 0x113   : > { %2149 = vmatmul.mubr.f32.gmra.mxu1 %v6051_v36  ;;  %5726 = vmatpush3.msra.mxu0 %v5130_v40  ;;  %v7443_v60 = vpop.f32.mrf.mxu1 }
 0x114   : > { %5694 = vmatprep.mubr.f32.mxu0 %v7431_v43  ;;  %2153 = vmatprep.mubr.f32.mxu1 %v6915_v26  ;;  %v2975_v26 = vld [vmem:[%s9721_s5 + $0x78] sm:$0xff] }
 0x115   : > { %5727 = vmatprep.subr.mxu0 %v5129_v48  ;;  %5790 = vmatpush3.msra.mxu1 %v3001_v25 }
 0x116   : > { %5695 = vmatmul.mubr.f32.gmra.mxu0 %v7441_v57  ;;  %v994_v55 = vpop.f32.mrf.mxu0  ;;  %v7451_v36 = vpop.f32.mrf.mxu1  ;;  %5791 = vmatprep.subr.mxu1 %v3000_v30 }
 0x117   : > { %9978 = vst [vmem:[#allocation8_spill] sm:$0xff] %v7451_v36  ;;  %2154 = vmatmul.mubr.f32.gmra.mxu1 %v6052_v3  ;;  %5728 = vmatpush3.msra.mxu0 %v5129_v48  ;;  %v7455_v40 = vadd.f32 %v7323_v6, %v994_v55  ;;  %v2974_v6 = vld [vmem:[%s9721_s5 + $0x70] sm:$0xff] }
 0x118   : > { %2158 = vmatprep.mubr.f32.mxu1 %v6931_v0  ;;  %5729 = vmatprep.mubr.f32.mxu0 %v9949_v29  ;;  %v996_v25 = vpop.f32.mrf.mxu0  ;;  %v7467_v36 = vpop.f32.mrf.mxu1  ;;  %v6053_v0 = vld [vmem:[%s6274_s16 + $0x90] sm:$0xff] }
 0x119   : > { %3008 = vmatprep.subr.mxu0 %v9931_v47  ;;  %5792 = vmatpush3.msra.mxu1 %v3000_v30 }
 0x11a   : > { %5730 = vmatmul.mubr.f32.vlgmr.msra.gmra.mxu0 %v9950_v38  ;;  %5793 = vmatprep.subr.mxu1 %v7460_v31  ;;  %v2973_v38 = vld [vmem:[%s9721_s5 + $0x68] sm:$0xff] }
 0x11b   : > { %2159 = vmatmul.mubr.f32.gmra.mxu1 %v6053_v0  ;;  %3009 = vmatpush1.msra.mxu0 %v2975_v26  ;;  %v999_v29 = vpop.f32.mrf.mxu0  ;;  %v7476_v48 = vpop.f32.mrf.mxu1 }
 0x11c   : > { %9979 = vst [vmem:[#allocation9_spill] sm:$0xff] %v7476_v48  ;;  %3010 = vmatprep.subr.mxu0 %v9931_v47  ;;  %2163 = vmatprep.mubr.f32.mxu1 %v6946_v44  ;;  %v7481_v30 = vadd.f32 %v7318_v5, %v999_v29  ;;  %v2972_v44 = vld [vmem:[%s9721_s5 + $0x60] sm:$0xff]  ;;  %v6054_v5 = vld [vmem:[%s6274_s16 + $0x98] sm:$0xff] }
 0x11d   : > { %5732 = vmatprep.mubr.f32.mxu0 %v9951_v16  ;;  %3011 = vmatpush1.msra.mxu0 %v2974_v6  ;;  %v1001_v55 = vpop.f32.mrf.mxu0  ;;  %v7487_v3 = vpop.f32.mrf.mxu1 }
 0x11e   : > { %9980 = vst [vmem:[#allocation10_spill] sm:$0xff] %v7487_v3  ;;  %5733 = vmatmul.mubr.f32.gmra.mxu0 %v9952_v39  ;;  %3012 = vmatprep.subr.mxu0 %v9931_v47  ;;  %v2971_v39 = vld [vmem:[%s9721_s5 + $0x58] sm:$0xff] }
 0x11f   : > { %2164 = vmatmul.mubr.f32.gmra.mxu1 %v6054_v5  ;;  %3013 = vmatpush1.msra.mxu0 %v2973_v38  ;;  %v1004_v26 = vpop.f32.mrf.mxu0  ;;  %v6056_v5 = vld [vmem:[%s6274_s16 + $0xb0] sm:$0xff] }
 0x120   : > { %3014 = vmatprep.subr.mxu0 %v9931_v47  ;;  %2168 = vmatprep.mubr.f32.mxu1 %v6962_v37  ;;  %v7498_v16 = vadd.f32 %v7337_v35, %v1004_v26  ;;  %v7500_v25 = vpop.f32.mrf.mxu1  ;;  %v2970_v37 = vld [vmem:[%s9721_s5 + $0x50] sm:$0xff]  ;;  %v6055_v35 = vld [vmem:[%s6274_s16 + $0xa8] sm:$0xff] }
 0x121   : > { %9981 = vst [vmem:[#allocation11_spill] sm:$0xff] %v7500_v25  ;;  %5735 = vmatprep.mubr.f32.mxu0 %v9953_v7  ;;  %3015 = vmatpush1.msra.mxu0 %v2972_v44  ;;  %v1006_v6 = vpop.f32.mrf.mxu0 }
 0x122   : > { %5736 = vmatmul.mubr.f32.gmra.mxu0 %v9954_v45  ;;  %3016 = vmatprep.subr.mxu0 %v9931_v47  ;;  %v7508_v0 = vpop.f32.mrf.mxu1  ;;  %v2969_v45 = vld [vmem:[%s9721_s5 + $0x48] sm:$0xff]  ;;  %v6057_v6 = vld [vmem:[%s6274_s16 + $0xc0] sm:$0xff] }
 0x123   : > { %9982 = vst [vmem:[#allocation12_spill] sm:$0xff] %v7508_v0  ;;  %2169 = vmatmul.mubr.f32.gmra.mxu1 %v6055_v35  ;;  %3017 = vmatpush1.msra.mxu0 %v2971_v39  ;;  %v10013_v0 = vld [vmem:[#allocation4_spill] sm:$0xff] }
 0x124   : > { %3018 = vmatprep.subr.mxu0 %v9931_v47  ;;  %2173 = vmatprep.mubr.f32.mxu1 %v6977_v63  ;;  %v1009_v7 = vpop.f32.mrf.mxu0  ;;  %v7516_v29 = vpop.f32.mrf.mxu1  ;;  %v2968_v63 = vld [vmem:[%s9721_s5 + $0x40] sm:$0xff] }
 0x125   : > { %9983 = vst [vmem:[#allocation13_spill] sm:$0xff] %v7516_v29  ;;  %5738 = vmatprep.mubr.f32.mxu0 %v9956_v46  ;;  %3019 = vmatpush1.msra.mxu0 %v2970_v37  ;;  %v7523_v38 = vadd.f32 %v7333_v13, %v1009_v7  ;;  %v6058_v7 = vld [vmem:[%s6274_s16 + $0xc8] sm:$0xff] }
 0x126   : > { %5739 = vmatmul.mubr.f32.gmra.mxu0 %v9957_v9  ;;  %3020 = vmatprep.subr.mxu0 %v9931_v47  ;;  %v1011_v55 = vpop.f32.mrf.mxu0  ;;  %v7527_v44 = vpop.f32.mrf.mxu1  ;;  %v2967_v9 = vld [vmem:[%s9721_s5 + $0x38] sm:$0xff] }
 0x127   : > { %9984 = vst [vmem:[#allocation14_spill] sm:$0xff] %v7527_v44  ;;  %2174 = vmatmul.mubr.f32.gmra.mxu1 %v6056_v5  ;;  %3021 = vmatpush1.msra.mxu0 %v2969_v45  ;;  %v6059_v5 = vld [vmem:[%s6274_s16 + $0xd8] sm:$0xff]  ;;  %v7857_v44 = vld [vmem:[%s7712_s8 + $0x50] sm:$0xff] }
 0x128   : > { %3022 = vmatprep.subr.mxu0 %v9931_v47  ;;  %2178 = vmatprep.mubr.f32.mxu1 %v6993_v14  ;;  %v1014_v46 = vpop.f32.mrf.mxu0  ;;  %v2966_v14 = vld [vmem:[%s9721_s5 + $0x30] sm:$0xff] }
 0x129   : > { %5741 = vmatprep.mubr.f32.mxu0 %v9958_v24  ;;  %3023 = vmatpush1.msra.mxu0 %v2968_v63  ;;  %v7540_v13 = vadd.f32 %v7352_v2, %v1014_v46  ;;  %v7542_v26 = vpop.f32.mrf.mxu1 }
 0x12a   : > { %9985 = vst [vmem:[#allocation15_spill] sm:$0xff] %v7542_v26  ;;  %5742 = vmatmul.mubr.f32.gmra.mxu0 %v9960_v21  ;;  %3024 = vmatprep.subr.mxu0 %v9931_v47  ;;  %v1016_v39 = vpop.f32.mrf.mxu0  ;;  %v2965_v21 = vld [vmem:[%s9721_s5 + $0x28] sm:$0xff] }
 0x12b   : > { %2179 = vmatmul.mubr.f32.gmra.mxu1 %v6057_v6  ;;  %3025 = vmatpush1.msra.mxu0 %v2967_v9  ;;  %v7550_v24 = vpop.f32.mrf.mxu1  ;;  %v2960_v39 = vld [vmem:[%s9721_s5] sm:$0xff]  ;;  %v7854_v26 = vld [vmem:[%s7712_s8 + $0x48] sm:$0xff] }
 0x12c   : > { %9986 = vst [vmem:[#allocation16_spill] sm:$0xff] %v7550_v24  ;;  %3026 = vmatprep.subr.mxu0 %v9931_v47  ;;  %2183 = vmatprep.mubr.f32.mxu1 %v7008_v20  ;;  %v2964_v20 = vld [vmem:[%s9721_s5 + $0x20] sm:$0xff]  ;;  %v2723_v25 = vrot.slane %v7854_v26, 1 }
 0x12d   : > { %5744 = vmatprep.mubr.f32.mxu0 %v9961_v32  ;;  %3027 = vmatpush1.msra.mxu0 %v2966_v14  ;;  %v1019_v2 = vpop.f32.mrf.mxu0  ;;  %v7558_v37 = vpop.f32.mrf.mxu1  ;;  %v6060_v14 = vld [vmem:[%s6274_s16 + $0xe0] sm:$0xff] }
 0x12e   : > { %9987 = vst [vmem:[#allocation17_spill] sm:$0xff] %v7558_v37  ;;  %v7561_v35 = vadd.f32 %v7346_v11, %v1019_v2  ;;  %5745 = vmatmul.mubr.f32.gmra.mxu0 %v9963_v15  ;;  %3028 = vmatprep.subr.mxu0 %v9931_v47  ;;  %v2963_v15 = vld [vmem:[%s9721_s5 + $0x18] sm:$0xff] }
 0x12f   : > { %2184 = vmatmul.mubr.f32.gmra.mxu1 %v6058_v7  ;;  %3029 = vmatpush1.msra.mxu0 %v2965_v21  ;;  %v1021_v32 = vpop.f32.mrf.mxu0  ;;  %v7569_v45 = vpop.f32.mrf.mxu1  ;;  %v2990_v21 = vld [vmem:[%s9721_s5 + $0xf0] sm:$0xff] }
 0x130   : > { %9988 = vst [vmem:[#allocation18_spill] sm:$0xff] %v7569_v45  ;;  %3030 = vmatprep.subr.mxu0 %v9931_v47  ;;  %2188 = vmatprep.mubr.f32.mxu1 %v7021_v50  ;;  %v2962_v50 = vld [vmem:[%s9721_s5 + $0x10] sm:$0xff]  ;;  %v2988_v32 = vld [vmem:[%s9721_s5 + $0xe0] sm:$0xff] }
 0x131   : > { %5747 = vmatprep.mubr.f32.mxu0 %v9964_v52  ;;  %3031 = vmatpush1.msra.mxu0 %v2964_v20  ;;  %v1024_v11 = vpop.f32.mrf.mxu0  ;;  %v6061_v20 = vld [vmem:[%s6274_s16 + $0xf0] sm:$0xff]  ;;  %v7836_v45 = vld [vmem:[%s7712_s8 + $0x40] sm:$0x3] }
 0x132   : > { %v7578_v55 = vadd.f32 %v7368_v22, %v1024_v11  ;;  %v7580_v63 = vpop.f32.mrf.mxu1  ;;  %5748 = vmatmul.mubr.f32.gmra.mxu0 %v9965_v42  ;;  %3032 = vmatprep.subr.mxu0 %v9931_v47  ;;  %v2961_v22 = vld [vmem:[%s9721_s5 + $0x8] sm:$0xff]  ;;  %v6062_v11 = vld [vmem:[%s6274_s16 + $0xf8] sm:$0xff] }
 0x133   : > { %9989 = vst [vmem:[#allocation19_spill] sm:$0xff] %v7580_v63  ;;  %2189 = vmatmul.mubr.f32.gmra.mxu1 %v6059_v5  ;;  %3033 = vmatpush1.msra.mxu0 %v2963_v15  ;;  %v1026_v52 = vpop.f32.mrf.mxu0  ;;  %v2986_v5 = vld [vmem:[%s9721_s5 + $0xd0] sm:$0xff] }
 0x134   : > { %v7588_v46 = vpop.f32.mrf.mxu1  ;;  %3034 = vmatprep.subr.mxu0 %v9931_v47  ;;  %2193 = vmatprep.mubr.f32.mxu1 %v7040_v61 }
 0x135   : > { %9990 = vst [vmem:[#allocation20_spill] sm:$0xff] %v7588_v46  ;;  %5750 = vmatprep.mubr.f32.mxu0 %v9966_v1  ;;  %3035 = vmatpush1.msra.mxu0 %v2962_v50 }
 0x136   : > { %v1029_v42 = vpop.f32.mrf.mxu0  ;;  %v7596_v9 = vpop.f32.mrf.mxu1  ;;  %5751 = vmatmul.mubr.f32.gmra.mxu0 %v9967_v17  ;;  %3036 = vmatprep.subr.mxu0 %v9931_v47  ;;  %v2991_v17 = vld [vmem:[%s9721_s5 + $0xf8] sm:$0xff] }
 0x137   : > { %9991 = vst [vmem:[#allocation21_spill] sm:$0xff] %v7596_v9  ;;  %v7604_v61 = vadd.f32 %v7360_v12, %v1029_v42  ;;  %2194 = vmatmul.mubr.f32.gmra.mxu1 %v6060_v14  ;;  %3037 = vmatpush1.msra.mxu0 %v2961_v22  ;;  %v6063_v22 = vld [vmem:[%s6274_s16 + $0x108] sm:$0xff]  ;;  %v9993_v42 = vld [vmem:[#allocation29_spill] sm:$0xff]  ;;  %v9994_v14 = vld [vmem:[#allocation27_spill] sm:$0xff] }
 0x138   : > { %v1031_v1 = vpop.f32.mrf.mxu0  ;;  %v7607_v6 = vpop.f32.mrf.mxu1  ;;  %3038 = vmatprep.subr.mxu0 %v9931_v47  ;;  %2198 = vmatprep.mubr.f32.mxu1 %v7056_v62 }
 0x139   : > { %9992 = vst [vmem:[#allocation22_spill] sm:$0xff] %v7607_v6  ;;  %5753 = vmatprep.mubr.f32.mxu0 %v9968_v41  ;;  %3039 = vmatpush1.msra.mxu0 %v2960_v39  ;;  %v2984_v1 = vld [vmem:[%s9721_s5 + $0xc0] sm:$0xff] }
 0x13a   : > { %v1034_v12 = vpop.f32.mrf.mxu0  ;;  %5754 = vmatmul.mubr.f32.gmra.mxu0 %v9969_v34  ;;  %3040 = vmatprep.subr.mxu0 %v9931_v47  ;;  %v2989_v34 = vld [vmem:[%s9721_s5 + $0xe8] sm:$0xff] }
 0x13b   : > { %v7621_v2 = vadd.f32 %v7387_v23, %v1034_v12  ;;  %v7623_v62 = vpop.f32.mrf.mxu1  ;;  %2199 = vmatmul.mubr.f32.gmra.mxu1 %v6061_v20  ;;  %3041 = vmatpush2.msra.mxu0 %v2991_v17  ;;  %v9995_v17 = vld [vmem:[#allocation6_spill] sm:$0xff]  ;;  %v6064_v20 = vld [vmem:[%s6274_s16 + $0x110] sm:$0xff] }
 0x13c   : > { %v1036_v41 = vpop.f32.mrf.mxu0  ;;  %3042 = vmatprep.subr.mxu0 %v9931_v47  ;;  %2203 = vmatprep.mubr.f32.mxu1 %v7068_v49 }
 0x13d   : > { %v1527_v7 = vpop.f32.mrf.mxu1  ;;  %5756 = vmatprep.mubr.f32.mxu0 %v9970_v4  ;;  %3043 = vmatpush2.msra.mxu0 %v2990_v21  ;;  %v9996_v41 = vld [vmem:[#allocation30_spill] sm:$0xff] }
 0x13e   : > { %v1039_v23 = vpop.f32.mrf.mxu0  ;;  %5757 = vmatmul.mubr.f32.gmra.mxu0 %v9971_v56  ;;  %3044 = vmatprep.subr.mxu0 %v9931_v47  ;;  %v2987_v56 = vld [vmem:[%s9721_s5 + $0xd8] sm:$0xff] }
 0x13f   : > { %v7638_v15 = vadd.f32 %v7379_v58, %v1039_v23  ;;  %v7640_v49 = vpop.f32.mrf.mxu1  ;;  %2204 = vmatmul.mubr.f32.gmra.mxu1 %v6062_v11  ;;  %3045 = vmatpush2.msra.mxu0 %v2989_v34  ;;  %v2983_v34 = vld [vmem:[%s9721_s5 + $0xb8] sm:$0xff]  ;;  %v9997_v23 = vld [vmem:[#allocation28_spill] sm:$0xff]  ;;  %v2982_v11 = vld [vmem:[%s9721_s5 + $0xb0] sm:$0xff] }
 0x140   : > { %v1041_v4 = vpop.f32.mrf.mxu0  ;;  %3046 = vmatprep.subr.mxu0 %v9931_v47  ;;  %2208 = vmatprep.mubr.f32.mxu1 %v7088_v51 }
 0x141   : > { %v1532_v50 = vpop.f32.mrf.mxu1  ;;  %5759 = vmatprep.mubr.f32.mxu0 %v9972_v53  ;;  %3047 = vmatpush2.msra.mxu0 %v2988_v32 }
 0x142   : > { %v1044_v58 = vpop.f32.mrf.mxu0  ;;  %5760 = vmatmul.mubr.f32.gmra.mxu0 %v9973_v59  ;;  %3048 = vmatprep.subr.mxu0 %v9931_v47  ;;  %v2985_v59 = vld [vmem:[%s9721_s5 + $0xc8] sm:$0xff]  ;;  %v6065_v50 = vld [vmem:[%s6274_s16 + $0x120] sm:$0xff] }
 0x143   : > { %v7655_v52 = vadd.f32 %v7401_v19, %v1044_v58  ;;  %v7657_v51 = vpop.f32.mrf.mxu1  ;;  %2209 = vmatmul.mubr.f32.gmra.mxu1 %v6063_v22  ;;  %3049 = vmatpush2.msra.mxu0 %v2987_v56  ;;  %v7695_v58 = vld [vmem:[%s7281_s19 + $0x18] sm:$0xff] }
 0x144   : > { %v1046_v53 = vpop.f32.mrf.mxu0  ;;  %3050 = vmatprep.subr.mxu0 %v9931_v47  ;;  %2213 = vmatprep.mubr.f32.mxu1 %v9993_v42 }
 0x145   : > { %v1537_v39 = vpop.f32.mrf.mxu1  ;;  %5762 = vmatprep.mubr.f32.mxu0 %v9975_v54  ;;  %3051 = vmatpush2.msra.mxu0 %v2986_v5  ;;  %v7698_v5 = vld [vmem:[%s7281_s19 + $0x20] sm:$0xff]  ;;  %v7706_v53 = vld [vmem:[%s7281_s19 + $0x28] sm:$0x3]  ;;  %s9069_s19 = scalar_lea.vmem %s9719_s3, %s5245_s13 }
 0x146   : > { %v1049_v19 = vpop.f32.mrf.mxu0  ;;  %5763 = vmatmul.mubr.f32.gmra.mxu0 %v9994_v14  ;;  %3052 = vmatprep.subr.mxu0 %v9931_v47  ;;  %v2980_v39 = vld [vmem:[%s9721_s5 + $0xa0] sm:$0xff]  ;;  %v840_v14 = vrot.slane %v7698_v5, 2 }
 0x147   : > { %v7672_v12 = vadd.f32 %v9995_v17, %v1049_v19  ;;  %v7674_v21 = vpop.f32.mrf.mxu1  ;;  %2214 = vmatmul.mubr.f32.gmra.mxu1 %v6064_v20  ;;  %3053 = vmatpush2.msra.mxu0 %v2985_v59  ;;  %v839_v19 = vrot.slane %v7695_v58, 2  ;;  %v6066_v17 = vld [vmem:[%s6274_s16 + $0x128] sm:$0xff]  ;;  %v7729_v20 = vld [vmem:[%s7712_s8] sm:$0xff] }
 0x148   : > { %v1051_v54 = vpop.f32.mrf.mxu0  ;;  %3054 = vmatprep.subr.mxu0 %v9931_v47  ;;  %2218 = vmatprep.mubr.f32.mxu1 %v9996_v41  ;;  %v9999_v41 = vld [vmem:[#allocation32_spill] sm:$0xff] }
 0x149   : > { %v1542_v7 = vpop.f32.mrf.mxu1  ;;  %5765 = vmatprep.mubr.f32.mxu0 %v9997_v23  ;;  %3055 = vmatpush2.msra.mxu0 %v2984_v1 }
 0x14a   : > { %v1054_v32 = vpop.f32.mrf.mxu0  ;;  %5766 = vmatmul.mubr.f32.gmra.mxu0 %v6838_v28  ;;  %3056 = vmatprep.subr.mxu0 %v9931_v47  ;;  %v9998_v28 = vld [vmem:[#allocation31_spill] sm:$0xff] }
 0x14b   : > { %v7689_v4 = vadd.f32 %v7421_v27, %v1054_v32  ;;  %v7691_v56 = vpop.f32.mrf.mxu1  ;;  %2219 = vmatmul.mubr.f32.gmra.mxu1 %v6065_v50  ;;  %3057 = vmatpush2.msra.mxu0 %v2983_v34  ;;  %v2981_v27 = vld [vmem:[%s9721_s5 + $0xa8] sm:$0xff]  ;;  %v2979_v34 = vld [vmem:[%s9721_s5 + $0x98] sm:$0xff]  ;;  %v841_v32 = vsel %vm753_vm0, %v839_v19, %v840_v14  ;;  %v2708_v50 = vrot.slane %v7729_v20, 1  ;;  %v10001_v19 = vld [vmem:[#allocation33_spill] sm:$0xff] }
 0x14c   : > { %v1056_v22 = vpop.f32.mrf.mxu0  ;;  %3058 = vmatprep.subr.mxu0 %v9931_v47  ;;  %2223 = vmatprep.mubr.f32.mxu1 %v9998_v28 }
 0x14d   : > { %v1547_v42 = vpop.f32.mrf.mxu1  ;;  %5768 = vmatprep.mubr.f32.mxu0 %v6854_v18  ;;  %3059 = vmatpush2.msra.mxu0 %v2982_v11  ;;  %v842_v18 = vrot.slane %v7706_v53, 2  ;;  %v2978_v11 = vld [vmem:[%s9721_s5 + $0x90] sm:$0xff] }
 0x14e   : > { %v7715_v59 = vpop.f32.mrf.mxu0  ;;  %5769 = vmatmul.mubr.f32.gmra.mxu0 %v6860_v8  ;;  %3060 = vmatprep.subr.mxu0 %v9931_v47  ;;  %v7732_v8 = vld [vmem:[%s7712_s8 + $0x8] sm:$0xff]  ;;  %v7756_v42 = vld [vmem:[%s7712_s8 + $0x10] sm:$0x3] }
 0x14f   : > { %v7724_v1 = vpop.f32.mrf.mxu1  ;;  %2224 = vmatmul.mubr.f32.gmra.mxu1 %v6066_v17  ;;  %3061 = vmatpush2.msra.mxu0 %v2981_v27  ;;  %v2709_v22 = vrot.slane %v7732_v8, 1  ;;  %v843_v27 = vsel %vm753_vm0, %v840_v14, %v842_v18  ;;  %v2976_v18 = vld [vmem:[%s9721_s5 + $0x80] sm:$0xff] }
 0x150   : > { %v1061_v54 = vpop.f32.mrf.mxu0  ;;  %3062 = vmatprep.subr.mxu0 %v9931_v47  ;;  %2228 = vmatprep.mubr.f32.mxu1 %v9999_v41  ;;  %v7767_v41 = vld [vmem:[%s7712_s8 + $0x20] sm:$0xff] }
 0x151   : > { %v1552_v7 = vpop.f32.mrf.mxu1  ;;  %5771 = vmatprep.mubr.f32.mxu0 %v7431_v43  ;;  %3063 = vmatpush2.msra.mxu0 %v2980_v39  ;;  %v7764_v54 = vld [vmem:[%s7712_s8 + $0x18] sm:$0xff] }
 0x152   : > { %v1064_v23 = vpop.f32.mrf.mxu0  ;;  %5772 = vmatmul.mubr.f32.gmra.mxu0 %v7441_v57  ;;  %3064 = vmatprep.subr.mxu0 %v9931_v47  ;;  %v6067_v57 = vld [vmem:[%s6274_s16 + $0x138] sm:$0xff]  ;;  %v2711_v7 = vrot.slane %v7756_v42, 1 }
 0x153   : > { %v7749_v43 = vadd.f32 %v7443_v60, %v1064_v23  ;;  %v7751_v28 = vpop.f32.mrf.mxu1  ;;  %2229 = vmatmul.mubr.f32.gmra.mxu1 %v6067_v57  ;;  %3065 = vmatpush2.msra.mxu0 %v2979_v34  ;;  %v2977_v60 = vld [vmem:[%s9721_s5 + $0x88] sm:$0xff]  ;;  %v2710_v34 = vsel %vm626_vm1, %v2708_v50, %v2709_v22  ;;  %v10002_v57 = vld [vmem:[#allocation34_spill] sm:$0xff]  ;;  %v2714_v50 = vrot.slane %v7767_v41, 1 }
 0x154   : > { %v1066_v39 = vpop.f32.mrf.mxu0  ;;  %3066 = vmatprep.subr.mxu0 %v9931_v47  ;;  %2233 = vmatprep.mubr.f32.mxu1 %v10001_v19 }
 0x155   : > { %10000 = vst [vmem:[#allocation23_spill] sm:$0xff] %v7749_v43  ;;  %v1557_v17 = vpop.f32.mrf.mxu1  ;;  %5774 = vmatprep.mubr.f32.mxu0 %v841_v32  ;;  %3067 = vmatpush2.msra.mxu0 %v2978_v11  ;;  %v6068_v32 = vld [vmem:[%s6274_s16 + $0x140] sm:$0xff]  ;;  %v2713_v39 = vrot.slane %v7764_v54, 1 }
 0x156   : > { %v7769_v14 = vpop.f32.mrf.mxu0  ;;  %5775 = vmatmul.mubr.f32.gmra.mxu0 %v843_v27  ;;  %3068 = vmatprep.subr.mxu0 %v9931_v47  ;;  %v5192_v27 = vld [vmem:[%s9721_s5 + $0x2f8] sm:$0xff]  ;;  %v7788_v17 = vld [vmem:[%s7712_s8 + $0x28] sm:$0x3] }
 0x157   : > { %v7777_v23 = vpop.f32.mrf.mxu1  ;;  %2234 = vmatmul.mubr.f32.gmra.mxu1 %v6068_v32  ;;  %3069 = vmatpush2.msra.mxu0 %v2977_v60  ;;  %v2712_v32 = vsel %vm626_vm1, %v2709_v22, %v2711_v7  ;;  %v7804_v22 = vsel %vm626_vm1, %v2713_v39, %v2714_v50  ;;  %v2716_v7 = vrot.slane %v7788_v17, 1 }
 0x158   : > { %v1071_v11 = vpop.f32.mrf.mxu0  ;;  %3070 = vmatprep.subr.mxu0 %v9931_v47  ;;  %2238 = vmatprep.mubr.f32.mxu1 %v10002_v57  ;;  %10005 = vst [vmem:[#allocation25_spill] sm:$0xff] %v7804_v22 }
 0x159   : > { %v1562_v19 = vpop.f32.mrf.mxu1  ;;  %3071 = vmatpush2.msra.mxu0 %v2976_v18  ;;  %3072 = vmatprep.mubr.f32.mxu0 %v2710_v34  ;;  %v2998_v11 = vld [vmem:[%s9721_s5 + $0x130] sm:$0xff]  ;;  %v7828_v9 = vsel %vm626_vm1, %v2714_v50, %v2716_v7  ;;  %v2996_v50 = vld [vmem:[%s9721_s5 + $0x120] sm:$0xff]  ;;  %v6071_v7 = vld [vmem:[%s6274_s16 + $0x168] sm:$0xff] }
 0x15a   : > { %5794 = vmatpush3.msra.mxu1 %v7460_v31  ;;  %v1074_v60 = vpop.f32.mrf.mxu0  ;;  %3073 = vmatmul.mubr.f32.vlgmr.msra.gmra.mxu0 %v7729_v20  ;;  %v6069_v34 = vld [vmem:[%s6274_s16 + $0x150] sm:$0xff]  ;;  %v10004_v19 = vld [vmem:[#allocation35_spill] sm:$0xff]  ;;  %10008 = vst [vmem:[#allocation29_spill] sm:$0xff] %v7828_v9 }
 0x15b   : > { %v7797_v57 = vadd.f32 %v7467_v36, %v1074_v60  ;;  %v7799_v18 = vpop.f32.mrf.mxu1  ;;  %2239 = vmatmul.mubr.f32.gmra.mxu1 %v6069_v34  ;;  %5857 = vmatprep.subr.mxu0 %v5192_v27  ;;  %v5191_v36 = vld [vmem:[%s9721_s5 + $0x2f0] sm:$0xff]  ;;  %v7814_v34 = vld [vmem:[%s7712_s8 + $0x38] sm:$0xff] }
 0x15c   : > { %5858 = vmatpush3.msra.mxu0 %v5192_v27  ;;  %v1076_v31 = vpop.f32.mrf.mxu0  ;;  %2243 = vmatprep.mubr.f32.mxu1 %v10004_v19  ;;  %v7811_v60 = vld [vmem:[%s7712_s8 + $0x30] sm:$0xff]  ;;  %v10007_v19 = vld [vmem:[#allocation36_spill] sm:$0xff]  ;;  %v2719_v46 = vrot.slane %v7814_v34, 1 }
 0x15d   : > { %10003 = vst [vmem:[#allocation24_spill] sm:$0xff] %v7797_v57  ;;  %v1567_v6 = vpop.f32.mrf.mxu1  ;;  %3077 = vmatprep.mubr.f32.mxu0 %v2712_v32  ;;  %5795 = vmatprep.subr.mxu1 %v2998_v11  ;;  %v6070_v32 = vld [vmem:[%s6274_s16 + $0x158] sm:$0xff] }
 0x15e   : > { %v7816_v27 = vpop.f32.mrf.mxu0  ;;  %3078 = vmatmul.mubr.f32.gmra.mxu0 %v7732_v8  ;;  %5796 = vmatpush3.msra.mxu1 %v2998_v11  ;;  %v2997_v6 = vld [vmem:[%s9721_s5 + $0x128] sm:$0xff]  ;;  %v2718_v11 = vrot.slane %v7811_v60, 1 }
 0x15f   : > { %10006 = vst [vmem:[#allocation26_spill] sm:$0xff] %v7816_v27  ;;  %v7822_v39 = vpop.f32.mrf.mxu1  ;;  %2244 = vmatmul.mubr.f32.gmra.mxu1 %v6070_v32  ;;  %3082 = vmatprep.mubr.f32.mxu0 %v7804_v22  ;;  %v5190_v32 = vld [vmem:[%s9721_s5 + $0x2e8] sm:$0xff]  ;;  %v2834_v27 = vrot.slane %v7729_v20, 2 }
 0x160   : > { %v1081_v31 = vpop.f32.mrf.mxu0  ;;  %2248 = vmatprep.mubr.f32.mxu1 %v10007_v19  ;;  %5859 = vmatprep.subr.mxu0 %v5191_v36  ;;  %v10010_v19 = vld [vmem:[#allocation37_spill] sm:$0xff]  ;;  %v7850_v37 = vsel %vm626_vm1, %v2718_v11, %v2719_v46  ;;  %v5189_v11 = vld [vmem:[%s9721_s5 + $0x2e0] sm:$0xff]  ;;  %v7910_v22 = vld [vmem:[%s7712_s8 + $0x68] sm:$0xff] }
 0x161   : > { %v1572_v63 = vpop.f32.mrf.mxu1  ;;  %5860 = vmatpush3.msra.mxu0 %v5191_v36  ;;  %5797 = vmatprep.subr.mxu1 %v2997_v6  ;;  %10011 = vst [vmem:[#allocation6_spill] sm:$0xff] %v7850_v37 }
 0x162   : > { %v7838_v31 = vpop.f32.mrf.mxu0  ;;  %3083 = vmatmul.mubr.f32.gmra.mxu0 %v7764_v54  ;;  %5798 = vmatpush3.msra.mxu1 %v2997_v6  ;;  %v2721_v6 = vrot.slane %v7836_v45, 1 }
 0x163   : > { %10009 = vst [vmem:[#allocation27_spill] sm:$0xff] %v7838_v31  ;;  %v7844_v63 = vpop.f32.mrf.mxu1  ;;  %2249 = vmatmul.mubr.f32.gmra.mxu1 %v6071_v7  ;;  %3087 = vmatprep.mubr.f32.mxu0 %v7828_v9  ;;  %v2995_v7 = vld [vmem:[%s9721_s5 + $0x118] sm:$0xff]  ;;  %v2724_v9 = vrot.slane %v7857_v44, 1 }
 0x164   : > { %v1086_v36 = vpop.f32.mrf.mxu0  ;;  %2253 = vmatprep.mubr.f32.mxu1 %v10010_v19  ;;  %5861 = vmatprep.subr.mxu0 %v5190_v32  ;;  %v2994_v19 = vld [vmem:[%s9721_s5 + $0x110] sm:$0xff]  ;;  %v7884_v31 = vld [vmem:[%s7712_s8 + $0x58] sm:$0x3] }
 0x165   : > { %v1577_v24 = vpop.f32.mrf.mxu1  ;;  %5862 = vmatpush3.msra.mxu0 %v5190_v32  ;;  %5799 = vmatprep.subr.mxu1 %v2996_v50  ;;  %v6072_v32 = vld [vmem:[%s6274_s16 + $0x170] sm:$0xff]  ;;  %v2726_v57 = vrot.slane %v7884_v31, 1 }
 0x166   : > { %v7862_v36 = vpop.f32.mrf.mxu0  ;;  %3088 = vmatmul.mubr.f32.gmra.mxu0 %v7767_v41  ;;  %5800 = vmatpush3.msra.mxu1 %v2996_v50  ;;  %v7877_v50 = vsel %vm626_vm1, %v2719_v46, %v2721_v6  ;;  %v2993_v46 = vld [vmem:[%s9721_s5 + $0x108] sm:$0xff] }
 0x167   : > { %10012 = vst [vmem:[#allocation30_spill] sm:$0xff] %v7862_v36  ;;  %v7868_v24 = vpop.f32.mrf.mxu1  ;;  %2254 = vmatmul.mubr.f32.gmra.mxu1 %v6072_v32  ;;  %3092 = vmatprep.mubr.f32.mxu0 %v7850_v37  ;;  %10014 = vst [vmem:[#allocation28_spill] sm:$0xff] %v7877_v50  ;;  %v712_v32 = vrot.slane %v7695_v58, 1  ;;  %v713_v37 = vrot.slane %v7698_v5, 1 }
 0x168   : > { %v1091_v29 = vpop.f32.mrf.mxu0  ;;  %2258 = vmatprep.mubr.f32.mxu1 %v10013_v0  ;;  %5801 = vmatprep.subr.mxu1 %v2995_v7  ;;  %v5188_v0 = vld [vmem:[%s9721_s5 + $0x2d8] sm:$0xff] }
 0x169   : > { %v1582_v3 = vpop.f32.mrf.mxu1  ;;  %5863 = vmatprep.subr.mxu0 %v5189_v11  ;;  %5802 = vmatpush3.msra.mxu1 %v2995_v7  ;;  %v10016_v7 = vld [vmem:[#allocation5_spill] sm:$0xff]  ;;  %v714_v36 = vsel %vm626_vm1, %v712_v32, %v713_v37 }
 0x16a   : > { %v7886_v29 = vpop.f32.mrf.mxu0  ;;  %3093 = vmatmul.mubr.f32.gmra.mxu0 %v7811_v60  ;;  %5803 = vmatprep.subr.mxu1 %v2994_v19 }
 0x16b   : > { %10015 = vst [vmem:[#allocation31_spill] sm:$0xff] %v7886_v29  ;;  %v7892_v3 = vpop.f32.mrf.mxu1  ;;  %2259 = vmatmul.mubr.f32.gmra.mxu1 %v7290_v10  ;;  %3097 = vmatprep.mubr.f32.mxu0 %v7877_v50  ;;  %v7901_v29 = vsel %vm626_vm1, %v2723_v25, %v2724_v9  ;;  %v715_v10 = vrot.slane %v7706_v53, 1  ;;  %v7907_v50 = vld [vmem:[%s7712_s8 + $0x60] sm:$0xff] }
 0x16c   : > { %v1096_v6 = vpop.f32.mrf.mxu0  ;;  %2263 = vmatprep.mubr.f32.mxu1 %v10016_v7  ;;  %10017 = vst [vmem:[#allocation32_spill] sm:$0xff] %v7901_v29  ;;  %5864 = vmatpush3.msra.mxu0 %v5189_v11  ;;  %v2992_v25 = vld [vmem:[%s9721_s5 + $0x100] sm:$0xff]  ;;  %v2728_v32 = vrot.slane %v7907_v50, 1  ;;  %v2729_v7 = vrot.slane %v7910_v22, 1 }
 0x16d   : > { %v1587_v48 = vpop.f32.mrf.mxu1  ;;  %5804 = vmatpush3.msra.mxu1 %v2994_v19  ;;  %5865 = vmatprep.subr.mxu0 %v5188_v0  ;;  %v10019_v11 = vld [vmem:[#allocation3_spill] sm:$0xff]  ;;  %v7923_v19 = vsel %vm626_vm1, %v2724_v9, %v2726_v57  ;;  %v716_v43 = vsel %vm626_vm1, %v713_v37, %v715_v10  ;;  %v5187_v9 = vld [vmem:[%s9721_s5 + $0x2d0] sm:$0xff]  ;;  %v2837_v37 = vrot.slane %v7756_v42, 2 }
 0x16e   : > { %v7912_v6 = vpop.f32.mrf.mxu0  ;;  %3098 = vmatmul.mubr.f32.gmra.mxu0 %v7814_v34  ;;  %5805 = vmatprep.subr.mxu1 %v2993_v46  ;;  %10020 = vst [vmem:[#allocation34_spill] sm:$0xff] %v7923_v19  ;;  %v7959_v42 = vld [vmem:[%s7712_s8 + $0x80] sm:$0xff] }
 0x16f   : > { %10018 = vst [vmem:[#allocation33_spill] sm:$0xff] %v7912_v6  ;;  %v7918_v48 = vpop.f32.mrf.mxu1  ;;  %2264 = vmatmul.mubr.f32.gmra.mxu1 %v10019_v11  ;;  %3102 = vmatprep.mubr.f32.mxu0 %v7901_v29  ;;  %v2835_v11 = vrot.slane %v7732_v8, 2  ;;  %v7931_v29 = vld [vmem:[%s7712_s8 + $0x70] sm:$0x3]  ;;  %v7945_v8 = vsel %vm626_vm1, %v2728_v32, %v2729_v7 }
 0x170   : > { %v1101_v53 = vpop.f32.mrf.mxu0  ;;  %2268 = vmatprep.mubr.f32.mxu1 %v714_v36  ;;  %5806 = vmatpush3.msra.mxu1 %v2993_v46  ;;  %10022 = vst [vmem:[#allocation36_spill] sm:$0xff] %v7945_v8 }
 0x171   : > { %v1592_v6 = vpop.f32.mrf.mxu1  ;;  %5807 = vmatprep.subr.mxu1 %v2992_v25  ;;  %5866 = vmatpush3.msra.mxu0 %v5188_v0  ;;  %v2731_v0 = vrot.slane %v7931_v29, 1  ;;  %v2836_v10 = vsel %vm753_vm0, %v2834_v27, %v2835_v11  ;;  %v5186_v53 = vld [vmem:[%s9721_s5 + $0x2c8] sm:$0xff] }
 0x172   : > { %v7933_v36 = vpop.f32.mrf.mxu0  ;;  %3103 = vmatmul.mubr.f32.gmra.mxu0 %v7854_v26  ;;  %5808 = vmatpush3.msra.mxu1 %v2992_v25  ;;  %v2839_v6 = vrot.slane %v7764_v54, 2 }
 0x173   : > { %10021 = vst [vmem:[#allocation35_spill] sm:$0xff] %v7933_v36  ;;  %v7939_v57 = vpop.f32.mrf.mxu1  ;;  %2269 = vmatmul.mubr.f32.gmra.mxu1 %v7695_v58  ;;  %3107 = vmatprep.mubr.f32.mxu0 %v7923_v19  ;;  %v2840_v58 = vrot.slane %v7767_v41, 2  ;;  %v2838_v41 = vsel %vm753_vm0, %v2835_v11, %v2837_v37  ;;  %v7970_v27 = vsel %vm626_vm1, %v2729_v7, %v2731_v0  ;;  %v5160_v19 = vld [vmem:[%s9721_s5 + $0x1f8] sm:$0xff]  ;;  %v2845_v7 = vrot.slane %v7814_v34, 2  ;;  %v5159_v0 = vld [vmem:[%s9721_s5 + $0x1f0] sm:$0xff] }
 0x174   : > { %v1106_v20 = vpop.f32.mrf.mxu0  ;;  %2273 = vmatprep.mubr.f32.mxu1 %v716_v43  ;;  %3603 = vmatprep.subr.mxu1 %v9931_v47  ;;  %v7956_v43 = vld [vmem:[%s7712_s8 + $0x78] sm:$0xff]  ;;  %10024 = vst [vmem:[#allocation4_spill] sm:$0xff] %v7970_v27  ;;  %v2847_v34 = vrot.slane %v7836_v45, 2 }
 0x175   : > { %v1597_v46 = vpop.f32.mrf.mxu1  ;;  %5867 = vmatprep.subr.mxu0 %v5187_v9  ;;  %v2842_v20 = vrot.slane %v7788_v17, 2  ;;  %v2844_v17 = vrot.slane %v7811_v60, 2 }
 0x176   : > { %v7952_v25 = vpop.f32.mrf.mxu0  ;;  %3108 = vmatmul.mubr.f32.gmra.mxu0 %v7857_v44 }
 0x177   : > { %10023 = vst [vmem:[#allocation37_spill] sm:$0xff] %v7952_v25  ;;  %v7964_v32 = vpop.f32.mrf.mxu1  ;;  %2274 = vmatmul.mubr.f32.gmra.mxu1 %v7698_v5  ;;  %3112 = vmatprep.mubr.f32.mxu0 %v7945_v8  ;;  %v7977_v5 = vsel %vm753_vm0, %v2839_v6, %v2840_v58  ;;  %v7997_v60 = vsel %vm753_vm0, %v2840_v58, %v2842_v20  ;;  %v2849_v58 = vrot.slane %v7854_v26, 2  ;;  %v2850_v20 = vrot.slane %v7857_v44, 2 }
 0x178   : > { %v1111_v54 = vpop.f32.mrf.mxu0  ;;  %5809 = vmatprep.mubr.f32.mxu1 %v2836_v10  ;;  %5868 = vmatpush3.msra.mxu0 %v5187_v9  ;;  %10025 = vst [vmem:[#allocation5_spill] sm:$0xff] %v7977_v5  ;;  %v2734_v10 = vrot.slane %v7959_v42, 1  ;;  %v7987_v9 = vld [vmem:[%s7712_s8 + $0x88] sm:$0x3]  ;;  %10027 = vst [vmem:[#allocation38_spill] sm:$0xff] %v7997_v60  ;;  %v8012_v45 = vsel %vm753_vm0, %v2844_v17, %v2845_v7  ;;  %v8031_v44 = vsel %vm753_vm0, %v2845_v7, %v2847_v34 }
 0x179   : > { %v1602_v46 = vpop.f32.mrf.mxu1  ;;  %v2733_v54 = vrot.slane %v7956_v43, 1  ;;  %5869 = vmatprep.subr.mxu0 %v5186_v53  ;;  %10030 = vst [vmem:[#allocation41_spill] sm:$0xff] %v8012_v45  ;;  %10031 = vst [vmem:[#allocation42_spill] sm:$0xff] %v8031_v44  ;;  %v2852_v26 = vrot.slane %v7884_v31, 2  ;;  %v8048_v31 = vsel %vm753_vm0, %v2849_v58, %v2850_v20  ;;  %v2854_v34 = vrot.slane %v7907_v50, 2 }
 0x17a   : > { %v7981_v11 = vpop.f32.mrf.mxu0  ;;  %3113 = vmatmul.mubr.f32.gmra.mxu0 %v7907_v50  ;;  %10034 = vst [vmem:[#allocation45_spill] sm:$0xff] %v8048_v31  ;;  %v2857_v50 = vrot.slane %v7931_v29, 2 }
 0x17b   : > { %10026 = vst [vmem:[#allocation3_spill] sm:$0xff] %v7981_v11  ;;  %v7989_v37 = vpop.f32.mrf.mxu1  ;;  %5810 = vmatmul.mubr.f32.vlgmr.msra.gmra.mxu1 %v2838_v41  ;;  %3117 = vmatprep.mubr.f32.mxu0 %v7970_v27  ;;  %v5158_v41 = vld [vmem:[%s9721_s5 + $0x1e8] sm:$0xff]  ;;  %v8005_v27 = vsel %vm626_vm1, %v2733_v54, %v2734_v10  ;;  %v8203_v11 = vld [vmem:[%s7712_s8 + $0xe0] sm:$0xff] }
 0x17c   : > { %3604 = vmatpush1.msra.mxu1 %v5160_v19  ;;  %v1116_v6 = vpop.f32.mrf.mxu0  ;;  %5812 = vmatprep.mubr.f32.mxu1 %v7977_v5  ;;  %10028 = vst [vmem:[#allocation39_spill] sm:$0xff] %v8005_v27  ;;  %v2736_v19 = vrot.slane %v7987_v9, 1  ;;  %v8020_v5 = vld [vmem:[%s7712_s8 + $0x98] sm:$0xff] }
 0x17d   : > { %v1607_v46 = vpop.f32.mrf.mxu1  ;;  %3605 = vmatprep.subr.mxu1 %v9931_v47  ;;  %5870 = vmatpush3.msra.mxu0 %v5186_v53  ;;  %v5157_v53 = vld [vmem:[%s9721_s5 + $0x1e0] sm:$0xff] }
 0x17e   : > { %3606 = vmatpush1.msra.mxu1 %v5159_v0  ;;  %v8008_v6 = vpop.f32.mrf.mxu0  ;;  %3118 = vmatmul.mubr.f32.gmra.mxu0 %v7910_v22  ;;  %v8017_v46 = vld [vmem:[%s7712_s8 + $0x90] sm:$0xff] }
 0x17f   : > { %10029 = vst [vmem:[#allocation40_spill] sm:$0xff] %v8008_v6  ;;  %v8022_v54 = vpop.f32.mrf.mxu1  ;;  %5813 = vmatmul.mubr.f32.gmra.mxu1 %v7997_v60  ;;  %3607 = vmatprep.subr.mxu1 %v9931_v47  ;;  %v5156_v60 = vld [vmem:[%s9721_s5 + $0x1d8] sm:$0xff]  ;;  %v2754_v6 = vrot.slane %v8203_v11, 1 }
 0x180   : > { %3608 = vmatpush1.msra.mxu1 %v5158_v41  ;;  %v1121_v17 = vpop.f32.mrf.mxu0  ;;  %3122 = vmatprep.mubr.f32.mxu0 %v8005_v27  ;;  %v8040_v41 = vsel %vm626_vm1, %v2734_v10, %v2736_v19  ;;  %v2739_v27 = vrot.slane %v8020_v5, 1  ;;  %v5155_v19 = vld [vmem:[%s9721_s5 + $0x1d0] sm:$0xff] }
 0x181   : > { %v1612_v0 = vpop.f32.mrf.mxu1  ;;  %3609 = vmatprep.subr.mxu1 %v9931_v47  ;;  %5815 = vmatprep.mubr.f32.mxu1 %v8012_v45  ;;  %10032 = vst [vmem:[#allocation43_spill] sm:$0xff] %v8040_v41  ;;  %v2738_v17 = vrot.slane %v8017_v46, 1  ;;  %v8053_v45 = vld [vmem:[%s7712_s8 + $0xa0] sm:$0x3] }
 0x182   : > { %3610 = vmatpush1.msra.mxu1 %v5157_v53  ;;  %v8044_v7 = vpop.f32.mrf.mxu0  ;;  %3123 = vmatmul.mubr.f32.gmra.mxu0 %v7956_v43  ;;  %v2855_v0 = vrot.slane %v7910_v22, 2  ;;  %v8064_v22 = vsel %vm753_vm0, %v2850_v20, %v2852_v26  ;;  %v2859_v20 = vrot.slane %v7956_v43, 2  ;;  %v2860_v26 = vrot.slane %v7959_v42, 2 }
 0x183   : > { %10033 = vst [vmem:[#allocation44_spill] sm:$0xff] %v8044_v7  ;;  %v8055_v10 = vpop.f32.mrf.mxu1  ;;  %5816 = vmatmul.mubr.f32.gmra.mxu1 %v8031_v44  ;;  %3611 = vmatprep.subr.mxu1 %v9931_v47  ;;  %10035 = vst [vmem:[#allocation46_spill] sm:$0xff] %v8064_v22  ;;  %v5154_v44 = vld [vmem:[%s9721_s5 + $0x1c8] sm:$0xff] }
 0x184   : > { %3612 = vmatpush1.msra.mxu1 %v5156_v60  ;;  %v1126_v53 = vpop.f32.mrf.mxu0  ;;  %3127 = vmatprep.mubr.f32.mxu0 %v8040_v41  ;;  %v8073_v60 = vsel %vm626_vm1, %v2738_v17, %v2739_v27  ;;  %v8080_v29 = vsel %vm753_vm0, %v2854_v34, %v2855_v0  ;;  %v8099_v43 = vsel %vm753_vm0, %v2855_v0, %v2857_v50  ;;  %v2865_v50 = vrot.slane %v8020_v5, 2 }
 0x185   : > { %v1617_v58 = vpop.f32.mrf.mxu1  ;;  %3613 = vmatprep.subr.mxu1 %v9931_v47  ;;  %5818 = vmatprep.mubr.f32.mxu1 %v8048_v31  ;;  %10036 = vst [vmem:[#allocation47_spill] sm:$0xff] %v8073_v60  ;;  %v2741_v53 = vrot.slane %v8053_v45, 1  ;;  %10038 = vst [vmem:[#allocation49_spill] sm:$0xff] %v8080_v29  ;;  %v8088_v31 = vld [vmem:[%s7712_s8 + $0xb0] sm:$0xff] }
 0x186   : > { %3614 = vmatpush1.msra.mxu1 %v5155_v19  ;;  %v8076_v41 = vpop.f32.mrf.mxu0  ;;  %3128 = vmatmul.mubr.f32.gmra.mxu0 %v7959_v42  ;;  %v8085_v58 = vld [vmem:[%s7712_s8 + $0xa8] sm:$0xff]  ;;  %v5153_v19 = vld [vmem:[%s9721_s5 + $0x1c0] sm:$0xff]  ;;  %10039 = vst [vmem:[#allocation50_spill] sm:$0xff] %v8099_v43  ;;  %v2862_v42 = vrot.slane %v7987_v9, 2  ;;  %v2864_v9 = vrot.slane %v8017_v46, 2 }
 0x187   : > { %10037 = vst [vmem:[#allocation48_spill] sm:$0xff] %v8076_v41  ;;  %v8090_v17 = vpop.f32.mrf.mxu1  ;;  %5819 = vmatmul.mubr.f32.gmra.mxu1 %v8064_v22  ;;  %3615 = vmatprep.subr.mxu1 %v9931_v47  ;;  %v5152_v22 = vld [vmem:[%s9721_s5 + $0x1b8] sm:$0xff]  ;;  %v8108_v7 = vsel %vm626_vm1, %v2739_v27, %v2741_v53  ;;  %v5151_v27 = vld [vmem:[%s9721_s5 + $0x1b0] sm:$0xff] }
 0x188   : > { %3616 = vmatpush1.msra.mxu1 %v5154_v44  ;;  %v1131_v34 = vpop.f32.mrf.mxu0  ;;  %3132 = vmatprep.mubr.f32.mxu0 %v8073_v60  ;;  %10040 = vst [vmem:[#allocation51_spill] sm:$0xff] %v8108_v7  ;;  %v2743_v44 = vrot.slane %v8085_v58, 1 }
 0x189   : > { %v1622_v8 = vpop.f32.mrf.mxu1  ;;  %3617 = vmatprep.subr.mxu1 %v9931_v47  ;;  %5821 = vmatprep.mubr.f32.mxu1 %v8080_v29  ;;  %v2744_v34 = vrot.slane %v8088_v31, 1 }
 0x18a   : > { %3618 = vmatpush1.msra.mxu1 %v5153_v19  ;;  %v8112_v0 = vpop.f32.mrf.mxu0  ;;  %3133 = vmatmul.mubr.f32.gmra.mxu0 %v8017_v46  ;;  %v8116_v8 = vsel %vm753_vm0, %v2859_v20, %v2860_v26  ;;  %v8129_v20 = vsel %vm753_vm0, %v2860_v26, %v2862_v42  ;;  %v2867_v46 = vrot.slane %v8053_v45, 2  ;;  %v2623_v19 = vld [vmem:[%s7712_s8 + $0xb8] sm:$0x3]  ;;  %v8145_v45 = vsel %vm753_vm0, %v2864_v9, %v2865_v50  ;;  %v5149_v42 = vld [vmem:[%s9721_s5 + $0x1a0] sm:$0xff] }
 0x18b   : > { %10041 = vst [vmem:[#allocation52_spill] sm:$0xff] %v8112_v0  ;;  %10042 = vst [vmem:[#allocation53_spill] sm:$0xff] %v8116_v8  ;;  %v8120_v29 = vpop.f32.mrf.mxu1  ;;  %5822 = vmatmul.mubr.f32.gmra.mxu1 %v8099_v43  ;;  %3619 = vmatprep.subr.mxu1 %v9931_v47  ;;  %v8157_v43 = vld [vmem:[%s7712_s8 + $0xc0] sm:$0xff] }
 0x18c   : > { %3620 = vmatpush1.msra.mxu1 %v5152_v22  ;;  %v1136_v53 = vpop.f32.mrf.mxu0  ;;  %3137 = vmatprep.mubr.f32.mxu0 %v8108_v7  ;;  %10043 = vst [vmem:[#allocation54_spill] sm:$0xff] %v8129_v20  ;;  %v5150_v22 = vld [vmem:[%s9721_s5 + $0x1a8] sm:$0xff]  ;;  %10046 = vst [vmem:[#allocation57_spill] sm:$0xff] %v8145_v45  ;;  %v5185_v0 = vld [vmem:[%s9721_s5 + $0x2c0] sm:$0xff] }
 0x18d   : > { %v1627_v60 = vpop.f32.mrf.mxu1  ;;  %3621 = vmatprep.subr.mxu1 %v9931_v47  ;;  %5824 = vmatprep.mubr.f32.mxu1 %v8116_v8  ;;  %v8139_v53 = vsel %vm626_vm1, %v2743_v44, %v2744_v34  ;;  %v2746_v44 = vrot.slane %v2623_v19, 1  ;;  %v2870_v8 = vrot.slane %v8088_v31, 2 }
 0x18e   : > { %10044 = vst [vmem:[#allocation55_spill] sm:$0xff] %v8139_v53  ;;  %3622 = vmatpush1.msra.mxu1 %v5151_v27  ;;  %v8141_v26 = vpop.f32.mrf.mxu0  ;;  %3138 = vmatmul.mubr.f32.gmra.mxu0 %v8020_v5  ;;  %v2869_v27 = vrot.slane %v8085_v58, 2  ;;  %v8160_v5 = vld [vmem:[%s7712_s8 + $0xc8] sm:$0xff] }
 0x18f   : > { %10045 = vst [vmem:[#allocation56_spill] sm:$0xff] %v8141_v26  ;;  %v8147_v60 = vpop.f32.mrf.mxu1  ;;  %5825 = vmatmul.mubr.f32.gmra.mxu1 %v8129_v20  ;;  %3623 = vmatprep.subr.mxu1 %v9931_v47  ;;  %v8164_v20 = vsel %vm753_vm0, %v2865_v50, %v2867_v46  ;;  %v5148_v26 = vld [vmem:[%s9721_s5 + $0x198] sm:$0xff]  ;;  %v2749_v50 = vrot.slane %v8160_v5, 1  ;;  %v2626_v46 = vld [vmem:[%s7712_s8 + $0xd0] sm:$0x3] }
 0x190   : > { %3624 = vmatpush1.msra.mxu1 %v5150_v22  ;;  %v1141_v9 = vpop.f32.mrf.mxu0  ;;  %3142 = vmatprep.mubr.f32.mxu0 %v8139_v53  ;;  %10047 = vst [vmem:[#allocation58_spill] sm:$0xff] %v8164_v20  ;;  %v2872_v22 = vrot.slane %v2623_v19, 2  ;;  %v8185_v19 = vsel %vm626_vm1, %v2744_v34, %v2746_v44  ;;  %v2875_v53 = vrot.slane %v8160_v5, 2  ;;  %v2877_v44 = vrot.slane %v2626_v46, 2 }
 0x191   : > { %v1632_v7 = vpop.f32.mrf.mxu1  ;;  %3625 = vmatprep.subr.mxu1 %v9931_v47  ;;  %5827 = vmatprep.mubr.f32.mxu1 %v8145_v45  ;;  %10050 = vst [vmem:[#allocation61_spill] sm:$0xff] %v8185_v19 }
 0x192   : > { %3626 = vmatpush1.msra.mxu1 %v5149_v42  ;;  %v8174_v9 = vpop.f32.mrf.mxu0  ;;  %3143 = vmatmul.mubr.f32.gmra.mxu0 %v8085_v58  ;;  %v2748_v7 = vrot.slane %v8157_v43, 1  ;;  %v8188_v42 = vsel %vm753_vm0, %v2869_v27, %v2870_v8  ;;  %v2874_v58 = vrot.slane %v8157_v43, 2  ;;  %v8197_v34 = vsel %vm753_vm0, %v2870_v8, %v2872_v22  ;;  %v8200_v27 = vld [vmem:[%s7712_s8 + $0xd8] sm:$0xff] }
 0x193   : > { %10048 = vst [vmem:[#allocation59_spill] sm:$0xff] %v8174_v9  ;;  %v8180_v45 = vpop.f32.mrf.mxu1  ;;  %5828 = vmatmul.mubr.f32.gmra.mxu1 %v8164_v20  ;;  %3627 = vmatprep.subr.mxu1 %v9931_v47  ;;  %10051 = vst [vmem:[#allocation62_spill] sm:$0xff] %v8188_v42  ;;  %v5147_v20 = vld [vmem:[%s9721_s5 + $0x190] sm:$0xff] }
 0x194   : > { %10049 = vst [vmem:[#allocation60_spill] sm:$0xff] %v8180_v45  ;;  %5871 = vmatprep.subr.mxu0 %v5185_v0  ;;  %3628 = vmatpush1.msra.mxu1 %v5148_v26  ;;  %v1146_v9 = vpop.f32.mrf.mxu0  ;;  %10052 = vst [vmem:[#allocation63_spill] sm:$0xff] %v8197_v34  ;;  %v8219_v22 = vsel %vm753_vm0, %v2874_v58, %v2875_v53  ;;  %v8233_v58 = vsel %vm753_vm0, %v2875_v53, %v2877_v44  ;;  %v8257_v45 = vld [vmem:[%s7712_s8 + $0x100] sm:$0x3] }
 0x195   : > { %5872 = vmatpush3.msra.mxu0 %v5185_v0  ;;  %v1637_v41 = vpop.f32.mrf.mxu1  ;;  %3629 = vmatprep.subr.mxu1 %v9931_v47  ;;  %v8213_v0 = vsel %vm626_vm1, %v2748_v7, %v2749_v50  ;;  %10056 = vst [vmem:[#allocation67_spill] sm:$0xff] %v8219_v22  ;;  %v8222_v9 = vld [vmem:[%s7712_s8 + $0xe8] sm:$0x3]  ;;  %v2751_v7 = vrot.slane %v2626_v46, 1  ;;  %10057 = vst [vmem:[#allocation68_spill] sm:$0xff] %v8233_v58 }
 0x196   : > { %3147 = vmatprep.mubr.f32.mxu0 %v8185_v19  ;;  %5830 = vmatprep.mubr.f32.mxu1 %v8188_v42  ;;  %v8207_v26 = vpop.f32.mrf.mxu0  ;;  %v5146_v41 = vld [vmem:[%s9721_s5 + $0x188] sm:$0xff]  ;;  %10054 = vst [vmem:[#allocation65_spill] sm:$0xff] %v8213_v0  ;;  %v2879_v19 = vrot.slane %v8200_v27, 2  ;;  %v2882_v53 = vrot.slane %v8222_v9, 2 }
 0x197   : > { %10053 = vst [vmem:[#allocation64_spill] sm:$0xff] %v8207_v26  ;;  %3630 = vmatpush1.msra.mxu1 %v5147_v20  ;;  %v8215_v8 = vpop.f32.mrf.mxu1  ;;  %3148 = vmatmul.mubr.f32.gmra.mxu0 %v8088_v31  ;;  %v5145_v20 = vld [vmem:[%s9721_s5 + $0x180] sm:$0xff]  ;;  %v2880_v26 = vrot.slane %v8203_v11, 2 }
 0x198   : > { %10055 = vst [vmem:[#allocation66_spill] sm:$0xff] %v8215_v8  ;;  %5831 = vmatmul.mubr.f32.gmra.mxu1 %v8197_v34  ;;  %3631 = vmatprep.subr.mxu1 %v9931_v47  ;;  %v1151_v42 = vpop.f32.mrf.mxu0  ;;  %v8236_v34 = vld [vmem:[%s7712_s8 + $0xf0] sm:$0xff] }
 0x199   : > { %3632 = vmatpush1.msra.mxu1 %v5146_v41  ;;  %v1642_v31 = vpop.f32.mrf.mxu1  ;;  %3152 = vmatprep.mubr.f32.mxu0 %v8213_v0  ;;  %v8239_v42 = vld [vmem:[%s7712_s8 + $0xf8] sm:$0xff] }
 0x19a   : > { %3633 = vmatprep.subr.mxu1 %v9931_v47  ;;  %5833 = vmatprep.mubr.f32.mxu1 %v8219_v22  ;;  %v5651_v46 = vpop.f32.mrf.mxu0  ;;  %v5184_v41 = vld [vmem:[%s9721_s5 + $0x2b8] sm:$0xff]  ;;  %v2753_v22 = vrot.slane %v8200_v27, 1 }
 0x19b   : > { %v5176_v31 = vld [vmem:[%s9721_s5 + $0x278] sm:$0xff]  ;;  %3634 = vmatpush1.msra.mxu1 %v5145_v20  ;;  %v8250_v44 = vpop.f32.mrf.mxu1  ;;  %v1756_v0 = vadd.f32 %v5651_v46, %v7640_v49  ;;  %3153 = vmatmul.mubr.f32.gmra.mxu0 %v8157_v43  ;;  %v8262_v20 = vsel %vm626_vm1, %v2749_v50, %v2751_v7  ;;  %v8265_v49 = vsel %vm753_vm0, %v2879_v19, %v2880_v26  ;;  %v2884_v43 = vrot.slane %v8236_v34, 2  ;;  %v5175_v50 = vld [vmem:[%s9721_s5 + $0x270] sm:$0xff]  ;;  %v8277_v7 = vld [vmem:[%s7712_s8 + $0x108] sm:$0xff] }
 0x19c   : > { %10058 = vst [vmem:[#allocation69_spill] sm:$0xff] %v8250_v44  ;;  %5834 = vmatmul.mubr.f32.gmra.mxu1 %v8233_v58  ;;  %3635 = vmatprep.subr.mxu1 %v9931_v47  ;;  %v1750_v36 = vpop.f32.mrf.mxu0  ;;  %10059 = vst [vmem:[#allocation70_spill] sm:$0xff] %v8262_v20  ;;  %v2885_v46 = vrot.slane %v8239_v42, 2  ;;  %v8280_v19 = vld [vmem:[%s7712_s8 + $0x110] sm:$0xff] }
 0x19d   : > { %10060 = vst [vmem:[#allocation71_spill] sm:$0xff] %v8265_v49  ;;  %v8270_v44 = vadd.f32 %v1756_v0, %v7481_v30  ;;  %5873 = vmatprep.subr.mxu0 %v5184_v41  ;;  %3636 = vmatpush2.msra.mxu1 %v5176_v31  ;;  %v1647_v8 = vpop.f32.mrf.mxu1  ;;  %v1751_v58 = vadd.f32 %v1750_v36, %v7623_v62  ;;  %v2887_v0 = vrot.slane %v8257_v45, 2  ;;  %v2756_v31 = vrot.slane %v8222_v9, 1  ;;  %v5173_v9 = vld [vmem:[%s9721_s5 + $0x260] sm:$0xff] }
 0x19e   : > { %5874 = vmatpush3.msra.mxu0 %v5184_v41  ;;  %3637 = vmatprep.subr.mxu1 %v9931_v47  ;;  %v5654_v25 = vpop.f32.mrf.mxu0  ;;  %v8284_v30 = vsel %vm753_vm0, %v2880_v26, %v2882_v53  ;;  %v5174_v41 = vld [vmem:[%s9721_s5 + $0x268] sm:$0xff]  ;;  %v8299_v26 = vsel %vm626_vm1, %v2753_v22, %v2754_v6  ;;  %v8309_v53 = vld [vmem:[%s7712_s8 + $0x118] sm:$0x3] }
 0x19f   : > { %10061 = vst [vmem:[#allocation72_spill] sm:$0xff] %v8284_v30  ;;  %v8288_v62 = vadd.f32 %v1751_v58, %v7455_v40  ;;  %3157 = vmatprep.mubr.f32.mxu0 %v8262_v20  ;;  %5836 = vmatprep.mubr.f32.mxu1 %v8265_v49  ;;  %v8292_v36 = vpop.f32.mrf.mxu1  ;;  %v1766_v8 = vadd.f32 %v5654_v25, %v7674_v21  ;;  %10062 = vst [vmem:[#allocation73_spill] sm:$0xff] %v8299_v26  ;;  %v2889_v21 = vrot.slane %v8277_v7, 2 }
 0x1a0   : > { %3638 = vmatpush2.msra.mxu1 %v5175_v50  ;;  %3158 = vmatmul.mubr.f32.gmra.mxu0 %v8160_v5  ;;  %v1760_v40 = vpop.f32.mrf.mxu0  ;;  %v8303_v58 = vsel %vm753_vm0, %v2884_v43, %v2885_v46  ;;  %v2890_v25 = vrot.slane %v8280_v19, 2  ;;  %v8322_v49 = vsel %vm753_vm0, %v2885_v46, %v2887_v0  ;;  %v5183_v46 = vld [vmem:[%s9721_s5 + $0x2b0] sm:$0xff]  ;;  %v5172_v0 = vld [vmem:[%s9721_s5 + $0x258] sm:$0xff] }
 0x1a1   : > { %10063 = vst [vmem:[#allocation74_spill] sm:$0xff] %v8303_v58  ;;  %v8312_v22 = vadd.f32 %v1766_v8, %v7523_v38  ;;  %5837 = vmatmul.mubr.f32.gmra.mxu1 %v8284_v30  ;;  %3639 = vmatprep.subr.mxu1 %v9931_v47  ;;  %v1652_v5 = vpop.f32.mrf.mxu1  ;;  %v1761_v43 = vadd.f32 %v1760_v40, %v7657_v51  ;;  %10064 = vst [vmem:[#allocation75_spill] sm:$0xff] %v8322_v49  ;;  %v8325_v38 = vld [vmem:[%s7712_s8 + $0x120] sm:$0xff]  ;;  %v8328_v8 = vld [vmem:[%s7712_s8 + $0x128] sm:$0xff]  ;;  %v2892_v40 = vrot.slane %v8309_v53, 2 }
 0x1a2   : > { %3640 = vmatpush2.msra.mxu1 %v5174_v41  ;;  %3162 = vmatprep.mubr.f32.mxu0 %v8299_v26  ;;  %v5657_v50 = vpop.f32.mrf.mxu0  ;;  %v8355_v30 = vld [vmem:[%s7712_s8 + $0x130] sm:$0x3] }
 0x1a3   : > { %v8331_v5 = vadd.f32 %v1761_v43, %v7498_v16  ;;  %3641 = vmatprep.subr.mxu1 %v9931_v47  ;;  %5839 = vmatprep.mubr.f32.mxu1 %v8303_v58  ;;  %v8335_v51 = vpop.f32.mrf.mxu1  ;;  %v1776_v41 = vadd.f32 %v5657_v50, %v7724_v1  ;;  %v8347_v43 = vsel %vm626_vm1, %v2754_v6, %v2756_v31  ;;  %v2758_v1 = vrot.slane %v8236_v34, 1  ;;  %v8380_v50 = vld [vmem:[%s7712_s8 + $0x138] sm:$0xff] }
 0x1a4   : > { %3642 = vmatpush2.msra.mxu1 %v5173_v9  ;;  %3163 = vmatmul.mubr.f32.gmra.mxu0 %v8200_v27  ;;  %v1770_v16 = vpop.f32.mrf.mxu0  ;;  %10065 = vst [vmem:[#allocation76_spill] sm:$0xff] %v8347_v43  ;;  %v8350_v58 = vsel %vm753_vm0, %v2889_v21, %v2890_v25  ;;  %v2894_v31 = vrot.slane %v8325_v38, 2  ;;  %v2895_v21 = vrot.slane %v8328_v8, 2 }
 0x1a5   : > { %10066 = vst [vmem:[#allocation77_spill] sm:$0xff] %v8350_v58  ;;  %v8358_v26 = vadd.f32 %v1776_v41, %v7561_v35  ;;  %5840 = vmatmul.mubr.f32.gmra.mxu1 %v8322_v49  ;;  %3643 = vmatprep.subr.mxu1 %v9931_v47  ;;  %v1657_v27 = vpop.f32.mrf.mxu1  ;;  %v1771_v6 = vadd.f32 %v1770_v16, %v7691_v56  ;;  %v5171_v35 = vld [vmem:[%s9721_s5 + $0x250] sm:$0xff]  ;;  %v8383_v49 = vld [vmem:[%s7712_s8 + $0x140] sm:$0xff] }
 0x1a6   : > { %5875 = vmatprep.subr.mxu0 %v5183_v46  ;;  %3644 = vmatpush2.msra.mxu1 %v5172_v0  ;;  %v5660_v9 = vpop.f32.mrf.mxu0  ;;  %v8376_v16 = vsel %vm753_vm0, %v2890_v25, %v2892_v40  ;;  %v2897_v0 = vrot.slane %v8355_v30, 2 }
 0x1a7   : > { %5876 = vmatpush3.msra.mxu0 %v5183_v46  ;;  %v8369_v41 = vadd.f32 %v1771_v6, %v7540_v13  ;;  %3645 = vmatprep.subr.mxu1 %v9931_v47  ;;  %v8372_v27 = vpop.f32.mrf.mxu1  ;;  %v1786_v56 = vadd.f32 %v5660_v9, %v7777_v23  ;;  %10067 = vst [vmem:[#allocation78_spill] sm:$0xff] %v8376_v16  ;;  %v5170_v13 = vld [vmem:[%s9721_s5 + $0x248] sm:$0xff]  ;;  %v10068_v23 = vrot.slane %v8239_v42, 1 }
 0x1a8   : > { %3167 = vmatprep.mubr.f32.mxu0 %v8347_v43  ;;  %5842 = vmatprep.mubr.f32.mxu1 %v8350_v58  ;;  %v1780_v46 = vpop.f32.mrf.mxu0  ;;  %v8401_v58 = vsel %vm753_vm0, %v2894_v31, %v2895_v21  ;;  %v8404_v43 = vld [vmem:[%s7712_s8 + $0x148] sm:$0x3] }
 0x1a9   : > { %v8393_v25 = vsel %vm626_vm1, %v2758_v1, %v10068_v23  ;;  %3646 = vmatpush2.msra.mxu1 %v5171_v35  ;;  %v8396_v40 = vadd.f32 %v1786_v56, %v7604_v61  ;;  %3168 = vmatmul.mubr.f32.gmra.mxu0 %v8203_v11  ;;  %v1662_v6 = vpop.f32.mrf.mxu1  ;;  %v1781_v9 = vadd.f32 %v1780_v46, %v7751_v28  ;;  %v5169_v61 = vld [vmem:[%s9721_s5 + $0x240] sm:$0xff]  ;;  %v2761_v11 = vrot.slane %v8257_v45, 1  ;;  %v8428_v45 = vld [vmem:[%s7712_s8 + $0x158] sm:$0xff] }
 0x1aa   : > { %10069 = vst [vmem:[#allocation79_spill] sm:$0xff] %v8393_v25  ;;  %10070 = vst [vmem:[#allocation80_spill] sm:$0xff] %v8401_v58  ;;  %5843 = vmatmul.mubr.f32.gmra.mxu1 %v8376_v16  ;;  %3647 = vmatprep.subr.mxu1 %v9931_v47  ;;  %v5663_v1 = vpop.f32.mrf.mxu0  ;;  %v2899_v28 = vrot.slane %v8380_v50, 2  ;;  %v2900_v35 = vrot.slane %v8383_v49, 2  ;;  %v8422_v23 = vsel %vm753_vm0, %v2895_v21, %v2897_v0  ;;  %v8425_v6 = vld [vmem:[%s7712_s8 + $0x150] sm:$0xff]  ;;  %v2902_v21 = vrot.slane %v8404_v43, 2 }
 0x1ab   : > { %3648 = vmatpush2.msra.mxu1 %v5170_v13  ;;  %v8415_v31 = vadd.f32 %v1781_v9, %v7578_v55  ;;  %3172 = vmatprep.mubr.f32.mxu0 %v8393_v25  ;;  %v8418_v56 = vpop.f32.mrf.mxu1  ;;  %v1796_v46 = vadd.f32 %v5663_v1, %v7822_v39  ;;  %10071 = vst [vmem:[#allocation81_spill] sm:$0xff] %v8422_v23  ;;  %v5182_v55 = vld [vmem:[%s9721_s5 + $0x2a8] sm:$0xff]  ;;  %v5168_v39 = vld [vmem:[%s9721_s5 + $0x238] sm:$0xff]  ;;  %v2764_v16 = vrot.slane %v8280_v19, 1  ;;  %v8447_v25 = vld [vmem:[%s7712_s8 + $0x160] sm:$0x3] }
 0x1ac   : > { %3649 = vmatprep.subr.mxu1 %v9931_v47  ;;  %5845 = vmatprep.mubr.f32.mxu1 %v8401_v58  ;;  %v1790_v13 = vpop.f32.mrf.mxu0  ;;  %v2763_v58 = vrot.slane %v8277_v7, 1 }
 0x1ad   : > { %3650 = vmatpush2.msra.mxu1 %v5169_v61  ;;  %v8440_v0 = vadd.f32 %v1796_v46, %v7638_v15  ;;  %3173 = vmatmul.mubr.f32.gmra.mxu0 %v8236_v34  ;;  %v1667_v9 = vpop.f32.mrf.mxu1  ;;  %v1791_v1 = vadd.f32 %v1790_v13, %v7799_v18  ;;  %v10072_v15 = vrot.slane %v8239_v42, 1  ;;  %v8457_v34 = vsel %vm753_vm0, %v2899_v28, %v2900_v35  ;;  %v8471_v28 = vld [vmem:[%s7712_s8 + $0x168] sm:$0xff] }
 0x1ae   : > { %5846 = vmatmul.mubr.f32.gmra.mxu1 %v8422_v23  ;;  %3651 = vmatprep.subr.mxu1 %v9931_v47  ;;  %10074 = vst [vmem:[#allocation83_spill] sm:$0xff] %v8457_v34  ;;  %v5666_v18 = vpop.f32.mrf.mxu0  ;;  %v2904_v46 = vrot.slane %v8425_v6, 2  ;;  %v2905_v13 = vrot.slane %v8428_v45, 2  ;;  %v5167_v23 = vld [vmem:[%s9721_s5 + $0x230] sm:$0xff] }
 0x1af   : > { %v8454_v61 = vsel %vm626_vm1, %v10072_v15, %v2761_v11  ;;  %5877 = vmatprep.subr.mxu0 %v5182_v55  ;;  %3652 = vmatpush2.msra.mxu1 %v5168_v39  ;;  %v8462_v9 = vadd.f32 %v1791_v1, %v7621_v2  ;;  %v8467_v20 = vpop.f32.mrf.mxu1  ;;  %v1806_v11 = vadd.f32 %v5666_v18, %v7868_v24  ;;  %v8474_v15 = vld [vmem:[%s7712_s8 + $0x170] sm:$0xff]  ;;  %v2907_v1 = vrot.slane %v8447_v25, 2 }
 0x1b0   : > { %10073 = vst [vmem:[#allocation82_spill] sm:$0xff] %v8454_v61  ;;  %5878 = vmatpush3.msra.mxu0 %v5182_v55  ;;  %3653 = vmatprep.subr.mxu1 %v9931_v47  ;;  %v8478_v39 = vsel %vm753_vm0, %v2900_v35, %v2902_v21  ;;  %v1800_v2 = vpop.f32.mrf.mxu0  ;;  %v5166_v55 = vld [vmem:[%s9721_s5 + $0x228] sm:$0xff]  ;;  %v8491_v35 = vsel %vm626_vm1, %v2763_v58, %v2764_v16  ;;  %v5165_v58 = vld [vmem:[%s9721_s5 + $0x220] sm:$0xff] }
 0x1b1   : > { %10075 = vst [vmem:[#allocation84_spill] sm:$0xff] %v8462_v9  ;;  %10076 = vst [vmem:[#allocation85_spill] sm:$0xff] %v8478_v39  ;;  %3177 = vmatprep.mubr.f32.mxu0 %v8454_v61  ;;  %5848 = vmatprep.mubr.f32.mxu1 %v8457_v34  ;;  %v8484_v24 = vadd.f32 %v1806_v11, %v7672_v12  ;;  %v1672_v18 = vpop.f32.mrf.mxu1  ;;  %v1801_v9 = vadd.f32 %v1800_v2, %v7844_v63  ;;  %v2766_v12 = vrot.slane %v8309_v53, 1  ;;  %v10080_v63 = vld [vmem:[#allocation7_spill] sm:$0xff] }
 0x1b2   : > { %10078 = vst [vmem:[#allocation87_spill] sm:$0xff] %v8491_v35  ;;  %3654 = vmatpush2.msra.mxu1 %v5167_v23  ;;  %3178 = vmatmul.mubr.f32.gmra.mxu0 %v8239_v42  ;;  %v8495_v21 = vsel %vm753_vm0, %v2904_v46, %v2905_v13  ;;  %v5669_v34 = vpop.f32.mrf.mxu0  ;;  %v2909_v11 = vrot.slane %v8471_v28, 2  ;;  %v2910_v61 = vrot.slane %v8474_v15, 2  ;;  %v1285_v2 = vadd.f32 %v10080_v63, %v7715_v59 }
 0x1b3   : > { %10077 = vst [vmem:[#allocation86_spill] sm:$0xff] %v8484_v24  ;;  %10079 = vst [vmem:[#allocation88_spill] sm:$0xff] %v8495_v21  ;;  %v8501_v24 = vld [vmem:[%s7712_s8 + $0x178] sm:$0x3]  ;;  %5849 = vmatmul.mubr.f32.gmra.mxu1 %v8478_v39  ;;  %3655 = vmatprep.subr.mxu1 %v9931_v47  ;;  %v8508_v42 = vadd.f32 %v1801_v9, %v7655_v52  ;;  %v8513_v53 = vpop.f32.mrf.mxu1  ;;  %v1816_v23 = vadd.f32 %v5669_v34, %v7918_v48  ;;  %v5181_v9 = vld [vmem:[%s9721_s5 + $0x2a0] sm:$0xff] }
 0x1b4   : > { %3656 = vmatpush2.msra.mxu1 %v5166_v55  ;;  %3182 = vmatprep.mubr.f32.mxu0 %v8491_v35  ;;  %v8518_v59 = vsel %vm753_vm0, %v2905_v13, %v2907_v1  ;;  %v1810_v46 = vpop.f32.mrf.mxu0  ;;  %v5164_v48 = vld [vmem:[%s9721_s5 + $0x218] sm:$0xff]  ;;  %v2912_v13 = vrot.slane %v8501_v24, 2  ;;  %v8534_v1 = vsel %vm626_vm1, %v2764_v16, %v2766_v12  ;;  %v8537_v18 = vsel %vm753_vm0, %v2909_v11, %v2910_v61  ;;  %v5163_v12 = vld [vmem:[%s9721_s5 + $0x210] sm:$0xff] }
 0x1b5   : > { %10081 = vst [vmem:[#allocation7_spill] sm:$0xff] %v8518_v59  ;;  %3657 = vmatprep.subr.mxu1 %v9931_v47  ;;  %5851 = vmatprep.mubr.f32.mxu1 %v8495_v21  ;;  %v8522_v52 = vadd.f32 %v1816_v23, %v1285_v2  ;;  %v1677_v34 = vpop.f32.mrf.mxu1  ;;  %v1811_v55 = vadd.f32 %v1810_v46, %v7892_v3  ;;  %10082 = vst [vmem:[#allocation89_spill] sm:$0xff] %v8534_v1  ;;  %v2768_v2 = vrot.slane %v8325_v38, 1 }
 0x1b6   : > { %3658 = vmatpush2.msra.mxu1 %v5165_v58  ;;  %3183 = vmatmul.mubr.f32.gmra.mxu0 %v8277_v7  ;;  %10083 = vst [vmem:[#allocation90_spill] sm:$0xff] %v8537_v18  ;;  %v5672_v63 = vpop.f32.mrf.mxu0  ;;  %v2769_v23 = vrot.slane %v8328_v8, 1  ;;  %v1295_v34 = vadd.f32 %v7433_v33, %v7769_v14  ;;  %v8558_v14 = vsel %vm753_vm0, %v2910_v61, %v2912_v13  ;;  %v10087_v61 = vld [vmem:[#allocation8_spill] sm:$0xff] }
 0x1b7   : > { %5852 = vmatmul.mubr.f32.gmra.mxu1 %v8518_v59  ;;  %3659 = vmatprep.subr.mxu1 %v9931_v47  ;;  %v8546_v3 = vadd.f32 %v1811_v55, %v7689_v4  ;;  %v8548_v7 = vpop.f32.mrf.mxu1  ;;  %v1826_v16 = vadd.f32 %v5672_v63, %v7964_v32  ;;  %10084 = vst [vmem:[#allocation91_spill] sm:$0xff] %v8558_v14  ;;  %v5162_v32 = vld [vmem:[%s9721_s5 + $0x208] sm:$0xff]  ;;  %v10086_v55 = vld [vmem:[#allocation26_spill] sm:$0xff] }
 0x1b8   : > { %5879 = vmatprep.subr.mxu0 %v5181_v9  ;;  %3660 = vmatpush2.msra.mxu1 %v5164_v48  ;;  %v1820_v11 = vpop.f32.mrf.mxu0  ;;  %v8567_v46 = vsel %vm626_vm1, %v2768_v2, %v2769_v23  ;;  %v2771_v48 = vrot.slane %v8355_v30, 1  ;;  %v1305_v13 = vadd.f32 %v10087_v61, %v10086_v55  ;;  %v5161_v30 = vld [vmem:[%s9721_s5 + $0x200] sm:$0xff]  ;;  %v10091_v61 = vld [vmem:[#allocation30_spill] sm:$0xff] }
 0x1b9   : > { %5880 = vmatpush3.msra.mxu0 %v5181_v9  ;;  %3661 = vmatprep.subr.mxu1 %v9931_v47  ;;  %v8555_v33 = vadd.f32 %v1826_v16, %v1295_v34  ;;  %v1682_v4 = vpop.f32.mrf.mxu1  ;;  %v1821_v58 = vadd.f32 %v1820_v11, %v7939_v57  ;;  %10085 = vst [vmem:[#allocation92_spill] sm:$0xff] %v8567_v46  ;;  %v10088_v57 = vld [vmem:[#allocation23_spill] sm:$0xff]  ;;  %v5180_v11 = vld [vmem:[%s9721_s5 + $0x298] sm:$0xff] }
 0x1ba   : > { %3187 = vmatprep.mubr.f32.mxu0 %v8534_v1  ;;  %5854 = vmatprep.mubr.f32.mxu1 %v8537_v18  ;;  %v5675_v9 = vpop.f32.mrf.mxu0  ;;  %v8596_v55 = vsel %vm626_vm1, %v2769_v23, %v2771_v48  ;;  %v6073_v23 = vld [vmem:[%s7712_s8 + $0x18] sm:$0xff]  ;;  %v10099_v18 = vld [vmem:[#allocation11_spill] sm:$0xff] }
 0x1bb   : > { %3662 = vmatpush2.msra.mxu1 %v5163_v12  ;;  %3188 = vmatmul.mubr.f32.gmra.mxu0 %v8280_v19  ;;  %v8574_v63 = vadd.f32 %v1821_v58, %v10088_v57  ;;  %v1836_v34 = vadd.f32 %v5675_v9, %v8022_v54  ;;  %v8577_v16 = vpop.f32.mrf.mxu1  ;;  %v2773_v12 = vrot.slane %v8380_v50, 1  ;;  %v2774_v19 = vrot.slane %v8383_v49, 1  ;;  %v10089_v9 = vld [vmem:[#allocation25_spill] sm:$0xff]  ;;  %10090 = vst [vmem:[#allocation26_spill] sm:$0xff] %v8596_v55 }
 0x1bc   : > { %5855 = vmatmul.mubr.f32.gmra.mxu1 %v8558_v14  ;;  %3663 = vmatprep.subr.mxu1 %v9931_v47  ;;  %v1830_v2 = vpop.f32.mrf.mxu0  ;;  %v10092_v57 = vld [vmem:[#allocation9_spill] sm:$0xff] }
 0x1bd   : > { %3664 = vmatpush2.msra.mxu1 %v5162_v32  ;;  %3192 = vmatprep.mubr.f32.mxu0 %v8567_v46  ;;  %v8587_v54 = vadd.f32 %v1836_v34, %v1305_v13  ;;  %v1831_v4 = vadd.f32 %v1830_v2, %v7989_v37  ;;  %v2122_v58 = vpop.f32.mrf.mxu1  ;;  %v1315_v14 = vadd.f32 %v10092_v57, %v10091_v61  ;;  %v10093_v13 = vld [vmem:[#allocation24_spill] sm:$0xff] }
 0x1be   : > { %3665 = vmatprep.subr.mxu1 %v9931_v47  ;;  %3667 = vmatprep.mubr.f32.mxu1 %v10089_v9  ;;  %v5678_v32 = vpop.f32.mrf.mxu0  ;;  %v5179_v58 = vld [vmem:[%s9721_s5 + $0x290] sm:$0xff]  ;;  %v8612_v9 = vsel %vm626_vm1, %v2773_v12, %v2774_v19 }
 0x1bf   : > { %3666 = vmatpush2.msra.mxu1 %v5161_v30  ;;  %3193 = vmatmul.mubr.f32.gmra.mxu0 %v8325_v38  ;;  %v8602_v34 = vadd.f32 %v1831_v4, %v10093_v13  ;;  %v1846_v37 = vadd.f32 %v5678_v32, %v8090_v17  ;;  %v8605_v2 = vpop.f32.mrf.mxu1  ;;  %10094 = vst [vmem:[#allocation8_spill] sm:$0xff] %v8612_v9  ;;  %v2776_v38 = vrot.slane %v8404_v43, 1  ;;  %v5240_v30 = vld [vmem:[%s9721_s5 + $0x478] sm:$0xff]  ;;  %v10095_v17 = vld [vmem:[#allocation27_spill] sm:$0xff]  ;;  %v10097_v12 = vld [vmem:[#allocation29_spill] sm:$0xff] }
 0x1c0   : > { %3668 = vmatmul.mubr.f32.vlgmr.msra.gmra.mxu1 %v6073_v23  ;;  %5881 = vmatprep.subr.mxu0 %v5180_v11  ;;  %v1840_v48 = vpop.f32.mrf.mxu0  ;;  %v10096_v4 = vld [vmem:[#allocation10_spill] sm:$0xff]  ;;  %v10098_v43 = vld [vmem:[#allocation33_spill] sm:$0xff] }
 0x1c1   : > { %v1310_v32 = vadd.f32 %v10096_v4, %v10095_v17  ;;  %5882 = vmatpush3.msra.mxu0 %v5180_v11  ;;  %3197 = vmatprep.mubr.f32.mxu0 %v8596_v55  ;;  %v8621_v61 = vadd.f32 %v1846_v37, %v1315_v14  ;;  %v1841_v57 = vadd.f32 %v1840_v48, %v8055_v10  ;;  %v2127_v13 = vpop.f32.mrf.mxu1  ;;  %v5178_v10 = vld [vmem:[%s9721_s5 + $0x288] sm:$0xff]  ;;  %v6074_v14 = vld [vmem:[%s7712_s8 + $0x20] sm:$0xff]  ;;  %v2779_v48 = vrot.slane %v8428_v45, 1 }
 0x1c2   : > { %3672 = vmatprep.mubr.f32.mxu1 %v10097_v12  ;;  %v5681_v23 = vpop.f32.mrf.mxu0  ;;  %5883 = vmatprep.subr.mxu0 %v5179_v58  ;;  %v1325_v46 = vadd.f32 %v10099_v18, %v10098_v43  ;;  %v8639_v18 = vsel %vm626_vm1, %v2774_v19, %v2776_v38  ;;  %v10101_v4 = vld [vmem:[#allocation31_spill] sm:$0xff]  ;;  %v10103_v13 = vld [vmem:[#allocation6_spill] sm:$0xff]  ;;  %v10104_v43 = vld [vmem:[#allocation37_spill] sm:$0xff] }
 0x1c3   : > { %3198 = vmatmul.mubr.f32.gmra.mxu0 %v8328_v8  ;;  %v8628_v59 = vadd.f32 %v1841_v57, %v1310_v32  ;;  %v1856_v11 = vadd.f32 %v5681_v23, %v8147_v60  ;;  %v8631_v17 = vpop.f32.mrf.mxu1  ;;  %5937 = vmatprep.subr.mxu1 %v5240_v30  ;;  %10100 = vst [vmem:[#allocation23_spill] sm:$0xff] %v8639_v18  ;;  %v2778_v8 = vrot.slane %v8425_v6, 1  ;;  %v5239_v60 = vld [vmem:[%s9721_s5 + $0x470] sm:$0xff]  ;;  %v10102_v32 = vld [vmem:[#allocation12_spill] sm:$0xff] }
 0x1c4   : > { %3673 = vmatmul.mubr.f32.gmra.mxu1 %v6074_v14  ;;  %3202 = vmatprep.mubr.f32.mxu0 %v8612_v9  ;;  %v1850_v37 = vpop.f32.mrf.mxu0  ;;  %v1320_v57 = vadd.f32 %v10102_v32, %v10101_v4  ;;  %v10105_v14 = vld [vmem:[#allocation13_spill] sm:$0xff]  ;;  %v10106_v4 = vld [vmem:[#allocation66_spill] sm:$0xff] }
 0x1c5   : > { %3677 = vmatprep.mubr.f32.mxu1 %v10103_v13  ;;  %v8649_v12 = vadd.f32 %v1856_v11, %v1325_v46  ;;  %5884 = vmatpush3.msra.mxu0 %v5179_v58  ;;  %v1851_v19 = vadd.f32 %v1850_v37, %v8120_v29  ;;  %v2132_v38 = vpop.f32.mrf.mxu1  ;;  %v1335_v9 = vadd.f32 %v10105_v14, %v10104_v43  ;;  %v5177_v46 = vld [vmem:[%s9721_s5 + $0x280] sm:$0xff]  ;;  %v8664_v29 = vld [vmem:[%s7712_s8 + $0x30] sm:$0xff]  ;;  %v5238_v11 = vld [vmem:[%s9721_s5 + $0x468] sm:$0xff] }
 0x1c6   : > { %v5684_v23 = vpop.f32.mrf.mxu0  ;;  %5885 = vmatprep.subr.mxu0 %v5178_v10  ;;  %5938 = vmatpush3.msra.mxu1 %v5240_v30  ;;  %10107 = vst [vmem:[#allocation25_spill] sm:$0xff] %v8664_v29  ;;  %v2781_v30 = vrot.slane %v8447_v25, 1  ;;  %v10109_v37 = vld [vmem:[#allocation35_spill] sm:$0xff]  ;;  %v10111_v38 = vld [vmem:[#allocation28_spill] sm:$0xff] }
 0x1c7   : > { %3203 = vmatmul.mubr.f32.gmra.mxu0 %v8380_v50  ;;  %v8655_v55 = vadd.f32 %v1851_v19, %v1320_v57  ;;  %v1866_v32 = vadd.f32 %v5684_v23, %v10106_v4  ;;  %v8658_v21 = vpop.f32.mrf.mxu1  ;;  %5939 = vmatprep.subr.mxu1 %v5239_v60  ;;  %v8669_v50 = vsel %vm626_vm1, %v2778_v8, %v2779_v48  ;;  %v10110_v57 = vld [vmem:[#allocation14_spill] sm:$0xff]  ;;  %v10112_v43 = vld [vmem:[#allocation60_spill] sm:$0xff] }
 0x1c8   : > { %3678 = vmatmul.mubr.f32.gmra.mxu1 %v8664_v29  ;;  %3207 = vmatprep.mubr.f32.mxu0 %v8639_v18  ;;  %v1860_v58 = vpop.f32.mrf.mxu0  ;;  %10108 = vst [vmem:[#allocation30_spill] sm:$0xff] %v8669_v50  ;;  %v1330_v19 = vadd.f32 %v10110_v57, %v10109_v37  ;;  %v10113_v25 = vld [vmem:[#allocation40_spill] sm:$0xff]  ;;  %v10114_v18 = vld [vmem:[#allocation15_spill] sm:$0xff] }
 0x1c9   : > { %3682 = vmatprep.mubr.f32.mxu1 %v10111_v38  ;;  %v8678_v23 = vadd.f32 %v1866_v32, %v1335_v9  ;;  %v1861_v14 = vadd.f32 %v1860_v58, %v10112_v43  ;;  %v2137_v4 = vpop.f32.mrf.mxu1  ;;  %5886 = vmatpush3.msra.mxu0 %v5178_v10  ;;  %v1345_v29 = vadd.f32 %v10114_v18, %v10113_v25  ;;  %v8690_v9 = vld [vmem:[%s7712_s8 + $0x38] sm:$0xff]  ;;  %v2783_v18 = vrot.slane %v8471_v28, 1  ;;  %v10117_v32 = vld [vmem:[#allocation3_spill] sm:$0xff]  ;;  %v10118_v58 = vld [vmem:[#allocation16_spill] sm:$0xff] }
 0x1ca   : > { %v5687_v8 = vpop.f32.mrf.mxu0  ;;  %5887 = vmatprep.subr.mxu0 %v5177_v46  ;;  %5940 = vmatpush3.msra.mxu1 %v5239_v60  ;;  %10115 = vst [vmem:[#allocation9_spill] sm:$0xff] %v8690_v9  ;;  %v8695_v60 = vsel %vm626_vm1, %v2779_v48, %v2781_v30  ;;  %v10119_v43 = vld [vmem:[#allocation32_spill] sm:$0xff]  ;;  %v10120_v4 = vld [vmem:[#allocation69_spill] sm:$0xff] }
 0x1cb   : > { %3208 = vmatmul.mubr.f32.gmra.mxu0 %v8383_v49  ;;  %v8684_v13 = vadd.f32 %v1861_v14, %v1330_v19  ;;  %v1876_v37 = vadd.f32 %v5687_v8, %v8292_v36  ;;  %v8687_v57 = vpop.f32.mrf.mxu1  ;;  %5941 = vmatprep.subr.mxu1 %v5238_v11  ;;  %10116 = vst [vmem:[#allocation24_spill] sm:$0xff] %v8695_v60  ;;  %v2784_v49 = vrot.slane %v8474_v15, 1  ;;  %v5237_v36 = vld [vmem:[%s9721_s5 + $0x460] sm:$0xff]  ;;  %v10121_v25 = vld [vmem:[#allocation48_spill] sm:$0xff] }
 0x1cc   : > { %3683 = vmatmul.mubr.f32.gmra.mxu1 %v8690_v9  ;;  %3212 = vmatprep.mubr.f32.mxu0 %v8669_v50  ;;  %v1870_v10 = vpop.f32.mrf.mxu0  ;;  %v1340_v19 = vadd.f32 %v10118_v58, %v10117_v32  ;;  %v10122_v50 = vld [vmem:[#allocation17_spill] sm:$0xff] }
 0x1cd   : > { %3687 = vmatprep.mubr.f32.mxu1 %v10119_v43  ;;  %v8705_v14 = vadd.f32 %v1876_v37, %v1345_v29  ;;  %v1871_v8 = vadd.f32 %v1870_v10, %v10120_v4  ;;  %v2142_v48 = vpop.f32.mrf.mxu1  ;;  %5888 = vmatpush3.msra.mxu0 %v5177_v46  ;;  %v1355_v9 = vadd.f32 %v10122_v50, %v10121_v25  ;;  %v5236_v46 = vld [vmem:[%s9721_s5 + $0x458] sm:$0xff]  ;;  %v8721_v29 = vld [vmem:[%s7712_s8 + $0x48] sm:$0xff] }
 0x1ce   : > { %v5690_v30 = vpop.f32.mrf.mxu0  ;;  %4198 = vmatprep.subr.mxu0 %v9931_v47  ;;  %5942 = vmatpush3.msra.mxu1 %v5238_v11  ;;  %v2786_v11 = vrot.slane %v8501_v24, 1  ;;  %v10125_v37 = vld [vmem:[#allocation18_spill] sm:$0xff]  ;;  %v10127_v25 = vld [vmem:[#allocation56_spill] sm:$0xff]  ;;  %v10128_v24 = vld [vmem:[#allocation19_spill] sm:$0xff] }
 0x1cf   : > { %3213 = vmatmul.mubr.f32.gmra.mxu0 %v8425_v6  ;;  %v8712_v38 = vadd.f32 %v1871_v8, %v1340_v19  ;;  %v1886_v32 = vadd.f32 %v5690_v30, %v8372_v27  ;;  %v8715_v58 = vpop.f32.mrf.mxu1  ;;  %5943 = vmatprep.subr.mxu1 %v5237_v36  ;;  %v8726_v6 = vsel %vm626_vm1, %v2783_v18, %v2784_v49  ;;  %v10124_v27 = vld [vmem:[#allocation44_spill] sm:$0xff]  ;;  %v10126_v19 = vld [vmem:[#allocation34_spill] sm:$0xff]  ;;  %v5235_v18 = vld [vmem:[%s9721_s5 + $0x450] sm:$0xff] }
 0x1d0   : > { %3688 = vmatmul.mubr.f32.gmra.mxu1 %v8721_v29  ;;  %3217 = vmatprep.mubr.f32.mxu0 %v8695_v60  ;;  %v1880_v50 = vpop.f32.mrf.mxu0  ;;  %10123 = vst [vmem:[#allocation27_spill] sm:$0xff] %v8726_v6  ;;  %v1350_v10 = vadd.f32 %v10125_v37, %v10124_v27  ;;  %v1365_v60 = vadd.f32 %v10128_v24, %v10127_v25  ;;  %v10130_v37 = vld [vmem:[#allocation52_spill] sm:$0xff] }
 0x1d1   : > { %3692 = vmatprep.mubr.f32.mxu1 %v10126_v19  ;;  %v8732_v4 = vadd.f32 %v1886_v32, %v1355_v9  ;;  %v1881_v8 = vadd.f32 %v1880_v50, %v8335_v51  ;;  %v2147_v48 = vpop.f32.mrf.mxu1  ;;  %5944 = vmatpush3.msra.mxu1 %v5237_v36  ;;  %v8747_v51 = vld [vmem:[%s7712_s8 + $0x50] sm:$0xff]  ;;  %v8752_v50 = vsel %vm626_vm1, %v2784_v49, %v2786_v11  ;;  %v10133_v49 = vld [vmem:[#allocation64_spill] sm:$0xff] }
 0x1d2   : > { %v5693_v30 = vpop.f32.mrf.mxu0  ;;  %5945 = vmatprep.subr.mxu1 %v5236_v46  ;;  %10129 = vst [vmem:[#allocation10_spill] sm:$0xff] %v8747_v51  ;;  %v10134_v11 = vld [vmem:[#allocation21_spill] sm:$0xff] }
 0x1d3   : > { %3218 = vmatmul.mubr.f32.gmra.mxu0 %v8428_v45  ;;  %v8741_v27 = vadd.f32 %v1881_v8, %v1350_v10  ;;  %v1896_v9 = vadd.f32 %v5693_v30, %v8467_v20  ;;  %v8744_v32 = vpop.f32.mrf.mxu1  ;;  %5946 = vmatpush3.msra.mxu1 %v5236_v46  ;;  %v5234_v45 = vld [vmem:[%s9721_s5 + $0x448] sm:$0xff]  ;;  %v1375_v24 = vadd.f32 %v10134_v11, %v10133_v49 }
 0x1d4   : > { %3693 = vmatmul.mubr.f32.gmra.mxu1 %v8747_v51  ;;  %3222 = vmatprep.mubr.f32.mxu0 %v8726_v6  ;;  %v1890_v36 = vpop.f32.mrf.mxu0  ;;  %v10131_v10 = vld [vmem:[#allocation20_spill] sm:$0xff] }
 0x1d5   : > { %v1360_v20 = vadd.f32 %v10131_v10, %v10130_v37  ;;  %v10132_v8 = vld [vmem:[#allocation36_spill] sm:$0xff]  ;;  %v8760_v46 = vadd.f32 %v1896_v9, %v1365_v60  ;;  %v1891_v48 = vadd.f32 %v1890_v36, %v8418_v56  ;;  %v2152_v30 = vpop.f32.mrf.mxu1  ;;  %5947 = vmatprep.subr.mxu1 %v5235_v18  ;;  %v5233_v56 = vld [vmem:[%s9721_s5 + $0x440] sm:$0xff]  ;;  %v10136_v9 = vld [vmem:[#allocation22_spill] sm:$0xff] }
 0x1d6   : > { %3697 = vmatprep.mubr.f32.mxu1 %v10132_v8  ;;  %v5696_v25 = vpop.f32.mrf.mxu0  ;;  %5948 = vmatpush3.msra.mxu1 %v5235_v18  ;;  %v8775_v60 = vld [vmem:[%s7712_s8 + $0x60] sm:$0xff]  ;;  %v10137_v10 = vld [vmem:[#allocation4_spill] sm:$0xff] }
 0x1d7   : > { %3223 = vmatmul.mubr.f32.gmra.mxu0 %v8471_v28  ;;  %v8766_v6 = vadd.f32 %v1891_v48, %v1360_v20  ;;  %v1906_v51 = vadd.f32 %v5696_v25, %v8548_v7  ;;  %v8769_v37 = vpop.f32.mrf.mxu1  ;;  %5949 = vmatprep.subr.mxu1 %v5234_v45  ;;  %v10135_v28 = vld [vmem:[#allocation59_spill] sm:$0xff]  ;;  %v5232_v25 = vld [vmem:[%s9721_s5 + $0x438] sm:$0xff] }
 0x1d8   : > { %3698 = vmatmul.mubr.f32.gmra.mxu1 %v8775_v60  ;;  %3227 = vmatprep.mubr.f32.mxu0 %v8752_v50  ;;  %v1900_v18 = vpop.f32.mrf.mxu0  ;;  %v1370_v36 = vadd.f32 %v10136_v9, %v10135_v28 }
 0x1d9   : > { %3702 = vmatprep.mubr.f32.mxu1 %v10137_v10  ;;  %v8782_v7 = vadd.f32 %v1906_v51, %v1375_v24  ;;  %v1901_v20 = vadd.f32 %v1900_v18, %v8513_v53  ;;  %v2157_v48 = vpop.f32.mrf.mxu1  ;;  %5950 = vmatpush3.msra.mxu1 %v5234_v45  ;;  %v8795_v51 = vld [vmem:[%s7712_s8 + $0x68] sm:$0xff]  ;;  %v10138_v53 = vld [vmem:[#allocation5_spill] sm:$0xff] }
 0x1da   : > { %v5731_v30 = vpop.f32.mrf.mxu0  ;;  %5951 = vmatprep.subr.mxu1 %v5233_v56  ;;  %v8802_v24 = vld [vmem:[%s9721_s5 + $0x430] sm:$0xff] }
 0x1db   : > { %3228 = vmatmul.mubr.f32.gmra.mxu0 %v8474_v15  ;;  %v8789_v49 = vadd.f32 %v1901_v20, %v1370_v36  ;;  %v8791_v11 = vpop.f32.mrf.mxu1  ;;  %v2351_v28 = vadd.f32 %v5731_v30, %v8605_v2  ;;  %5952 = vmatpush3.msra.mxu1 %v5233_v56  ;;  %v10139_v15 = vld [vmem:[#allocation39_spill] sm:$0xff]  ;;  %v5208_v2 = vld [vmem:[%s9721_s5 + $0x378] sm:$0xff] }
 0x1dc   : > { %3703 = vmatmul.mubr.f32.gmra.mxu1 %v8795_v51  ;;  %5889 = vmatprep.mubr.f32.mxu0 %v10138_v53  ;;  %v2345_v45 = vpop.f32.mrf.mxu0  ;;  %v10140_v20 = vld [vmem:[#allocation38_spill] sm:$0xff] }
 0x1dd   : > { %3707 = vmatprep.mubr.f32.mxu1 %v10139_v15  ;;  %v8806_v18 = vadd.f32 %v2351_v28, %v8270_v44  ;;  %v2162_v56 = vpop.f32.mrf.mxu1  ;;  %v2346_v9 = vadd.f32 %v2345_v45, %v8577_v16  ;;  %5953 = vmatprep.subr.mxu1 %v5232_v25  ;;  %v5207_v44 = vld [vmem:[%s9721_s5 + $0x370] sm:$0xff]  ;;  %v8822_v53 = vld [vmem:[%s7712_s8 + $0x78] sm:$0xff] }
 0x1de   : > { %v5734_v36 = vpop.f32.mrf.mxu0  ;;  %5954 = vmatpush3.msra.mxu1 %v5232_v25 }
 0x1df   : > { %5890 = vmatmul.mubr.f32.vlgmr.msra.gmra.mxu0 %v10140_v20  ;;  %v8814_v48 = vadd.f32 %v2346_v9, %v8288_v62  ;;  %v2165_v30 = vpop.f32.mrf.mxu1  ;;  %v2361_v28 = vadd.f32 %v5734_v36, %v8658_v21  ;;  %5955 = vmatprep.subr.mxu1 %v8802_v24  ;;  %v10142_v62 = vld [vmem:[#allocation43_spill] sm:$0xff]  ;;  %v5206_v21 = vld [vmem:[%s9721_s5 + $0x368] sm:$0xff]  ;;  %v10144_v9 = vld [vmem:[#allocation41_spill] sm:$0xff] }
 0x1e0   : > { %3708 = vmatmul.mubr.f32.gmra.mxu1 %v8822_v53  ;;  %4199 = vmatpush1.msra.mxu0 %v5208_v2  ;;  %v2355_v16 = vpop.f32.mrf.mxu0  ;;  %v10145_v36 = vld [vmem:[#allocation42_spill] sm:$0xff] }
 0x1e1   : > { %10141 = vst [vmem:[#allocation29_spill] sm:$0xff] %v8814_v48  ;;  %4200 = vmatprep.subr.mxu0 %v9931_v47  ;;  %3712 = vmatprep.mubr.f32.mxu1 %v10142_v62  ;;  %v8828_v25 = vadd.f32 %v2361_v28, %v8312_v22  ;;  %v2167_v45 = vpop.f32.mrf.mxu1  ;;  %v2356_v56 = vadd.f32 %v2355_v16, %v8631_v17  ;;  %v5205_v22 = vld [vmem:[%s9721_s5 + $0x360] sm:$0xff] }
 0x1e2   : > { %5892 = vmatprep.mubr.f32.mxu0 %v10144_v9  ;;  %4201 = vmatpush1.msra.mxu0 %v5207_v44  ;;  %v5737_v2 = vpop.f32.mrf.mxu0  ;;  %v8847_v17 = vld [vmem:[%s7712_s8 + $0x80] sm:$0xff] }
 0x1e3   : > { %10143 = vst [vmem:[#allocation33_spill] sm:$0xff] %v8828_v25  ;;  %5893 = vmatmul.mubr.f32.gmra.mxu0 %v10145_v36  ;;  %4202 = vmatprep.subr.mxu0 %v9931_v47  ;;  %v8838_v20 = vadd.f32 %v2356_v56, %v8331_v5  ;;  %v8843_v28 = vpop.f32.mrf.mxu1  ;;  %v2371_v45 = vadd.f32 %v5737_v2, %v8715_v58  ;;  %v10147_v16 = vld [vmem:[#allocation47_spill] sm:$0xff]  ;;  %v5204_v56 = vld [vmem:[%s9721_s5 + $0x358] sm:$0xff]  ;;  %v10149_v2 = vld [vmem:[#allocation45_spill] sm:$0xff] }
 0x1e4   : > { %3713 = vmatmul.mubr.f32.gmra.mxu1 %v8847_v17  ;;  %4203 = vmatpush1.msra.mxu0 %v5206_v21  ;;  %v2365_v44 = vpop.f32.mrf.mxu0  ;;  %v10150_v25 = vld [vmem:[#allocation46_spill] sm:$0xff] }
 0x1e5   : > { %10146 = vst [vmem:[#allocation11_spill] sm:$0xff] %v8838_v20  ;;  %4204 = vmatprep.subr.mxu0 %v9931_v47  ;;  %3717 = vmatprep.mubr.f32.mxu1 %v10147_v16  ;;  %v8853_v5 = vadd.f32 %v2371_v45, %v8358_v26  ;;  %v2172_v20 = vpop.f32.mrf.mxu1  ;;  %v2366_v58 = vadd.f32 %v2365_v44, %v8687_v57  ;;  %v5203_v26 = vld [vmem:[%s9721_s5 + $0x350] sm:$0xff]  ;;  %v5202_v44 = vld [vmem:[%s9721_s5 + $0x348] sm:$0xff] }
 0x1e6   : > { %5895 = vmatprep.mubr.f32.mxu0 %v10149_v2  ;;  %4205 = vmatpush1.msra.mxu0 %v5205_v22  ;;  %v5740_v21 = vpop.f32.mrf.mxu0  ;;  %v10152_v22 = vld [vmem:[#allocation51_spill] sm:$0xff] }
 0x1e7   : > { %10148 = vst [vmem:[#allocation31_spill] sm:$0xff] %v8853_v5  ;;  %5896 = vmatmul.mubr.f32.gmra.mxu0 %v10150_v25  ;;  %4206 = vmatprep.subr.mxu0 %v9931_v47  ;;  %v8863_v48 = vadd.f32 %v2366_v58, %v8369_v41  ;;  %v2175_v45 = vpop.f32.mrf.mxu1  ;;  %v2381_v20 = vadd.f32 %v5740_v21, %v8769_v37  ;;  %v8870_v5 = vld [vmem:[%s7712_s8 + $0x90] sm:$0xff] }
 0x1e8   : > { %3718 = vmatmul.mubr.f32.gmra.mxu1 %v8870_v5  ;;  %4207 = vmatpush1.msra.mxu0 %v5204_v56  ;;  %v2375_v57 = vpop.f32.mrf.mxu0  ;;  %v10154_v21 = vld [vmem:[#allocation49_spill] sm:$0xff] }
 0x1e9   : > { %10151 = vst [vmem:[#allocation12_spill] sm:$0xff] %v8863_v48  ;;  %4208 = vmatprep.subr.mxu0 %v9931_v47  ;;  %3722 = vmatprep.mubr.f32.mxu1 %v10152_v22  ;;  %v8876_v41 = vadd.f32 %v2381_v20, %v8396_v40  ;;  %v2177_v58 = vpop.f32.mrf.mxu1  ;;  %v2376_v37 = vadd.f32 %v2375_v57, %v8744_v32  ;;  %v10155_v48 = vld [vmem:[#allocation50_spill] sm:$0xff]  ;;  %v5201_v40 = vld [vmem:[%s9721_s5 + $0x340] sm:$0xff] }
 0x1ea   : > { %5898 = vmatprep.mubr.f32.mxu0 %v10154_v21  ;;  %4209 = vmatpush1.msra.mxu0 %v5203_v26  ;;  %v5743_v56 = vpop.f32.mrf.mxu0  ;;  %v8892_v58 = vld [vmem:[%s7712_s8 + $0x98] sm:$0xff]  ;;  %v10157_v26 = vld [vmem:[#allocation55_spill] sm:$0xff] }
 0x1eb   : > { %10153 = vst [vmem:[#allocation37_spill] sm:$0xff] %v8876_v41  ;;  %5899 = vmatmul.mubr.f32.gmra.mxu0 %v10155_v48  ;;  %4210 = vmatprep.subr.mxu0 %v9931_v47  ;;  %v8886_v25 = vadd.f32 %v2376_v37, %v8415_v31  ;;  %v2180_v20 = vpop.f32.mrf.mxu1  ;;  %v2391_v41 = vadd.f32 %v5743_v56, %v2165_v30  ;;  %v5200_v57 = vld [vmem:[%s9721_s5 + $0x338] sm:$0xff]  ;;  %v10159_v56 = vld [vmem:[#allocation53_spill] sm:$0xff]  ;;  %v10161_v48 = vld [vmem:[#allocation84_spill] sm:$0xff] }
 0x1ec   : > { %3723 = vmatmul.mubr.f32.gmra.mxu1 %v8892_v58  ;;  %4211 = vmatpush1.msra.mxu0 %v5202_v44  ;;  %v2385_v32 = vpop.f32.mrf.mxu0 }
 0x1ed   : > { %10156 = vst [vmem:[#allocation13_spill] sm:$0xff] %v8886_v25  ;;  %4212 = vmatprep.subr.mxu0 %v9931_v47  ;;  %3727 = vmatprep.mubr.f32.mxu1 %v10157_v26  ;;  %v8898_v31 = vadd.f32 %v2391_v41, %v8440_v0  ;;  %v2182_v37 = vpop.f32.mrf.mxu1  ;;  %v2386_v30 = vadd.f32 %v2385_v32, %v8791_v11  ;;  %v10160_v25 = vld [vmem:[#allocation54_spill] sm:$0xff]  ;;  %v5199_v0 = vld [vmem:[%s9721_s5 + $0x330] sm:$0xff] }
 0x1ee   : > { %5901 = vmatprep.mubr.f32.mxu0 %v10159_v56  ;;  %4213 = vmatpush1.msra.mxu0 %v5201_v40  ;;  %v5746_v44 = vpop.f32.mrf.mxu0  ;;  %v8914_v37 = vld [vmem:[%s7712_s8 + $0xa8] sm:$0xff]  ;;  %v10163_v40 = vld [vmem:[#allocation61_spill] sm:$0xff]  ;;  %v10164_v32 = vld [vmem:[#allocation86_spill] sm:$0xff] }
 0x1ef   : > { %10158 = vst [vmem:[#allocation66_spill] sm:$0xff] %v8898_v31  ;;  %5902 = vmatmul.mubr.f32.gmra.mxu0 %v10160_v25  ;;  %4214 = vmatprep.subr.mxu0 %v9931_v47  ;;  %v8908_v21 = vadd.f32 %v2386_v30, %v10161_v48  ;;  %v2185_v41 = vpop.f32.mrf.mxu1  ;;  %v2401_v31 = vadd.f32 %v5746_v44, %v2175_v45  ;;  %v5198_v30 = vld [vmem:[%s9721_s5 + $0x328] sm:$0xff]  ;;  %v10166_v44 = vld [vmem:[#allocation57_spill] sm:$0xff]  ;;  %v10167_v25 = vld [vmem:[#allocation58_spill] sm:$0xff] }
 0x1f0   : > { %3728 = vmatmul.mubr.f32.gmra.mxu1 %v8914_v37  ;;  %4215 = vmatpush1.msra.mxu0 %v5200_v57  ;;  %v2395_v11 = vpop.f32.mrf.mxu0 }
 0x1f1   : > { %10162 = vst [vmem:[#allocation35_spill] sm:$0xff] %v8908_v21  ;;  %4216 = vmatprep.subr.mxu0 %v9931_v47  ;;  %3732 = vmatprep.mubr.f32.mxu1 %v10163_v40  ;;  %v8920_v48 = vadd.f32 %v2401_v31, %v10164_v32  ;;  %v2187_v21 = vpop.f32.mrf.mxu1  ;;  %v2396_v45 = vadd.f32 %v2395_v11, %v8843_v28  ;;  %v5197_v31 = vld [vmem:[%s9721_s5 + $0x320] sm:$0xff]  ;;  %v5196_v11 = vld [vmem:[%s9721_s5 + $0x318] sm:$0xff] }
 0x1f2   : > { %5904 = vmatprep.mubr.f32.mxu0 %v10166_v44  ;;  %4217 = vmatpush1.msra.mxu0 %v5199_v0  ;;  %v5749_v57 = vpop.f32.mrf.mxu0  ;;  %v8936_v21 = vld [vmem:[%s7712_s8 + $0xb0] sm:$0xff] }
 0x1f3   : > { %10165 = vst [vmem:[#allocation14_spill] sm:$0xff] %v8920_v48  ;;  %5905 = vmatmul.mubr.f32.gmra.mxu0 %v10167_v25  ;;  %4218 = vmatprep.subr.mxu0 %v9931_v47  ;;  %v8930_v56 = vadd.f32 %v2396_v45, %v8508_v42  ;;  %v2190_v32 = vpop.f32.mrf.mxu1  ;;  %v2411_v48 = vadd.f32 %v5749_v57, %v2185_v41  ;;  %v10169_v0 = vld [vmem:[#allocation65_spill] sm:$0xff]  ;;  %v10171_v57 = vld [vmem:[#allocation62_spill] sm:$0xff] }
 0x1f4   : > { %3733 = vmatmul.mubr.f32.gmra.mxu1 %v8936_v21  ;;  %4219 = vmatpush1.msra.mxu0 %v5198_v30  ;;  %v2405_v28 = vpop.f32.mrf.mxu0  ;;  %v10172_v30 = vld [vmem:[#allocation63_spill] sm:$0xff] }
 0x1f5   : > { %10168 = vst [vmem:[#allocation60_spill] sm:$0xff] %v8930_v56  ;;  %4220 = vmatprep.subr.mxu0 %v9931_v47  ;;  %3737 = vmatprep.mubr.f32.mxu1 %v10169_v0  ;;  %v8942_v42 = vadd.f32 %v2411_v48, %v8522_v52  ;;  %v2192_v45 = vpop.f32.mrf.mxu1  ;;  %v2406_v41 = vadd.f32 %v2405_v28, %v2180_v20  ;;  %v5195_v52 = vld [vmem:[%s9721_s5 + $0x310] sm:$0xff]  ;;  %v10174_v28 = vld [vmem:[#allocation70_spill] sm:$0xff] }
 0x1f6   : > { %5907 = vmatprep.mubr.f32.mxu0 %v10171_v57  ;;  %4221 = vmatpush1.msra.mxu0 %v5197_v31  ;;  %v5752_v56 = vpop.f32.mrf.mxu0  ;;  %v5193_v57 = vld [vmem:[%s9721_s5 + $0x300] sm:$0xff] }
 0x1f7   : > { %10170 = vst [vmem:[#allocation40_spill] sm:$0xff] %v8942_v42  ;;  %5908 = vmatmul.mubr.f32.gmra.mxu0 %v10172_v30  ;;  %4222 = vmatprep.subr.mxu0 %v9931_v47  ;;  %v8951_v25 = vadd.f32 %v2406_v41, %v8546_v3  ;;  %v2195_v48 = vpop.f32.mrf.mxu1  ;;  %v8957_v42 = vld [vmem:[%s7712_s8 + $0xc0] sm:$0xff]  ;;  %v5194_v3 = vld [vmem:[%s9721_s5 + $0x308] sm:$0xff] }
 0x1f8   : > { %3738 = vmatmul.mubr.f32.gmra.mxu1 %v8957_v42  ;;  %4223 = vmatpush1.msra.mxu0 %v5196_v11  ;;  %v2421_v20 = vadd.f32 %v5752_v56, %v2195_v48  ;;  %v2415_v31 = vpop.f32.mrf.mxu0  ;;  %v10177_v56 = vld [vmem:[#allocation68_spill] sm:$0xff] }
 0x1f9   : > { %10173 = vst [vmem:[#allocation15_spill] sm:$0xff] %v8951_v25  ;;  %4224 = vmatprep.subr.mxu0 %v9931_v47  ;;  %3742 = vmatprep.mubr.f32.mxu1 %v10174_v28  ;;  %v2197_v45 = vpop.f32.mrf.mxu1  ;;  %v2416_v41 = vadd.f32 %v2415_v31, %v2190_v32  ;;  %v10175_v25 = vld [vmem:[#allocation67_spill] sm:$0xff]  ;;  %v8978_v32 = vld [vmem:[%s7712_s8 + $0xc8] sm:$0xff] }
 0x1fa   : > { %5910 = vmatprep.mubr.f32.mxu0 %v10175_v25  ;;  %4225 = vmatpush1.msra.mxu0 %v5195_v52  ;;  %v8967_v30 = vadd.f32 %v2421_v20, %v8555_v33  ;;  %v5755_v11 = vpop.f32.mrf.mxu0  ;;  %10179 = vst [vmem:[#allocation32_spill] sm:$0xff] %v8978_v32  ;;  %v10180_v52 = vld [vmem:[#allocation73_spill] sm:$0xff] }
 0x1fb   : > { %5911 = vmatmul.mubr.f32.gmra.mxu0 %v10177_v56  ;;  %4226 = vmatprep.subr.mxu0 %v9931_v47  ;;  %v8972_v48 = vadd.f32 %v2416_v41, %v8574_v63  ;;  %v2200_v45 = vpop.f32.mrf.mxu1  ;;  %v5224_v63 = vld [vmem:[%s9721_s5 + $0x3f8] sm:$0xff]  ;;  %v10181_v41 = vld [vmem:[#allocation71_spill] sm:$0xff]  ;;  %v5223_v56 = vld [vmem:[%s9721_s5 + $0x3f0] sm:$0xff] }
 0x1fc   : > { %10176 = vst [vmem:[#allocation3_spill] sm:$0xff] %v8967_v30  ;;  %3743 = vmatmul.mubr.f32.gmra.mxu1 %v8978_v32  ;;  %4227 = vmatpush1.msra.mxu0 %v5194_v3  ;;  %v2425_v33 = vpop.f32.mrf.mxu0  ;;  %v10182_v30 = vld [vmem:[#allocation72_spill] sm:$0xff]  ;;  %v9142_v32 = vld [vmem:[%s7712_s8 + $0x120] sm:$0xff] }
 0x1fd   : > { %10178 = vst [vmem:[#allocation16_spill] sm:$0xff] %v8972_v48  ;;  %4228 = vmatprep.subr.mxu0 %v9931_v47  ;;  %3747 = vmatprep.mubr.f32.mxu1 %v10180_v52  ;;  %v2202_v20 = vpop.f32.mrf.mxu1  ;;  %v2426_v31 = vadd.f32 %v2425_v33, %v2200_v45  ;;  %v8996_v52 = vld [vmem:[%s7712_s8 + $0xd8] sm:$0xff]  ;;  %v10185_v33 = vld [vmem:[#allocation76_spill] sm:$0xff] }
 0x1fe   : > { %5913 = vmatprep.mubr.f32.mxu0 %v10181_v41  ;;  %4229 = vmatpush1.msra.mxu0 %v5193_v57  ;;  %v5758_v48 = vpop.f32.mrf.mxu0  ;;  %10184 = vst [vmem:[#allocation48_spill] sm:$0xff] %v8996_v52  ;;  %v10188_v41 = vld [vmem:[#allocation75_spill] sm:$0xff] }
 0x1ff   : > { %5914 = vmatmul.mubr.f32.gmra.mxu0 %v10182_v30  ;;  %4230 = vmatprep.subr.mxu0 %v9931_v47  ;;  %v8990_v3 = vadd.f32 %v2426_v31, %v8602_v34  ;;  %v2205_v25 = vpop.f32.mrf.mxu1  ;;  %v5222_v34 = vld [vmem:[%s9721_s5 + $0x3e8] sm:$0xff]  ;;  %v10186_v31 = vld [vmem:[#allocation74_spill] sm:$0xff] }
 0x200   : > { %3748 = vmatmul.mubr.f32.gmra.mxu1 %v8996_v52  ;;  %4231 = vmatpush2.msra.mxu0 %v5224_v63  ;;  %v2431_v57 = vadd.f32 %v5755_v11, %v2205_v25  ;;  %v2435_v45 = vpop.f32.mrf.mxu0  ;;  %v5221_v25 = vld [vmem:[%s9721_s5 + $0x3e0] sm:$0xff]  ;;  %v10208_v52 = vld [vmem:[#allocation90_spill] sm:$0xff] }
 0x201   : > { %10183 = vst [vmem:[#allocation69_spill] sm:$0xff] %v8990_v3  ;;  %4232 = vmatprep.subr.mxu0 %v9931_v47  ;;  %3752 = vmatprep.mubr.f32.mxu1 %v10185_v33  ;;  %v2207_v20 = vpop.f32.mrf.mxu1  ;;  %v9014_v63 = vld [vmem:[%s7712_s8 + $0xe0] sm:$0xff] }
 0x202   : > { %5916 = vmatprep.mubr.f32.mxu0 %v10186_v31  ;;  %4233 = vmatpush2.msra.mxu0 %v5223_v56  ;;  %v9006_v3 = vadd.f32 %v2431_v57, %v8587_v54  ;;  %v5761_v30 = vpop.f32.mrf.mxu0  ;;  %10189 = vst [vmem:[#allocation44_spill] sm:$0xff] %v9014_v63  ;;  %v10190_v54 = vld [vmem:[#allocation79_spill] sm:$0xff]  ;;  %v5220_v57 = vld [vmem:[%s9721_s5 + $0x3d8] sm:$0xff] }
 0x203   : > { %5917 = vmatmul.mubr.f32.gmra.mxu0 %v10188_v41  ;;  %4234 = vmatprep.subr.mxu0 %v9931_v47  ;;  %v2210_v11 = vpop.f32.mrf.mxu1  ;;  %v10191_v41 = vld [vmem:[#allocation77_spill] sm:$0xff] }
 0x204   : > { %10187 = vst [vmem:[#allocation17_spill] sm:$0xff] %v9006_v3  ;;  %3753 = vmatmul.mubr.f32.gmra.mxu1 %v9014_v63  ;;  %4235 = vmatpush2.msra.mxu0 %v5222_v34  ;;  %v2436_v56 = vadd.f32 %v2435_v45, %v2210_v11  ;;  %v2445_v20 = vpop.f32.mrf.mxu0  ;;  %v10193_v34 = vld [vmem:[#allocation78_spill] sm:$0xff]  ;;  %v5219_v45 = vld [vmem:[%s9721_s5 + $0x3d0] sm:$0xff] }
 0x205   : > { %4236 = vmatprep.subr.mxu0 %v9931_v47  ;;  %3757 = vmatprep.mubr.f32.mxu1 %v10190_v54  ;;  %v2212_v3 = vpop.f32.mrf.mxu1  ;;  %v9034_v54 = vld [vmem:[%s7712_s8 + $0xf0] sm:$0xff] }
 0x206   : > { %5919 = vmatprep.mubr.f32.mxu0 %v10191_v41  ;;  %4237 = vmatpush2.msra.mxu0 %v5221_v25  ;;  %v9024_v31 = vadd.f32 %v2436_v56, %v8628_v59  ;;  %v9026_v63 = vpop.f32.mrf.mxu0  ;;  %10194 = vst [vmem:[#allocation34_spill] sm:$0xff] %v9034_v54  ;;  %v10195_v25 = vld [vmem:[#allocation82_spill] sm:$0xff]  ;;  %v5218_v56 = vld [vmem:[%s9721_s5 + $0x3c8] sm:$0xff] }
 0x207   : > { %5920 = vmatmul.mubr.f32.gmra.mxu0 %v10193_v34  ;;  %4238 = vmatprep.subr.mxu0 %v9931_v47  ;;  %v2215_v11 = vpop.f32.mrf.mxu1  ;;  %v10196_v34 = vld [vmem:[#allocation80_spill] sm:$0xff] }
 0x208   : > { %10192 = vst [vmem:[#allocation18_spill] sm:$0xff] %v9024_v31  ;;  %3758 = vmatmul.mubr.f32.gmra.mxu1 %v9034_v54  ;;  %4239 = vmatpush2.msra.mxu0 %v5220_v57  ;;  %v2441_v3 = vadd.f32 %v5758_v48, %v2215_v11  ;;  %v2455_v59 = vpop.f32.mrf.mxu0  ;;  %v10198_v48 = vld [vmem:[#allocation81_spill] sm:$0xff]  ;;  %v5217_v57 = vld [vmem:[%s9721_s5 + $0x3c0] sm:$0xff] }
 0x209   : > { %4240 = vmatprep.subr.mxu0 %v9931_v47  ;;  %3762 = vmatprep.mubr.f32.mxu1 %v10195_v25  ;;  %v2217_v31 = vpop.f32.mrf.mxu1  ;;  %v9054_v25 = vld [vmem:[%s7712_s8 + $0xf8] sm:$0xff] }
 0x20a   : > { %5922 = vmatprep.mubr.f32.mxu0 %v10196_v34  ;;  %4241 = vmatpush2.msra.mxu0 %v5219_v45  ;;  %v9044_v41 = vadd.f32 %v2441_v3, %v8621_v61  ;;  %v9046_v54 = vpop.f32.mrf.mxu0  ;;  %10199 = vst [vmem:[#allocation19_spill] sm:$0xff] %v9054_v25  ;;  %v5216_v45 = vld [vmem:[%s9721_s5 + $0x3b8] sm:$0xff]  ;;  %v9100_v34 = vld [vmem:[%s9069_s19 + $0x10] sm:$0x3] }
 0x20b   : > { %5923 = vmatmul.mubr.f32.gmra.mxu0 %v10198_v48  ;;  %4242 = vmatprep.subr.mxu0 %v9931_v47  ;;  %v2220_v11 = vpop.f32.mrf.mxu1  ;;  %v9083_v48 = vld [vmem:[%s7712_s8 + $0x108] sm:$0xff] }
 0x20c   : > { %10197 = vst [vmem:[#allocation56_spill] sm:$0xff] %v9044_v41  ;;  %3763 = vmatmul.mubr.f32.gmra.mxu1 %v9054_v25  ;;  %4243 = vmatpush2.msra.mxu0 %v5218_v56  ;;  %v2446_v31 = vadd.f32 %v2445_v20, %v2220_v11  ;;  %v9057_v61 = vpop.f32.mrf.mxu0  ;;  %v10200_v56 = vld [vmem:[#allocation83_spill] sm:$0xff]  ;;  %10202 = vst [vmem:[#allocation20_spill] sm:$0xff] %v9083_v48 }
 0x20d   : > { %4244 = vmatprep.subr.mxu0 %v9931_v47  ;;  %3767 = vmatprep.mubr.f32.mxu1 %v8491_v35  ;;  %v2222_v3 = vpop.f32.mrf.mxu1 }
 0x20e   : > { %5925 = vmatprep.mubr.f32.mxu0 %v10200_v56  ;;  %4245 = vmatpush2.msra.mxu0 %v5217_v57  ;;  %v9073_v20 = vadd.f32 %v2446_v31, %v8655_v55  ;;  %v9075_v11 = vpop.f32.mrf.mxu0  ;;  %v5215_v3 = vld [vmem:[%s9721_s5 + $0x3b0] sm:$0xff]  ;;  %v9089_v31 = vld [vmem:[%s9069_s19] sm:$0xff] }
 0x20f   : > { %5926 = vmatmul.mubr.f32.gmra.mxu0 %v8478_v39  ;;  %4246 = vmatprep.subr.mxu0 %v9931_v47  ;;  %v2225_v41 = vpop.f32.mrf.mxu1  ;;  %v5214_v39 = vld [vmem:[%s9721_s5 + $0x3a8] sm:$0xff] }
 0x210   : > { %10201 = vst [vmem:[#allocation52_spill] sm:$0xff] %v9073_v20  ;;  %3768 = vmatmul.mubr.f32.gmra.mxu1 %v9083_v48  ;;  %4247 = vmatpush2.msra.mxu0 %v5216_v45  ;;  %v2451_v57 = vadd.f32 %v5761_v30, %v2225_v41  ;;  %v9086_v55 = vpop.f32.mrf.mxu0  ;;  %v9092_v20 = vld [vmem:[%s9069_s19 + $0x8] sm:$0xff]  ;;  %v10205_v48 = vld [vmem:[#allocation7_spill] sm:$0xff] }
 0x211   : > { %4248 = vmatprep.subr.mxu0 %v9931_v47  ;;  %3772 = vmatprep.mubr.f32.mxu1 %v8534_v1  ;;  %v2227_v56 = vpop.f32.mrf.mxu1  ;;  %v10203_v45 = vld [vmem:[#allocation88_spill] sm:$0xff]  ;;  %v5213_v1 = vld [vmem:[%s9721_s5 + $0x3a0] sm:$0xff]  ;;  %v2915_v25 = vrot.slane %v9092_v20, 2 }
 0x212   : > { %5928 = vmatprep.mubr.f32.mxu0 %v10203_v45  ;;  %4249 = vmatpush2.msra.mxu0 %v5215_v3  ;;  %v9104_v30 = vadd.f32 %v2451_v57, %v8649_v12  ;;  %v9106_v41 = vpop.f32.mrf.mxu0  ;;  %v2914_v56 = vrot.slane %v9089_v31, 2  ;;  %v9116_v45 = vld [vmem:[%s7712_s8 + $0x110] sm:$0xff]  ;;  %v2917_v57 = vrot.slane %v9100_v34, 2 }
 0x213   : > { %5929 = vmatmul.mubr.f32.gmra.mxu0 %v10205_v48  ;;  %4250 = vmatprep.subr.mxu0 %v9931_v47  ;;  %v2230_v35 = vpop.f32.mrf.mxu1  ;;  %10206 = vst [vmem:[#allocation64_spill] sm:$0xff] %v9116_v45  ;;  %v5212_v48 = vld [vmem:[%s9721_s5 + $0x398] sm:$0xff] }
 0x214   : > { %10204 = vst [vmem:[#allocation36_spill] sm:$0xff] %v9104_v30  ;;  %3773 = vmatmul.mubr.f32.gmra.mxu1 %v9116_v45  ;;  %4251 = vmatpush2.msra.mxu0 %v5214_v39  ;;  %v2456_v12 = vadd.f32 %v2455_v59, %v2230_v35  ;;  %v9119_v3 = vpop.f32.mrf.mxu0  ;;  %v10207_v30 = vld [vmem:[#allocation92_spill] sm:$0xff]  ;;  %v10210_v59 = vld [vmem:[#allocation91_spill] sm:$0xff]  ;;  %v9136_v45 = vsel %vm753_vm0, %v2914_v56, %v2915_v25  ;;  %v10213_v56 = vld [vmem:[#allocation26_spill] sm:$0xff] }
 0x215   : > { %4252 = vmatprep.subr.mxu0 %v9931_v47  ;;  %3777 = vmatprep.mubr.f32.mxu1 %v10207_v30  ;;  %v2232_v33 = vpop.f32.mrf.mxu1  ;;  %10211 = vst [vmem:[#allocation59_spill] sm:$0xff] %v9136_v45  ;;  %v5211_v30 = vld [vmem:[%s9721_s5 + $0x390] sm:$0xff] }
 0x216   : > { %5931 = vmatprep.mubr.f32.mxu0 %v10208_v52  ;;  %4253 = vmatpush2.msra.mxu0 %v5213_v1  ;;  %v9129_v39 = vadd.f32 %v2456_v12, %v8684_v13  ;;  %v9131_v35 = vpop.f32.mrf.mxu0  ;;  %v9147_v13 = vsel %vm753_vm0, %v2915_v25, %v2917_v57  ;;  %v5209_v25 = vld [vmem:[%s9721_s5 + $0x380] sm:$0xff] }
 0x217   : > { %5932 = vmatmul.mubr.f32.gmra.mxu0 %v10210_v59  ;;  %4254 = vmatprep.subr.mxu0 %v9931_v47  ;;  %v2235_v33 = vpop.f32.mrf.mxu1  ;;  %10212 = vst [vmem:[#allocation22_spill] sm:$0xff] %v9147_v13 }
 0x218   : > { %10209 = vst [vmem:[#allocation21_spill] sm:$0xff] %v9129_v39  ;;  %3778 = vmatmul.mubr.f32.gmra.mxu1 %v9142_v32  ;;  %4255 = vmatpush2.msra.mxu0 %v5212_v48  ;;  %v2461_v1 = vadd.f32 %v9026_v63, %v2235_v33  ;;  %v9149_v12 = vpop.f32.mrf.mxu0  ;;  %v5210_v39 = vld [vmem:[%s9721_s5 + $0x388] sm:$0xff] }
 0x219   : > { %4256 = vmatprep.subr.mxu0 %v9931_v47  ;;  %3782 = vmatprep.mubr.f32.mxu1 %v10213_v56  ;;  %v2237_v59 = vpop.f32.mrf.mxu1  ;;  %v9168_v33 = vld [vmem:[%s7712_s8 + $0x128] sm:$0xff] }
 0x21a   : > { %5934 = vmatprep.mubr.f32.mxu0 %v9136_v45  ;;  %4257 = vmatpush2.msra.mxu0 %v5211_v30  ;;  %v9158_v48 = vadd.f32 %v2461_v1, %v8678_v23  ;;  %v9160_v63 = vpop.f32.mrf.mxu0  ;;  %10215 = vst [vmem:[#allocation5_spill] sm:$0xff] %v9168_v33  ;;  %v10216_v59 = vld [vmem:[#allocation8_spill] sm:$0xff] }
 0x21b   : > { %5935 = vmatmul.mubr.f32.gmra.mxu0 %v9147_v13  ;;  %4258 = vmatprep.subr.mxu0 %v9931_v47  ;;  %v2240_v57 = vpop.f32.mrf.mxu1 }
 0x21c   : > { %10214 = vst [vmem:[#allocation4_spill] sm:$0xff] %v9158_v48  ;;  %3783 = vmatmul.mubr.f32.gmra.mxu1 %v9168_v33  ;;  %4259 = vmatpush2.msra.mxu0 %v5210_v39  ;;  %v2466_v23 = vadd.f32 %v9057_v61, %v2240_v57  ;;  %v3076_v30 = vpop.f32.mrf.mxu0  ;;  %v10217_v48 = vld [vmem:[#allocation6_spill] sm:$0xff]  ;;  %v5230_v39 = vld [vmem:[%s9721_s5 + $0x428] sm:$0xff]  ;;  %v10218_v33 = vld [vmem:[#allocation25_spill] sm:$0xff] }
 0x21d   : > { %4260 = vmatprep.subr.mxu0 %v9931_v47  ;;  %3787 = vmatprep.mubr.f32.mxu1 %v10216_v59  ;;  %v2242_v1 = vpop.f32.mrf.mxu1  ;;  %v9186_v47 = vld [vmem:[%s7712_s8 + $0x138] sm:$0xff]  ;;  %v5229_v57 = vld [vmem:[%s9721_s5 + $0x420] sm:$0xff] }
 0x21e   : > { %4261 = vmatpush2.msra.mxu0 %v5209_v25  ;;  %4262 = vmatprep.mubr.f32.mxu0 %v10217_v48  ;;  %v9176_v13 = vadd.f32 %v2466_v23, %v8712_v38  ;;  %v9178_v45 = vpop.f32.mrf.mxu0  ;;  %v10219_v48 = vld [vmem:[#allocation28_spill] sm:$0xff]  ;;  %v10220_v23 = vld [vmem:[#allocation23_spill] sm:$0xff]  ;;  %v10222_v1 = vld [vmem:[#allocation9_spill] sm:$0xff] }
 0x21f   : > { %4263 = vmatmul.mubr.f32.vlgmr.msra.gmra.mxu0 %v10218_v33  ;;  %v2245_v61 = vpop.f32.mrf.mxu1  ;;  %5956 = vmatpush3.msra.mxu1 %v8802_v24 }
 0x220   : > { %3788 = vmatmul.mubr.f32.gmra.mxu1 %v9186_v47  ;;  %4267 = vmatprep.mubr.f32.mxu0 %v10219_v48  ;;  %v2471_v38 = vadd.f32 %v9046_v54, %v2245_v61  ;;  %v3081_v25 = vpop.f32.mrf.mxu0  ;;  %v5228_v54 = vld [vmem:[%s9721_s5 + $0x418] sm:$0xff]  ;;  %v9205_v61 = vld [vmem:[%s7712_s8 + $0x140] sm:$0xff] }
 0x221   : > { %3792 = vmatprep.mubr.f32.mxu1 %v10220_v23  ;;  %v2247_v33 = vpop.f32.mrf.mxu1  ;;  %5957 = vmatprep.subr.mxu1 %v5230_v39  ;;  %v10223_v25 = vld [vmem:[#allocation30_spill] sm:$0xff] }
 0x222   : > { %v9196_v24 = vadd.f32 %v2471_v38, %v8705_v14  ;;  %v9198_v30 = vpop.f32.mrf.mxu0  ;;  %5958 = vmatpush3.msra.mxu1 %v5230_v39 }
 0x223   : > { %4268 = vmatmul.mubr.f32.gmra.mxu0 %v10222_v1  ;;  %v2250_v48 = vpop.f32.mrf.mxu1  ;;  %5959 = vmatprep.subr.mxu1 %v5229_v57 }
 0x224   : > { %10221 = vst [vmem:[#allocation39_spill] sm:$0xff] %v9196_v24  ;;  %3793 = vmatmul.mubr.f32.gmra.mxu1 %v9205_v61  ;;  %4272 = vmatprep.mubr.f32.mxu0 %v10119_v43  ;;  %v2476_v14 = vadd.f32 %v9086_v55, %v2250_v48  ;;  %v3086_v38 = vpop.f32.mrf.mxu0  ;;  %v5227_v24 = vld [vmem:[%s9721_s5 + $0x410] sm:$0xff]  ;;  %v5226_v48 = vld [vmem:[%s9721_s5 + $0x408] sm:$0xff] }
 0x225   : > { %3797 = vmatprep.mubr.f32.mxu1 %v10223_v25  ;;  %v2252_v39 = vpop.f32.mrf.mxu1  ;;  %5960 = vmatpush3.msra.mxu1 %v5229_v57  ;;  %v9221_v55 = vld [vmem:[%s7712_s8 + $0x150] sm:$0xff] }
 0x226   : > { %v9212_v33 = vadd.f32 %v2476_v14, %v8741_v27  ;;  %v9214_v1 = vpop.f32.mrf.mxu0  ;;  %5961 = vmatprep.subr.mxu1 %v5228_v54  ;;  %v10225_v14 = vld [vmem:[#allocation24_spill] sm:$0xff]  ;;  %v10227_v39 = vld [vmem:[#allocation10_spill] sm:$0xff] }
 0x227   : > { %4273 = vmatmul.mubr.f32.gmra.mxu0 %v8721_v29  ;;  %v2255_v43 = vpop.f32.mrf.mxu1  ;;  %5962 = vmatpush3.msra.mxu1 %v5228_v54 }
 0x228   : > { %10224 = vst [vmem:[#allocation38_spill] sm:$0xff] %v9212_v33  ;;  %3798 = vmatmul.mubr.f32.gmra.mxu1 %v9221_v55  ;;  %4277 = vmatprep.mubr.f32.mxu0 %v10126_v19  ;;  %v2481_v27 = vadd.f32 %v9075_v11, %v2255_v43  ;;  %v3091_v57 = vpop.f32.mrf.mxu0  ;;  %v5225_v11 = vld [vmem:[%s9721_s5 + $0x400] sm:$0xff]  ;;  %v9240_v43 = vld [vmem:[%s7712_s8 + $0x158] sm:$0xff]  ;;  %v2789_v33 = vrot.slane %v9092_v20, 1 }
 0x229   : > { %3802 = vmatprep.mubr.f32.mxu1 %v10225_v14  ;;  %v2257_v38 = vpop.f32.mrf.mxu1  ;;  %5963 = vmatprep.subr.mxu1 %v5227_v24  ;;  %v10228_v57 = vld [vmem:[#allocation27_spill] sm:$0xff] }
 0x22a   : > { %v9231_v29 = vadd.f32 %v2481_v27, %v8732_v4  ;;  %v9233_v54 = vpop.f32.mrf.mxu0  ;;  %5964 = vmatpush3.msra.mxu1 %v5227_v24 }
 0x22b   : > { %4278 = vmatmul.mubr.f32.gmra.mxu0 %v10227_v39  ;;  %v2260_v19 = vpop.f32.mrf.mxu1  ;;  %5965 = vmatprep.subr.mxu1 %v5226_v48 }
 0x22c   : > { %10226 = vst [vmem:[#allocation43_spill] sm:$0xff] %v9231_v29  ;;  %3803 = vmatmul.mubr.f32.gmra.mxu1 %v9240_v43  ;;  %4282 = vmatprep.mubr.f32.mxu0 %v10132_v8  ;;  %v2486_v4 = vadd.f32 %v9119_v3, %v2260_v19  ;;  %v3096_v27 = vpop.f32.mrf.mxu0  ;;  %v2788_v29 = vrot.slane %v9089_v31, 1  ;;  %v9255_v3 = vld [vmem:[%s7712_s8 + $0x168] sm:$0xff] }
 0x22d   : > { %3807 = vmatprep.mubr.f32.mxu1 %v10228_v57  ;;  %v2262_v24 = vpop.f32.mrf.mxu1  ;;  %5966 = vmatpush3.msra.mxu1 %v5226_v48 }
 0x22e   : > { %v9247_v38 = vadd.f32 %v2486_v4, %v8766_v6  ;;  %v9249_v39 = vpop.f32.mrf.mxu0  ;;  %5967 = vmatprep.subr.mxu1 %v5225_v11 }
 0x22f   : > { %4283 = vmatmul.mubr.f32.gmra.mxu0 %v8775_v60  ;;  %v2265_v8 = vpop.f32.mrf.mxu1  ;;  %5968 = vmatpush3.msra.mxu1 %v5225_v11  ;;  %v9265_v60 = vsel %vm626_vm1, %v2788_v29, %v2789_v33  ;;  %v2791_v11 = vrot.slane %v9100_v34, 1 }
 0x230   : > { %3808 = vmatmul.mubr.f32.gmra.mxu1 %v9255_v3  ;;  %4287 = vmatprep.mubr.f32.mxu0 %v10137_v10  ;;  %v2491_v6 = vadd.f32 %v9106_v41, %v2265_v8  ;;  %v3101_v48 = vpop.f32.mrf.mxu0  ;;  %v9272_v10 = vld [vmem:[%s7712_s8 + $0x170] sm:$0xff] }
 0x231   : > { %3812 = vmatprep.mubr.f32.mxu1 %v8752_v50  ;;  %v2267_v19 = vpop.f32.mrf.mxu1  ;;  %v9282_v34 = vsel %vm626_vm1, %v2789_v33, %v2791_v11 }
 0x232   : > { %v9262_v4 = vadd.f32 %v2491_v6, %v8760_v46  ;;  %v9267_v27 = vpop.f32.mrf.mxu0 }
 0x233   : > { %4288 = vmatmul.mubr.f32.gmra.mxu0 %v8795_v51  ;;  %v2270_v24 = vpop.f32.mrf.mxu1 }
 0x234   : > { %3813 = vmatmul.mubr.f32.gmra.mxu1 %v9272_v10  ;;  %4292 = vmatprep.mubr.f32.mxu0 %v10139_v15  ;;  %v2496_v41 = vadd.f32 %v9149_v12, %v2270_v24  ;;  %v3106_v46 = vpop.f32.mrf.mxu0 }
 0x235   : > { %3817 = vmatprep.mubr.f32.mxu1 %v9265_v60  ;;  %v2272_v29 = vpop.f32.mrf.mxu1 }
 0x236   : > { %v9279_v8 = vadd.f32 %v2496_v41, %v8789_v49  ;;  %v3109_v51 = vpop.f32.mrf.mxu0  ;;  %v10229_v41 = vld [vmem:[#allocation29_spill] sm:$0xff] }
 0x237   : > { %4293 = vmatmul.mubr.f32.gmra.mxu0 %v8822_v53  ;;  %v2275_v6 = vpop.f32.mrf.mxu1 }
 0x238   : > { %3818 = vmatmul.mubr.f32.gmra.mxu1 %v9089_v31  ;;  %4297 = vmatprep.mubr.f32.mxu0 %v10142_v62  ;;  %v2501_v15 = vadd.f32 %v9131_v35, %v2275_v6  ;;  %v3111_v12 = vpop.f32.mrf.mxu0  ;;  %v10231_v6 = vld [vmem:[#allocation46_spill] sm:$0xff] }
 0x239   : > { %3822 = vmatprep.mubr.f32.mxu1 %v9282_v34  ;;  %v2277_v48 = vpop.f32.mrf.mxu1 }
 0x23a   : > { %v9290_v49 = vadd.f32 %v2501_v15, %v8782_v7  ;;  %v3114_v19 = vpop.f32.mrf.mxu0  ;;  %v10232_v15 = vld [vmem:[#allocation11_spill] sm:$0xff] }
 0x23b   : > { %4298 = vmatmul.mubr.f32.gmra.mxu0 %v8847_v17  ;;  %v5811_v33 = vpop.f32.mrf.mxu1 }
 0x23c   : > { %3823 = vmatmul.mubr.f32.gmra.mxu1 %v9092_v20  ;;  %4302 = vmatprep.mubr.f32.mxu0 %v10147_v16  ;;  %v3305_v53 = vadd.f32 %v5811_v33, %v9178_v45  ;;  %v3116_v62 = vpop.f32.mrf.mxu0  ;;  %v10230_v45 = vld [vmem:[#allocation33_spill] sm:$0xff]  ;;  %v10234_v33 = vld [vmem:[#allocation31_spill] sm:$0xff] }
 0x23d   : > { %5969 = vmatprep.mubr.f32.mxu1 %v10144_v9  ;;  %v3299_v35 = vpop.f32.mrf.mxu1 }
 0x23e   : > { %v9298_v11 = vadd.f32 %v3305_v53, %v8806_v18  ;;  %v3300_v7 = vadd.f32 %v3299_v35, %v9160_v63  ;;  %v3119_v24 = vpop.f32.mrf.mxu0  ;;  %v10235_v35 = vld [vmem:[#allocation50_spill] sm:$0xff] }
 0x23f   : > { %4303 = vmatmul.mubr.f32.gmra.mxu0 %v8870_v5  ;;  %v5814_v17 = vpop.f32.mrf.mxu1 }
 0x240   : > { %5970 = vmatmul.mubr.f32.vlgmr.msra.gmra.mxu1 %v10145_v36  ;;  %v9304_v46 = vadd.f32 %v3300_v7, %v10229_v41  ;;  %4307 = vmatprep.mubr.f32.mxu0 %v10152_v22  ;;  %v3315_v16 = vadd.f32 %v5814_v17, %v9214_v1  ;;  %v3121_v9 = vpop.f32.mrf.mxu0  ;;  %v10233_v1 = vld [vmem:[#allocation49_spill] sm:$0xff]  ;;  %v10236_v7 = vld [vmem:[#allocation12_spill] sm:$0xff] }
 0x241   : > { %5972 = vmatprep.mubr.f32.mxu1 %v10149_v2  ;;  %v3309_v18 = vpop.f32.mrf.mxu1  ;;  %v10237_v41 = vld [vmem:[#allocation53_spill] sm:$0xff] }
 0x242   : > { %v9310_v29 = vadd.f32 %v3315_v16, %v10230_v45  ;;  %v3310_v63 = vadd.f32 %v3309_v18, %v9198_v30  ;;  %v3124_v5 = vpop.f32.mrf.mxu0  ;;  %v10238_v9 = vld [vmem:[#allocation37_spill] sm:$0xff] }
 0x243   : > { %4308 = vmatmul.mubr.f32.gmra.mxu0 %v8892_v58  ;;  %v5817_v36 = vpop.f32.mrf.mxu1 }
 0x244   : > { %5973 = vmatmul.mubr.f32.gmra.mxu1 %v10231_v6  ;;  %v9316_v12 = vadd.f32 %v3310_v63, %v10232_v15  ;;  %4312 = vmatprep.mubr.f32.mxu0 %v10157_v26  ;;  %v3325_v22 = vadd.f32 %v5817_v36, %v9249_v39  ;;  %v3126_v2 = vpop.f32.mrf.mxu0  ;;  %v10239_v63 = vld [vmem:[#allocation54_spill] sm:$0xff]  ;;  %v10240_v36 = vld [vmem:[#allocation13_spill] sm:$0xff] }
 0x245   : > { %5975 = vmatprep.mubr.f32.mxu1 %v10233_v1  ;;  %v3319_v48 = vpop.f32.mrf.mxu1 }
 0x246   : > { %v9322_v53 = vadd.f32 %v3325_v22, %v10234_v33  ;;  %v3320_v30 = vadd.f32 %v3319_v48, %v9233_v54  ;;  %v3129_v58 = vpop.f32.mrf.mxu0  ;;  %v10241_v22 = vld [vmem:[#allocation66_spill] sm:$0xff]  ;;  %v10243_v33 = vld [vmem:[#allocation35_spill] sm:$0xff] }
 0x247   : > { %4313 = vmatmul.mubr.f32.gmra.mxu0 %v8914_v37  ;;  %v5820_v62 = vpop.f32.mrf.mxu1  ;;  %v10242_v48 = vld [vmem:[#allocation58_spill] sm:$0xff] }
 0x248   : > { %5976 = vmatmul.mubr.f32.gmra.mxu1 %v10235_v35  ;;  %v9328_v17 = vadd.f32 %v3320_v30, %v10236_v7  ;;  %4317 = vmatprep.mubr.f32.mxu0 %v10163_v40  ;;  %v3335_v26 = vadd.f32 %v5820_v62, %v3109_v51  ;;  %v3131_v39 = vpop.f32.mrf.mxu0  ;;  %v10244_v62 = vld [vmem:[#allocation62_spill] sm:$0xff] }
 0x249   : > { %5978 = vmatprep.mubr.f32.mxu1 %v10237_v41  ;;  %v3329_v16 = vpop.f32.mrf.mxu1  ;;  %v10245_v35 = vld [vmem:[#allocation14_spill] sm:$0xff]  ;;  %v10246_v39 = vld [vmem:[#allocation32_spill] sm:$0xff]  ;;  %v10247_v41 = vld [vmem:[#allocation63_spill] sm:$0xff] }
 0x24a   : > { %v9333_v18 = vadd.f32 %v3335_v26, %v10238_v9  ;;  %v3330_v54 = vadd.f32 %v3329_v16, %v9267_v27  ;;  %v3134_v45 = vpop.f32.mrf.mxu0  ;;  %v10248_v16 = vld [vmem:[#allocation60_spill] sm:$0xff] }
 0x24b   : > { %4318 = vmatmul.mubr.f32.gmra.mxu0 %v8936_v21  ;;  %v5823_v37 = vpop.f32.mrf.mxu1 }
 0x24c   : > { %5979 = vmatmul.mubr.f32.gmra.mxu1 %v10239_v63  ;;  %v9339_v6 = vadd.f32 %v3330_v54, %v10240_v36  ;;  %4322 = vmatprep.mubr.f32.mxu0 %v10169_v0  ;;  %v3345_v40 = vadd.f32 %v5823_v37, %v3119_v24  ;;  %v3136_v51 = vpop.f32.mrf.mxu0  ;;  %v10249_v54 = vld [vmem:[#allocation73_spill] sm:$0xff]  ;;  %v10250_v37 = vld [vmem:[#allocation67_spill] sm:$0xff]  ;;  %v10251_v36 = vld [vmem:[#allocation40_spill] sm:$0xff] }
 0x24d   : > { %5981 = vmatprep.mubr.f32.mxu1 %v10166_v44  ;;  %v3339_v15 = vpop.f32.mrf.mxu1  ;;  %v10252_v51 = vld [vmem:[#allocation48_spill] sm:$0xff] }
 0x24e   : > { %v9344_v2 = vadd.f32 %v3345_v40, %v10241_v22  ;;  %v3340_v27 = vadd.f32 %v3339_v15, %v3114_v19  ;;  %v3139_v1 = vpop.f32.mrf.mxu0  ;;  %v10253_v22 = vld [vmem:[#allocation68_spill] sm:$0xff] }
 0x24f   : > { %4323 = vmatmul.mubr.f32.gmra.mxu0 %v8957_v42  ;;  %v5826_v21 = vpop.f32.mrf.mxu1 }
 0x250   : > { %5982 = vmatmul.mubr.f32.gmra.mxu1 %v10242_v48  ;;  %v9349_v30 = vadd.f32 %v3340_v27, %v10243_v33  ;;  %4327 = vmatprep.mubr.f32.mxu0 %v10174_v28  ;;  %v3355_v0 = vadd.f32 %v5826_v21, %v3129_v58  ;;  %v3141_v24 = vpop.f32.mrf.mxu0  ;;  %v10254_v27 = vld [vmem:[#allocation15_spill] sm:$0xff]  ;;  %v10255_v48 = vld [vmem:[#allocation76_spill] sm:$0xff] }
 0x251   : > { %5984 = vmatprep.mubr.f32.mxu1 %v10244_v62  ;;  %v3349_v44 = vpop.f32.mrf.mxu1 }
 0x252   : > { %v9354_v7 = vadd.f32 %v3355_v0, %v10245_v35  ;;  %v3350_v19 = vadd.f32 %v3349_v44, %v3124_v5  ;;  %v3144_v26 = vpop.f32.mrf.mxu0  ;;  %v10257_v44 = vld [vmem:[#allocation3_spill] sm:$0xff] }
 0x253   : > { %4328 = vmatmul.mubr.f32.gmra.mxu0 %v10246_v39  ;;  %v5829_v42 = vpop.f32.mrf.mxu1 }
 0x254   : > { %5985 = vmatmul.mubr.f32.gmra.mxu1 %v10247_v41  ;;  %v9359_v9 = vadd.f32 %v3350_v19, %v10248_v16  ;;  %4332 = vmatprep.mubr.f32.mxu0 %v10249_v54  ;;  %v3365_v28 = vadd.f32 %v5829_v42, %v3139_v1  ;;  %v3146_v58 = vpop.f32.mrf.mxu0  ;;  %v10256_v1 = vld [vmem:[#allocation71_spill] sm:$0xff]  ;;  %v10259_v42 = vld [vmem:[#allocation72_spill] sm:$0xff] }
 0x255   : > { %5987 = vmatprep.mubr.f32.mxu1 %v10250_v37  ;;  %v3359_v63 = vpop.f32.mrf.mxu1  ;;  %v10260_v41 = vld [vmem:[#allocation79_spill] sm:$0xff]  ;;  %v10261_v54 = vld [vmem:[#allocation16_spill] sm:$0xff]  ;;  %v10262_v58 = vld [vmem:[#allocation74_spill] sm:$0xff] }
 0x256   : > { %v9364_v40 = vadd.f32 %v3365_v28, %v10251_v36  ;;  %v3360_v5 = vadd.f32 %v3359_v63, %v3134_v45  ;;  %v10258_v45 = vld [vmem:[#allocation44_spill] sm:$0xff]  ;;  %v10263_v36 = vld [vmem:[#allocation34_spill] sm:$0xff] }
 0x257   : > { %4333 = vmatmul.mubr.f32.gmra.mxu0 %v10252_v51  ;;  %v3149_v15 = vpop.f32.mrf.mxu0  ;;  %v10264_v51 = vld [vmem:[#allocation75_spill] sm:$0xff] }
 0x258   : > { %5988 = vmatmul.mubr.f32.gmra.mxu1 %v10253_v22  ;;  %v9369_v21 = vadd.f32 %v3360_v5, %v10254_v27  ;;  %4337 = vmatprep.mubr.f32.mxu0 %v10255_v48  ;;  %v5832_v33 = vpop.f32.mrf.mxu1  ;;  %v10266_v22 = vld [vmem:[#allocation69_spill] sm:$0xff] }
 0x259   : > { %5990 = vmatprep.mubr.f32.mxu1 %v10256_v1  ;;  %v3375_v0 = vadd.f32 %v5832_v33, %v3149_v15  ;;  %v3151_v24 = vpop.f32.mrf.mxu0  ;;  %v10265_v15 = vld [vmem:[#allocation82_spill] sm:$0xff]  ;;  %v10267_v1 = vld [vmem:[#allocation77_spill] sm:$0xff] }
 0x25a   : > { %v3369_v62 = vpop.f32.mrf.mxu1  ;;  %v10268_v24 = vld [vmem:[#allocation17_spill] sm:$0xff] }
 0x25b   : > { %v9374_v35 = vadd.f32 %v3375_v0, %v10257_v44  ;;  %4338 = vmatmul.mubr.f32.gmra.mxu0 %v10258_v45  ;;  %v3370_v19 = vadd.f32 %v3369_v62, %v3144_v26  ;;  %v3154_v39 = vpop.f32.mrf.mxu0  ;;  %v10269_v44 = vld [vmem:[#allocation19_spill] sm:$0xff] }
 0x25c   : > { %5991 = vmatmul.mubr.f32.gmra.mxu1 %v10259_v42  ;;  %4342 = vmatprep.mubr.f32.mxu0 %v10260_v41  ;;  %v5835_v16 = vpop.f32.mrf.mxu1 }
 0x25d   : > { %v9380_v28 = vadd.f32 %v3370_v19, %v10261_v54  ;;  %5993 = vmatprep.mubr.f32.mxu1 %v10262_v58  ;;  %v3156_v37 = vpop.f32.mrf.mxu0  ;;  %v10270_v19 = vld [vmem:[#allocation78_spill] sm:$0xff]  ;;  %v10272_v58 = vld [vmem:[#allocation80_spill] sm:$0xff] }
 0x25e   : > { %v3379_v63 = vpop.f32.mrf.mxu1  ;;  %v10273_v37 = vld [vmem:[#allocation18_spill] sm:$0xff] }
 0x25f   : > { %4343 = vmatmul.mubr.f32.gmra.mxu0 %v10263_v36  ;;  %v3380_v5 = vadd.f32 %v3379_v63, %v3154_v39  ;;  %v10271_v39 = vld [vmem:[#allocation87_spill] sm:$0xff]  ;;  %v10274_v36 = vld [vmem:[#allocation20_spill] sm:$0xff] }
 0x260   : > { %5994 = vmatmul.mubr.f32.gmra.mxu1 %v10264_v51  ;;  %4347 = vmatprep.mubr.f32.mxu0 %v10265_v15  ;;  %v3159_v26 = vpop.f32.mrf.mxu0  ;;  %v10275_v51 = vld [vmem:[#allocation89_spill] sm:$0xff] }
 0x261   : > { %v9387_v27 = vadd.f32 %v3380_v5, %v10266_v22  ;;  %v3385_v48 = vadd.f32 %v5835_v16, %v3159_v26  ;;  %v5838_v33 = vpop.f32.mrf.mxu1  ;;  %5996 = vmatprep.mubr.f32.mxu1 %v10267_v1  ;;  %v10276_v15 = vld [vmem:[#allocation81_spill] sm:$0xff]  ;;  %v10277_v22 = vld [vmem:[#allocation83_spill] sm:$0xff] }
 0x262   : > { %v3161_v0 = vpop.f32.mrf.mxu0 }
 0x263   : > { %v9391_v62 = vadd.f32 %v3385_v48, %v10268_v24  ;;  %4348 = vmatmul.mubr.f32.gmra.mxu0 %v10269_v44  ;;  %v3389_v45 = vpop.f32.mrf.mxu1  ;;  %v10278_v0 = vld [vmem:[#allocation64_spill] sm:$0xff] }
 0x264   : > { %5997 = vmatmul.mubr.f32.gmra.mxu1 %v10270_v19  ;;  %4352 = vmatprep.mubr.f32.mxu0 %v10271_v39  ;;  %v3164_v42 = vpop.f32.mrf.mxu0  ;;  %v10279_v44 = vld [vmem:[#allocation56_spill] sm:$0xff] }
 0x265   : > { %v3390_v41 = vadd.f32 %v3389_v45, %v3164_v42  ;;  %v5841_v54 = vpop.f32.mrf.mxu1  ;;  %5999 = vmatprep.mubr.f32.mxu1 %v10272_v58  ;;  %v10280_v39 = vld [vmem:[#allocation92_spill] sm:$0xff]  ;;  %v10281_v42 = vld [vmem:[#allocation85_spill] sm:$0xff] }
 0x266   : > { %v3166_v16 = vpop.f32.mrf.mxu0  ;;  %v10282_v58 = vld [vmem:[#allocation88_spill] sm:$0xff] }
 0x267   : > { %v9398_v63 = vadd.f32 %v3390_v41, %v10273_v37  ;;  %4353 = vmatmul.mubr.f32.gmra.mxu0 %v10274_v36  ;;  %v3399_v5 = vpop.f32.mrf.mxu1  ;;  %v9413_v36 = vld [vmem:[%s9069_s19 + $0x18] sm:$0xff] }
 0x268   : > { %4357 = vmatprep.mubr.f32.mxu0 %v10275_v51  ;;  %6000 = vmatmul.mubr.f32.gmra.mxu1 %v10276_v15  ;;  %v9416_v51 = vld [vmem:[%s9069_s19 + $0x20] sm:$0xff]  ;;  %v10283_v15 = vld [vmem:[#allocation52_spill] sm:$0xff] }
 0x269   : > { %v3169_v26 = vpop.f32.mrf.mxu0  ;;  %6002 = vmatprep.mubr.f32.mxu1 %v10277_v22 }
 0x26a   : > { %v3395_v48 = vadd.f32 %v5838_v33, %v3169_v26  ;;  %v5844_v1 = vpop.f32.mrf.mxu1 }
 0x26b   : > { %4358 = vmatmul.mubr.f32.gmra.mxu0 %v10278_v0  ;;  %v3171_v24 = vpop.f32.mrf.mxu0 }
 0x26c   : > { %v9406_v45 = vadd.f32 %v3395_v48, %v10279_v44  ;;  %v3409_v19 = vpop.f32.mrf.mxu1  ;;  %4362 = vmatprep.mubr.f32.mxu0 %v10280_v39  ;;  %6003 = vmatmul.mubr.f32.gmra.mxu1 %v10281_v42  ;;  %v10285_v48 = vld [vmem:[#allocation7_spill] sm:$0xff]  ;;  %v9427_v24 = vld [vmem:[%s9069_s19 + $0x28] sm:$0x3]  ;;  %v10286_v42 = vld [vmem:[#allocation5_spill] sm:$0xff] }
 0x26d   : > { %v3174_v41 = vpop.f32.mrf.mxu0  ;;  %6005 = vmatprep.mubr.f32.mxu1 %v10282_v58  ;;  %v10287_v58 = vld [vmem:[#allocation91_spill] sm:$0xff] }
 0x26e   : > { %v3400_v16 = vadd.f32 %v3399_v5, %v3174_v41  ;;  %v5847_v37 = vpop.f32.mrf.mxu1  ;;  %v2919_v5 = vrot.slane %v9413_v36, 2 }
 0x26f   : > { %4363 = vmatmul.mubr.f32.gmra.mxu0 %v9142_v32  ;;  %v3176_v33 = vpop.f32.mrf.mxu0  ;;  %v2920_v32 = vrot.slane %v9416_v51, 2 }
 0x270   : > { %v9419_v26 = vadd.f32 %v3400_v16, %v10283_v15  ;;  %v3419_v22 = vpop.f32.mrf.mxu1  ;;  %4367 = vmatprep.mubr.f32.mxu0 %v10213_v56  ;;  %6006 = vmatmul.mubr.f32.gmra.mxu1 %v10285_v48  ;;  %v10288_v56 = vld [vmem:[#allocation36_spill] sm:$0xff]  ;;  %v10289_v33 = vld [vmem:[#allocation59_spill] sm:$0xff]  ;;  %v2922_v15 = vrot.slane %v9427_v24, 2 }
 0x271   : > { %6008 = vmatprep.mubr.f32.mxu1 %v10208_v52 }
 0x272   : > { %10284 = vst [vmem:[#allocation41_spill] sm:$0xff] %v9419_v26  ;;  %v3179_v0 = vpop.f32.mrf.mxu0  ;;  %v2921_v26 = vsel %vm753_vm0, %v2919_v5, %v2920_v32 }
 0x273   : > { %v3405_v44 = vadd.f32 %v5841_v54, %v3179_v0  ;;  %v5850_v39 = vpop.f32.mrf.mxu1  ;;  %4368 = vmatmul.mubr.f32.gmra.mxu0 %v10286_v42 }
 0x274   : > { %v3181_v41 = vpop.f32.mrf.mxu0  ;;  %4372 = vmatprep.mubr.f32.mxu0 %v10216_v59  ;;  %6009 = vmatmul.mubr.f32.gmra.mxu1 %v10287_v58  ;;  %v10290_v59 = vld [vmem:[#allocation22_spill] sm:$0xff] }
 0x275   : > { %v9433_v16 = vadd.f32 %v3405_v44, %v10288_v56  ;;  %v3429_v52 = vpop.f32.mrf.mxu1  ;;  %6011 = vmatprep.mubr.f32.mxu1 %v10289_v33  ;;  %v10291_v44 = vld [vmem:[#allocation21_spill] sm:$0xff]  ;;  %v2923_v56 = vsel %vm753_vm0, %v2920_v32, %v2922_v15 }
 0x276   : > { %v3184_v48 = vpop.f32.mrf.mxu0 }
 0x277   : > { %v3410_v54 = vadd.f32 %v3409_v19, %v3184_v48  ;;  %v9438_v0 = vpop.f32.mrf.mxu1  ;;  %4373 = vmatmul.mubr.f32.gmra.mxu0 %v9186_v47 }
 0x278   : > { %v3186_v42 = vpop.f32.mrf.mxu0  ;;  %4377 = vmatprep.mubr.f32.mxu0 %v10220_v23  ;;  %6012 = vmatmul.mubr.f32.gmra.mxu1 %v10290_v59  ;;  %v10292_v23 = vld [vmem:[#allocation4_spill] sm:$0xff] }
 0x279   : > { %v9444_v41 = vadd.f32 %v3410_v54, %v10291_v44  ;;  %v3439_v58 = vpop.f32.mrf.mxu1  ;;  %6014 = vmatprep.mubr.f32.mxu1 %v2921_v26 }
 0x27b   : > { %v3189_v33 = vpop.f32.mrf.mxu0  ;;  %4378 = vmatmul.mubr.f32.gmra.mxu0 %v9205_v61 }
 0x27c   : > { %v3415_v19 = vadd.f32 %v5844_v1, %v3189_v33  ;;  %v9448_v5 = vpop.f32.mrf.mxu1  ;;  %4382 = vmatprep.mubr.f32.mxu0 %v10223_v25  ;;  %6015 = vmatmul.mubr.f32.gmra.mxu1 %v2923_v56  ;;  %v10293_v33 = vld [vmem:[#allocation39_spill] sm:$0xff] }
 0x27d   : > { %v3191_v47 = vpop.f32.mrf.mxu0 }
 0x27e   : > { %v9452_v48 = vadd.f32 %v3415_v19, %v10292_v23  ;;  %v3449_v42 = vpop.f32.mrf.mxu1  ;;  %v10294_v23 = vld [vmem:[#allocation38_spill] sm:$0xff] }
 0x27f   : > { %v3194_v54 = vpop.f32.mrf.mxu0  ;;  %4383 = vmatmul.mubr.f32.gmra.mxu0 %v9221_v55 }
 0x280   : > { %v3420_v26 = vadd.f32 %v3419_v22, %v3194_v54  ;;  %v9455_v59 = vpop.f32.mrf.mxu1  ;;  %4387 = vmatprep.mubr.f32.mxu0 %v10225_v14 }
 0x281   : > { %v3196_v61 = vpop.f32.mrf.mxu0 }
 0x282   : > { %v9459_v1 = vadd.f32 %v3420_v26, %v9176_v13  ;;  %v3671_v32 = vpop.f32.mrf.mxu1 }
 0x283   : > { %v3199_v25 = vpop.f32.mrf.mxu0  ;;  %4388 = vmatmul.mubr.f32.gmra.mxu0 %v9240_v43  ;;  %v10295_v32 = vld [vmem:[#allocation43_spill] sm:$0xff] }
 0x284   : > { %v3425_v15 = vadd.f32 %v5847_v37, %v3199_v25  ;;  %v3674_v44 = vpop.f32.mrf.mxu1  ;;  %4392 = vmatprep.mubr.f32.mxu0 %v10228_v57 }
 0x285   : > { %v3201_v56 = vpop.f32.mrf.mxu0 }
 0x286   : > { %v9464_v55 = vadd.f32 %v3425_v15, %v10293_v33  ;;  %v3676_v22 = vpop.f32.mrf.mxu1 }
 0x287   : > { %v3204_v19 = vpop.f32.mrf.mxu0  ;;  %4393 = vmatmul.mubr.f32.gmra.mxu0 %v9255_v3  ;;  %v2793_v3 = vrot.slane %v9413_v36, 1 }
 0x288   : > { %v3430_v14 = vadd.f32 %v3429_v52, %v3204_v19  ;;  %v9467_v47 = vpop.f32.mrf.mxu1  ;;  %4397 = vmatprep.mubr.f32.mxu0 %v8752_v50  ;;  %v2794_v52 = vrot.slane %v9416_v51, 1 }
 0x289   : > { %v3206_v13 = vpop.f32.mrf.mxu0 }
 0x28a   : > { %v9471_v43 = vadd.f32 %v3430_v14, %v10294_v23  ;;  %v3681_v37 = vpop.f32.mrf.mxu1 }
 0x28b   : > { %v3209_v54 = vpop.f32.mrf.mxu0  ;;  %4398 = vmatmul.mubr.f32.gmra.mxu0 %v9272_v10 }
 0x28c   : > { %v3435_v57 = vadd.f32 %v5850_v39, %v3209_v54  ;;  %v3684_v26 = vpop.f32.mrf.mxu1  ;;  %4402 = vmatprep.mubr.f32.mxu0 %v9265_v60  ;;  %v2795_v39 = vsel %vm626_vm1, %v2793_v3, %v2794_v52  ;;  %v2796_v60 = vrot.slane %v9427_v24, 1 }
 0x28d   : > { %v3211_v61 = vpop.f32.mrf.mxu0 }
 0x28e   : > { %v9478_v25 = vadd.f32 %v3435_v57, %v10295_v32  ;;  %v3686_v50 = vpop.f32.mrf.mxu1 }
 0x28f   : > { %v3214_v15 = vpop.f32.mrf.mxu0  ;;  %4403 = vmatmul.mubr.f32.gmra.mxu0 %v9089_v31 }
 0x290   : > { %v3440_v56 = vadd.f32 %v3439_v58, %v3214_v15  ;;  %v3689_v33 = vpop.f32.mrf.mxu1  ;;  %4407 = vmatprep.mubr.f32.mxu0 %v9282_v34  ;;  %v2797_v58 = vsel %vm626_vm1, %v2794_v52, %v2796_v60 }
 0x291   : > { %v3216_v10 = vpop.f32.mrf.mxu0 }
 0x292   : > { %v9485_v22 = vadd.f32 %v3440_v56, %v9247_v38  ;;  %v3691_v19 = vpop.f32.mrf.mxu1 }
 0x293   : > { %v3219_v14 = vpop.f32.mrf.mxu0  ;;  %4408 = vmatmul.mubr.f32.gmra.mxu0 %v9092_v20 }
 0x294   : > { %v3445_v13 = vadd.f32 %v9438_v0, %v3219_v14  ;;  %v3694_v23 = vpop.f32.mrf.mxu1  ;;  %4412 = vmatprep.mubr.f32.mxu0 %v2795_v39 }
 0x295   : > { %v3221_v31 = vpop.f32.mrf.mxu0 }
 0x296   : > { %v9491_v34 = vadd.f32 %v3445_v13, %v9262_v4  ;;  %v3696_v37 = vpop.f32.mrf.mxu1 }
 0x297   : > { %v3224_v54 = vpop.f32.mrf.mxu0  ;;  %4413 = vmatmul.mubr.f32.gmra.mxu0 %v9413_v36 }
 0x298   : > { %v3450_v38 = vadd.f32 %v3449_v42, %v3224_v54  ;;  %v3699_v24 = vpop.f32.mrf.mxu1  ;;  %4417 = vmatprep.mubr.f32.mxu0 %v2797_v58 }
 0x299   : > { %v3226_v57 = vpop.f32.mrf.mxu0 }
 0x29a   : > { %v9495_v20 = vadd.f32 %v3450_v38, %v9279_v8  ;;  %v3701_v0 = vpop.f32.mrf.mxu1 }
 0x29b   : > { %v3229_v61 = vpop.f32.mrf.mxu0  ;;  %4418 = vmatmul.mubr.f32.gmra.mxu0 %v9416_v51 }
 0x29c   : > { %v3455_v3 = vadd.f32 %v9448_v5, %v3229_v61  ;;  %v3704_v52 = vpop.f32.mrf.mxu1 }
 0x29d   : > { %v3231_v4 = vpop.f32.mrf.mxu0 }
 0x29e   : > { %v9500_v32 = vadd.f32 %v3455_v3, %v9290_v49  ;;  %v3706_v50 = vpop.f32.mrf.mxu1 }
 0x29f   : > { %v5891_v36 = vpop.f32.mrf.mxu0 }
 0x2a0   : > { %v3709_v42 = vpop.f32.mrf.mxu1  ;;  %v3900_v15 = vadd.f32 %v5891_v36, %v3674_v44 }
 0x2a1   : > { %v3894_v56 = vpop.f32.mrf.mxu0 }
 0x2a2   : > { %v9503_v10 = vadd.f32 %v3900_v15, %v9298_v11  ;;  %v3711_v8 = vpop.f32.mrf.mxu1  ;;  %v3895_v39 = vadd.f32 %v3894_v56, %v9455_v59 }
 0x2a3   : > { %v5894_v60 = vpop.f32.mrf.mxu0 }
 0x2a4   : > { %v9507_v51 = vadd.f32 %v3895_v39, %v9304_v46  ;;  %v3714_v5 = vpop.f32.mrf.mxu1  ;;  %v3910_v19 = vadd.f32 %v5894_v60, %v3684_v26 }
 0x2a5   : > { %v3904_v14 = vpop.f32.mrf.mxu0 }
 0x2a6   : > { %v9510_v49 = vadd.f32 %v3910_v19, %v9310_v29  ;;  %v3716_v13 = vpop.f32.mrf.mxu1  ;;  %v3905_v44 = vadd.f32 %v3904_v14, %v9467_v47 }
 0x2a7   : > { %v5897_v31 = vpop.f32.mrf.mxu0 }
 0x2a8   : > { %v9514_v11 = vadd.f32 %v3905_v44, %v9316_v12  ;;  %v3719_v58 = vpop.f32.mrf.mxu1  ;;  %v3920_v37 = vadd.f32 %v5897_v31, %v3694_v23 }
 0x2a9   : > { %v3914_v59 = vpop.f32.mrf.mxu0 }
 0x2aa   : > { %v9517_v54 = vadd.f32 %v3920_v37, %v9322_v53  ;;  %v3721_v46 = vpop.f32.mrf.mxu1  ;;  %v3915_v38 = vadd.f32 %v3914_v59, %v3689_v33 }
 0x2ab   : > { %v5900_v26 = vpop.f32.mrf.mxu0 }
 0x2ac   : > { %v9520_v57 = vadd.f32 %v3915_v38, %v9328_v17  ;;  %v3724_v29 = vpop.f32.mrf.mxu1  ;;  %v3930_v0 = vadd.f32 %v5900_v26, %v3704_v52 }
 0x2ad   : > { %v3924_v61 = vpop.f32.mrf.mxu0 }
 0x2ae   : > { %v9523_v47 = vadd.f32 %v3930_v0, %v9333_v18  ;;  %v3726_v12 = vpop.f32.mrf.mxu1  ;;  %v3925_v3 = vadd.f32 %v3924_v61, %v3699_v24 }
 0x2af   : > { %v5903_v4 = vpop.f32.mrf.mxu0 }
 0x2b0   : > { %v9526_v23 = vadd.f32 %v3925_v3, %v9339_v6  ;;  %v3729_v53 = vpop.f32.mrf.mxu1  ;;  %v3940_v50 = vadd.f32 %v5903_v4, %v3714_v5 }
 0x2b1   : > { %v3934_v36 = vpop.f32.mrf.mxu0 }
 0x2b2   : > { %v9529_v33 = vadd.f32 %v3940_v50, %v9344_v2  ;;  %v3731_v17 = vpop.f32.mrf.mxu1  ;;  %v3935_v15 = vadd.f32 %v3934_v36, %v3709_v42 }
 0x2b3   : > { %v5906_v56 = vpop.f32.mrf.mxu0 }
 0x2b4   : > { %v9532_v52 = vadd.f32 %v3935_v15, %v9349_v30  ;;  %v3734_v18 = vpop.f32.mrf.mxu1  ;;  %v3950_v8 = vadd.f32 %v5906_v56, %v3724_v29 }
 0x2b5   : > { %v3944_v39 = vpop.f32.mrf.mxu0 }
 0x2b6   : > { %v9535_v24 = vadd.f32 %v3950_v8, %v9354_v7  ;;  %v3736_v6 = vpop.f32.mrf.mxu1  ;;  %v3945_v60 = vadd.f32 %v3944_v39, %v3719_v58 }
 0x2b7   : > { %v5909_v19 = vpop.f32.mrf.mxu0 }
 0x2b8   : > { %v9538_v5 = vadd.f32 %v3945_v60, %v9359_v9  ;;  %v3739_v2 = vpop.f32.mrf.mxu1  ;;  %v3960_v14 = vadd.f32 %v5909_v19, %v3734_v18 }
 0x2b9   : > { %v3954_v13 = vpop.f32.mrf.mxu0 }
 0x2ba   : > { %v9541_v42 = vadd.f32 %v3960_v14, %v9364_v40  ;;  %v3741_v30 = vpop.f32.mrf.mxu1  ;;  %v3955_v44 = vadd.f32 %v3954_v13, %v3729_v53 }
 0x2bb   : > { %v5912_v31 = vpop.f32.mrf.mxu0 }
 0x2bc   : > { %v9544_v37 = vadd.f32 %v3955_v44, %v9369_v21  ;;  %v3744_v7 = vpop.f32.mrf.mxu1 }
 0x2bd   : > { %v3970_v59 = vadd.f32 %v5912_v31, %v3744_v7  ;;  %v3964_v46 = vpop.f32.mrf.mxu0  ;;  %v10296_v31 = vld [vmem:[#allocation41_spill] sm:$0xff] }
 0x2be   : > { %v3746_v58 = vpop.f32.mrf.mxu1  ;;  %v3965_v38 = vadd.f32 %v3964_v46, %v3739_v2 }
 0x2bf   : > { %v9547_v9 = vadd.f32 %v3970_v59, %v9374_v35  ;;  %v5915_v26 = vpop.f32.mrf.mxu0 }
 0x2c0   : > { %v9550_v29 = vadd.f32 %v3965_v38, %v9380_v28  ;;  %v3749_v40 = vpop.f32.mrf.mxu1 }
 0x2c1   : > { %v3974_v0 = vpop.f32.mrf.mxu0 }
 0x2c2   : > { %v3751_v61 = vpop.f32.mrf.mxu1  ;;  %v3975_v12 = vadd.f32 %v3974_v0, %v3749_v40 }
 0x2c3   : > { %v5918_v3 = vpop.f32.mrf.mxu0 }
 0x2c4   : > { %v9553_v21 = vadd.f32 %v3975_v12, %v9387_v27  ;;  %v3754_v4 = vpop.f32.mrf.mxu1 }
 0x2c5   : > { %v3980_v53 = vadd.f32 %v5915_v26, %v3754_v4  ;;  %v3984_v50 = vpop.f32.mrf.mxu0 }
 0x2c6   : > { %v3756_v36 = vpop.f32.mrf.mxu1 }
 0x2c7   : > { %v9556_v17 = vadd.f32 %v3980_v53, %v9391_v62  ;;  %v5921_v35 = vpop.f32.mrf.mxu0 }
 0x2c8   : > { %v3759_v15 = vpop.f32.mrf.mxu1 }
 0x2c9   : > { %v3985_v56 = vadd.f32 %v3984_v50, %v3759_v15  ;;  %v3994_v28 = vpop.f32.mrf.mxu0 }
 0x2ca   : > { %v3761_v18 = vpop.f32.mrf.mxu1 }
 0x2cb   : > { %v9559_v8 = vadd.f32 %v3985_v56, %v9398_v63  ;;  %v5924_v39 = vpop.f32.mrf.mxu0 }
 0x2cc   : > { %v3764_v6 = vpop.f32.mrf.mxu1 }
 0x2cd   : > { %v3990_v60 = vadd.f32 %v5918_v3, %v3764_v6  ;;  %v4004_v27 = vpop.f32.mrf.mxu0 }
 0x2ce   : > { %v3766_v19 = vpop.f32.mrf.mxu1 }
 0x2cf   : > { %v9562_v2 = vadd.f32 %v3990_v60, %v9406_v45  ;;  %v5927_v14 = vpop.f32.mrf.mxu0 }
 0x2d0   : > { %v3769_v13 = vpop.f32.mrf.mxu1 }
 0x2d1   : > { %v3995_v62 = vadd.f32 %v3994_v28, %v3769_v13  ;;  %v4014_v30 = vpop.f32.mrf.mxu0 }
 0x2d2   : > { %v3771_v44 = vpop.f32.mrf.mxu1 }
 0x2d3   : > { %v9565_v7 = vadd.f32 %v3995_v62, %v10296_v31  ;;  %v5930_v59 = vpop.f32.mrf.mxu0 }
 0x2d4   : > { %v3774_v46 = vpop.f32.mrf.mxu1 }
 0x2d5   : > { %v4000_v63 = vadd.f32 %v5921_v35, %v3774_v46  ;;  %v4024_v58 = vpop.f32.mrf.mxu0 }
 0x2d6   : > { %v3776_v38 = vpop.f32.mrf.mxu1 }
 0x2d7   : > { %v9568_v26 = vadd.f32 %v4000_v63, %v9433_v16  ;;  %v5933_v40 = vpop.f32.mrf.mxu0 }
 0x2d8   : > { %v3779_v0 = vpop.f32.mrf.mxu1 }
 0x2d9   : > { %v4005_v45 = vadd.f32 %v4004_v27, %v3779_v0  ;;  %v4034_v61 = vpop.f32.mrf.mxu0 }
 0x2da   : > { %v3781_v12 = vpop.f32.mrf.mxu1 }
 0x2db   : > { %v9571_v3 = vadd.f32 %v4005_v45, %v9444_v41  ;;  %v5936_v4 = vpop.f32.mrf.mxu0 }
 0x2dc   : > { %v3784_v53 = vpop.f32.mrf.mxu1 }
 0x2dd   : > { %v4010_v50 = vadd.f32 %v5924_v39, %v3784_v53  ;;  %v4044_v36 = vpop.f32.mrf.mxu0 }
 0x2de   : > { %v3786_v15 = vpop.f32.mrf.mxu1 }
 0x2df   : > { %v9574_v35 = vadd.f32 %v4010_v50, %v9452_v48  ;;  %v4264_v56 = vpop.f32.mrf.mxu0 }
 0x2e0   : > { %v3789_v28 = vpop.f32.mrf.mxu1 }
 0x2e1   : > { %v4015_v16 = vadd.f32 %v4014_v30, %v3789_v28  ;;  %v4266_v18 = vpop.f32.mrf.mxu0 }
 0x2e2   : > { %v3791_v6 = vpop.f32.mrf.mxu1 }
 0x2e3   : > { %v9577_v60 = vadd.f32 %v4015_v16, %v9459_v1  ;;  %v4269_v27 = vpop.f32.mrf.mxu0 }
 0x2e4   : > { %v3794_v19 = vpop.f32.mrf.mxu1 }
 0x2e5   : > { %v4020_v41 = vadd.f32 %v5927_v14, %v3794_v19  ;;  %v4271_v13 = vpop.f32.mrf.mxu0 }
 0x2e6   : > { %v3796_v62 = vpop.f32.mrf.mxu1 }
 0x2e7   : > { %v9580_v39 = vadd.f32 %v4020_v41, %v9464_v55  ;;  %v4274_v44 = vpop.f32.mrf.mxu0 }
 0x2e8   : > { %v3799_v31 = vpop.f32.mrf.mxu1 }
 0x2e9   : > { %v4025_v48 = vadd.f32 %v4024_v58, %v3799_v31  ;;  %v4276_v46 = vpop.f32.mrf.mxu0 }
 0x2ea   : > { %v3801_v63 = vpop.f32.mrf.mxu1 }
 0x2eb   : > { %v9583_v30 = vadd.f32 %v4025_v48, %v9471_v43  ;;  %v4279_v38 = vpop.f32.mrf.mxu0 }
 0x2ec   : > { %v3804_v0 = vpop.f32.mrf.mxu1 }
 0x2ed   : > { %v4030_v1 = vadd.f32 %v5930_v59, %v3804_v0  ;;  %v4281_v45 = vpop.f32.mrf.mxu0 }
 0x2ee   : > { %v3806_v12 = vpop.f32.mrf.mxu1 }
 0x2ef   : > { %v9586_v14 = vadd.f32 %v4030_v1, %v9478_v25  ;;  %v4284_v53 = vpop.f32.mrf.mxu0 }
 0x2f0   : > { %v3809_v50 = vpop.f32.mrf.mxu1 }
 0x2f1   : > { %v4035_v55 = vadd.f32 %v4034_v61, %v3809_v50  ;;  %v4286_v15 = vpop.f32.mrf.mxu0 }
 0x2f2   : > { %v3811_v28 = vpop.f32.mrf.mxu1 }
 0x2f3   : > { %v9589_v58 = vadd.f32 %v4035_v55, %v9485_v22  ;;  %v4289_v16 = vpop.f32.mrf.mxu0 }
 0x2f4   : > { %v3814_v18 = vpop.f32.mrf.mxu1 }
 0x2f5   : > { %v4040_v43 = vadd.f32 %v5933_v40, %v3814_v18  ;;  %v4291_v6 = vpop.f32.mrf.mxu0 }
 0x2f6   : > { %v3816_v19 = vpop.f32.mrf.mxu1 }
 0x2f7   : > { %v9592_v59 = vadd.f32 %v4040_v43, %v9491_v34  ;;  %v4294_v41 = vpop.f32.mrf.mxu0 }
 0x2f8   : > { %v3819_v13 = vpop.f32.mrf.mxu1 }
 0x2f9   : > { %v4045_v25 = vadd.f32 %v4044_v36, %v3819_v13  ;;  %v4296_v62 = vpop.f32.mrf.mxu0  ;;  %v9603_v36 = vld [vmem:[%s9722_s6] ss:$0 sm:$0xff] }
 0x2fa   : > { %v3821_v31 = vpop.f32.mrf.mxu1 }
 0x2fb   : > { %v9595_v61 = vadd.f32 %v4045_v25, %v9495_v20  ;;  %v4299_v48 = vpop.f32.mrf.mxu0 }
 0x2fc   : > { %v3824_v22 = vpop.f32.mrf.mxu1 }
 0x2fd   : > { %v4050_v46 = vadd.f32 %v5936_v4, %v3824_v22  ;;  %v4301_v63 = vpop.f32.mrf.mxu0 }
 0x2fe   : > { %v3826_v0 = vpop.f32.mrf.mxu1 }
 0x2ff   : > { %v9598_v40 = vadd.f32 %v4050_v46, %v9500_v32  ;;  %v4304_v1 = vpop.f32.mrf.mxu0 }
 0x300   : > { %v5971_v34 = vpop.f32.mrf.mxu1 }
 0x301   : > { %v4495_v45 = vadd.f32 %v5971_v34, %v4269_v27  ;;  %v4306_v12 = vpop.f32.mrf.mxu0 }
 0x302   : > { %v4489_v50 = vpop.f32.mrf.mxu1 }
 0x303   : > { %v4681_v20 = vadd.f32 %v4495_v45, %v9503_v10  ;;  %v4490_v55 = vadd.f32 %v4489_v50, %v4264_v56  ;;  %v4309_v4 = vpop.f32.mrf.mxu0 }
 0x304   : > { %v5974_v15 = vpop.f32.mrf.mxu1 }
 0x305   : > { %v4784_v28 = vadd.f32 %v9603_v36, %v4681_v20  ;;  %v4680_v32 = vadd.f32 %v4490_v55, %v9507_v51  ;;  %v4505_v18 = vadd.f32 %v5974_v15, %v4279_v38  ;;  %v4311_v43 = vpop.f32.mrf.mxu0 }
 0x306   : > { %v4499_v27 = vpop.f32.mrf.mxu1 }
 0x307   : > { %v4816_v6 = vmax.f32 %v4784_v28, 0.0  ;;  %v4783_v10 = vadd.f32 %v9603_v36, %v4680_v32  ;;  %v4683_v56 = vadd.f32 %v4505_v18, %v9510_v49  ;;  %v4500_v19 = vadd.f32 %v4499_v27, %v4274_v44  ;;  %v4314_v13 = vpop.f32.mrf.mxu0 }
 0x308   : > { %v5977_v25 = vpop.f32.mrf.mxu1 }
 0x309   : > { %4848 = vst [vmem:[%s9612_s23 + $0x8] sm:$0xff] %v4816_v6  ;;  %v4815_v51 = vmax.f32 %v4783_v10, 0.0  ;;  %v4786_v38 = vadd.f32 %v9603_v36, %v4683_v56  ;;  %v4682_v62 = vadd.f32 %v4500_v19, %v9514_v11  ;;  %v4515_v31 = vadd.f32 %v5977_v25, %v4289_v16  ;;  %v4316_v22 = vpop.f32.mrf.mxu0 }
 0x30a   : > { %v4509_v46 = vpop.f32.mrf.mxu1 }
 0x30b   : > { %4847 = vst [vmem:[%s9612_s23] sm:$0xff] %v4815_v51  ;;  %v4818_v63 = vmax.f32 %v4786_v38, 0.0  ;;  %v4785_v0 = vadd.f32 %v9603_v36, %v4682_v62  ;;  %v4685_v49 = vadd.f32 %v4515_v31, %v9517_v54  ;;  %v4510_v44 = vadd.f32 %v4509_v46, %v4284_v53  ;;  %v4319_v34 = vpop.f32.mrf.mxu0 }
 0x30c   : > { %v5980_v45 = vpop.f32.mrf.mxu1 }
 0x30d   : > { %4850 = vst [vmem:[%s9612_s23 + $0x18] sm:$0xff] %v4818_v63  ;;  %v4817_v12 = vmax.f32 %v4785_v0, 0.0  ;;  %v4788_v50 = vadd.f32 %v9603_v36, %v4685_v49  ;;  %v4684_v11 = vadd.f32 %v4510_v44, %v9520_v57  ;;  %v4525_v16 = vadd.f32 %v5980_v45, %v4299_v48  ;;  %v4321_v20 = vpop.f32.mrf.mxu0 }
 0x30e   : > { %v4519_v55 = vpop.f32.mrf.mxu1 }
 0x30f   : > { %4849 = vst [vmem:[%s9612_s23 + $0x10] sm:$0xff] %v4817_v12  ;;  %v4820_v15 = vmax.f32 %v4788_v50, 0.0  ;;  %v4787_v28 = vadd.f32 %v9603_v36, %v4684_v11  ;;  %v4687_v54 = vadd.f32 %v4525_v16, %v9523_v47  ;;  %v4520_v53 = vadd.f32 %v4519_v55, %v4294_v41  ;;  %v4324_v32 = vpop.f32.mrf.mxu0 }
 0x310   : > { %v5983_v18 = vpop.f32.mrf.mxu1 }
 0x311   : > { %4852 = vst [vmem:[%s9612_s23 + $0x28] sm:$0xff] %v4820_v15  ;;  %v4819_v43 = vmax.f32 %v4787_v28, 0.0  ;;  %v4790_v27 = vadd.f32 %v9603_v36, %v4687_v54  ;;  %v4686_v57 = vadd.f32 %v4520_v53, %v9526_v23  ;;  %v4535_v48 = vadd.f32 %v5983_v18, %v4309_v4  ;;  %v4326_v6 = vpop.f32.mrf.mxu0 }
 0x312   : > { %v4529_v10 = vpop.f32.mrf.mxu1 }
 0x313   : > { %4851 = vst [vmem:[%s9612_s23 + $0x20] sm:$0xff] %v4819_v43  ;;  %v4822_v56 = vmax.f32 %v4790_v27, 0.0  ;;  %v4789_v19 = vadd.f32 %v9603_v36, %v4686_v57  ;;  %v4689_v47 = vadd.f32 %v4535_v48, %v9529_v33  ;;  %v4530_v41 = vadd.f32 %v4529_v10, %v4304_v1  ;;  %v4329_v25 = vpop.f32.mrf.mxu0 }
 0x314   : > { %v5986_v51 = vpop.f32.mrf.mxu1 }
 0x315   : > { %4854 = vst [vmem:[%s9612_s23 + $0x38] sm:$0xff] %v4822_v56  ;;  %v4821_v38 = vmax.f32 %v4789_v19, 0.0  ;;  %v4792_v62 = vadd.f32 %v9603_v36, %v4689_v47  ;;  %v4688_v23 = vadd.f32 %v4530_v41, %v9532_v52  ;;  %v4545_v4 = vadd.f32 %v5986_v51, %v4319_v34  ;;  %v4331_v31 = vpop.f32.mrf.mxu0 }
 0x316   : > { %v4539_v22 = vpop.f32.mrf.mxu1 }
 0x317   : > { %4853 = vst [vmem:[%s9612_s23 + $0x30] sm:$0xff] %v4821_v38  ;;  %v4824_v46 = vmax.f32 %v4792_v62, 0.0  ;;  %v4791_v63 = vadd.f32 %v9603_v36, %v4688_v23  ;;  %v4691_v33 = vadd.f32 %v4545_v4, %v9535_v24  ;;  %v4540_v1 = vadd.f32 %v4539_v22, %v4314_v13  ;;  %v4334_v0 = vpop.f32.mrf.mxu0 }
 0x318   : > { %v5989_v49 = vpop.f32.mrf.mxu1 }
 0x319   : > { %4856 = vst [vmem:[%s9612_s23 + $0x48] sm:$0xff] %v4824_v46  ;;  %v4823_v44 = vmax.f32 %v4791_v63, 0.0  ;;  %v4794_v45 = vadd.f32 %v9603_v36, %v4691_v33  ;;  %v4690_v52 = vadd.f32 %v4540_v1, %v9538_v5  ;;  %v4555_v34 = vadd.f32 %v5989_v49, %v4329_v25  ;;  %v4336_v12 = vpop.f32.mrf.mxu0 }
 0x31a   : > { %v4549_v50 = vpop.f32.mrf.mxu1 }
 0x31b   : > { %4855 = vst [vmem:[%s9612_s23 + $0x40] sm:$0xff] %v4823_v44  ;;  %v4826_v11 = vmax.f32 %v4794_v45, 0.0  ;;  %v4793_v16 = vadd.f32 %v9603_v36, %v4690_v52  ;;  %v4693_v24 = vadd.f32 %v4555_v34, %v9541_v42  ;;  %v4550_v13 = vadd.f32 %v4549_v50, %v4324_v32  ;;  %v4339_v20 = vpop.f32.mrf.mxu0 }
 0x31c   : > { %v5992_v55 = vpop.f32.mrf.mxu1 }
 0x31d   : > { %4858 = vst [vmem:[%s9612_s23 + $0x58] sm:$0xff] %v4826_v11  ;;  %v4825_v15 = vmax.f32 %v4793_v16, 0.0  ;;  %v4796_v28 = vadd.f32 %v9603_v36, %v4693_v24  ;;  %v4692_v5 = vadd.f32 %v4550_v13, %v9544_v37  ;;  %v4565_v54 = vadd.f32 %v5992_v55, %v4339_v20  ;;  %v4341_v53 = vpop.f32.mrf.mxu0 }
 0x31e   : > { %v4559_v18 = vpop.f32.mrf.mxu1 }
 0x31f   : > { %4857 = vst [vmem:[%s9612_s23 + $0x50] sm:$0xff] %v4825_v15  ;;  %v4828_v43 = vmax.f32 %v4796_v28, 0.0  ;;  %v4795_v27 = vadd.f32 %v9603_v36, %v4692_v5  ;;  %v4695_v42 = vadd.f32 %v4565_v54, %v9547_v9  ;;  %v4560_v32 = vadd.f32 %v4559_v18, %v4334_v0  ;;  %v4344_v57 = vpop.f32.mrf.mxu0 }
 0x320   : > { %v5995_v48 = vpop.f32.mrf.mxu1 }
 0x321   : > { %4860 = vst [vmem:[%s9612_s23 + $0x68] sm:$0xff] %v4828_v43  ;;  %v4827_v6 = vmax.f32 %v4795_v27, 0.0  ;;  %v4798_v10 = vadd.f32 %v9603_v36, %v4695_v42  ;;  %v4694_v37 = vadd.f32 %v4560_v32, %v9550_v29  ;;  %v4346_v56 = vpop.f32.mrf.mxu0 }
 0x322   : > { %v4569_v19 = vpop.f32.mrf.mxu1 }
 0x323   : > { %4859 = vst [vmem:[%s9612_s23 + $0x60] sm:$0xff] %v4827_v6  ;;  %v4830_v47 = vmax.f32 %v4798_v10, 0.0  ;;  %v4797_v41 = vadd.f32 %v9603_v36, %v4694_v37  ;;  %v4570_v25 = vadd.f32 %v4569_v19, %v4344_v57  ;;  %v4349_v51 = vpop.f32.mrf.mxu0 }
 0x324   : > { %v4575_v9 = vadd.f32 %v5995_v48, %v4349_v51  ;;  %v5998_v38 = vpop.f32.mrf.mxu1 }
 0x325   : > { %4862 = vst [vmem:[%s9612_s23 + $0x78] sm:$0xff] %v4830_v47  ;;  %v4829_v62 = vmax.f32 %v4797_v41, 0.0  ;;  %v4696_v23 = vadd.f32 %v4570_v25, %v9553_v21  ;;  %v4351_v4 = vpop.f32.mrf.mxu0 }
 0x326   : > { %v4697_v29 = vadd.f32 %v4575_v9, %v9556_v17  ;;  %v4579_v31 = vpop.f32.mrf.mxu1 }
 0x327   : > { %4861 = vst [vmem:[%s9612_s23 + $0x70] sm:$0xff] %v4829_v62  ;;  %v4799_v22 = vadd.f32 %v9603_v36, %v4696_v23  ;;  %v4354_v46 = vpop.f32.mrf.mxu0 }
 0x328   : > { %v4800_v63 = vadd.f32 %v9603_v36, %v4697_v29  ;;  %v4580_v33 = vadd.f32 %v4579_v31, %v4354_v46  ;;  %v6001_v49 = vpop.f32.mrf.mxu1 }
 0x329   : > { %v4831_v1 = vmax.f32 %v4799_v22, 0.0  ;;  %v4356_v0 = vpop.f32.mrf.mxu0 }
 0x32a   : > { %v4832_v44 = vmax.f32 %v4800_v63, 0.0  ;;  %v4698_v45 = vadd.f32 %v4580_v33, %v9559_v8  ;;  %v4589_v12 = vpop.f32.mrf.mxu1 }
 0x32b   : > { %4863 = vst [vmem:[%s9612_s23 + $0x80] sm:$0xff] %v4831_v1  ;;  %v4359_v21 = vpop.f32.mrf.mxu0 }
 0x32c   : > { %4864 = vst [vmem:[%s9612_s23 + $0x88] sm:$0xff] %v4832_v44  ;;  %v4801_v17 = vadd.f32 %v9603_v36, %v4698_v45  ;;  %v4585_v52 = vadd.f32 %v5998_v38, %v4359_v21  ;;  %v6004_v8 = vpop.f32.mrf.mxu1 }
 0x32d   : > { %v4361_v34 = vpop.f32.mrf.mxu0 }
 0x32e   : > { %v4833_v50 = vmax.f32 %v4801_v17, 0.0  ;;  %v4699_v11 = vadd.f32 %v4585_v52, %v9562_v2  ;;  %v4599_v18 = vpop.f32.mrf.mxu1 }
 0x32f   : > { %v4364_v16 = vpop.f32.mrf.mxu0 }
 0x330   : > { %4865 = vst [vmem:[%s9612_s23 + $0x90] sm:$0xff] %v4833_v50  ;;  %v4802_v24 = vadd.f32 %v9603_v36, %v4699_v11  ;;  %v4590_v13 = vadd.f32 %v4589_v12, %v4364_v16  ;;  %v6007_v48 = vpop.f32.mrf.mxu1 }
 0x331   : > { %v4366_v20 = vpop.f32.mrf.mxu0 }
 0x332   : > { %v4834_v55 = vmax.f32 %v4802_v24, 0.0  ;;  %v4700_v15 = vadd.f32 %v4590_v13, %v9565_v7  ;;  %v4609_v47 = vpop.f32.mrf.mxu1 }
 0x333   : > { %v4369_v28 = vpop.f32.mrf.mxu0 }
 0x334   : > { %4866 = vst [vmem:[%s9612_s23 + $0x98] sm:$0xff] %v4834_v55  ;;  %v4803_v5 = vadd.f32 %v9603_v36, %v4700_v15  ;;  %v4595_v54 = vadd.f32 %v6001_v49, %v4369_v28  ;;  %v6010_v62 = vpop.f32.mrf.mxu1 }
 0x335   : > { %v4371_v53 = vpop.f32.mrf.mxu0 }
 0x336   : > { %v4835_v2 = vmax.f32 %v4803_v5, 0.0  ;;  %v4701_v43 = vadd.f32 %v4595_v54, %v9568_v26  ;;  %v4619_v46 = vpop.f32.mrf.mxu1 }
 0x337   : > { %v4374_v27 = vpop.f32.mrf.mxu0 }
 0x338   : > { %4867 = vst [vmem:[%s9612_s23 + $0xa0] sm:$0xff] %v4835_v2  ;;  %v4804_v42 = vadd.f32 %v9603_v36, %v4701_v43  ;;  %v4600_v32 = vadd.f32 %v4599_v18, %v4374_v27  ;;  %v6013_v44 = vpop.f32.mrf.mxu1 }
 0x339   : > { %v4376_v57 = vpop.f32.mrf.mxu0 }
 0x33a   : > { %v4836_v7 = vmax.f32 %v4804_v42, 0.0  ;;  %v4702_v6 = vadd.f32 %v4600_v32, %v9571_v3  ;;  %v4629_v12 = vpop.f32.mrf.mxu1 }
 0x33b   : > { %v4379_v10 = vpop.f32.mrf.mxu0 }
 0x33c   : > { %4868 = vst [vmem:[%s9612_s23 + $0xa8] sm:$0xff] %v4836_v7  ;;  %v4805_v37 = vadd.f32 %v9603_v36, %v4702_v6  ;;  %v4605_v56 = vadd.f32 %v6004_v8, %v4379_v10  ;;  %v6016_v20 = vpop.f32.mrf.mxu1 }
 0x33d   : > { %v4381_v19 = vpop.f32.mrf.mxu0 }
 0x33e   : > { %v4837_v26 = vmax.f32 %v4805_v37, 0.0  ;;  %v4703_v41 = vadd.f32 %v4605_v56, %v9574_v35  ;;  %v4639_v54 = vpop.f32.mrf.mxu1 }
 0x33f   : > { %v4384_v25 = vpop.f32.mrf.mxu0 }
 0x340   : > { %4869 = vst [vmem:[%s9612_s23 + $0xb0] sm:$0xff] %v4837_v26  ;;  %v4806_v51 = vadd.f32 %v9603_v36, %v4703_v41  ;;  %v4610_v9 = vadd.f32 %v4609_v47, %v4384_v25 }
 0x341   : > { %v4386_v38 = vpop.f32.mrf.mxu0 }
 0x342   : > { %v4838_v3 = vmax.f32 %v4806_v51, 0.0  ;;  %v4704_v23 = vadd.f32 %v4610_v9, %v9577_v60 }
 0x343   : > { %v4389_v4 = vpop.f32.mrf.mxu0 }
 0x344   : > { %4870 = vst [vmem:[%s9612_s23 + $0xb8] sm:$0xff] %v4838_v3  ;;  %v4807_v29 = vadd.f32 %v9603_v36, %v4704_v23  ;;  %v4615_v31 = vadd.f32 %v6007_v48, %v4389_v4 }
 0x345   : > { %v4391_v22 = vpop.f32.mrf.mxu0 }
 0x346   : > { %v4839_v35 = vmax.f32 %v4807_v29, 0.0  ;;  %v4705_v63 = vadd.f32 %v4615_v31, %v9580_v39 }
 0x347   : > { %v4394_v33 = vpop.f32.mrf.mxu0 }
 0x348   : > { %4871 = vst [vmem:[%s9612_s23 + $0xc0] sm:$0xff] %v4839_v35  ;;  %v4808_v1 = vadd.f32 %v9603_v36, %v4705_v63  ;;  %v4620_v0 = vadd.f32 %v4619_v46, %v4394_v33 }
 0x349   : > { %v4396_v49 = vpop.f32.mrf.mxu0 }
 0x34a   : > { %v4840_v60 = vmax.f32 %v4808_v1, 0.0  ;;  %v4706_v45 = vadd.f32 %v4620_v0, %v9583_v30 }
 0x34b   : > { %v4399_v21 = vpop.f32.mrf.mxu0 }
 0x34c   : > { %4872 = vst [vmem:[%s9612_s23 + $0xc8] sm:$0xff] %v4840_v60  ;;  %v4809_v17 = vadd.f32 %v9603_v36, %v4706_v45  ;;  %v4625_v52 = vadd.f32 %v6010_v62, %v4399_v21 }
 0x34d   : > { %v4401_v34 = vpop.f32.mrf.mxu0 }
 0x34e   : > { %v4841_v39 = vmax.f32 %v4809_v17, 0.0  ;;  %v4707_v50 = vadd.f32 %v4625_v52, %v9586_v14 }
 0x34f   : > { %v4404_v11 = vpop.f32.mrf.mxu0 }
 0x350   : > { %4873 = vst [vmem:[%s9612_s23 + $0xd0] sm:$0xff] %v4841_v39  ;;  %v4810_v16 = vadd.f32 %v9603_v36, %v4707_v50  ;;  %v4630_v24 = vadd.f32 %v4629_v12, %v4404_v11 }
 0x351   : > { %v4406_v13 = vpop.f32.mrf.mxu0 }
 0x352   : > { %v4842_v30 = vmax.f32 %v4810_v16, 0.0  ;;  %v4708_v8 = vadd.f32 %v4630_v24, %v9589_v58 }
 0x353   : > { %v4409_v55 = vpop.f32.mrf.mxu0 }
 0x354   : > { %4874 = vst [vmem:[%s9612_s23 + $0xd8] sm:$0xff] %v4842_v30  ;;  %v4811_v15 = vadd.f32 %v9603_v36, %v4708_v8  ;;  %v4635_v28 = vadd.f32 %v6013_v44, %v4409_v55 }
 0x355   : > { %v4411_v5 = vpop.f32.mrf.mxu0 }
 0x356   : > { %v4843_v14 = vmax.f32 %v4811_v15, 0.0  ;;  %v4709_v53 = vadd.f32 %v4635_v28, %v9592_v59 }
 0x357   : > { %v4414_v18 = vpop.f32.mrf.mxu0 }
 0x358   : > { %4875 = vst [vmem:[%s9612_s23 + $0xe0] sm:$0xff] %v4843_v14  ;;  %v4812_v2 = vadd.f32 %v9603_v36, %v4709_v53  ;;  %v4640_v43 = vadd.f32 %v4639_v54, %v4414_v18 }
 0x359   : > { %v4416_v27 = vpop.f32.mrf.mxu0 }
 0x35a   : > { %v4844_v58 = vmax.f32 %v4812_v2, 0.0  ;;  %v4710_v42 = vadd.f32 %v4640_v43, %v9595_v61 }
 0x35b   : > { %v4419_v32 = vpop.f32.mrf.mxu0 }
 0x35c   : > { %4876 = vst [vmem:[%s9612_s23 + $0xe8] sm:$0xff] %v4844_v58  ;;  %v4813_v57 = vadd.f32 %v9603_v36, %v4710_v42  ;;  %v4645_v48 = vadd.f32 %v6016_v20, %v4419_v32 }
 0x35d   : > { %v4421_v7 = vpop.f32.mrf.mxu0 }
 0x35e   : > { %v4845_v6 = vmax.f32 %v4813_v57, 0.0  ;;  %v4711_v10 = vadd.f32 %v4645_v48, %v9598_v40 }
 0x360   : > { %4877 = vst [vmem:[%s9612_s23 + $0xf0] sm:$0xff] %v4845_v6  ;;  %v4814_v59 = vadd.f32 %v9603_v36, %v4711_v10 }
 0x362   : > { %v4846_v37 = vmax.f32 %v4814_v59, 0.0 }
 0x364   : > { %4878 = vst [vmem:[%s9612_s23 + $0xf8] sm:$0xff] %v4846_v37 }
 0x365 PF: > { %s17_s26 = sadd.s32 1, %s6125_s26   ;;  %s10297_s24 = smov %s6121_s25 }
 0x366   : > { %p14_p5 = scmp.ge.s32.totalorder %s17_s26, 4   ;;  %s10298_s25 = smov %s10300_s27 }
 0x368   :  { %16 = sbr.rel (!%p14_p5) target bundleno = 2 (0x2), region = 91 }

</bundles_post_ra>
